<compile_context>
chip_gen: v5e
topology: v5e:2x2
jax: 0.10.0
libtpu: 0.0.40
codegen_flags: <defaults>
</compile_context>

<pallas_src>
import math

import jax
import jax.numpy as jnp
from jax import lax
from jax.experimental import pallas as pl
from jax.experimental.pallas import tpu as pltpu


def _silu(v):
    return v * jax.nn.sigmoid(v)          # sigmoid -> EUP, mul -> VPU


def _group_norm(h, M, gamma, beta, eps):
    """GroupNorm on a (C, S) tile.  M is the (G, C) one-hot group matrix.

    Two-pass (centered) variance, all stats as (C,1)/(G,1) f32 columns,
    broadcast back over lanes on the VPU."""
    C, S = h.shape
    G = M.shape[0]
    n = float((C // G) * S)
    csum = jnp.sum(h, axis=1, keepdims=True)                             # (C,1)
    mean_g = jnp.dot(M, csum, preferred_element_type=jnp.float32) / n    # (G,1)
    mean_c = lax.dot_general(M, mean_g, (((0,), (0,)), ((), ())),
                             preferred_element_type=jnp.float32)         # (C,1)
    hc = h - mean_c
    cvar = jnp.sum(hc * hc, axis=1, keepdims=True)                       # (C,1)
    var_g = jnp.dot(M, cvar, preferred_element_type=jnp.float32) / n     # (G,1)
    rstd_g = lax.rsqrt(var_g + eps)                                      # (G,1)
    rstd_c = lax.dot_general(M, rstd_g, (((0,), (0,)), ((), ())),
                             preferred_element_type=jnp.float32)         # (C,1)
    return hc * rstd_c * gamma + beta


def _conv3x3(h, w_flat, bias, H, W, wcol, mm_dtype):
    """3x3 'SAME' conv on a flattened (C, S) tile, S = H*W.

    Builds 9 shifted taps (zero padded, row-wrap masked), stacks them on the
    sublane axis and runs a single (C_out, 9C) x (9C, S) MXU matmul with
    f32 accumulation."""
    C, S = h.shape
    P = W + 1                                        # covers |dy*W + dx| <= W+1
    zpad = jnp.zeros((C, P), jnp.float32)
    hpad = jnp.concatenate([zpad, h, zpad], axis=1)  # (C, S + 2P)
    taps = []
    for dy in (-1, 0, 1):
        for dx in (-1, 0, 1):
            d = dy * W + dx
            tap = lax.slice_in_dim(hpad, P + d, P + d + S, axis=1)      # (C, S)
            if dx != 0:
                valid = jnp.logical_and(wcol + dx >= 0, wcol + dx < W)  # (1, S)
                tap = jnp.where(valid, tap, 0.0)
            taps.append(tap.astype(mm_dtype))
    stack = jnp.concatenate(taps, axis=0)            # (9C, S)
    out = jnp.dot(w_flat.astype(mm_dtype), stack,
                  preferred_element_type=jnp.float32)                   # (C_out, S)
    return out + bias


def _res_block_body(x_ref, emb_ref, m_in_ref, m_out_ref,
                    g_in_ref, b_in_ref, w1_ref, b1_ref,
                    wt_ref, bt_ref, g_out_ref, b_out_ref,
                    w2_ref, b2_ref, wskip_ref, bskip_ref, out_ref,
                    *, H, W, eps, mm_dtype, has_skip):
    f32 = jnp.float32
    S = H * W
    C_out = out_ref.shape[0]

    x = x_ref[...].astype(f32)                                           # (C_in, S)
    wcol = lax.broadcasted_iota(jnp.int32, (1, S), 1) % W                # hoisted once

    # ---- in_norm -> SiLU -> in_conv (3x3) ----
    h = _group_norm(x, m_in_ref[...], g_in_ref[...], b_in_ref[...], eps)
    h = _silu(h)
    h = _conv3x3(h, w1_ref[...], b1_ref[...], H, W, wcol, mm_dtype)      # (C_out, S)

    # ---- time embedding: SiLU -> Linear -> split into (cond_w | cond_b) ----
    e = _silu(emb_ref[...].astype(f32))                                  # (N, T)
    cond_all = lax.dot_general(
        wt_ref[...], e.astype(mm_dtype),
        (((1,), (1,)), ((), ())),
        preferred_element_type=f32) + bt_ref[...]                        # (2*C_out, N)
    b_idx = pl.program_id(0)
    n_b = cond_all.shape[1]
    sel = (lax.broadcasted_iota(jnp.int32, (n_b, 1), 0) == b_idx).astype(f32)
    cond = jnp.dot(cond_all, sel, preferred_element_type=f32)            # (2*C_out, 1)
    cond_w = cond[:C_out, :]
    cond_b = cond[C_out:, :]

    # ---- out_norm * (1 + cond_w) + cond_b -> SiLU -> out_conv (zero-init) ----
    h = _group_norm(h, m_out_ref[...], g_out_ref[...], b_out_ref[...], eps)
    h = h * (1.0 + cond_w) + cond_b
    h = _silu(h)
    h = _conv3x3(h, w2_ref[...], b2_ref[...], H, W, wcol, mm_dtype)      # (C_out, S)

    # ---- residual: identity or 1x1-conv skip projection ----
    if has_skip:
        skip = jnp.dot(wskip_ref[...], x.astype(mm_dtype),
                       preferred_element_type=f32) + bskip_ref[...]
    else:
        skip = x
    out_ref[...] = (skip + h).astype(out_ref.dtype)


def _group_onehot(G, C):
    c = jnp.arange(C)[None, :]
    g = jnp.arange(G)[:, None]
    return (c // (C // G) == g).astype(jnp.float32)        # (G, C)


def my_res_block(x, emb, params, *, num_groups=32, eps=1e-5,
                 mm_dtype=jnp.bfloat16):
    """x: (B, C_in, H, W) f32, emb: (B, T) f32.  Returns (B, C_out, H, W)."""
    B, C_in, H, W = x.shape
    S = H * W
    (g_in, b_in, w1, b1, wt, bt, g_out, b_out, w2, b2, wskip, bskip) = params
    C_out = w1.shape[0]
    G = num_groups
    assert C_in % G == 0 and C_out % G == 0
    has_skip = (C_in != C_out)

    col = lambda v: v.reshape(-1, 1).astype(jnp.float32)
    # (C_out, C_in, 3, 3) -> (C_out, 9*C_in) matching the im2col tap ordering.
    w1_flat = w1.transpose(0, 2, 3, 1).reshape(C_out, 9 * C_in).astype(mm_dtype)
    w2_flat = w2.transpose(0, 2, 3, 1).reshape(C_out, 9 * C_out).astype(mm_dtype)
    wt_mm = wt.astype(mm_dtype)

    inputs = [x.reshape(B, C_in, S), emb,
              _group_onehot(G, C_in), _group_onehot(G, C_out),
              col(g_in), col(b_in), w1_flat, col(b1),
              wt_mm, col(bt), col(g_out), col(b_out),
              w2_flat, col(b2)]

    def full(a):
        nd = a.ndim
        return pl.BlockSpec(a.shape, lambda b, _n=nd: (0,) * _n)

    in_specs = [pl.BlockSpec((None, C_in, S), lambda b: (b, 0, 0))]
    in_specs += [full(a) for a in inputs[1:]]

    if has_skip:
        wskip_mm = wskip.reshape(C_out, C_in).astype(mm_dtype)
        inputs += [wskip_mm, col(bskip)]
        in_specs += [full(wskip_mm), full(col(bskip))]

    # Explicit scoped-VMEM budget sized to the live set (v5e/v6e defaults are
    # only 16/32 MiB), clamped to v7x's 64 MiB physical VMEM.
    mm_bytes = jnp.dtype(mm_dtype).itemsize
    est = (8 * 4 * S * max(C_in, C_out)                    # f32 activation temporaries
           + 9 * S * (C_in + C_out) * mm_bytes             # im2col stacks
           + 2 * 4 * S * (C_in + C_out)                    # double-buffered x / out blocks
           + 2 * sum(int(a.size) * jnp.dtype(a.dtype).itemsize
                     for a in inputs[1:]))
    vmem_limit = int(min(64 * 1024 * 1024, max(16 * 1024 * 1024, 2 * est)))

    def kernel(*refs):
        if has_skip:
            (x_ref, emb_ref, m_in_ref, m_out_ref,
             g_in_ref, b_in_ref, w1_ref, b1_ref,
             wt_ref, bt_ref, g_out_ref, b_out_ref,
             w2_ref, b2_ref, wskip_ref, bskip_ref, out_ref) = refs
        else:
            (x_ref, emb_ref, m_in_ref, m_out_ref,
             g_in_ref, b_in_ref, w1_ref, b1_ref,
             wt_ref, bt_ref, g_out_ref, b_out_ref,
             w2_ref, b2_ref, out_ref) = refs
            wskip_ref = bskip_ref = None
        _res_block_body(x_ref, emb_ref, m_in_ref, m_out_ref,
                        g_in_ref, b_in_ref, w1_ref, b1_ref,
                        wt_ref, bt_ref, g_out_ref, b_out_ref,
                        w2_ref, b2_ref, wskip_ref, bskip_ref, out_ref,
                        H=H, W=W, eps=eps, mm_dtype=mm_dtype,
                        has_skip=has_skip)

    out3 = pl.pallas_call(
        kernel,
        out_shape=jax.ShapeDtypeStruct((B, C_out, S), x.dtype),
        grid=(B,),
        in_specs=in_specs,
        out_specs=pl.BlockSpec((None, C_out, S), lambda b: (b, 0, 0)),
        compiler_params=pltpu.CompilerParams(
            dimension_semantics=("parallel",),
            vmem_limit_bytes=vmem_limit),
    )(*inputs)
    return out3.reshape(B, C_out, H, W)


def reference_forward(x, emb, params, *, num_groups=32, eps=1e-5):
    """Pure-JAX f32 port of MyResBlock.forward (for validation)."""
    (g_in, b_in, w1, b1, wt, bt, g_out, b_out, w2, b2, wskip, bskip) = params
    B, C_in, H, W = x.shape
    C_out = w1.shape[0]
    G = num_groups

    def gn(v, gamma, beta):
        N, C = v.shape[:2]
        vg = v.reshape(N, G, -1)
        m = vg.mean(axis=2, keepdims=True)
        var = vg.var(axis=2, keepdims=True)
        vn = ((vg - m) / jnp.sqrt(var + eps)).reshape(v.shape)
        return vn * gamma.reshape(1, C, 1, 1) + beta.reshape(1, C, 1, 1)

    def conv(v, w, b):
        o = lax.conv_general_dilated(
            v, w, window_strides=(1, 1), padding="SAME",
            dimension_numbers=("NCHW", "OIHW", "NCHW"),
            precision=lax.Precision.HIGHEST)
        return o + b.reshape(1, -1, 1, 1)

    silu = lambda v: v * jax.nn.sigmoid(v)

    h = conv(silu(gn(x, g_in, b_in)), w1, b1)
    e = jnp.matmul(silu(emb), wt.T, precision=lax.Precision.HIGHEST) + bt
    cond_w = e[:, :C_out].reshape(B, C_out, 1, 1)
    cond_b = e[:, C_out:].reshape(B, C_out, 1, 1)
    h = gn(h, g_out, b_out) * (1.0 + cond_w) + cond_b
    h = conv(silu(h), w2, b2)
    if C_in == C_out:
        skip = x
    else:
        skip = conv(x, wskip, bskip)
    return skip + h


if __name__ == "__main__":
    key = jax.random.PRNGKey(0)
    ks = jax.random.split(key, 16)

    # ---------- Test A: in_channels == out_channels (identity skip) ----------
    B, C_in, C_out, H, W, T = 2, 64, 64, 16, 16, 128
    x = jax.random.normal(ks[0], (B, C_in, H, W), jnp.float32)
    emb = jax.random.normal(ks[1], (B, T), jnp.float32)
    params_a = (
        jnp.ones((C_in,), jnp.float32), jnp.zeros((C_in,), jnp.float32),
        jax.random.normal(ks[2], (C_out, C_in, 3, 3), jnp.float32) / math.sqrt(9 * C_in),
        jax.random.normal(ks[3], (C_out,), jnp.float32) * 0.01,
        jax.random.normal(ks[4], (2 * C_out, T), jnp.float32) * (0.1 / math.sqrt(T)),
        jax.random.normal(ks[5], (2 * C_out,), jnp.float32) * 0.01,
        jnp.ones((C_out,), jnp.float32), jnp.zeros((C_out,), jnp.float32),
        jnp.zeros((C_out, C_out, 3, 3), jnp.float32),     # zero_module(out_conv)
        jnp.zeros((C_out,), jnp.float32),
        jnp.zeros((C_out, C_in, 1, 1), jnp.float32),      # unused (identity skip)
        jnp.zeros((C_out,), jnp.float32),
    )
    out_a = jax.block_until_ready(my_res_block(x, emb, params_a))
    assert out_a.shape == (B, C_out, H, W) and out_a.dtype == x.dtype
    # zero-initialized out_conv + identity skip -> exact residual identity
    assert jnp.allclose(out_a, x, atol=1e-6), float(jnp.max(jnp.abs(out_a - x)))

    # ---------- Test B: 1x1 skip projection, fully random parameters ----------
    B, C_in, C_out, H, W, T = 2, 32, 64, 16, 16, 128
    x = jax.random.normal(ks[6], (B, C_in, H, W), jnp.float32)
    emb = jax.random.normal(ks[7], (B, T), jnp.float32)
    params_b = (
        1.0 + 0.1 * jax.random.normal(ks[8], (C_in,), jnp.float32),
        0.1 * jax.random.normal(ks[9], (C_in,), jnp.float32),
        jax.random.normal(ks[10], (C_out, C_in, 3, 3), jnp.float32) / math.sqrt(9 * C_in),
        jax.random.normal(ks[11], (C_out,), jnp.float32) * 0.01,
        jax.random.normal(ks[12], (2 * C_out, T), jnp.float32) * (0.1 / math.sqrt(T)),
        jax.random.normal(ks[13], (2 * C_out,), jnp.float32) * 0.01,
        1.0 + 0.1 * jax.random.normal(ks[14], (C_out,), jnp.float32),
        0.1 * jax.random.normal(ks[15], (C_out,), jnp.float32),
        jax.random.normal(ks[2], (C_out, C_out, 3, 3), jnp.float32) / math.sqrt(9 * C_out),
        jax.random.normal(ks[3], (C_out,), jnp.float32) * 0.01,
        jax.random.normal(ks[4], (C_out, C_in, 1, 1), jnp.float32) / math.sqrt(C_in),
        jax.random.normal(ks[5], (C_out,), jnp.float32) * 0.01,
    )
    ref_b = reference_forward(x, emb, params_b)

    # exact-math path (f32 matmuls) -- tight check of the algorithm
    out_f32 = jax.block_until_ready(
        my_res_block(x, emb, params_b, mm_dtype=jnp.float32))
    assert jnp.allclose(out_f32, ref_b, atol=2e-3, rtol=2e-3), \
        float(jnp.max(jnp.abs(out_f32 - ref_b)))

    # performance path (bf16 MXU operands, f32 accumulation)
    out_bf16 = jax.block_until_ready(my_res_block(x, emb, params_b))
    assert jnp.allclose(out_bf16, ref_b, atol=1e-1, rtol=1e-1), \
        float(jnp.max(jnp.abs(out_bf16 - ref_b)))

    print("KERNEL_OK")
</pallas_src>

<mosaic_0001>
module attributes {stable_mosaic.version = 11 : i64} {
  func.func @kernel(%arg0: i32, %arg1: memref<1x64x256xf32, #tpu.memory_space<vmem>>, %arg2: memref<2x128xf32, #tpu.memory_space<vmem>>, %arg3: memref<32x64xf32, #tpu.memory_space<vmem>>, %arg4: memref<32x64xf32, #tpu.memory_space<vmem>>, %arg5: memref<64x1xf32, #tpu.memory_space<vmem>>, %arg6: memref<64x1xf32, #tpu.memory_space<vmem>>, %arg7: memref<64x576xbf16, #tpu.memory_space<vmem>>, %arg8: memref<64x1xf32, #tpu.memory_space<vmem>>, %arg9: memref<128x128xbf16, #tpu.memory_space<vmem>>, %arg10: memref<128x1xf32, #tpu.memory_space<vmem>>, %arg11: memref<64x1xf32, #tpu.memory_space<vmem>>, %arg12: memref<64x1xf32, #tpu.memory_space<vmem>>, %arg13: memref<64x576xbf16, #tpu.memory_space<vmem>>, %arg14: memref<64x1xf32, #tpu.memory_space<vmem>>, %arg15: memref<1x64x256xf32, #tpu.memory_space<vmem>>) attributes {dimension_semantics = [#tpu.dimension_semantics<parallel>], iteration_bounds = array<i64: 2>, scalar_prefetch = 0 : i64, scratch_operands = 0 : i64, tpu.core_type = #tpu.core_type<tc>, window_params = [{transform_indices = @transform_0, window_bounds = array<i64: 1, 64, 256>}, {pipeline_mode = #tpu.pipeline_mode<synchronous>, transform_indices = @transform_1, window_bounds = array<i64: 2, 128>}, {pipeline_mode = #tpu.pipeline_mode<synchronous>, transform_indices = @transform_2, window_bounds = array<i64: 32, 64>}, {pipeline_mode = #tpu.pipeline_mode<synchronous>, transform_indices = @transform_3, window_bounds = array<i64: 32, 64>}, {pipeline_mode = #tpu.pipeline_mode<synchronous>, transform_indices = @transform_4, window_bounds = array<i64: 64, 1>}, {pipeline_mode = #tpu.pipeline_mode<synchronous>, transform_indices = @transform_5, window_bounds = array<i64: 64, 1>}, {pipeline_mode = #tpu.pipeline_mode<synchronous>, transform_indices = @transform_6, window_bounds = array<i64: 64, 576>}, {pipeline_mode = #tpu.pipeline_mode<synchronous>, transform_indices = @transform_7, window_bounds = array<i64: 64, 1>}, {pipeline_mode = #tpu.pipeline_mode<synchronous>, transform_indices = @transform_8, window_bounds = array<i64: 128, 128>}, {pipeline_mode = #tpu.pipeline_mode<synchronous>, transform_indices = @transform_9, window_bounds = array<i64: 128, 1>}, {pipeline_mode = #tpu.pipeline_mode<synchronous>, transform_indices = @transform_10, window_bounds = array<i64: 64, 1>}, {pipeline_mode = #tpu.pipeline_mode<synchronous>, transform_indices = @transform_11, window_bounds = array<i64: 64, 1>}, {pipeline_mode = #tpu.pipeline_mode<synchronous>, transform_indices = @transform_12, window_bounds = array<i64: 64, 576>}, {pipeline_mode = #tpu.pipeline_mode<synchronous>, transform_indices = @transform_13, window_bounds = array<i64: 64, 1>}, {transform_indices = @transform_14, window_bounds = array<i64: 1, 64, 256>}]} {
    %c0 = arith.constant 0 : index
    %c0_0 = arith.constant 0 : index
    %c0_1 = arith.constant 0 : index
    %0 = vector.load %arg1[%c0, %c0_0, %c0_1] : memref<1x64x256xf32, #tpu.memory_space<vmem>>, vector<1x64x256xf32>
    %1 = vector.shape_cast %0 : vector<1x64x256xf32> to vector<64x256xf32>
    %2 = tpu.iota {dimensions = array<i32: 1>} : vector<1x256xi32>
    %c16_i32 = arith.constant 16 : i32
    %c0_i32 = arith.constant 0 : i32
    %3 = arith.cmpi eq, %c16_i32, %c0_i32 : i32
    %c1_i32 = arith.constant 1 : i32
    %4 = arith.select %3, %c1_i32, %c16_i32 : i32
    %5 = vector.broadcast %4 : i32 to vector<1x256xi32>
    %6 = arith.remsi %2, %5 : vector<1x256xi32>
    %c0_i32_2 = arith.constant 0 : i32
    %7 = vector.broadcast %c0_i32_2 : i32 to vector<1x256xi32>
    %8 = arith.cmpi ne, %6, %7 : vector<1x256xi32>
    %c0_i32_3 = arith.constant 0 : i32
    %9 = vector.broadcast %c0_i32_3 : i32 to vector<1x256xi32>
    %10 = arith.cmpi slt, %6, %9 : vector<1x256xi32>
    %c0_i32_4 = arith.constant 0 : i32
    %11 = arith.cmpi slt, %4, %c0_i32_4 : i32
    %12 = vector.broadcast %11 : i1 to vector<1x256xi1>
    %13 = vector.broadcast %12 : vector<1x256xi1> to vector<1x256xi1>
    %14 = arith.xori %10, %13 : vector<1x256xi1>
    %15 = arith.andi %14, %8 : vector<1x256xi1>
    %16 = vector.broadcast %4 : i32 to vector<1x256xi32>
    %17 = arith.addi %6, %16 : vector<1x256xi32>
    %18 = arith.select %15, %17, %6 : vector<1x256xi1>, vector<1x256xi32>
    %c0_5 = arith.constant 0 : index
    %c0_6 = arith.constant 0 : index
    %19 = vector.load %arg3[%c0_5, %c0_6] : memref<32x64xf32, #tpu.memory_space<vmem>>, vector<32x64xf32>
    %c0_7 = arith.constant 0 : index
    %c0_8 = arith.constant 0 : index
    %20 = vector.load %arg5[%c0_7, %c0_8] : memref<64x1xf32, #tpu.memory_space<vmem>>, vector<64x1xf32>
    %c0_9 = arith.constant 0 : index
    %c0_10 = arith.constant 0 : index
    %21 = vector.load %arg6[%c0_9, %c0_10] : memref<64x1xf32, #tpu.memory_space<vmem>>, vector<64x1xf32>
    %cst = arith.constant dense<0.000000e+00> : vector<64xf32>
    %22 = vector.multi_reduction <add>, %1, %cst [1] : vector<64x256xf32> to vector<64xf32>
    %23 = vector.shape_cast %22 : vector<64xf32> to vector<64x1xf32>
    %cst_11 = arith.constant dense<0.000000e+00> : vector<32x1xf32>
    %24 = tpu.matmul %19, %23, %cst_11 {dimension_numbers = #tpu.dot_dimension_numbers<[1], [0], [0], [1], [0, 0, 1, 1], [], []>} : vector<32x64xf32>, vector<64x1xf32>, vector<32x1xf32> -> vector<32x1xf32>
    %cst_12 = arith.constant 5.120000e+02 : f32
    %25 = vector.broadcast %cst_12 : f32 to vector<32x1xf32>
    %26 = arith.divf %24, %25 : vector<32x1xf32>
    %cst_13 = arith.constant dense<0.000000e+00> : vector<64x1xf32>
    %27 = tpu.matmul %19, %26, %cst_13 {dimension_numbers = #tpu.dot_dimension_numbers<[0], [0], [1], [1], [0, 1, 1, 1], [], []>} : vector<32x64xf32>, vector<32x1xf32>, vector<64x1xf32> -> vector<64x1xf32>
    %28 = vector.broadcast %27 : vector<64x1xf32> to vector<64x256xf32>
    %29 = arith.subf %1, %28 : vector<64x256xf32>
    %30 = arith.mulf %29, %29 : vector<64x256xf32>
    %cst_14 = arith.constant dense<0.000000e+00> : vector<64xf32>
    %31 = vector.multi_reduction <add>, %30, %cst_14 [1] : vector<64x256xf32> to vector<64xf32>
    %32 = vector.shape_cast %31 : vector<64xf32> to vector<64x1xf32>
    %cst_15 = arith.constant dense<0.000000e+00> : vector<32x1xf32>
    %33 = tpu.matmul %19, %32, %cst_15 {dimension_numbers = #tpu.dot_dimension_numbers<[1], [0], [0], [1], [0, 0, 1, 1], [], []>} : vector<32x64xf32>, vector<64x1xf32>, vector<32x1xf32> -> vector<32x1xf32>
    %cst_16 = arith.constant 5.120000e+02 : f32
    %34 = vector.broadcast %cst_16 : f32 to vector<32x1xf32>
    %35 = arith.divf %33, %34 : vector<32x1xf32>
    %cst_17 = arith.constant 9.99999974E-6 : f32
    %36 = vector.broadcast %cst_17 : f32 to vector<32x1xf32>
    %37 = arith.addf %35, %36 : vector<32x1xf32>
    %38 = math.rsqrt %37 : vector<32x1xf32>
    %cst_18 = arith.constant dense<0.000000e+00> : vector<64x1xf32>
    %39 = tpu.matmul %19, %38, %cst_18 {dimension_numbers = #tpu.dot_dimension_numbers<[0], [0], [1], [1], [0, 1, 1, 1], [], []>} : vector<32x64xf32>, vector<32x1xf32>, vector<64x1xf32> -> vector<64x1xf32>
    %40 = vector.broadcast %39 : vector<64x1xf32> to vector<64x256xf32>
    %41 = arith.mulf %29, %40 : vector<64x256xf32>
    %42 = vector.broadcast %20 : vector<64x1xf32> to vector<64x256xf32>
    %43 = arith.mulf %41, %42 : vector<64x256xf32>
    %44 = vector.broadcast %21 : vector<64x1xf32> to vector<64x256xf32>
    %45 = arith.addf %43, %44 : vector<64x256xf32>
    %46 = arith.negf %45 : vector<64x256xf32>
    %47 = math.exp %46 : vector<64x256xf32>
    %cst_19 = arith.constant 1.000000e+00 : f32
    %48 = vector.broadcast %cst_19 : f32 to vector<64x256xf32>
    %49 = arith.addf %48, %47 : vector<64x256xf32>
    %50 = arith.divf %48, %49 : vector<64x256xf32>
    %51 = arith.mulf %45, %50 : vector<64x256xf32>
    %c0_20 = arith.constant 0 : index
    %c0_21 = arith.constant 0 : index
    %52 = vector.load %arg7[%c0_20, %c0_21] : memref<64x576xbf16, #tpu.memory_space<vmem>>, vector<64x576xbf16>
    %c0_22 = arith.constant 0 : index
    %c0_23 = arith.constant 0 : index
    %53 = vector.load %arg8[%c0_22, %c0_23] : memref<64x1xf32, #tpu.memory_space<vmem>>, vector<64x1xf32>
    %cst_24 = arith.constant 0.000000e+00 : f32
    %54 = vector.broadcast %cst_24 : f32 to vector<64x17xf32>
    %55 = tpu.concatenate %54, %51, %54 in 1 : vector<64x17xf32>, vector<64x256xf32>, vector<64x17xf32> -> vector<64x290xf32>
    %56 = vector.extract_strided_slice %55 {offsets = [0, 0], sizes = [64, 256], strides = [1, 1]} : vector<64x290xf32> to vector<64x256xf32>
    %c-1_i32 = arith.constant -1 : i32
    %57 = vector.broadcast %c-1_i32 : i32 to vector<1x256xi32>
    %58 = arith.addi %18, %57 : vector<1x256xi32>
    %c0_i32_25 = arith.constant 0 : i32
    %59 = vector.broadcast %c0_i32_25 : i32 to vector<1x256xi32>
    %60 = arith.cmpi sge, %58, %59 : vector<1x256xi32>
    %c-1_i32_26 = arith.constant -1 : i32
    %61 = vector.broadcast %c-1_i32_26 : i32 to vector<1x256xi32>
    %62 = arith.addi %18, %61 : vector<1x256xi32>
    %c16_i32_27 = arith.constant 16 : i32
    %63 = vector.broadcast %c16_i32_27 : i32 to vector<1x256xi32>
    %64 = arith.cmpi slt, %62, %63 : vector<1x256xi32>
    %65 = arith.andi %60, %64 : vector<1x256xi1>
    %cst_28 = arith.constant 0.000000e+00 : f32
    %66 = vector.shape_cast %65 : vector<1x256xi1> to vector<1x256xi1>
    %67 = vector.broadcast %66 : vector<1x256xi1> to vector<64x256xi1>
    %68 = vector.broadcast %cst_28 : f32 to vector<64x256xf32>
    %69 = arith.select %67, %56, %68 : vector<64x256xi1>, vector<64x256xf32>
    %70 = arith.truncf %69 : vector<64x256xf32> to vector<64x256xbf16>
    %71 = vector.extract_strided_slice %55 {offsets = [0, 1], sizes = [64, 256], strides = [1, 1]} : vector<64x290xf32> to vector<64x256xf32>
    %72 = arith.truncf %71 : vector<64x256xf32> to vector<64x256xbf16>
    %73 = vector.extract_strided_slice %55 {offsets = [0, 2], sizes = [64, 256], strides = [1, 1]} : vector<64x290xf32> to vector<64x256xf32>
    %c1_i32_29 = arith.constant 1 : i32
    %74 = vector.broadcast %c1_i32_29 : i32 to vector<1x256xi32>
    %75 = arith.addi %18, %74 : vector<1x256xi32>
    %c0_i32_30 = arith.constant 0 : i32
    %76 = vector.broadcast %c0_i32_30 : i32 to vector<1x256xi32>
    %77 = arith.cmpi sge, %75, %76 : vector<1x256xi32>
    %c1_i32_31 = arith.constant 1 : i32
    %78 = vector.broadcast %c1_i32_31 : i32 to vector<1x256xi32>
    %79 = arith.addi %18, %78 : vector<1x256xi32>
    %c16_i32_32 = arith.constant 16 : i32
    %80 = vector.broadcast %c16_i32_32 : i32 to vector<1x256xi32>
    %81 = arith.cmpi slt, %79, %80 : vector<1x256xi32>
    %82 = arith.andi %77, %81 : vector<1x256xi1>
    %cst_33 = arith.constant 0.000000e+00 : f32
    %83 = vector.shape_cast %82 : vector<1x256xi1> to vector<1x256xi1>
    %84 = vector.broadcast %83 : vector<1x256xi1> to vector<64x256xi1>
    %85 = vector.broadcast %cst_33 : f32 to vector<64x256xf32>
    %86 = arith.select %84, %73, %85 : vector<64x256xi1>, vector<64x256xf32>
    %87 = arith.truncf %86 : vector<64x256xf32> to vector<64x256xbf16>
    %88 = vector.extract_strided_slice %55 {offsets = [0, 16], sizes = [64, 256], strides = [1, 1]} : vector<64x290xf32> to vector<64x256xf32>
    %c-1_i32_34 = arith.constant -1 : i32
    %89 = vector.broadcast %c-1_i32_34 : i32 to vector<1x256xi32>
    %90 = arith.addi %18, %89 : vector<1x256xi32>
    %c0_i32_35 = arith.constant 0 : i32
    %91 = vector.broadcast %c0_i32_35 : i32 to vector<1x256xi32>
    %92 = arith.cmpi sge, %90, %91 : vector<1x256xi32>
    %c-1_i32_36 = arith.constant -1 : i32
    %93 = vector.broadcast %c-1_i32_36 : i32 to vector<1x256xi32>
    %94 = arith.addi %18, %93 : vector<1x256xi32>
    %c16_i32_37 = arith.constant 16 : i32
    %95 = vector.broadcast %c16_i32_37 : i32 to vector<1x256xi32>
    %96 = arith.cmpi slt, %94, %95 : vector<1x256xi32>
    %97 = arith.andi %92, %96 : vector<1x256xi1>
    %cst_38 = arith.constant 0.000000e+00 : f32
    %98 = vector.shape_cast %97 : vector<1x256xi1> to vector<1x256xi1>
    %99 = vector.broadcast %98 : vector<1x256xi1> to vector<64x256xi1>
    %100 = vector.broadcast %cst_38 : f32 to vector<64x256xf32>
    %101 = arith.select %99, %88, %100 : vector<64x256xi1>, vector<64x256xf32>
    %102 = arith.truncf %101 : vector<64x256xf32> to vector<64x256xbf16>
    %103 = vector.extract_strided_slice %55 {offsets = [0, 17], sizes = [64, 256], strides = [1, 1]} : vector<64x290xf32> to vector<64x256xf32>
    %104 = arith.truncf %103 : vector<64x256xf32> to vector<64x256xbf16>
    %105 = vector.extract_strided_slice %55 {offsets = [0, 18], sizes = [64, 256], strides = [1, 1]} : vector<64x290xf32> to vector<64x256xf32>
    %c1_i32_39 = arith.constant 1 : i32
    %106 = vector.broadcast %c1_i32_39 : i32 to vector<1x256xi32>
    %107 = arith.addi %18, %106 : vector<1x256xi32>
    %c0_i32_40 = arith.constant 0 : i32
    %108 = vector.broadcast %c0_i32_40 : i32 to vector<1x256xi32>
    %109 = arith.cmpi sge, %107, %108 : vector<1x256xi32>
    %c1_i32_41 = arith.constant 1 : i32
    %110 = vector.broadcast %c1_i32_41 : i32 to vector<1x256xi32>
    %111 = arith.addi %18, %110 : vector<1x256xi32>
    %c16_i32_42 = arith.constant 16 : i32
    %112 = vector.broadcast %c16_i32_42 : i32 to vector<1x256xi32>
    %113 = arith.cmpi slt, %111, %112 : vector<1x256xi32>
    %114 = arith.andi %109, %113 : vector<1x256xi1>
    %cst_43 = arith.constant 0.000000e+00 : f32
    %115 = vector.shape_cast %114 : vector<1x256xi1> to vector<1x256xi1>
    %116 = vector.broadcast %115 : vector<1x256xi1> to vector<64x256xi1>
    %117 = vector.broadcast %cst_43 : f32 to vector<64x256xf32>
    %118 = arith.select %116, %105, %117 : vector<64x256xi1>, vector<64x256xf32>
    %119 = arith.truncf %118 : vector<64x256xf32> to vector<64x256xbf16>
    %120 = vector.extract_strided_slice %55 {offsets = [0, 32], sizes = [64, 256], strides = [1, 1]} : vector<64x290xf32> to vector<64x256xf32>
    %c-1_i32_44 = arith.constant -1 : i32
    %121 = vector.broadcast %c-1_i32_44 : i32 to vector<1x256xi32>
    %122 = arith.addi %18, %121 : vector<1x256xi32>
    %c0_i32_45 = arith.constant 0 : i32
    %123 = vector.broadcast %c0_i32_45 : i32 to vector<1x256xi32>
    %124 = arith.cmpi sge, %122, %123 : vector<1x256xi32>
    %c-1_i32_46 = arith.constant -1 : i32
    %125 = vector.broadcast %c-1_i32_46 : i32 to vector<1x256xi32>
    %126 = arith.addi %18, %125 : vector<1x256xi32>
    %c16_i32_47 = arith.constant 16 : i32
    %127 = vector.broadcast %c16_i32_47 : i32 to vector<1x256xi32>
    %128 = arith.cmpi slt, %126, %127 : vector<1x256xi32>
    %129 = arith.andi %124, %128 : vector<1x256xi1>
    %cst_48 = arith.constant 0.000000e+00 : f32
    %130 = vector.shape_cast %129 : vector<1x256xi1> to vector<1x256xi1>
    %131 = vector.broadcast %130 : vector<1x256xi1> to vector<64x256xi1>
    %132 = vector.broadcast %cst_48 : f32 to vector<64x256xf32>
    %133 = arith.select %131, %120, %132 : vector<64x256xi1>, vector<64x256xf32>
    %134 = arith.truncf %133 : vector<64x256xf32> to vector<64x256xbf16>
    %135 = vector.extract_strided_slice %55 {offsets = [0, 33], sizes = [64, 256], strides = [1, 1]} : vector<64x290xf32> to vector<64x256xf32>
    %136 = arith.truncf %135 : vector<64x256xf32> to vector<64x256xbf16>
    %137 = vector.extract_strided_slice %55 {offsets = [0, 34], sizes = [64, 256], strides = [1, 1]} : vector<64x290xf32> to vector<64x256xf32>
    %c1_i32_49 = arith.constant 1 : i32
    %138 = vector.broadcast %c1_i32_49 : i32 to vector<1x256xi32>
    %139 = arith.addi %18, %138 : vector<1x256xi32>
    %c0_i32_50 = arith.constant 0 : i32
    %140 = vector.broadcast %c0_i32_50 : i32 to vector<1x256xi32>
    %141 = arith.cmpi sge, %139, %140 : vector<1x256xi32>
    %c1_i32_51 = arith.constant 1 : i32
    %142 = vector.broadcast %c1_i32_51 : i32 to vector<1x256xi32>
    %143 = arith.addi %18, %142 : vector<1x256xi32>
    %c16_i32_52 = arith.constant 16 : i32
    %144 = vector.broadcast %c16_i32_52 : i32 to vector<1x256xi32>
    %145 = arith.cmpi slt, %143, %144 : vector<1x256xi32>
    %146 = arith.andi %141, %145 : vector<1x256xi1>
    %cst_53 = arith.constant 0.000000e+00 : f32
    %147 = vector.shape_cast %146 : vector<1x256xi1> to vector<1x256xi1>
    %148 = vector.broadcast %147 : vector<1x256xi1> to vector<64x256xi1>
    %149 = vector.broadcast %cst_53 : f32 to vector<64x256xf32>
    %150 = arith.select %148, %137, %149 : vector<64x256xi1>, vector<64x256xf32>
    %151 = arith.truncf %150 : vector<64x256xf32> to vector<64x256xbf16>
    %152 = tpu.concatenate %70, %72, %87, %102, %104, %119, %134, %136, %151 in 0 : vector<64x256xbf16>, vector<64x256xbf16>, vector<64x256xbf16>, vector<64x256xbf16>, vector<64x256xbf16>, vector<64x256xbf16>, vector<64x256xbf16>, vector<64x256xbf16>, vector<64x256xbf16> -> vector<576x256xbf16>
    %cst_54 = arith.constant dense<0.000000e+00> : vector<64x256xf32>
    %153 = tpu.matmul %52, %152, %cst_54 {dimension_numbers = #tpu.dot_dimension_numbers<[1], [0], [0], [1], [0, 0, 1, 1], [], []>} : vector<64x576xbf16>, vector<576x256xbf16>, vector<64x256xf32> -> vector<64x256xf32>
    %154 = vector.broadcast %53 : vector<64x1xf32> to vector<64x256xf32>
    %155 = arith.addf %153, %154 : vector<64x256xf32>
    %c0_55 = arith.constant 0 : index
    %c0_56 = arith.constant 0 : index
    %156 = vector.load %arg2[%c0_55, %c0_56] : memref<2x128xf32, #tpu.memory_space<vmem>>, vector<2x128xf32>
    %157 = arith.negf %156 : vector<2x128xf32>
    %158 = math.exp %157 : vector<2x128xf32>
    %cst_57 = arith.constant 1.000000e+00 : f32
    %159 = vector.broadcast %cst_57 : f32 to vector<2x128xf32>
    %160 = arith.addf %159, %158 : vector<2x128xf32>
    %161 = arith.divf %159, %160 : vector<2x128xf32>
    %162 = arith.mulf %156, %161 : vector<2x128xf32>
    %c0_58 = arith.constant 0 : index
    %c0_59 = arith.constant 0 : index
    %163 = vector.load %arg9[%c0_58, %c0_59] : memref<128x128xbf16, #tpu.memory_space<vmem>>, vector<128x128xbf16>
    %164 = arith.truncf %162 : vector<2x128xf32> to vector<2x128xbf16>
    %cst_60 = arith.constant dense<0.000000e+00> : vector<128x2xf32>
    %165 = tpu.matmul %163, %164, %cst_60 {dimension_numbers = #tpu.dot_dimension_numbers<[1], [1], [0], [0], [0, 0, 1, 0], [], []>} : vector<128x128xbf16>, vector<2x128xbf16>, vector<128x2xf32> -> vector<128x2xf32>
    %c0_61 = arith.constant 0 : index
    %c0_62 = arith.constant 0 : index
    %166 = vector.load %arg10[%c0_61, %c0_62] : memref<128x1xf32, #tpu.memory_space<vmem>>, vector<128x1xf32>
    %167 = vector.broadcast %166 : vector<128x1xf32> to vector<128x2xf32>
    %168 = arith.addf %165, %167 : vector<128x2xf32>
    %169 = tpu.iota {dimensions = array<i32: 0>} : vector<2x1xi32>
    %170 = vector.broadcast %arg0 : i32 to vector<2x1xi32>
    %171 = arith.cmpi eq, %169, %170 : vector<2x1xi32>
    %172 = arith.extui %171 : vector<2x1xi1> to vector<2x1xi32>
    %173 = arith.sitofp %172 : vector<2x1xi32> to vector<2x1xf32>
    %cst_63 = arith.constant dense<0.000000e+00> : vector<128x1xf32>
    %174 = tpu.matmul %168, %173, %cst_63 {dimension_numbers = #tpu.dot_dimension_numbers<[1], [0], [0], [1], [0, 0, 1, 1], [], []>} : vector<128x2xf32>, vector<2x1xf32>, vector<128x1xf32> -> vector<128x1xf32>
    %175 = vector.extract_strided_slice %174 {offsets = [0, 0], sizes = [64, 1], strides = [1, 1]} : vector<128x1xf32> to vector<64x1xf32>
    %176 = vector.extract_strided_slice %174 {offsets = [64, 0], sizes = [64, 1], strides = [1, 1]} : vector<128x1xf32> to vector<64x1xf32>
    %c0_64 = arith.constant 0 : index
    %c0_65 = arith.constant 0 : index
    %177 = vector.load %arg4[%c0_64, %c0_65] : memref<32x64xf32, #tpu.memory_space<vmem>>, vector<32x64xf32>
    %c0_66 = arith.constant 0 : index
    %c0_67 = arith.constant 0 : index
    %178 = vector.load %arg11[%c0_66, %c0_67] : memref<64x1xf32, #tpu.memory_space<vmem>>, vector<64x1xf32>
    %c0_68 = arith.constant 0 : index
    %c0_69 = arith.constant 0 : index
    %179 = vector.load %arg12[%c0_68, %c0_69] : memref<64x1xf32, #tpu.memory_space<vmem>>, vector<64x1xf32>
    %cst_70 = arith.constant dense<0.000000e+00> : vector<64xf32>
    %180 = vector.multi_reduction <add>, %155, %cst_70 [1] : vector<64x256xf32> to vector<64xf32>
    %181 = vector.shape_cast %180 : vector<64xf32> to vector<64x1xf32>
    %cst_71 = arith.constant dense<0.000000e+00> : vector<32x1xf32>
    %182 = tpu.matmul %177, %181, %cst_71 {dimension_numbers = #tpu.dot_dimension_numbers<[1], [0], [0], [1], [0, 0, 1, 1], [], []>} : vector<32x64xf32>, vector<64x1xf32>, vector<32x1xf32> -> vector<32x1xf32>
    %cst_72 = arith.constant 5.120000e+02 : f32
    %183 = vector.broadcast %cst_72 : f32 to vector<32x1xf32>
    %184 = arith.divf %182, %183 : vector<32x1xf32>
    %cst_73 = arith.constant dense<0.000000e+00> : vector<64x1xf32>
    %185 = tpu.matmul %177, %184, %cst_73 {dimension_numbers = #tpu.dot_dimension_numbers<[0], [0], [1], [1], [0, 1, 1, 1], [], []>} : vector<32x64xf32>, vector<32x1xf32>, vector<64x1xf32> -> vector<64x1xf32>
    %186 = vector.broadcast %185 : vector<64x1xf32> to vector<64x256xf32>
    %187 = arith.subf %155, %186 : vector<64x256xf32>
    %188 = arith.mulf %187, %187 : vector<64x256xf32>
    %cst_74 = arith.constant dense<0.000000e+00> : vector<64xf32>
    %189 = vector.multi_reduction <add>, %188, %cst_74 [1] : vector<64x256xf32> to vector<64xf32>
    %190 = vector.shape_cast %189 : vector<64xf32> to vector<64x1xf32>
    %cst_75 = arith.constant dense<0.000000e+00> : vector<32x1xf32>
    %191 = tpu.matmul %177, %190, %cst_75 {dimension_numbers = #tpu.dot_dimension_numbers<[1], [0], [0], [1], [0, 0, 1, 1], [], []>} : vector<32x64xf32>, vector<64x1xf32>, vector<32x1xf32> -> vector<32x1xf32>
    %cst_76 = arith.constant 5.120000e+02 : f32
    %192 = vector.broadcast %cst_76 : f32 to vector<32x1xf32>
    %193 = arith.divf %191, %192 : vector<32x1xf32>
    %cst_77 = arith.constant 9.99999974E-6 : f32
    %194 = vector.broadcast %cst_77 : f32 to vector<32x1xf32>
    %195 = arith.addf %193, %194 : vector<32x1xf32>
    %196 = math.rsqrt %195 : vector<32x1xf32>
    %cst_78 = arith.constant dense<0.000000e+00> : vector<64x1xf32>
    %197 = tpu.matmul %177, %196, %cst_78 {dimension_numbers = #tpu.dot_dimension_numbers<[0], [0], [1], [1], [0, 1, 1, 1], [], []>} : vector<32x64xf32>, vector<32x1xf32>, vector<64x1xf32> -> vector<64x1xf32>
    %198 = vector.broadcast %197 : vector<64x1xf32> to vector<64x256xf32>
    %199 = arith.mulf %187, %198 : vector<64x256xf32>
    %200 = vector.broadcast %178 : vector<64x1xf32> to vector<64x256xf32>
    %201 = arith.mulf %199, %200 : vector<64x256xf32>
    %202 = vector.broadcast %179 : vector<64x1xf32> to vector<64x256xf32>
    %203 = arith.addf %201, %202 : vector<64x256xf32>
    %cst_79 = arith.constant 1.000000e+00 : f32
    %204 = vector.broadcast %cst_79 : f32 to vector<64x1xf32>
    %205 = arith.addf %204, %175 : vector<64x1xf32>
    %206 = vector.broadcast %205 : vector<64x1xf32> to vector<64x256xf32>
    %207 = arith.mulf %203, %206 : vector<64x256xf32>
    %208 = vector.broadcast %176 : vector<64x1xf32> to vector<64x256xf32>
    %209 = arith.addf %207, %208 : vector<64x256xf32>
    %210 = arith.negf %209 : vector<64x256xf32>
    %211 = math.exp %210 : vector<64x256xf32>
    %cst_80 = arith.constant 1.000000e+00 : f32
    %212 = vector.broadcast %cst_80 : f32 to vector<64x256xf32>
    %213 = arith.addf %212, %211 : vector<64x256xf32>
    %214 = arith.divf %212, %213 : vector<64x256xf32>
    %215 = arith.mulf %209, %214 : vector<64x256xf32>
    %c0_81 = arith.constant 0 : index
    %c0_82 = arith.constant 0 : index
    %216 = vector.load %arg13[%c0_81, %c0_82] : memref<64x576xbf16, #tpu.memory_space<vmem>>, vector<64x576xbf16>
    %c0_83 = arith.constant 0 : index
    %c0_84 = arith.constant 0 : index
    %217 = vector.load %arg14[%c0_83, %c0_84] : memref<64x1xf32, #tpu.memory_space<vmem>>, vector<64x1xf32>
    %cst_85 = arith.constant 0.000000e+00 : f32
    %218 = vector.broadcast %cst_85 : f32 to vector<64x17xf32>
    %219 = tpu.concatenate %218, %215, %218 in 1 : vector<64x17xf32>, vector<64x256xf32>, vector<64x17xf32> -> vector<64x290xf32>
    %220 = vector.extract_strided_slice %219 {offsets = [0, 0], sizes = [64, 256], strides = [1, 1]} : vector<64x290xf32> to vector<64x256xf32>
    %c-1_i32_86 = arith.constant -1 : i32
    %221 = vector.broadcast %c-1_i32_86 : i32 to vector<1x256xi32>
    %222 = arith.addi %18, %221 : vector<1x256xi32>
    %c0_i32_87 = arith.constant 0 : i32
    %223 = vector.broadcast %c0_i32_87 : i32 to vector<1x256xi32>
    %224 = arith.cmpi sge, %222, %223 : vector<1x256xi32>
    %c-1_i32_88 = arith.constant -1 : i32
    %225 = vector.broadcast %c-1_i32_88 : i32 to vector<1x256xi32>
    %226 = arith.addi %18, %225 : vector<1x256xi32>
    %c16_i32_89 = arith.constant 16 : i32
    %227 = vector.broadcast %c16_i32_89 : i32 to vector<1x256xi32>
    %228 = arith.cmpi slt, %226, %227 : vector<1x256xi32>
    %229 = arith.andi %224, %228 : vector<1x256xi1>
    %cst_90 = arith.constant 0.000000e+00 : f32
    %230 = vector.shape_cast %229 : vector<1x256xi1> to vector<1x256xi1>
    %231 = vector.broadcast %230 : vector<1x256xi1> to vector<64x256xi1>
    %232 = vector.broadcast %cst_90 : f32 to vector<64x256xf32>
    %233 = arith.select %231, %220, %232 : vector<64x256xi1>, vector<64x256xf32>
    %234 = arith.truncf %233 : vector<64x256xf32> to vector<64x256xbf16>
    %235 = vector.extract_strided_slice %219 {offsets = [0, 1], sizes = [64, 256], strides = [1, 1]} : vector<64x290xf32> to vector<64x256xf32>
    %236 = arith.truncf %235 : vector<64x256xf32> to vector<64x256xbf16>
    %237 = vector.extract_strided_slice %219 {offsets = [0, 2], sizes = [64, 256], strides = [1, 1]} : vector<64x290xf32> to vector<64x256xf32>
    %c1_i32_91 = arith.constant 1 : i32
    %238 = vector.broadcast %c1_i32_91 : i32 to vector<1x256xi32>
    %239 = arith.addi %18, %238 : vector<1x256xi32>
    %c0_i32_92 = arith.constant 0 : i32
    %240 = vector.broadcast %c0_i32_92 : i32 to vector<1x256xi32>
    %241 = arith.cmpi sge, %239, %240 : vector<1x256xi32>
    %c1_i32_93 = arith.constant 1 : i32
    %242 = vector.broadcast %c1_i32_93 : i32 to vector<1x256xi32>
    %243 = arith.addi %18, %242 : vector<1x256xi32>
    %c16_i32_94 = arith.constant 16 : i32
    %244 = vector.broadcast %c16_i32_94 : i32 to vector<1x256xi32>
    %245 = arith.cmpi slt, %243, %244 : vector<1x256xi32>
    %246 = arith.andi %241, %245 : vector<1x256xi1>
    %cst_95 = arith.constant 0.000000e+00 : f32
    %247 = vector.shape_cast %246 : vector<1x256xi1> to vector<1x256xi1>
    %248 = vector.broadcast %247 : vector<1x256xi1> to vector<64x256xi1>
    %249 = vector.broadcast %cst_95 : f32 to vector<64x256xf32>
    %250 = arith.select %248, %237, %249 : vector<64x256xi1>, vector<64x256xf32>
    %251 = arith.truncf %250 : vector<64x256xf32> to vector<64x256xbf16>
    %252 = vector.extract_strided_slice %219 {offsets = [0, 16], sizes = [64, 256], strides = [1, 1]} : vector<64x290xf32> to vector<64x256xf32>
    %c-1_i32_96 = arith.constant -1 : i32
    %253 = vector.broadcast %c-1_i32_96 : i32 to vector<1x256xi32>
    %254 = arith.addi %18, %253 : vector<1x256xi32>
    %c0_i32_97 = arith.constant 0 : i32
    %255 = vector.broadcast %c0_i32_97 : i32 to vector<1x256xi32>
    %256 = arith.cmpi sge, %254, %255 : vector<1x256xi32>
    %c-1_i32_98 = arith.constant -1 : i32
    %257 = vector.broadcast %c-1_i32_98 : i32 to vector<1x256xi32>
    %258 = arith.addi %18, %257 : vector<1x256xi32>
    %c16_i32_99 = arith.constant 16 : i32
    %259 = vector.broadcast %c16_i32_99 : i32 to vector<1x256xi32>
    %260 = arith.cmpi slt, %258, %259 : vector<1x256xi32>
    %261 = arith.andi %256, %260 : vector<1x256xi1>
    %cst_100 = arith.constant 0.000000e+00 : f32
    %262 = vector.shape_cast %261 : vector<1x256xi1> to vector<1x256xi1>
    %263 = vector.broadcast %262 : vector<1x256xi1> to vector<64x256xi1>
    %264 = vector.broadcast %cst_100 : f32 to vector<64x256xf32>
    %265 = arith.select %263, %252, %264 : vector<64x256xi1>, vector<64x256xf32>
    %266 = arith.truncf %265 : vector<64x256xf32> to vector<64x256xbf16>
    %267 = vector.extract_strided_slice %219 {offsets = [0, 17], sizes = [64, 256], strides = [1, 1]} : vector<64x290xf32> to vector<64x256xf32>
    %268 = arith.truncf %267 : vector<64x256xf32> to vector<64x256xbf16>
    %269 = vector.extract_strided_slice %219 {offsets = [0, 18], sizes = [64, 256], strides = [1, 1]} : vector<64x290xf32> to vector<64x256xf32>
    %c1_i32_101 = arith.constant 1 : i32
    %270 = vector.broadcast %c1_i32_101 : i32 to vector<1x256xi32>
    %271 = arith.addi %18, %270 : vector<1x256xi32>
    %c0_i32_102 = arith.constant 0 : i32
    %272 = vector.broadcast %c0_i32_102 : i32 to vector<1x256xi32>
    %273 = arith.cmpi sge, %271, %272 : vector<1x256xi32>
    %c1_i32_103 = arith.constant 1 : i32
    %274 = vector.broadcast %c1_i32_103 : i32 to vector<1x256xi32>
    %275 = arith.addi %18, %274 : vector<1x256xi32>
    %c16_i32_104 = arith.constant 16 : i32
    %276 = vector.broadcast %c16_i32_104 : i32 to vector<1x256xi32>
    %277 = arith.cmpi slt, %275, %276 : vector<1x256xi32>
    %278 = arith.andi %273, %277 : vector<1x256xi1>
    %cst_105 = arith.constant 0.000000e+00 : f32
    %279 = vector.shape_cast %278 : vector<1x256xi1> to vector<1x256xi1>
    %280 = vector.broadcast %279 : vector<1x256xi1> to vector<64x256xi1>
    %281 = vector.broadcast %cst_105 : f32 to vector<64x256xf32>
    %282 = arith.select %280, %269, %281 : vector<64x256xi1>, vector<64x256xf32>
    %283 = arith.truncf %282 : vector<64x256xf32> to vector<64x256xbf16>
    %284 = vector.extract_strided_slice %219 {offsets = [0, 32], sizes = [64, 256], strides = [1, 1]} : vector<64x290xf32> to vector<64x256xf32>
    %c-1_i32_106 = arith.constant -1 : i32
    %285 = vector.broadcast %c-1_i32_106 : i32 to vector<1x256xi32>
    %286 = arith.addi %18, %285 : vector<1x256xi32>
    %c0_i32_107 = arith.constant 0 : i32
    %287 = vector.broadcast %c0_i32_107 : i32 to vector<1x256xi32>
    %288 = arith.cmpi sge, %286, %287 : vector<1x256xi32>
    %c-1_i32_108 = arith.constant -1 : i32
    %289 = vector.broadcast %c-1_i32_108 : i32 to vector<1x256xi32>
    %290 = arith.addi %18, %289 : vector<1x256xi32>
    %c16_i32_109 = arith.constant 16 : i32
    %291 = vector.broadcast %c16_i32_109 : i32 to vector<1x256xi32>
    %292 = arith.cmpi slt, %290, %291 : vector<1x256xi32>
    %293 = arith.andi %288, %292 : vector<1x256xi1>
    %cst_110 = arith.constant 0.000000e+00 : f32
    %294 = vector.shape_cast %293 : vector<1x256xi1> to vector<1x256xi1>
    %295 = vector.broadcast %294 : vector<1x256xi1> to vector<64x256xi1>
    %296 = vector.broadcast %cst_110 : f32 to vector<64x256xf32>
    %297 = arith.select %295, %284, %296 : vector<64x256xi1>, vector<64x256xf32>
    %298 = arith.truncf %297 : vector<64x256xf32> to vector<64x256xbf16>
    %299 = vector.extract_strided_slice %219 {offsets = [0, 33], sizes = [64, 256], strides = [1, 1]} : vector<64x290xf32> to vector<64x256xf32>
    %300 = arith.truncf %299 : vector<64x256xf32> to vector<64x256xbf16>
    %301 = vector.extract_strided_slice %219 {offsets = [0, 34], sizes = [64, 256], strides = [1, 1]} : vector<64x290xf32> to vector<64x256xf32>
    %c1_i32_111 = arith.constant 1 : i32
    %302 = vector.broadcast %c1_i32_111 : i32 to vector<1x256xi32>
    %303 = arith.addi %18, %302 : vector<1x256xi32>
    %c0_i32_112 = arith.constant 0 : i32
    %304 = vector.broadcast %c0_i32_112 : i32 to vector<1x256xi32>
    %305 = arith.cmpi sge, %303, %304 : vector<1x256xi32>
    %c1_i32_113 = arith.constant 1 : i32
    %306 = vector.broadcast %c1_i32_113 : i32 to vector<1x256xi32>
    %307 = arith.addi %18, %306 : vector<1x256xi32>
    %c16_i32_114 = arith.constant 16 : i32
    %308 = vector.broadcast %c16_i32_114 : i32 to vector<1x256xi32>
    %309 = arith.cmpi slt, %307, %308 : vector<1x256xi32>
    %310 = arith.andi %305, %309 : vector<1x256xi1>
    %cst_115 = arith.constant 0.000000e+00 : f32
    %311 = vector.shape_cast %310 : vector<1x256xi1> to vector<1x256xi1>
    %312 = vector.broadcast %311 : vector<1x256xi1> to vector<64x256xi1>
    %313 = vector.broadcast %cst_115 : f32 to vector<64x256xf32>
    %314 = arith.select %312, %301, %313 : vector<64x256xi1>, vector<64x256xf32>
    %315 = arith.truncf %314 : vector<64x256xf32> to vector<64x256xbf16>
    %316 = tpu.concatenate %234, %236, %251, %266, %268, %283, %298, %300, %315 in 0 : vector<64x256xbf16>, vector<64x256xbf16>, vector<64x256xbf16>, vector<64x256xbf16>, vector<64x256xbf16>, vector<64x256xbf16>, vector<64x256xbf16>, vector<64x256xbf16>, vector<64x256xbf16> -> vector<576x256xbf16>
    %cst_116 = arith.constant dense<0.000000e+00> : vector<64x256xf32>
    %317 = tpu.matmul %216, %316, %cst_116 {dimension_numbers = #tpu.dot_dimension_numbers<[1], [0], [0], [1], [0, 0, 1, 1], [], []>} : vector<64x576xbf16>, vector<576x256xbf16>, vector<64x256xf32> -> vector<64x256xf32>
    %318 = vector.broadcast %217 : vector<64x1xf32> to vector<64x256xf32>
    %319 = arith.addf %317, %318 : vector<64x256xf32>
    %320 = arith.addf %1, %319 : vector<64x256xf32>
    %c0_117 = arith.constant 0 : index
    %c0_118 = arith.constant 0 : index
    %c0_119 = arith.constant 0 : index
    %321 = vector.load %arg15[%c0_117, %c0_118, %c0_119] : memref<1x64x256xf32, #tpu.memory_space<vmem>>, vector<1x64x256xf32>
    %322 = vector.shape_cast %321 : vector<1x64x256xf32> to vector<64x256xf32>
    %323 = vector.shape_cast %320 : vector<64x256xf32> to vector<1x64x256xf32>
    tpu.vector_store %arg15[%c0_117, %c0_118, %c0_119], %323 {strides = array<i32>} : memref<1x64x256xf32, #tpu.memory_space<vmem>>, vector<1x64x256xf32>,
    return
  }
  func.func @transform_0(%arg0: i32) -> (i32, i32, i32) {
    %c0_i32 = arith.constant 0 : i32
    %c0_i32_0 = arith.constant 0 : i32
    %c0_i32_1 = arith.constant 0 : i32
    return %arg0, %c0_i32, %c0_i32_0 : i32, i32, i32
  }
  func.func @transform_1(%arg0: i32) -> (i32, i32) {
    %c0_i32 = arith.constant 0 : i32
    %c0_i32_0 = arith.constant 0 : i32
    %c0_i32_1 = arith.constant 0 : i32
    return %c0_i32, %c0_i32_0 : i32, i32
  }
  func.func @transform_2(%arg0: i32) -> (i32, i32) {
    %c0_i32 = arith.constant 0 : i32
    %c0_i32_0 = arith.constant 0 : i32
    %c0_i32_1 = arith.constant 0 : i32
    return %c0_i32, %c0_i32_0 : i32, i32
  }
  func.func @transform_3(%arg0: i32) -> (i32, i32) {
    %c0_i32 = arith.constant 0 : i32
    %c0_i32_0 = arith.constant 0 : i32
    %c0_i32_1 = arith.constant 0 : i32
    return %c0_i32, %c0_i32_0 : i32, i32
  }
  func.func @transform_4(%arg0: i32) -> (i32, i32) {
    %c0_i32 = arith.constant 0 : i32
    %c0_i32_0 = arith.constant 0 : i32
    %c0_i32_1 = arith.constant 0 : i32
    return %c0_i32, %c0_i32_0 : i32, i32
  }
  func.func @transform_5(%arg0: i32) -> (i32, i32) {
    %c0_i32 = arith.constant 0 : i32
    %c0_i32_0 = arith.constant 0 : i32
    %c0_i32_1 = arith.constant 0 : i32
    return %c0_i32, %c0_i32_0 : i32, i32
  }
  func.func @transform_6(%arg0: i32) -> (i32, i32) {
    %c0_i32 = arith.constant 0 : i32
    %c0_i32_0 = arith.constant 0 : i32
    %c0_i32_1 = arith.constant 0 : i32
    return %c0_i32, %c0_i32_0 : i32, i32
  }
  func.func @transform_7(%arg0: i32) -> (i32, i32) {
    %c0_i32 = arith.constant 0 : i32
    %c0_i32_0 = arith.constant 0 : i32
    %c0_i32_1 = arith.constant 0 : i32
    return %c0_i32, %c0_i32_0 : i32, i32
  }
  func.func @transform_8(%arg0: i32) -> (i32, i32) {
    %c0_i32 = arith.constant 0 : i32
    %c0_i32_0 = arith.constant 0 : i32
    %c0_i32_1 = arith.constant 0 : i32
    return %c0_i32, %c0_i32_0 : i32, i32
  }
  func.func @transform_9(%arg0: i32) -> (i32, i32) {
    %c0_i32 = arith.constant 0 : i32
    %c0_i32_0 = arith.constant 0 : i32
    %c0_i32_1 = arith.constant 0 : i32
    return %c0_i32, %c0_i32_0 : i32, i32
  }
  func.func @transform_10(%arg0: i32) -> (i32, i32) {
    %c0_i32 = arith.constant 0 : i32
    %c0_i32_0 = arith.constant 0 : i32
    %c0_i32_1 = arith.constant 0 : i32
    return %c0_i32, %c0_i32_0 : i32, i32
  }
  func.func @transform_11(%arg0: i32) -> (i32, i32) {
    %c0_i32 = arith.constant 0 : i32
    %c0_i32_0 = arith.constant 0 : i32
    %c0_i32_1 = arith.constant 0 : i32
    return %c0_i32, %c0_i32_0 : i32, i32
  }
  func.func @transform_12(%arg0: i32) -> (i32, i32) {
    %c0_i32 = arith.constant 0 : i32
    %c0_i32_0 = arith.constant 0 : i32
    %c0_i32_1 = arith.constant 0 : i32
    return %c0_i32, %c0_i32_0 : i32, i32
  }
  func.func @transform_13(%arg0: i32) -> (i32, i32) {
    %c0_i32 = arith.constant 0 : i32
    %c0_i32_0 = arith.constant 0 : i32
    %c0_i32_1 = arith.constant 0 : i32
    return %c0_i32, %c0_i32_0 : i32, i32
  }
  func.func @transform_14(%arg0: i32) -> (i32, i32, i32) {
    %c0_i32 = arith.constant 0 : i32
    %c0_i32_0 = arith.constant 0 : i32
    %c0_i32_1 = arith.constant 0 : i32
    return %arg0, %c0_i32, %c0_i32_0 : i32, i32, i32
  }
}

</mosaic_0001>

<bundles_post_ra>
// kernel: tpu_custom_call.1
= control target key start
LH: loop header
LB: loop body
LE: loop exit
PB: predicated region body
PF: predicated region fallthrough
CT: control target
= control target key end

     0   :  { %s11944_s0 = inlined_call_operand.hbm [shape: f32[2,64,256], index: 0, kind: input, shape index: {}]   ;;  %s11945_s1 = inlined_call_operand.vmem [shape: f32[2,128], index: 1, kind: input, shape index: {}]   ;;  %s11946_s2 = inlined_call_operand.vmem [shape: f32[32,64], index: 2, kind: input, shape index: {}]   ;;  %s11947_s3 = inlined_call_operand.vmem [shape: f32[32,64], index: 3, kind: input, shape index: {}]   ;;  %s11948_s4 = inlined_call_operand.vmem [shape: f32[64,1], index: 4, kind: input, shape index: {}]   ;;  %s11949_s5 = inlined_call_operand.vmem [shape: f32[64,1], index: 5, kind: input, shape index: {}]   ;;  %s11950_s6 = inlined_call_operand.vmem [shape: bf16[64,576], index: 6, kind: input, shape index: {}]   ;;  %s11951_s7 = inlined_call_operand.vmem [shape: f32[64,1], index: 7, kind: input, shape index: {}]   ;;  %s11952_s8 = inlined_call_operand.vmem [shape: bf16[128,128], index: 8, kind: input, shape index: {}]   ;;  %s11953_s9 = inlined_call_operand.vmem [shape: f32[128,1], index: 9, kind: input, shape index: {}]   ;;  %s11954_s10 = inlined_call_operand.vmem [shape: f32[64,1], index: 10, kind: input, shape index: {}]   ;;  %s11955_s11 = inlined_call_operand.vmem [shape: f32[64,1], index: 11, kind: input, shape index: {}]   ;;  %s11956_s12 = inlined_call_operand.hbm [shape: bf16[64,576], index: 12, kind: input, shape index: {}]   ;;  %s11957_s13 = inlined_call_operand.vmem [shape: f32[64,1], index: 13, kind: input, shape index: {}]   ;;  %s11958_s14 = inlined_call_operand.hbm [shape: f32[2,64,256], index: 14, kind: output, shape index: {}]  }
   0x1   :  { %12005 = sst [smem:[#allocation43_spill]] %s11944_s0 }
   0x2   :  { %12006 = sst [smem:[#allocation44_spill]] %s11956_s12 }
   0x3   :  { %12007 = sst [smem:[#allocation45_spill]] %s11957_s13 }
   0x4   :  { %12008 = sst [smem:[#allocation46_spill]] %s11958_s14 }
   0x5   :  { %19 = vsyncpa [#allocation3], 0 }
   0x6   :  { %21 = vsyncpa [#allocation3 + $0x1], 0 }
   0x7   :  { %22 = vsyncpa [#allocation6], 0 }
   0x8   :  { %23 = vsyncpa [#allocation4], 0 }
   0x9   :  { %25 = vsyncpa [#allocation4 + $0x1], 0  ;;  %s7616_s29 = smov 0   ;;  %s7618_s30 = smov 0  }
   0xa   :  { %s7620_s15 = smov 0   ;;  %s7622_s16 = smov 0  }
   0xb LB: > { %12009 = sst [smem:[#allocation11_spill]] %s7508_s29  ;;  %s7637_s17 = sadd.s32 4294967295, %s7520_s16   ;;  %s7520_s16 = sphi %s7622_s16, %s12349_s16   ;;  %s7516_s15 = sphi %s7620_s15, %s12351_s15   ;;  %s7512_s30 = sphi %s7618_s30, %s12353_s30   ;;  %s7508_s29 = sphi %s7616_s29, %s12352_s29  }
   0xc   : > { %12010 = sst [smem:[#allocation12_spill]] %s7516_s15  ;;  %s6089_s18 = sadd.s32 4294967294, %s7520_s16  }
   0xd   : > { %p51_p0 = scmp.ne.s32.totalorder %s7512_s30, %s7508_s29  ;;  %p52_p1 = scmp.eq.s32.totalorder %s7637_s17, 0 }
   0xe   : > { %p348_p2 = scmp.eq.s32.totalorder %s7637_s17, 1  ;;  %p354_p3 = scmp.eq.s32.totalorder %s6089_s18, 1 }
   0xf   : > { %p7646_p4 = por %p52_p1, %p51_p0  ;;  %p6090_p5 = scmp.ge.s32.totalorder %s7520_s16, 1 }
  0x10   : > { %p7651_p6 = por %p354_p3, %p51_p0  ;;  %p361_p7 = scmp.lt.s32.totalorder %s7520_s16, 3 }
  0x11   : > { %s12014_s12 = sld [smem:[#allocation44_spill]]  ;;  %s7522_s25 = smov [#allocation5]  }
  0x12   : > { %s12012_s20 = scalar_select %p7651_p6, 1, 0 }
  0x13   : > { %p7659_p8 = pnand %p6090_p5, %p361_p7  ;;  %s407_s26 = sshll.u32 %s7522_s25, 4  ;;  %s408_s26 = int_to_ptr.vmem [resolvable:$true] %s407_s26 }
  0x14   : > { %12013 = sst [smem:[#allocation13_spill]] %s12012_s20  ;;  %s7669_s27 = sadd.s32 1, %s7520_s16  }
  0x15   : > { %p6474_p9 = pneg %p7659_p8  ;;  %12016 = sst [smem:[#allocation14_spill]] %s7669_s27 }
  0x16   : > { %s7523_s28 = smov 320   ;;  %s7524_s18 = smov 20  }
  0x17   : > { %s405_s23 = sshll.u32 %s12014_s12, 4  ;;  %p6475_p10 = pnand %p6474_p9, %p52_p1  ;;  %s406_s23 = int_to_ptr.hbm [resolvable:$true] %s405_s23 }
  0x18   : > { %s35_s21 = ssub.s32 %s7520_s16, %s7669_s27  ;;  %s38_s22 = sadd.s32 1, %s7516_s15 }
  0x19   : > { %6477 = dma.hbm_to_vmem [thread:$0]  (!%p6475_p10), %s406_s23, 2560, %s408_s26, [#allocation6], %s7523_s28, %s7523_s28, %s7524_s18  }
  0x1a   : > { %p36_p12 = scmp.eq.s32.totalorder %s35_s21, 0  ;;  %p45_p13 = scmp.ne.s32.totalorder %s7516_s15, %s7512_s30 }
  0x1b   : > { %p46_p0 = scmp.eq.s32.totalorder %s7520_s16, 0  ;;  %p6487_p3 = scmp.lt.s32.totalorder %s7520_s16, 2 }
  0x1c   : > { %s7679_s25 = scalar_select %p36_p12, %s7516_s15, %s38_s22  }
  0x1d   : > { %p47_p5 = por %p46_p0, %p45_p13  ;;  %p7683_p7 = por %p348_p2, %p45_p13 }
  0x1e   : > { %12017 = sst [smem:[#allocation15_spill]] %s7679_s25  ;;  %s424_s20 = sand.u32 1, %s7516_s15  }
  0x1f   : > { %s6412_s29 = sshll.u32 %s7520_s16, 7  ;;  %s6093_s14 = sshll.u32 %s424_s20, 7 }
  0x20   : > { %s12019_s0 = sld [smem:[#allocation43_spill]]  ;;  %s428_s18 = scalar_lea.vmem [#allocation2], %s6093_s14 }
  0x21   : > { %s436_s21 = sshll.u32 %s428_s18, 4  ;;  %p7694_p9 = pnand %p6487_p3, %p47_p5  ;;  %s437_s21 = int_to_ptr.vmem [resolvable:$true] %s436_s21 }
  0x22   : > { %s425_s25 = scalar_lea.sflag [#allocation3], %s424_s20 }
  0x23   : > { %p7424_p10 = pneg %p7694_p9 }
  0x26   : > { %s433_s26 = scalar_lea.hbm %s12019_s0, %s6412_s29  ;;  %s7427_s29 = scalar_lea.hbm %s12019_s0, 256 }
  0x27   : > { %s434_s28 = sshll.u32 %s433_s26, 4  ;;  %s435_s28 = int_to_ptr.hbm [resolvable:$true] %s434_s28 }
  0x28   : > { %s7420_s27 = sshra.s32 %s435_s28, 4  ;;  %s7421_s27 = int_to_ptr.hbm [resolvable:$true] %s7420_s27 }
  0x29   : > { %s7422_s15 = scalar_lea.hbm %s7421_s27, 128  ;;  %p7428_p0 = scmp.lt.s32.totalorder %s7421_s27, %s12019_s0 }
  0x2a   : > { %p7423_p2 = scmp.ne.s32.totalorder %s7421_s27, %s7422_s15  ;;  %p7429_p3 = scmp.lt.s32.totalorder %s7427_s29, %s7422_s15 }
  0x2c   : > { %p7425_p12 = pnand %p7424_p10, %p7423_p2  ;;  %p7430_p5 = por %p7429_p3, %p7428_p0 }
  0x2e   : > { %p7426_p13 = pneg %p7425_p12 }
  0x30   : > { %p7431_p11 = pnand %p7430_p5, %p7426_p13 }
  0x32   : > { %7434 = shalt.err (!%p7431_p11)
}
  0x33   : > { %s7525_s20 = smov 256   ;;  %s7526_s18 = smov 16  }
  0x34   : > { %6481 = dma.hbm_to_vmem [thread:$0]  (!%p7694_p9), %s435_s28, 2048, %s437_s21, %s425_s25, %s7525_s20, %s7525_s20, %s7526_s18  }
  0x35   : > { %448 = sbr.rel (%p7659_p8) target bundleno = 3911 (0xf47), region = 76 }
  0x3a   : > { %s7711_s13 = sand.u32 1, %s7512_s30  }
  0x3b   : > { %s11971_s27 = sshll.u32 %s7711_s13, 7  ;;  %s451_s15 = scalar_lea.sflag [#allocation3], %s7711_s13 }
  0x3c   : > { %s7717_s14 = scalar_lea.vmem [#allocation2], %s11971_s27 }
  0x3d   : > { %7495 = dma.done.wait (%p7646_p4), %s451_s15, 2048  }
  0x3e   : > { %7497 = vsyncadd (%p7646_p4), %s451_s15, 4294965248 }
  0x3f   : > { %7499 = dma.done.wait (%p52_p1), [#allocation6], 2560  }
  0x40   : > { %7501 = vsyncadd (%p52_p1), [#allocation6], 4294964736  ;;  %v7728_v0 = vld [vmem:[%s7717_s14 + $0x70] sm:$0xff]  ;;  %v7731_v1 = vld [vmem:[%s7717_s14 + $0x78] sm:$0xff]  ;;  %vm11996_vm0 = vcmask 523264   ;;  %v7527_v38 = vmov 512.0  }
  0x41   : > { %v7734_v2 = vld [vmem:[%s7717_s14 + $0x50] sm:$0xff]  ;;  %v590_v3 = vadd.f32 %v7731_v1, %v7728_v0  ;;  %v7739_v4 = vld [vmem:[%s7717_s14 + $0x58] sm:$0xff]  ;;  %v7752_v9 = vld [vmem:[%s7717_s14 + $0x60] sm:$0xff]  ;;  %7224 = vrcp.f32 %v7527_v38  ;;  %vm678_vm2 = vcmask 261120   ;;  %v7528_v59 = vmov 0   ;;  %s7529_s21 = smov 17  }
  0x42   : > { %v584_v5 = vadd.f32 %v7739_v4, %v7734_v2  ;;  %v7744_v6 = vld [vmem:[%s7717_s14 + $0x30] sm:$0xff]  ;;  %v7747_v7 = vld [vmem:[%s7717_s14 + $0x38] sm:$0xff]  ;;  %v7755_v10 = vld [vmem:[%s7717_s14 + $0x68] sm:$0xff]  ;;  %6541 = vset.pattern.permute.xlu1 %v7528_v59  ;;  %6542 = vset.pattern.permute.xlu0 %v7528_v59  ;;  %s11994_s22 = smov 112   ;;  %s7531_s29 = smov 110  }
  0x43   : > { %591 = vadd.xlane.f32.xlu0 %v590_v3  ;;  %v578_v8 = vadd.f32 %v7747_v7, %v7744_v6  ;;  %v7758_v11 = vld [vmem:[%s7717_s14 + $0x40] sm:$0xff]  ;;  %v7761_v12 = vld [vmem:[%s7717_s14 + $0x48] sm:$0xff]  ;;  %v587_v15 = vadd.f32 %v7755_v10, %v7752_v9  ;;  %v7776_v18 = vld [vmem:[%s7717_s14 + $0x10] sm:$0xff]  ;;  %s7532_s23 = smov 126   ;;  %s11992_s26 = smov 127  }
  0x44   : > { %585 = vadd.xlane.f32.xlu1 %v584_v5  ;;  %v7764_v13 = vld [vmem:[%s7717_s14 + $0x20] sm:$0xff]  ;;  %v7767_v14 = vld [vmem:[%s7717_s14 + $0x28] sm:$0xff]  ;;  %v581_v16 = vadd.f32 %v7761_v12, %v7758_v11  ;;  %v7779_v19 = vld [vmem:[%s7717_s14 + $0x18] sm:$0xff]  ;;  %s11978_s20 = smov 95   ;;  %s11974_s18 = smov 96  }
  0x45   : > { %579 = vadd.xlane.f32.xlu2 %v578_v8  ;;  %v575_v17 = vadd.f32 %v7767_v14, %v7764_v13  ;;  %v7782_v20 = vld [vmem:[%s7717_s14] sm:$0xff]  ;;  %v7785_v21 = vld [vmem:[%s7717_s14 + $0x8] sm:$0xff]  ;;  %v572_v22 = vadd.f32 %v7779_v19, %v7776_v18  ;;  %v7806_v26 = vld [vmem:[%s11946_s2 + $0x10] sm:$0xff]  ;;  %s11976_s15 = smov 94   ;;  %s11972_s19 = smov 111  }
  0x46   : > { %v569_v23 = vadd.f32 %v7785_v21, %v7782_v20  ;;  %v7794_v24 = vld [vmem:[%s11946_s2] sm:$0xff]  ;;  %v7800_v25 = vld [vmem:[%s11946_s2 + $0x8] sm:$0xff]  ;;  %v7812_v27 = vld [vmem:[%s11946_s2 + $0x18] sm:$0xff]  ;;  %s12168_s24 = smov 95   ;;  %s12169_s25 = smov 94  }
  0x47   : > { %v7225_v40 = vpop.eup %7224  ;;  %s12344_s27 = sshll.u32 %s7711_s13, 7 }
  0x48   : > { %v636_v42 = vmul.f32 512.0, %v7225_v40  ;;  %vm640_vm1 = vweird.f32 %v7225_v40 }
  0x4a   : > { %v637_v44 = vsub.f32 1.0, %v636_v42 }
  0x4b   : > { %588 = vadd.xlane.f32.xlu0 %v587_v15 }
  0x4c   : > { %582 = vadd.xlane.f32.xlu1 %v581_v16  ;;  %v638_v46 = vmul.f32 %v7225_v40, %v637_v44 }
  0x4d   : > { %576 = vadd.xlane.f32.xlu2 %v575_v17 }
  0x4e   : > { %v639_v48 = vadd.f32 %v7225_v40, %v638_v46 }
  0x50   : > { %v7831_v49 = vsel %vm640_vm1, %v7225_v40, %v639_v48 }
  0x51   : > { %12021 = vst [vmem:[#allocation16_spill] sm:$0xff] %v7831_v49 }
  0x53   : > { %573 = vadd.xlane.f32.xlu0 %v572_v22 }
  0x54   : > { %570 = vadd.xlane.f32.xlu1 %v569_v23 }
  0x76   : > { %646 = vxpose.xlu2.b32.start [1/4] (short) (narrow) %v7794_v24, 64 }
  0x7e   : > { %647 = vxpose.xlu2.b32.cont [2/4] (short) (narrow) %v7800_v25, 64 }
  0x86   : > { %648 = vxpose.xlu2.b32.cont [3/4] (short) (narrow) %v7806_v26, 64 }
  0x8e   : > { %649 = vxpose.xlu2.b32.end [4/4] (short) (narrow) %v7812_v27, 64 }
  0xb6   : > { %v592_v28 = vpop.xlane.xlu0 %591 }
  0xb7   : > { %614 = vmatpush.msra.mxu0 %v592_v28  ;;  %v586_v29 = vpop.xlane.xlu1 %585 }
  0xb8   : > { %v580_v30 = vpop.xlane.xlu2 %579 }
  0xbe   : > { %v589_v31 = vpop.xlane.xlu0 %588 }
  0xbf   : > { %615 = vmatpush.msra.mxu0 %v589_v31  ;;  %v583_v32 = vpop.xlane.xlu1 %582 }
  0xc0   : > { %v577_v33 = vpop.xlane.xlu2 %576 }
  0xc1   : > { %616 = vmatpush.msra.mxu0 %v586_v29 }
  0xc3   : > { %617 = vmatpush.msra.mxu0 %v583_v32 }
  0xc5   : > { %618 = vmatpush.msra.mxu0 %v580_v30 }
  0xc6   : > { %v574_v34 = vpop.xlane.xlu0 %573 }
  0xc7   : > { %619 = vmatpush.msra.mxu0 %v577_v33  ;;  %v571_v35 = vpop.xlane.xlu1 %570 }
  0xc9   : > { %620 = vmatpush.msra.mxu0 %v574_v34 }
  0xcb   : > { %621 = vmatpush.msra.mxu0 %v571_v35 }
  0xcc   : > { %6100 = vmatmul.msk.f32.vlgmr.msra.gmra.mxu0 %vm11996_vm0, %v7794_v24 }
  0xd4   : > { %6101 = vmatmul.msk.f32.gmra.mxu0 %vm11996_vm0, %v7800_v25 }
  0xdc   : > { %6102 = vmatmul.msk.f32.gmra.mxu0 %vm11996_vm0, %v7806_v26 }
  0xe4   : > { %6103 = vmatmul.msk.f32.gmra.mxu0 %vm11996_vm0, %v7812_v27 }
  0xf0   : > { %6543 = vset.pattern.permute.xlu2 %v7528_v59 }
 0x10f   : > { %v7823_v36 = vpop.trf.xlu2 }
 0x117   : > { %v7825_v37 = vpop.trf.xlu2 }
 0x11f   : > { %v7827_v41 = vpop.trf.xlu2 }
 0x127   : > { %v7829_v45 = vpop.trf.xlu2 }
 0x12f   : > { %v7834_v52 = vpop.trf.xlu2 }
 0x137   : > { %v7843_v56 = vpop.trf.xlu2 }
 0x13f   : > { %v7849_v57 = vpop.trf.xlu2 }
 0x147   : > { %v7855_v58 = vpop.trf.xlu2 }
 0x149   : > { %v623_v39 = vpop.f32.mrf.mxu0 }
 0x14a   : > { %v642_v55 = vmul.f32 %v7831_v49, %v623_v39 }
 0x151   : > { %v626_v43 = vpop.f32.mrf.mxu0 }
 0x152   : > { %v643_v54 = vmul.f32 %v7831_v49, %v626_v43 }
 0x159   : > { %v629_v47 = vpop.f32.mrf.mxu0 }
 0x15a   : > { %v644_v53 = vmul.f32 %v7831_v49, %v629_v47 }
 0x161   : > { %v632_v50 = vpop.f32.mrf.mxu0 }
 0x162   : > { %v645_v51 = vmul.f32 %v7831_v49, %v632_v50 }
 0x164   : > { %715 = vmatpush.msra.mxu1 %v645_v51  ;;  %6462 = vmatpush.msra.mxu3 %v645_v51 }
 0x166   : > { %716 = vmatpush.msra.mxu1 %v644_v53  ;;  %6463 = vmatpush.msra.mxu3 %v644_v53 }
 0x168   : > { %717 = vmatpush.msra.mxu1 %v643_v54  ;;  %6464 = vmatpush.msra.mxu3 %v643_v54 }
 0x16a   : > { %718 = vmatpush.msra.mxu1 %v642_v55  ;;  %6465 = vmatpush.msra.mxu3 %v642_v55 }
 0x16b   : > { %6104 = vmatmul.msk.f32.vlgmr.msra.gmra.mxu1 %vm678_vm2, %v7823_v36  ;;  %6108 = vmatmul.msk.f32.vlgmr.msra.gmra.mxu3 %vm678_vm2, %v7834_v52 }
 0x173   : > { %6105 = vmatmul.msk.f32.gmra.mxu1 %vm678_vm2, %v7825_v37  ;;  %6109 = vmatmul.msk.f32.gmra.mxu3 %vm678_vm2, %v7843_v56 }
 0x17b   : > { %6106 = vmatmul.msk.f32.gmra.mxu1 %vm678_vm2, %v7827_v41  ;;  %6110 = vmatmul.msk.f32.gmra.mxu3 %vm678_vm2, %v7849_v57 }
 0x183   : > { %6107 = vmatmul.msk.f32.gmra.mxu1 %vm678_vm2, %v7829_v45  ;;  %6111 = vmatmul.msk.f32.gmra.mxu3 %vm678_vm2, %v7855_v58 }
 0x1e8   : > { %v720_v61 = vpop.f32.mrf.mxu1 }
 0x1ee   : > { %v732_v60 = vpop.f32.mrf.mxu3 }
 0x1ef   : > { %766 = vperm.xlu1 %6541, %v732_v60  }
 0x1f0   : > { %v723_v63 = vpop.f32.mrf.mxu1 }
 0x1f6   : > { %v735_v62 = vpop.f32.mrf.mxu3 }
 0x1f7   : > { %771 = vperm.xlu1 %6541, %v735_v62  }
 0x1f8   : > { %v726_v5 = vpop.f32.mrf.mxu1 }
 0x1fe   : > { %v738_v3 = vpop.f32.mrf.mxu3 }
 0x1ff   : > { %776 = vperm.xlu1 %6541, %v738_v3  }
 0x200   : > { %v729_v15 = vpop.f32.mrf.mxu1 }
 0x206   : > { %v741_v8 = vpop.f32.mrf.mxu3 }
 0x207   : > { %781 = vperm.xlu0 %6542, %v741_v8   ;;  %756 = vperm.xlu1 %6541, %v726_v5  }
 0x20f   : > { %746 = vperm.xlu1 %6541, %v720_v61   ;;  %761 = vperm.xlu0 %6542, %v729_v15   ;;  %v568_v15 = vld [vmem:[%s11949_s5 + $0x38] sm:$0xff] }
 0x217   : > { %751 = vperm.xlu0 %6542, %v723_v63  }
 0x261   : > { %v767_v16 = vpop.permute.xlu1 %766 }
 0x262   : > { %v7862_v17 = vsub.f32 %v7758_v11, %v767_v16  ;;  %v7865_v22 = vsub.f32 %v7761_v12, %v767_v16  ;;  %v567_v16 = vld [vmem:[%s11949_s5 + $0x30] sm:$0xff] }
 0x264   : > { %v808_v23 = vmul.f32 %v7862_v17, %v7862_v17  ;;  %v809_v28 = vmul.f32 %v7865_v22, %v7865_v22 }
 0x266   : > { %v828_v29 = vadd.f32 %v809_v28, %v808_v23  ;;  %v558_v23 = vld [vmem:[%s11948_s4 + $0x28] sm:$0xff]  ;;  %v557_v28 = vld [vmem:[%s11948_s4 + $0x20] sm:$0xff] }
 0x268   : > { %829 = vadd.xlane.f32.xlu0 %v828_v29  ;;  %v566_v29 = vld [vmem:[%s11949_s5 + $0x28] sm:$0xff] }
 0x269   : > { %v772_v30 = vpop.permute.xlu1 %771 }
 0x26a   : > { %v7872_v31 = vsub.f32 %v7734_v2, %v772_v30  ;;  %v7875_v32 = vsub.f32 %v7739_v4, %v772_v30  ;;  %v565_v30 = vld [vmem:[%s11949_s5 + $0x20] sm:$0xff] }
 0x26c   : > { %v810_v11 = vmul.f32 %v7872_v31, %v7872_v31  ;;  %v811_v12 = vmul.f32 %v7875_v32, %v7875_v32 }
 0x26e   : > { %v831_v33 = vadd.f32 %v811_v12, %v810_v11  ;;  %v556_v11 = vld [vmem:[%s11948_s4 + $0x18] sm:$0xff]  ;;  %v555_v12 = vld [vmem:[%s11948_s4 + $0x10] sm:$0xff] }
 0x270   : > { %832 = vadd.xlane.f32.xlu2 %v831_v33  ;;  %v553_v33 = vld [vmem:[%s11948_s4] sm:$0xff] }
 0x271   : > { %v777_v34 = vpop.permute.xlu1 %776 }
 0x272   : > { %v7882_v35 = vsub.f32 %v7752_v9, %v777_v34  ;;  %v7885_v38 = vsub.f32 %v7755_v10, %v777_v34  ;;  %v564_v34 = vld [vmem:[%s11949_s5 + $0x18] sm:$0xff] }
 0x274   : > { %v812_v2 = vmul.f32 %v7882_v35, %v7882_v35  ;;  %v813_v4 = vmul.f32 %v7885_v38, %v7885_v38 }
 0x276   : > { %v834_v39 = vadd.f32 %v813_v4, %v812_v2  ;;  %v561_v2 = vld [vmem:[%s11949_s5] sm:$0xff]  ;;  %v554_v4 = vld [vmem:[%s11948_s4 + $0x8] sm:$0xff] }
 0x278   : > { %835 = vadd.xlane.f32.xlu1 %v834_v39  ;;  %v562_v39 = vld [vmem:[%s11949_s5 + $0x8] sm:$0xff] }
 0x279   : > { %v782_v40 = vpop.permute.xlu0 %781  ;;  %v757_v42 = vpop.permute.xlu1 %756 }
 0x27a   : > { %v7892_v43 = vsub.f32 %v7728_v0, %v782_v40  ;;  %v7895_v44 = vsub.f32 %v7731_v1, %v782_v40  ;;  %v7902_v46 = vsub.f32 %v7764_v13, %v757_v42  ;;  %v7905_v47 = vsub.f32 %v7767_v14, %v757_v42 }
 0x27c   : > { %v814_v9 = vmul.f32 %v7892_v43, %v7892_v43  ;;  %v815_v10 = vmul.f32 %v7895_v44, %v7895_v44  ;;  %v804_v51 = vmul.f32 %v7902_v46, %v7902_v46  ;;  %v805_v53 = vmul.f32 %v7905_v47, %v7905_v47 }
 0x27e   : > { %v837_v48 = vadd.f32 %v815_v10, %v814_v9 }
 0x280   : > { %838 = vadd.xlane.f32.xlu0 %v837_v48 }
 0x281   : > { %v762_v50 = vpop.permute.xlu0 %761  ;;  %v747_v13 = vpop.permute.xlu1 %746 }
 0x282   : > { %v7908_v0 = vsub.f32 %v7744_v6, %v762_v50  ;;  %v7911_v1 = vsub.f32 %v7747_v7, %v762_v50  ;;  %v7922_v55 = vsub.f32 %v7782_v20, %v747_v13  ;;  %v7925_v6 = vsub.f32 %v7785_v21, %v747_v13 }
 0x283   : > { %v822_v7 = vadd.f32 %v805_v53, %v804_v51 }
 0x284   : > { %v806_v14 = vmul.f32 %v7908_v0, %v7908_v0  ;;  %v807_v54 = vmul.f32 %v7911_v1, %v7911_v1  ;;  %v800_v63 = vmul.f32 %v7922_v55, %v7922_v55  ;;  %v801_v20 = vmul.f32 %v7925_v6, %v7925_v6 }
 0x286   : > { %v825_v59 = vadd.f32 %v807_v54, %v806_v14  ;;  %v816_v5 = vadd.f32 %v801_v20, %v800_v63 }
 0x288   : > { %823 = vadd.xlane.f32.xlu0 %v822_v7  ;;  %826 = vadd.xlane.f32.xlu1 %v825_v59 }
 0x289   : > { %v752_v60 = vpop.permute.xlu0 %751 }
 0x28a   : > { %v7928_v61 = vsub.f32 %v7776_v18, %v752_v60  ;;  %v7931_v62 = vsub.f32 %v7779_v19, %v752_v60  ;;  %v560_v18 = vld [vmem:[%s11948_s4 + $0x38] sm:$0xff]  ;;  %v559_v19 = vld [vmem:[%s11948_s4 + $0x30] sm:$0xff] }
 0x28c   : > { %v802_v21 = vmul.f32 %v7928_v61, %v7928_v61  ;;  %v803_v3 = vmul.f32 %v7931_v62, %v7931_v62 }
 0x28e   : > { %v819_v8 = vadd.f32 %v803_v3, %v802_v21 }
 0x290   : > { %817 = vadd.xlane.f32.xlu0 %v816_v5  ;;  %820 = vadd.xlane.f32.xlu1 %v819_v8 }
 0x2a4   : > { %1051 = vperm.xlu0 %6542, %v560_v18  }
 0x2a9   : > { %1046 = vperm.xlu1 %6541, %v559_v19  }
 0x2ac   : > { %1107 = vperm.xlu0 %6542, %v568_v15  }
 0x2b1   : > { %1102 = vperm.xlu1 %6541, %v567_v16  }
 0x2b4   : > { %1041 = vperm.xlu0 %6542, %v558_v23  }
 0x2b9   : > { %1036 = vperm.xlu1 %6541, %v557_v28  }
 0x2bc   : > { %1097 = vperm.xlu0 %6542, %v566_v29  }
 0x2c1   : > { %1092 = vperm.xlu1 %6541, %v565_v30  }
 0x2c4   : > { %1031 = vperm.xlu0 %6542, %v556_v11  }
 0x2c9   : > { %1026 = vperm.xlu1 %6541, %v555_v12  }
 0x2cc   : > { %1016 = vperm.xlu0 %6542, %v553_v33  }
 0x2d1   : > { %1087 = vperm.xlu1 %6541, %v564_v34  }
 0x2d4   : > { %1072 = vperm.xlu0 %6542, %v561_v2  }
 0x2d9   : > { %1021 = vperm.xlu1 %6541, %v554_v4  }
 0x2db   : > { %v830_v40 = vpop.xlane.xlu0 %829 }
 0x2e1   : > { %1077 = vperm.xlu1 %6541, %v562_v39  }
 0x2e3   : > { %v833_v10 = vpop.xlane.xlu2 %832 }
 0x2eb   : > { %v836_v42 = vpop.xlane.xlu1 %835 }
 0x2f3   : > { %v839_v9 = vpop.xlane.xlu0 %838 }
 0x2f4   : > { %848 = vmatpush.msra.mxu2 %v839_v9 }
 0x2f6   : > { %849 = vmatpush.msra.mxu2 %v836_v42 }
 0x2f8   : > { %850 = vmatpush.msra.mxu2 %v833_v10 }
 0x2fa   : > { %851 = vmatpush.msra.mxu2 %v830_v40 }
 0x2fb   : > { %v827_v48 = vpop.xlane.xlu1 %826  ;;  %v824_v50 = vpop.xlane.xlu0 %823 }
 0x2fc   : > { %852 = vmatpush.msra.mxu2 %v827_v48 }
 0x2fe   : > { %853 = vmatpush.msra.mxu2 %v824_v50 }
 0x303   : > { %v821_v51 = vpop.xlane.xlu1 %820  ;;  %v818_v53 = vpop.xlane.xlu0 %817 }
 0x304   : > { %854 = vmatpush.msra.mxu2 %v821_v51 }
 0x306   : > { %855 = vmatpush.msra.mxu2 %v818_v53 }
 0x307   : > { %6112 = vmatmul.msk.f32.vlgmr.msra.gmra.mxu2 %vm11996_vm0, %v7794_v24 }
 0x30f   : > { %6113 = vmatmul.msk.f32.gmra.mxu2 %vm11996_vm0, %v7800_v25 }
 0x317   : > { %6114 = vmatmul.msk.f32.gmra.mxu2 %vm11996_vm0, %v7806_v26 }
 0x31f   : > { %6115 = vmatmul.msk.f32.gmra.mxu2 %vm11996_vm0, %v7812_v27 }
 0x38a   : > { %v857_v13 = vpop.f32.mrf.mxu2 }
 0x38b   : > { %v869_v7 = vmul.f32 %v857_v13, %v7831_v49 }
 0x38d   : > { %v873_v24 = vadd.f32 1e-05, %v869_v7  ;;  %v8021_v7 = vpop.permute.xlu0 %1051 }
 0x38f   : > { %vm883_vm13 = vweird.f32 %v873_v24 }
 0x392   : > { %v860_v14 = vpop.f32.mrf.mxu2 }
 0x393   : > { %v870_v54 = vmul.f32 %v860_v14, %v7831_v49  ;;  %v8017_v14 = vpop.permute.xlu1 %1046 }
 0x395   : > { %v874_v59 = vadd.f32 1e-05, %v870_v54 }
 0x397   : > { %7226 = vrsqrt.f32 %v874_v59  ;;  %vm893_vm10 = vweird.f32 %v874_v59 }
 0x39a   : > { %v863_v60 = vpop.f32.mrf.mxu2 }
 0x39b   : > { %v871_v63 = vmul.f32 %v863_v60, %v7831_v49 }
 0x39d   : > { %v875_v20 = vadd.f32 1e-05, %v871_v63  ;;  %v7227_v21 = vpop.eup %7226  ;;  %v8025_v63 = vpop.permute.xlu0 %1107 }
 0x39e   : > { %v888_v18 = vmul.f32 %v7227_v21, %v874_v59  ;;  %vm894_vm8 = vweird.f32 %v7227_v21 }
 0x39f   : > { %7228 = vrsqrt.f32 %v875_v20  ;;  %vm903_vm7 = vweird.f32 %v875_v20  ;;  %vm895_vm12 = vmor %vm893_vm10, %vm894_vm8 }
 0x3a0   : > { %7230 = vrsqrt.f32 %v873_v24  ;;  %v889_v16 = vmul.f32 %v7227_v21, %v888_v18 }
 0x3a2   : > { %v866_v25 = vpop.f32.mrf.mxu2  ;;  %v890_v12 = vmul.f32 0.5, %v889_v16 }
 0x3a3   : > { %v872_v26 = vmul.f32 %v866_v25, %v7831_v49 }
 0x3a4   : > { %v891_v39 = vsub.f32 1.5, %v890_v12 }
 0x3a5   : > { %v7229_v27 = vpop.eup %7228  ;;  %v876_v3 = vadd.f32 1e-05, %v872_v26 }
 0x3a6   : > { %v7231_v5 = vpop.eup %7230  ;;  %v898_v8 = vmul.f32 %v7229_v27, %v875_v20  ;;  %vm904_vm5 = vweird.f32 %v7229_v27  ;;  %v892_v48 = vmul.f32 %v7227_v21, %v891_v39  ;;  %v8029_v20 = vpop.permute.xlu0 %1041 }
 0x3a7   : > { %7232 = vrsqrt.f32 %v876_v3  ;;  %v878_v19 = vmul.f32 %v7231_v5, %v873_v24  ;;  %vm913_vm4 = vweird.f32 %v876_v3  ;;  %vm905_vm9 = vmor %vm903_vm7, %vm904_vm5  ;;  %vm884_vm11 = vweird.f32 %v7231_v5 }
 0x3a8   : > { %v899_v15 = vmul.f32 %v7229_v27, %v898_v8  ;;  %v896_v53 = vsel %vm895_vm12, %v7227_v21, %v892_v48  ;;  %vm885_vm14 = vmor %vm883_vm13, %vm884_vm11 }
 0x3a9   : > { %v879_v28 = vmul.f32 %v7231_v5, %v878_v19 }
 0x3aa   : > { %v900_v30 = vmul.f32 0.5, %v899_v15 }
 0x3ab   : > { %v880_v33 = vmul.f32 0.5, %v879_v28 }
 0x3ac   : > { %v901_v2 = vsub.f32 1.5, %v900_v30 }
 0x3ad   : > { %v7233_v23 = vpop.eup %7232  ;;  %v881_v40 = vsub.f32 1.5, %v880_v33 }
 0x3ae   : > { %v908_v29 = vmul.f32 %v7233_v23, %v876_v3  ;;  %vm914_vm3 = vweird.f32 %v7233_v23  ;;  %v902_v9 = vmul.f32 %v7229_v27, %v901_v2  ;;  %v8031_v26 = vpop.permute.xlu0 %1097 }
 0x3af   : > { %vm915_vm6 = vmor %vm913_vm4, %vm914_vm3  ;;  %v882_v51 = vmul.f32 %v7231_v5, %v881_v40 }
 0x3b0   : > { %v909_v11 = vmul.f32 %v7233_v23, %v908_v29  ;;  %v906_v50 = vsel %vm905_vm9, %v7229_v27, %v902_v9 }
 0x3b1   : > { %v886_v13 = vsel %vm885_vm14, %v7231_v5, %v882_v51 }
 0x3b2   : > { %v910_v34 = vmul.f32 0.5, %v909_v11 }
 0x3b4   : > { %v911_v4 = vsub.f32 1.5, %v910_v34 }
 0x3b6   : > { %v912_v42 = vmul.f32 %v7233_v23, %v911_v4  ;;  %v1032_v27 = vpop.permute.xlu0 %1031 }
 0x3b8   : > { %v916_v10 = vsel %vm915_vm6, %v7233_v23, %v912_v42 }
 0x3b9   : > { %929 = vmatpush.msrb.mxu3 %v916_v10 }
 0x3bb   : > { %930 = vmatpush.msrb.mxu3 %v906_v50 }
 0x3bd   : > { %931 = vmatpush.msrb.mxu3 %v896_v53 }
 0x3be   : > { %v1017_v5 = vpop.permute.xlu0 %1016 }
 0x3bf   : > { %932 = vmatpush.msrb.mxu3 %v886_v13 }
 0x3c0   : > { %6116 = vmatmul.msk.f32.vlgmr.msrb.gmra.mxu3 %vm678_vm2, %v7823_v36 }
 0x3c6   : > { %v1073_v18 = vpop.permute.xlu0 %1072 }
 0x3c8   : > { %6117 = vmatmul.msk.f32.gmra.mxu3 %vm678_vm2, %v7825_v37 }
 0x3d0   : > { %6118 = vmatmul.msk.f32.gmra.mxu3 %vm678_vm2, %v7827_v41  ;;  %v563_v41 = vld [vmem:[%s11949_s5 + $0x10] sm:$0xff] }
 0x3d1   : > { %1082 = vperm.xlu2 %6543, %v563_v41  }
 0x3d8   : > { %6119 = vmatmul.msk.f32.gmra.mxu3 %vm678_vm2, %v7829_v45 }
 0x3e0   : > { %6120 = vmatmul.msk.f32.gmra.mxu3 %vm678_vm2, %v7834_v52 }
 0x3e8   : > { %6121 = vmatmul.msk.f32.gmra.mxu3 %vm678_vm2, %v7843_v56 }
 0x3f0   : > { %6122 = vmatmul.msk.f32.gmra.mxu3 %vm678_vm2, %v7849_v57 }
 0x3f8   : > { %6123 = vmatmul.msk.f32.gmra.mxu3 %vm678_vm2, %v7855_v58  ;;  %v8019_v58 = vpop.permute.xlu1 %1102 }
 0x400   : > { %v8023_v60 = vpop.permute.xlu1 %1036 }
 0x408   : > { %v8027_v24 = vpop.permute.xlu1 %1092 }
 0x410   : > { %v1027_v25 = vpop.permute.xlu1 %1026 }
 0x418   : > { %v8033_v21 = vpop.permute.xlu1 %1087 }
 0x420   : > { %v1022_v3 = vpop.permute.xlu1 %1021 }
 0x428   : > { %v1078_v8 = vpop.permute.xlu1 %1077 }
 0x42b   : > { %v1083_v53 = vpop.permute.xlu2 %1082 }
 0x443   : > { %v934_v36 = vpop.f32.mrf.mxu3 }
 0x444   : > { %960 = vperm.xlu1 %6541, %v934_v36  }
 0x44b   : > { %v937_v37 = vpop.f32.mrf.mxu3 }
 0x44c   : > { %965 = vperm.xlu0 %6542, %v937_v37  }
 0x453   : > { %v940_v45 = vpop.f32.mrf.mxu3 }
 0x454   : > { %970 = vperm.xlu1 %6541, %v940_v45  }
 0x45b   : > { %v943_v52 = vpop.f32.mrf.mxu3 }
 0x45c   : > { %975 = vperm.xlu0 %6542, %v943_v52  }
 0x463   : > { %v946_v56 = vpop.f32.mrf.mxu3 }
 0x464   : > { %980 = vperm.xlu1 %6541, %v946_v56  }
 0x46b   : > { %v949_v57 = vpop.f32.mrf.mxu3 }
 0x46c   : > { %985 = vperm.xlu0 %6542, %v949_v57  }
 0x473   : > { %v952_v54 = vpop.f32.mrf.mxu3 }
 0x474   : > { %990 = vperm.xlu1 %6541, %v952_v54  }
 0x47b   : > { %v955_v59 = vpop.f32.mrf.mxu3 }
 0x47c   : > { %995 = vperm.xlu0 %6542, %v955_v59  }
 0x4b6   : > { %v961_v19 = vpop.permute.xlu1 %960 }
 0x4b7   : > { %v998_v15 = vmul.f32 %v961_v19, %v7922_v55  ;;  %v999_v16 = vmul.f32 %v961_v19, %v7925_v6 }
 0x4b9   : > { %v1054_v23 = vmul.f32 %v1017_v5, %v998_v15  ;;  %v1055_v28 = vmul.f32 %v1017_v5, %v999_v16 }
 0x4bb   : > { %v8037_v29 = vadd.f32 %v1073_v18, %v1054_v23  ;;  %v8039_v30 = vadd.f32 %v1073_v18, %v1055_v28 }
 0x4bd   : > { %v6124_v11 = vmul.f32 -1.442695, %v8037_v29  ;;  %v6125_v12 = vmul.f32 -1.442695, %v8039_v30 }
 0x4be   : > { %v966_v33 = vpop.permute.xlu0 %965 }
 0x4bf   : > { %7234 = vpow2.f32 %v6124_v11  ;;  %v1000_v34 = vmul.f32 %v966_v33, %v7928_v61  ;;  %v1001_v2 = vmul.f32 %v966_v33, %v7931_v62 }
 0x4c0   : > { %7236 = vpow2.f32 %v6125_v12 }
 0x4c1   : > { %v1056_v55 = vmul.f32 %v1022_v3, %v1000_v34  ;;  %v1057_v4 = vmul.f32 %v1022_v3, %v1001_v2 }
 0x4c3   : > { %v8045_v6 = vadd.f32 %v1078_v8, %v1056_v55  ;;  %v8047_v39 = vadd.f32 %v1078_v8, %v1057_v4 }
 0x4c5   : > { %v7235_v40 = vpop.eup %7234  ;;  %v6126_v42 = vmul.f32 -1.442695, %v8045_v6  ;;  %v6127_v48 = vmul.f32 -1.442695, %v8047_v39 }
 0x4c6   : > { %v7237_v9 = vpop.eup %7236  ;;  %v8050_v10 = vadd.f32 1.0, %v7235_v40  ;;  %v971_v50 = vpop.permute.xlu1 %970 }
 0x4c7   : > { %v8053_v51 = vadd.f32 1.0, %v7237_v9  ;;  %7238 = vpow2.f32 %v6126_v42  ;;  %v1002_v61 = vmul.f32 %v971_v50, %v7902_v46  ;;  %v1003_v62 = vmul.f32 %v971_v50, %v7905_v47 }
 0x4c8   : > { %7240 = vrcp.f32 %v8050_v10  ;;  %v1199_v54 = vand.u32 2147483647, %v8050_v10  ;;  %v1201_v18 = vand.u32 2147483648, %v8050_v10  ;;  %vm1195_vm15 = vweird.f32 %v8050_v10 }
 0x4c9   : > { %7242 = vrcp.f32 %v8053_v51  ;;  %v1058_v13 = vmul.f32 %v1027_v25, %v1002_v61  ;;  %v1059_v36 = vmul.f32 %v1027_v25, %v1003_v62  ;;  %v1216_v15 = vand.u32 2147483648, %v8053_v51 }
 0x4ca   : > { %7244 = vpow2.f32 %v6127_v48  ;;  %vm1210_vm1 = vweird.f32 %v8053_v51  ;;  %vm8093_vm3 = vcmp.eq.f32.partialorder %v1199_v54, 8.507059e+37  ;;  %v1202_v2 = vor.u32 1.1754944e-38, %v1201_v18 }
 0x4cb   : > { %v8059_v37 = vadd.f32 %v1083_v53, %v1058_v13  ;;  %v8061_v41 = vadd.f32 %v1083_v53, %v1059_v36  ;;  %v1217_v4 = vor.u32 1.1754944e-38, %v1216_v15 }
 0x4cd   : > { %v7239_v45 = vpop.eup %7238  ;;  %v6128_v52 = vmul.f32 -1.442695, %v8059_v37  ;;  %v6129_v56 = vmul.f32 -1.442695, %v8061_v41 }
 0x4ce   : > { %v8065_v46 = vpop.eup %7240  ;;  %v8067_v47 = vadd.f32 1.0, %v7239_v45  ;;  %v976_v57 = vpop.permute.xlu0 %975 }
 0x4cf   : > { %v8070_v59 = vpop.eup %7242  ;;  %7246 = vpow2.f32 %v6128_v52  ;;  %v1004_v25 = vmul.f32 %v976_v57, %v7908_v0  ;;  %v1005_v3 = vmul.f32 %v976_v57, %v7911_v1  ;;  %v1191_v5 = vmul.f32 %v8065_v46, %v8050_v10 }
 0x4d0   : > { %v7245_v8 = vpop.eup %7244  ;;  %7248 = vrcp.f32 %v8067_v47  ;;  %v1206_v19 = vmul.f32 %v8070_v59, %v8053_v51  ;;  %v1214_v0 = vand.u32 2147483647, %v8053_v51  ;;  %vm1196_vm4 = vweird.f32 %v8065_v46 }
 0x4d1   : > { %7250 = vpow2.f32 %v6129_v56  ;;  %v1060_v16 = vmul.f32 %v1032_v27, %v1004_v25  ;;  %v1061_v23 = vmul.f32 %v1032_v27, %v1005_v3  ;;  %v8082_v28 = vadd.f32 1.0, %v7245_v8  ;;  %vm8130_vm7 = vmor %vm1195_vm15, %vm1196_vm4 }
 0x4d2   : > { %v1192_v1 = vsub.f32 1.0, %v1191_v5  ;;  %v1207_v11 = vsub.f32 1.0, %v1206_v19  ;;  %vm1211_vm5 = vweird.f32 %v8070_v59  ;;  %vm8102_vm6 = vcmp.eq.f32.partialorder %v1214_v0, 8.507059e+37 }
 0x4d3   : > { %v8085_v12 = vadd.f32 %v8033_v21, %v1060_v16  ;;  %v8088_v33 = vadd.f32 %v8033_v21, %v1061_v23  ;;  %7252 = vrcp.f32 %v8082_v28  ;;  %v1229_v62 = vand.u32 2147483647, %v8067_v47  ;;  %vm8150_vm8 = vmor %vm1210_vm1, %vm1211_vm5 }
 0x4d4   : > { %v1193_v34 = vmul.f32 %v8065_v46, %v1192_v1  ;;  %v1208_v55 = vmul.f32 %v8070_v59, %v1207_v11  ;;  %v1231_v53 = vand.u32 2147483648, %v8067_v47  ;;  %v1244_v8 = vand.u32 2147483647, %v8082_v28 }
 0x4d5   : > { %v7247_v40 = vpop.eup %7246  ;;  %v6130_v42 = vmul.f32 -1.442695, %v8085_v12  ;;  %v6131_v21 = vmul.f32 -1.442695, %v8088_v33  ;;  %v1246_v18 = vand.u32 2147483648, %v8082_v28  ;;  %vm1225_vm9 = vweird.f32 %v8067_v47 }
 0x4d6   : > { %v8106_v48 = vpop.eup %7248  ;;  %v8109_v50 = vadd.f32 1.0, %v7247_v40  ;;  %v981_v61 = vpop.permute.xlu1 %980  ;;  %v1194_v52 = vadd.f32 %v8065_v46, %v1193_v34  ;;  %v1209_v57 = vadd.f32 %v8070_v59, %v1208_v55  ;;  %v8134_v5 = vor.u32 1.1754944e-38, %v1231_v53 }
 0x4d7   : > { %v7251_v13 = vpop.eup %7250  ;;  %7254 = vpow2.f32 %v6130_v42  ;;  %v1006_v36 = vmul.f32 %v981_v61, %v7862_v17  ;;  %v1007_v45 = vmul.f32 %v981_v61, %v7865_v22  ;;  %v1221_v54 = vmul.f32 %v8106_v48, %v8067_v47 }
 0x4d8   : > { %v8116_v56 = vadd.f32 1.0, %v7251_v13  ;;  %7256 = vrcp.f32 %v8109_v50  ;;  %v1261_v25 = vand.u32 2147483648, %v8109_v50  ;;  %v1259_v19 = vand.u32 2147483647, %v8109_v50 }
 0x4d9   : > { %7258 = vpow2.f32 %v6131_v21  ;;  %v1062_v3 = vmul.f32 %v8023_v60, %v1006_v36  ;;  %v1063_v17 = vmul.f32 %v8023_v60, %v1007_v45  ;;  %v8155_v23 = vpop.eup %7252  ;;  %v1198_v1 = vsel %vm8130_vm7, %v8065_v46, %v1194_v52 }
 0x4da   : > { %7260 = vrcp.f32 %v8116_v56  ;;  %v1276_v60 = vand.u32 2147483648, %v8116_v56  ;;  %v1274_v0 = vand.u32 2147483647, %v8116_v56  ;;  %v1222_v11 = vsub.f32 1.0, %v1221_v54 }
 0x4db   : > { %v8141_v15 = vadd.f32 %v8027_v24, %v1062_v3  ;;  %v8144_v16 = vadd.f32 %v8027_v24, %v1063_v17  ;;  %v1213_v24 = vsel %vm8150_vm8, %v8070_v59, %v1209_v57  ;;  %vm1255_vm10 = vweird.f32 %v8109_v50 }
 0x4dc   : > { %v1262_v34 = vor.u32 1.1754944e-38, %v1261_v25  ;;  %v1203_v42 = vsel %vm8093_vm3, %v1202_v2, %v1198_v1  ;;  %vm8169_vm11 = vcmp.eq.f32.partialorder %v1229_v62, 8.507059e+37  ;;  %v8173_v61 = vor.u32 1.1754944e-38, %v1276_v60 }
 0x4dd   : > { %v7255_v51 = vpop.eup %7254  ;;  %v6132_v55 = vmul.f32 -1.442695, %v8141_v15  ;;  %v6133_v40 = vmul.f32 -1.442695, %v8144_v16  ;;  %v1218_v53 = vsel %vm8102_vm6, %v1217_v4, %v1213_v24  ;;  %v1430_v13 = vmul.f32 %v1203_v42, %v8037_v29 }
 0x4de   : > { %v7257_v46 = vpop.eup %7256  ;;  %v8175_v59 = vadd.f32 1.0, %v7255_v51  ;;  %v986_v36 = vpop.permute.xlu0 %985  ;;  %vm8181_vm12 = vcmp.eq.f32.partialorder %v1259_v19, 8.507059e+37  ;;  %vm1270_vm13 = vweird.f32 %v8116_v56  ;;  %v1431_v2 = vmul.f32 %v1218_v53, %v8039_v30 }
 0x4df   : > { %v7259_v45 = vpop.eup %7258  ;;  %v1251_v52 = vmul.f32 %v7257_v46, %v8109_v50  ;;  %7262 = vpow2.f32 %v6132_v55  ;;  %v1223_v62 = vmul.f32 %v8106_v48, %v1222_v11  ;;  %v1008_v29 = vmul.f32 %v986_v36, %v7872_v31 }
 0x4e0   : > { %v7261_v57 = vpop.eup %7260  ;;  %v8188_v9 = vadd.f32 1.0, %v7259_v45  ;;  %7264 = vrcp.f32 %v8175_v59  ;;  %v1009_v4 = vmul.f32 %v986_v36, %v7875_v32  ;;  %vm1256_vm14 = vweird.f32 %v7257_v46 }
 0x4e1   : > { %v1252_v54 = vsub.f32 1.0, %v1251_v52  ;;  %v1266_v25 = vmul.f32 %v7261_v57, %v8116_v56  ;;  %vm8194_vm15 = vcmp.eq.f32.partialorder %v1274_v0, 8.507059e+37  ;;  %7266 = vpow2.f32 %v6133_v40  ;;  %vm1257_vm7 = vmor %vm1255_vm10, %vm1256_vm14 }
 0x4e2   : > { %vm1271_vm1 = vweird.f32 %v7261_v57  ;;  %v6544_v30 = vpack.i.bf16 %v1431_v2, %v1430_v13  ;;  %v1064_v17 = vmul.f32 %v8029_v20, %v1008_v29  ;;  %v1065_v22 = vmul.f32 %v8029_v20, %v1009_v4 }
 0x4e3   : > { %v1253_v19 = vmul.f32 %v7257_v46, %v1252_v54  ;;  %v1267_v60 = vsub.f32 1.0, %v1266_v25  ;;  %v1224_v31 = vadd.f32 %v8106_v48, %v1223_v62  ;;  %vm1226_vm3 = vweird.f32 %v8106_v48 }
 0x4e4   : > { %vm1240_vm4 = vweird.f32 %v8082_v28  ;;  %7268 = vrcp.f32 %v8188_v9  ;;  %6545 = vrot.lane.b32.xlu0 %v6544_v30, %s7529_s21  ;;  %v8206_v32 = vadd.f32 %v8031_v26, %v1064_v17  ;;  %v8209_v10 = vadd.f32 %v8031_v26, %v1065_v22  ;;  %vm1227_vm5 = vmor %vm1225_vm9, %vm1226_vm3 }
 0x4e5   : > { %v1236_v20 = vmul.f32 %v8155_v23, %v8082_v28  ;;  %v7263_v0 = vpop.eup %7262  ;;  %v1254_v1 = vadd.f32 %v7257_v46, %v1253_v19  ;;  %v1268_v24 = vmul.f32 %v7261_v57, %v1267_v60  ;;  %v1228_v11 = vsel %vm1227_vm5, %v8106_v48, %v1224_v31  ;;  %vm1272_vm9 = vmor %vm1270_vm13, %vm1271_vm1 }
 0x4e6   : > { %vm1241_vm6 = vweird.f32 %v8155_v23  ;;  %v8217_v51 = vpop.eup %7264  ;;  %v8222_v26 = vadd.f32 1.0, %v7263_v0  ;;  %v6134_v47 = vmul.f32 -1.442695, %v8206_v32  ;;  %v1233_v55 = vsel %vm8169_vm11, %v8134_v5, %v1228_v11  ;;  %v991_v36 = vpop.permute.xlu1 %990 }
 0x4e7   : > { %vm8230_vm8 = vcmp.eq.f32.partialorder %v1244_v8, 8.507059e+37  ;;  %v7267_v40 = vpop.eup %7266  ;;  %v1258_v42 = vsel %vm1257_vm7, %v7257_v46, %v1254_v1  ;;  %v1269_v53 = vadd.f32 %v7261_v57, %v1268_v24  ;;  %v6135_v50 = vmul.f32 -1.442695, %v8209_v10  ;;  %vm1242_vm10 = vmor %vm1240_vm4, %vm1241_vm6 }
 0x4e8   : > { %v1237_v13 = vsub.f32 1.0, %v1236_v20  ;;  %v1263_v45 = vsel %vm8181_vm12, %v1262_v34, %v1258_v42  ;;  %v8240_v5 = vadd.f32 1.0, %v7267_v40  ;;  %7270 = vrcp.f32 %v8222_v26 }
 0x4e9   : > { %v1247_v8 = vor.u32 1.1754944e-38, %v1246_v18  ;;  %v1273_v21 = vsel %vm1272_vm9, %v7261_v57, %v1269_v53  ;;  %7272 = vpow2.f32 %v6134_v47  ;;  %v1432_v52 = vmul.f32 %v1233_v55, %v8045_v6 }
 0x4ea   : > { %v1238_v46 = vmul.f32 %v8155_v23, %v1237_v13  ;;  %v8247_v2 = vpop.eup %7268  ;;  %v1278_v56 = vsel %vm8194_vm15, %v8173_v61, %v1273_v21  ;;  %7274 = vrcp.f32 %v8240_v5  ;;  %v1010_v34 = vmul.f32 %v991_v36, %v7882_v35 }
 0x4eb   : > { %v1011_v27 = vmul.f32 %v991_v36, %v7885_v38  ;;  %v8256_v18 = vmul.f32 %v1263_v45, %v8059_v37  ;;  %7276 = vpow2.f32 %v6135_v50  ;;  %v1281_v6 = vmul.f32 %v8217_v51, %v8175_v59 }
 0x4ec   : > { %v1239_v62 = vadd.f32 %v8155_v23, %v1238_v46  ;;  %v8262_v57 = vmul.f32 %v1278_v56, %v8061_v41  ;;  %v1066_v35 = vmul.f32 %v8017_v14, %v1010_v34  ;;  %vm1285_vm11 = vweird.f32 %v8175_v59 }
 0x4ed   : > { %v1067_v38 = vmul.f32 %v8017_v14, %v1011_v27  ;;  %v1282_v61 = vsub.f32 1.0, %v1281_v6  ;;  %vm1286_vm12 = vweird.f32 %v8217_v51  ;;  %v1289_v29 = vand.u32 2147483647, %v8175_v59 }
 0x4ee   : > { %v1243_v37 = vsel %vm1242_vm10, %v8155_v23, %v1239_v62  ;;  %v8274_v41 = vpop.eup %7270  ;;  %v8279_v28 = vadd.f32 %v8019_v58, %v1066_v35  ;;  %v996_v14 = vpop.permute.xlu0 %995  ;;  %v1291_v25 = vand.u32 2147483648, %v8175_v59  ;;  %vm1287_vm14 = vmor %vm1285_vm11, %vm1286_vm12  ;;  %v1296_v47 = vmul.f32 %v8247_v2, %v8188_v9 }
 0x4ef   : > { %v1248_v4 = vsel %vm8230_vm8, %v1247_v8, %v1243_v37  ;;  %v8282_v54 = vadd.f32 %v8019_v58, %v1067_v38  ;;  %v7273_v23 = vpop.eup %7272  ;;  %v1012_v30 = vmul.f32 %v996_v14, %v7892_v43  ;;  %v1013_v17 = vmul.f32 %v996_v14, %v7895_v44 }
 0x4f0   : > { %v1433_v3 = vmul.f32 %v1248_v4, %v8047_v39  ;;  %v1283_v22 = vmul.f32 %v8217_v51, %v1282_v61  ;;  %v8289_v19 = vpop.eup %7274  ;;  %v8291_v60 = vadd.f32 1.0, %v7273_v23  ;;  %v6136_v31 = vmul.f32 -1.442695, %v8279_v28 }
 0x4f1   : > { %v6137_v58 = vmul.f32 -1.442695, %v8282_v54  ;;  %vm8295_vm13 = vcmp.eq.f32.partialorder %v1289_v29, 8.507059e+37  ;;  %v7277_v0 = vpop.eup %7276  ;;  %v1068_v43 = vmul.f32 %v8021_v7, %v1012_v30  ;;  %v1069_v44 = vmul.f32 %v8021_v7, %v1013_v17 }
 0x4f2   : > { %v6549_v39 = vpack.i.bf16 %v1433_v3, %v1432_v52  ;;  %v1284_v1 = vadd.f32 %v8217_v51, %v1283_v22  ;;  %v8302_v24 = vadd.f32 1.0, %v7277_v0  ;;  %7278 = vrcp.f32 %v8291_v60 }
 0x4f3   : > { %v1292_v11 = vor.u32 1.1754944e-38, %v1291_v25  ;;  %7280 = vpow2.f32 %v6136_v31  ;;  %v8313_v7 = vadd.f32 %v8025_v63, %v1068_v43  ;;  %v8316_v55 = vadd.f32 %v8025_v63, %v1069_v44 }
 0x4f4   : > { %6550 = vrot.lane.b32.xlu2 %v6549_v39, %s7529_s21  ;;  %v1288_v48 = vsel %vm1287_vm14, %v8217_v51, %v1284_v1  ;;  %7282 = vrcp.f32 %v8302_v24  ;;  %v1297_v40 = vsub.f32 1.0, %v1296_v47  ;;  %v6554_v42 = vpack.i.bf16 %v8262_v57, %v8256_v18 }
 0x4f5   : > { %v1293_v59 = vsel %vm8295_vm13, %v1292_v11, %v1288_v48  ;;  %7284 = vpow2.f32 %v6137_v58  ;;  %v6138_v53 = vmul.f32 -1.442695, %v8313_v7  ;;  %v6139_v50 = vmul.f32 -1.442695, %v8316_v55 }
 0x4f6   : > { %v1298_v13 = vmul.f32 %v8247_v2, %v1297_v40  ;;  %vm1301_vm15 = vweird.f32 %v8247_v2  ;;  %v1304_v63 = vand.u32 2147483647, %v8188_v9  ;;  %v1306_v51 = vand.u32 2147483648, %v8188_v9 }
 0x4f7   : > { %7286 = vpow2.f32 %v6138_v53  ;;  %vm1300_vm1 = vweird.f32 %v8188_v9  ;;  %v1436_v36 = vmul.f32 %v1293_v59, %v8085_v12  ;;  %v1311_v45 = vmul.f32 %v8274_v41, %v8222_v26 }
 0x4f8   : > { %v8334_v8 = vpop.eup %7278  ;;  %7288 = vpow2.f32 %v6139_v50  ;;  %v1299_v21 = vadd.f32 %v8247_v2, %v1298_v13  ;;  %vm1315_vm3 = vweird.f32 %v8222_v26  ;;  %vm1316_vm4 = vweird.f32 %v8274_v41  ;;  %vm1302_vm5 = vmor %vm1300_vm1, %vm1301_vm15 }
 0x4f9   : > { %v7281_v46 = vpop.eup %7280  ;;  %vm1305_vm6 = vcmp.eq.f32.partialorder %v1304_v63, 8.507059e+37  ;;  %v1307_v52 = vor.u32 1.1754944e-38, %v1306_v51  ;;  %v1312_v56 = vsub.f32 1.0, %v1311_v45  ;;  %v1326_v12 = vmul.f32 %v8289_v19, %v8240_v5  ;;  %vm1317_vm9 = vmor %vm1315_vm3, %vm1316_vm4 }
 0x4fa   : > { %v8341_v9 = vpop.eup %7282  ;;  %v8343_v34 = vadd.f32 1.0, %v7281_v46  ;;  %v1303_v27 = vsel %vm1302_vm5, %v8247_v2, %v1299_v21  ;;  %v1319_v18 = vand.u32 2147483647, %v8222_v26  ;;  %v1321_v62 = vand.u32 2147483648, %v8222_v26 }
 0x4fb   : > { %v7285_v6 = vpop.eup %7284  ;;  %v1308_v57 = vsel %vm1305_vm6, %v1307_v52, %v1303_v27  ;;  %v1313_v35 = vmul.f32 %v8274_v41, %v1312_v56  ;;  %vm1330_vm7 = vweird.f32 %v8240_v5  ;;  %vm1331_vm8 = vweird.f32 %v8289_v19 }
 0x4fc   : > { %6555 = vrot.lane.b32.xlu2 %v6554_v42, %s7529_s21  ;;  %v8352_v38 = vadd.f32 1.0, %v7285_v6  ;;  %7290 = vrcp.f32 %v8343_v34  ;;  %v1437_v2 = vmul.f32 %v1308_v57, %v8088_v33  ;;  %v1327_v37 = vsub.f32 1.0, %v1326_v12  ;;  %vm1332_vm12 = vmor %vm1330_vm7, %vm1331_vm8 }
 0x4fd   : > { %v7287_v61 = vpop.eup %7286  ;;  %v1314_v29 = vadd.f32 %v8274_v41, %v1313_v35  ;;  %v1334_v4 = vand.u32 2147483647, %v8240_v5  ;;  %v1336_v14 = vand.u32 2147483648, %v8240_v5  ;;  %v1341_v25 = vmul.f32 %v8334_v8, %v8291_v60 }
 0x4fe   : > { %v7289_v23 = vpop.eup %7288  ;;  %v8361_v3 = vadd.f32 1.0, %v7287_v61  ;;  %v6559_v30 = vpack.i.bf16 %v1437_v2, %v1436_v36  ;;  %v1322_v33 = vor.u32 1.1754944e-38, %v1321_v62  ;;  %v1328_v17 = vmul.f32 %v8289_v19, %v1327_v37 }
 0x4ff   : > { %7292 = vrcp.f32 %v8352_v38  ;;  %v8369_v22 = vadd.f32 1.0, %v7289_v23  ;;  %v1318_v31 = vsel %vm1317_vm9, %v8274_v41, %v1314_v29  ;;  %vm1320_vm10 = vcmp.eq.f32.partialorder %v1319_v18, 8.507059e+37 }
 0x500   : > { %6560 = vrot.lane.b32.xlu1 %v6559_v30, %s7529_s21  ;;  %v1323_v58 = vsel %vm1320_vm10, %v1322_v33, %v1318_v31  ;;  %v1329_v20 = vadd.f32 %v8289_v19, %v1328_v17  ;;  %vm1335_vm11 = vcmp.eq.f32.partialorder %v1334_v4, 8.507059e+37  ;;  %v1342_v0 = vsub.f32 1.0, %v1341_v25 }
 0x501   : > { %7294 = vrcp.f32 %v8361_v3  ;;  %v1337_v26 = vor.u32 1.1754944e-38, %v1336_v14  ;;  %v1438_v39 = vmul.f32 %v1323_v58, %v8141_v15  ;;  %vm1346_vm13 = vweird.f32 %v8334_v8 }
 0x502   : > { %v7291_v41 = vpop.eup %7290  ;;  %v1333_v43 = vsel %vm1332_vm12, %v8289_v19, %v1329_v20  ;;  %v1343_v44 = vmul.f32 %v8334_v8, %v1342_v0  ;;  %v1349_v1 = vand.u32 2147483647, %v8291_v60  ;;  %v1351_v11 = vand.u32 2147483648, %v8291_v60 }
 0x503   : > { %v1338_v47 = vsel %vm1335_vm11, %v1337_v26, %v1333_v43  ;;  %v1356_v48 = vmul.f32 %v8341_v9, %v8302_v24  ;;  %vm1345_vm14 = vweird.f32 %v8291_v60  ;;  %v1364_v42 = vand.u32 2147483647, %v8302_v24 }
 0x504   : > { %v1439_v5 = vmul.f32 %v1338_v47, %v8144_v16  ;;  %v1344_v59 = vadd.f32 %v8334_v8, %v1343_v44  ;;  %v1352_v15 = vor.u32 1.1754944e-38, %v1351_v11  ;;  %vm1347_vm15 = vmor %vm1345_vm14, %vm1346_vm13  ;;  %v1366_v53 = vand.u32 2147483648, %v8302_v24 }
 0x505   : > { %v8390_v40 = vpop.eup %7292  ;;  %v1357_v19 = vsub.f32 1.0, %v1356_v48  ;;  %v1371_v50 = vmul.f32 %v7291_v41, %v8343_v34  ;;  %7296 = vrcp.f32 %v8369_v22  ;;  %vm1350_vm1 = vcmp.eq.f32.partialorder %v1349_v1, 8.507059e+37 }
 0x506   : > { %v6564_v13 = vpack.i.bf16 %v1439_v5, %v1438_v39  ;;  %v1348_v16 = vsel %vm1347_vm15, %v8334_v8, %v1344_v59  ;;  %vm1360_vm3 = vweird.f32 %v8302_v24  ;;  %vm1361_vm4 = vweird.f32 %v8341_v9 }
 0x507   : > { %v8397_v63 = vpop.eup %7294  ;;  %v1353_v60 = vsel %vm1350_vm1, %v1352_v15, %v1348_v16  ;;  %v1358_v51 = vmul.f32 %v8341_v9, %v1357_v19  ;;  %vm8403_vm5 = vcmp.eq.f32.partialorder %v1364_v42, 8.507059e+37  ;;  %v1372_v45 = vsub.f32 1.0, %v1371_v50  ;;  %vm1362_vm8 = vmor %vm1360_vm3, %vm1361_vm4 }
 0x508   : > { %6565 = vrot.lane.b32.xlu1 %v6564_v13, %s7529_s21  ;;  %vm1375_vm6 = vweird.f32 %v8343_v34  ;;  %vm1376_vm7 = vweird.f32 %v7291_v41  ;;  %v1367_v21 = vor.u32 1.1754944e-38, %v1366_v53  ;;  %v1381_v46 = vand.u32 2147483648, %v8343_v34 }
 0x509   : > { %v1359_v8 = vadd.f32 %v8341_v9, %v1358_v51  ;;  %v1386_v24 = vmul.f32 %v8390_v40, %v8352_v38  ;;  %v1440_v52 = vmul.f32 %v1353_v60, %v8206_v32  ;;  %v1373_v56 = vmul.f32 %v7291_v41, %v1372_v45  ;;  %vm1377_vm11 = vmor %vm1375_vm6, %vm1376_vm7 }
 0x50a   : > { %v1379_v12 = vand.u32 2147483647, %v8343_v34  ;;  %vm1390_vm9 = vweird.f32 %v8352_v38  ;;  %vm1391_vm10 = vweird.f32 %v8390_v40  ;;  %v1401_v62 = vmul.f32 %v8397_v63, %v8361_v3 }
 0x50b   : > { %v1363_v27 = vsel %vm1362_vm8, %v8341_v9, %v1359_v8  ;;  %v1387_v18 = vsub.f32 1.0, %v1386_v24  ;;  %v7297_v6 = vpop.eup %7296  ;;  %v1374_v35 = vadd.f32 %v7291_v41, %v1373_v56  ;;  %v1394_v32 = vand.u32 2147483647, %v8352_v38  ;;  %vm1392_vm14 = vmor %vm1390_vm9, %vm1391_vm10 }
 0x50c   : > { %v1368_v57 = vsel %vm8403_vm5, %v1367_v21, %v1363_v27  ;;  %v1396_v2 = vand.u32 2147483648, %v8352_v38  ;;  %v1382_v9 = vor.u32 1.1754944e-38, %v1381_v46  ;;  %v1402_v29 = vsub.f32 1.0, %v1401_v62 }
 0x50d   : > { %v1441_v37 = vmul.f32 %v1368_v57, %v8209_v10  ;;  %v1388_v61 = vmul.f32 %v8390_v40, %v1387_v18  ;;  %v1378_v4 = vsel %vm1377_vm11, %v7291_v41, %v1374_v35  ;;  %vm1380_vm12 = vcmp.eq.f32.partialorder %v1379_v12, 8.507059e+37 }
 0x50e   : > { %vm1406_vm13 = vweird.f32 %v8397_v63  ;;  %v1411_v14 = vand.u32 2147483648, %v8361_v3  ;;  %v1383_v23 = vsel %vm1380_vm12, %v1382_v9, %v1378_v4  ;;  %v1403_v10 = vmul.f32 %v8397_v63, %v1402_v29 }
 0x50f   : > { %v6569_v25 = vpack.i.bf16 %v1441_v37, %v1440_v52  ;;  %v1389_v30 = vadd.f32 %v8390_v40, %v1388_v61  ;;  %vm1395_vm15 = vcmp.eq.f32.partialorder %v1394_v32, 8.507059e+37  ;;  %v1397_v34 = vor.u32 1.1754944e-38, %v1396_v2 }
 0x510   : > { %v1409_v33 = vand.u32 2147483647, %v8361_v3  ;;  %v1416_v17 = vmul.f32 %v7297_v6, %v8369_v22  ;;  %v1442_v58 = vmul.f32 %v1383_v23, %v8279_v28  ;;  %v1404_v20 = vadd.f32 %v8397_v63, %v1403_v10 }
 0x511   : > { %6570 = vrot.lane.b32.xlu0 %v6569_v25, %s7529_s21  ;;  %v1393_v31 = vsel %vm1392_vm14, %v8390_v40, %v1389_v30  ;;  %vm1405_vm1 = vweird.f32 %v8361_v3  ;;  %v1412_v41 = vor.u32 1.1754944e-38, %v1411_v14  ;;  %v1426_v43 = vand.u32 2147483648, %v8369_v22 }
 0x512   : > { %v1398_v0 = vsel %vm1395_vm15, %v1397_v34, %v1393_v31  ;;  %vm1407_vm3 = vmor %vm1405_vm1, %vm1406_vm13  ;;  %v1417_v38 = vsub.f32 1.0, %v1416_v17  ;;  %vm1410_vm4 = vcmp.eq.f32.partialorder %v1409_v33, 8.507059e+37  ;;  %vm1421_vm5 = vweird.f32 %v7297_v6 }
 0x513   : > { %v1443_v26 = vmul.f32 %v1398_v0, %v8282_v54  ;;  %v1408_v39 = vsel %vm1407_vm3, %v8397_v63, %v1404_v20  ;;  %v1424_v28 = vand.u32 2147483647, %v8369_v22  ;;  %vm1420_vm6 = vweird.f32 %v8369_v22 }
 0x514   : > { %v1418_v44 = vmul.f32 %v7297_v6, %v1417_v38  ;;  %v1413_v11 = vsel %vm1410_vm4, %v1412_v41, %v1408_v39  ;;  %vm1422_vm7 = vmor %vm1420_vm6, %vm1421_vm5  ;;  %v1427_v47 = vor.u32 1.1754944e-38, %v1426_v43  ;;  %v11966_v40 = vlaneseq }
 0x515   : > { %v6574_v1 = vpack.i.bf16 %v1443_v26, %v1442_v58  ;;  %vm1425_vm8 = vcmp.eq.f32.partialorder %v1424_v28, 8.507059e+37  ;;  %v1444_v54 = vmul.f32 %v1413_v11, %v8313_v7  ;;  %vm1526_vm9 = vcmask 138240  }
 0x516   : > { %v1419_v3 = vadd.f32 %v7297_v6, %v1418_v44  ;;  %v8455_v19 = vand.u32 127, %v11966_v40  ;;  %vm12000_vm12 = vcmask 916480   ;;  %vm11999_vm13 = vcmask 900096  }
 0x517   : > { %vm12003_vm14 = vcmask 1031168   ;;  %vm11998_vm3 = vcmask 1039360   ;;  %vm11991_vm4 = vcmask 769024   ;;  %vm11997_vm5 = vcmask 785408  }
 0x518   : > { %v1423_v48 = vsel %vm1422_vm7, %v7297_v6, %v1419_v3  ;;  %v8458_v22 = vadd.s32 128, %v8455_v19  ;;  %v529_v42 = vand.u32 15, %v8455_v19  ;;  %vm11990_vm6 = vcmask 777216  }
 0x519   : > { %6575 = vrot.lane.b32.xlu0 %v6574_v1, %s7529_s21  ;;  %v1428_v5 = vsel %vm1425_vm8, %v1427_v47, %v1423_v48  ;;  %vm11989_vm7 = vcmask 908288  }
 0x51a   : > { %v1445_v59 = vmul.f32 %v1428_v5, %v8316_v55  ;;  %v536_v53 = vand.u32 15, %v8458_v22  ;;  %v8464_v7 = vadd.s32 4294967295, %v529_v42 }
 0x51c   : > { %v6579_v15 = vpack.i.bf16 %v1445_v59, %v1444_v54  ;;  %12042 = vst [vmem:[#allocation17_spill] sm:$0xff] %v8464_v7  ;;  %v8468_v55 = vadd.s32 4294967295, %v536_v53  ;;  %vm1577_vm10 = vcmp.ge.s32.totalorder %v8464_v7, 0 }
 0x51e   : > { %6580 = vrot.lane.b32.xlu2 %v6579_v15, %s7529_s21  ;;  %12043 = vst [vmem:[#allocation18_spill] sm:$0xff] %v8468_v55  ;;  %vm1578_vm11 = vcmp.ge.s32.totalorder %v8468_v55, 0 }
 0x54e   : > { %v6551_v50 = vpop.permute.xlu2 %6550 }
 0x54f   : > { %v6553_v13 = vunpack.i.h.bf16 %v6551_v50  ;;  %v6552_v16 = vunpack.i.l.bf16 %v6551_v50 }
 0x551   : > { %v1568_v63 = vsel %vm1526_vm9, %v6553_v13, 0.0  ;;  %v1528_v60 = vsel %vm1526_vm9, %v6552_v16, %v6553_v13  ;;  %v1560_v51 = vsel %vm1526_vm9, 0.0, %v6552_v16 }
 0x552   : > { %v8475_v36 = vpack.i.bf16 %v1568_v63, %v1528_v60  ;;  %v1589_v45 = vsel %vm1577_vm10, %v1560_v51, 0.0  ;;  %v1590_v8 = vsel %vm1578_vm11, %v1528_v60, 0.0  ;;  %v1614_v37 = vpack.c.bf16 %v1568_v63, %v1568_v63 }
 0x553   : > { %v1604_v21 = vpack.c.bf16 %v1590_v8, %v1589_v45  ;;  %v1613_v39 = vpack.c.bf16 %v1528_v60, %v1560_v51 }
 0x554   : > { %v2241_v14 = vunpack.c.l.b16 %v1614_v37 }
 0x555   : > { %v2190_v31 = vunpack.c.l.b16 %v1604_v21  ;;  %v2191_v20 = vunpack.c.h.b16 %v1604_v21  ;;  %v2240_v44 = vunpack.c.h.b16 %v1613_v39  ;;  %v2239_v28 = vunpack.c.l.b16 %v1613_v39 }
 0x556   : > { %v8481_v46 = vpop.permute.xlu2 %6555  ;;  %v6546_v56 = vpop.permute.xlu0 %6545 }
 0x557   : > { %v6558_v24 = vunpack.i.h.bf16 %v8481_v46  ;;  %v6557_v52 = vunpack.i.l.bf16 %v8481_v46  ;;  %v6548_v12 = vunpack.i.h.bf16 %v6546_v56  ;;  %v6547_v27 = vunpack.i.l.bf16 %v6546_v56 }
 0x559   : > { %v8486_v18 = vsel %vm1526_vm9, %v6557_v52, %v6558_v24  ;;  %v1567_v62 = vsel %vm1526_vm9, %v6548_v12, 0.0  ;;  %v1527_v6 = vsel %vm1526_vm9, %v6547_v27, %v6548_v12  ;;  %v1559_v57 = vsel %vm1526_vm9, 0.0, %v6547_v27 }
 0x55a   : > { %v8492_v35 = vsel %vm1526_vm9, 0.0, %v6557_v52  ;;  %v8494_v32 = vpack.i.bf16 %v1560_v51, %v1567_v62  ;;  %v8496_v2 = vpack.i.bf16 %v1527_v6, %v1559_v57  ;;  %v1612_v9 = vpack.c.bf16 %v1567_v62, %v1567_v62 }
 0x55b   : > { %v8506_v61 = vpack.i.bf16 %v8486_v18, %v8492_v35  ;;  %v1591_v29 = vsel %vm1577_vm10, %v8492_v35, 0.0  ;;  %v1592_v25 = vsel %vm1578_vm11, %v8486_v18, 0.0  ;;  %v1587_v10 = vsel %vm1577_vm10, %v1559_v57, 0.0 }
 0x55c   : > { %6600 = vrot.lane.b32.xlu1 %v8494_v32, %s11994_s22  ;;  %6595 = vrot.lane.b32.xlu0 %v8496_v2, %s7531_s29  ;;  %v2238_v4 = vunpack.c.l.b16 %v1612_v9  ;;  %v8516_v30 = vpack.c.bf16 %v1592_v25, %v1591_v29  ;;  %v1588_v34 = vsel %vm1578_vm11, %v1527_v6, 0.0  ;;  %v1611_v26 = vpack.c.bf16 %v1527_v6, %v1559_v57 }
 0x55d   : > { %6585 = vrot.lane.b32.xlu2 %v8496_v2, %s11994_s22  ;;  %v1603_v33 = vpack.c.bf16 %v1588_v34, %v1587_v10  ;;  %v8554_v15 = vsel %vm1526_vm9, %v6558_v24, 0.0 }
 0x55e   : > { %v8514_v23 = vpack.c.b16 %v2241_v14, %v2238_v4  ;;  %v2237_v41 = vunpack.c.h.b16 %v1611_v26  ;;  %v2236_v43 = vunpack.c.l.b16 %v1611_v26 }
 0x55f   : > { %v2188_v17 = vunpack.c.l.b16 %v1603_v33  ;;  %v2189_v58 = vunpack.c.h.b16 %v1603_v33 }
 0x560   : > { %v8538_v11 = vpack.c.b16 %v2240_v44, %v2237_v41  ;;  %v8540_v3 = vpack.c.b16 %v2239_v28, %v2236_v43  ;;  %v2192_v41 = vunpack.c.l.b16 %v8516_v30  ;;  %v2193_v43 = vunpack.c.h.b16 %v8516_v30 }
 0x561   : > { %v8528_v0 = vpack.c.b16 %v2190_v31, %v2188_v17  ;;  %v8530_v38 = vpack.c.b16 %v2191_v20, %v2189_v58  ;;  %v1615_v31 = vpack.c.bf16 %v8486_v18, %v8492_v35 }
 0x563   : > { %12044 = vst [vmem:[#allocation19_spill] sm:$0xff] %v8530_v38 }
 0x564   : > { %6610 = vrot.lane.b32.xlu1 %v8494_v32, %s7532_s23  ;;  %6605 = vrot.lane.b32.xlu0 %v8475_v36, %s11994_s22 }
 0x565   : > { %6590 = vrot.lane.b32.xlu2 %v8496_v2, %s7532_s23 }
 0x56c   : > { %6625 = vrot.lane.b32.xlu1 %v8475_v36, %s7531_s29  ;;  %6615 = vrot.lane.b32.xlu0 %v8475_v36, %s7532_s23 }
 0x56d   : > { %6620 = vrot.lane.b32.xlu2 %v8494_v32, %s7531_s29 }
 0x572   : > { %v6561_v1 = vpop.permute.xlu1 %6560 }
 0x573   : > { %v6563_v47 = vunpack.i.h.bf16 %v6561_v1  ;;  %v6562_v48 = vunpack.i.l.bf16 %v6561_v1 }
 0x574   : > { %2274 = vrot.lane.b32.xlu0 %v8538_v11, %s11992_s26  ;;  %2272 = vrot.lane.b32.xlu1 %v8540_v3, %s11992_s26 }
 0x575   : > { %v8547_v54 = vsel %vm1526_vm9, %v6563_v47, 0.0  ;;  %v1530_v5 = vsel %vm1526_vm9, %v6562_v48, %v6563_v47  ;;  %v1562_v59 = vsel %vm1526_vm9, 0.0, %v6562_v48  ;;  %2514 = vrot.lane.b32.xlu2 %v8540_v3, %s11978_s20 }
 0x576   : > { %v8557_v13 = vpack.i.bf16 %v8547_v54, %v1530_v5  ;;  %v8560_v16 = vpack.i.bf16 %v1562_v59, %v8554_v15  ;;  %v1593_v12 = vsel %vm1577_vm10, %v1562_v59, 0.0  ;;  %v1594_v27 = vsel %vm1578_vm11, %v1530_v5, 0.0 }
 0x577   : > { %v1606_v4 = vpack.c.bf16 %v1594_v27, %v1593_v12  ;;  %v1617_v39 = vpack.c.bf16 %v1530_v5, %v1562_v59  ;;  %v2242_v27 = vunpack.c.l.b16 %v1615_v31 }
 0x578   : > { %v6581_v50 = vpop.permute.xlu2 %6580 }
 0x579   : > { %v6583_v45 = vunpack.i.h.bf16 %v6581_v50  ;;  %v6582_v8 = vunpack.i.l.bf16 %v6581_v50  ;;  %v2194_v58 = vunpack.c.l.b16 %v1606_v4  ;;  %v2195_v20 = vunpack.c.h.b16 %v1606_v4 }
 0x57a   : > { %v6566_v63 = vpop.permute.xlu1 %6565  ;;  %v2245_v50 = vunpack.c.l.b16 %v1617_v39 }
 0x57b   : > { %v6568_v60 = vunpack.i.h.bf16 %v6566_v63  ;;  %v6567_v51 = vunpack.i.l.bf16 %v6566_v63  ;;  %v8575_v24 = vsel %vm1526_vm9, %v6582_v8, %v6583_v45  ;;  %v8578_v52 = vsel %vm1526_vm9, 0.0, %v6582_v8 }
 0x57c   : > { %6640 = vrot.lane.b32.xlu0 %v8506_v61, %s7531_s29  ;;  %2516 = vrot.lane.b32.xlu1 %v8538_v11, %s11978_s20  ;;  %v1601_v62 = vsel %vm1577_vm10, %v8578_v52, 0.0  ;;  %v1602_v6 = vsel %vm1578_vm11, %v8575_v24, 0.0  ;;  %v8636_v35 = vsel %vm1526_vm9, %v6583_v45, 0.0  ;;  %v8641_v47 = vpack.c.b16 %v2194_v58, %v2192_v41 }
 0x57d   : > { %v8567_v21 = vsel %vm1526_vm9, %v6567_v51, %v6568_v60  ;;  %v8570_v46 = vsel %vm1526_vm9, 0.0, %v6567_v51  ;;  %6635 = vrot.lane.b32.xlu2 %v8506_v61, %s7532_s23  ;;  %v8594_v37 = vpack.c.bf16 %v1602_v6, %v1601_v62  ;;  %v8620_v26 = vsel %vm1526_vm9, %v6568_v60, 0.0 }
 0x57e   : > { %v8582_v56 = vpack.i.bf16 %v8567_v21, %v8570_v46  ;;  %v1595_v9 = vsel %vm1577_vm10, %v8570_v46, 0.0  ;;  %v1596_v29 = vsel %vm1578_vm11, %v8567_v21, 0.0  ;;  %v8643_v48 = vpack.c.b16 %v2195_v20, %v2193_v43 }
 0x57f   : > { %v1607_v10 = vpack.c.bf16 %v1596_v29, %v1595_v9  ;;  %v2246_v63 = vunpack.c.h.b16 %v1617_v39  ;;  %v1626_v45 = vpack.c.bf16 %v8636_v35, %v8636_v35  ;;  %v2243_v62 = vunpack.c.h.b16 %v1615_v31 }
 0x580   : > { %12045 = vst [vmem:[#allocation20_spill] sm:$0xff] %v8643_v48  ;;  %v8662_v6 = vpack.c.b16 %v2245_v50, %v2242_v27  ;;  %v1618_v9 = vpack.c.bf16 %v8547_v54, %v8547_v54  ;;  %v1616_v54 = vpack.c.bf16 %v8554_v15, %v8554_v15  ;;  %v2202_v43 = vunpack.c.l.b16 %v8594_v37 }
 0x581   : > { %v2259_v4 = vunpack.c.l.b16 %v1626_v45  ;;  %v2196_v31 = vunpack.c.l.b16 %v1607_v10 }
 0x582   : > { %v2244_v27 = vunpack.c.l.b16 %v1616_v54 }
 0x583   : > { %v6571_v57 = vpop.permute.xlu0 %6570 }
 0x584   : > { %v6573_v14 = vunpack.i.h.bf16 %v6571_v57  ;;  %v6572_v25 = vunpack.i.l.bf16 %v6571_v57  ;;  %6645 = vrot.lane.b32.xlu0 %v8560_v16, %s11994_s22  ;;  %6630 = vrot.lane.b32.xlu1 %v8506_v61, %s11994_s22  ;;  %v8664_v57 = vpack.c.b16 %v2246_v63, %v2243_v62  ;;  %v2247_v63 = vunpack.c.l.b16 %v1618_v9 }
 0x585   : > { %6650 = vrot.lane.b32.xlu2 %v8557_v13, %s11994_s22  ;;  %v1620_v9 = vpack.c.bf16 %v8620_v26, %v8620_v26 }
 0x586   : > { %v8609_v34 = vsel %vm1526_vm9, %v6573_v14, 0.0  ;;  %v8612_v33 = vsel %vm1526_vm9, %v6572_v25, %v6573_v14  ;;  %v8615_v17 = vsel %vm1526_vm9, 0.0, %v6572_v25  ;;  %v8696_v62 = vpack.c.b16 %v2247_v63, %v2244_v27 }
 0x587   : > { %v8626_v44 = vpack.i.bf16 %v8615_v17, %v8620_v26  ;;  %v8630_v28 = vpack.i.bf16 %v8609_v34, %v8612_v33  ;;  %v1597_v18 = vsel %vm1577_vm10, %v8615_v17, 0.0  ;;  %v1598_v30 = vsel %vm1578_vm11, %v8612_v33, 0.0 }
 0x588   : > { %v1608_v60 = vpack.c.bf16 %v1598_v30, %v1597_v18  ;;  %v2203_v18 = vunpack.c.h.b16 %v8594_v37  ;;  %v1622_v37 = vpack.c.bf16 %v8609_v34, %v8609_v34  ;;  %v8770_v63 = vpack.i.bf16 %v8636_v35, %v8575_v24 }
 0x589   : > { %v8774_v27 = vpack.c.bf16 %v8575_v24, %v8578_v52  ;;  %v8789_v24 = vadd.s32 1, %v536_v53 }
 0x58a   : > { %v2198_v39 = vunpack.c.l.b16 %v1608_v60  ;;  %v2199_v41 = vunpack.c.h.b16 %v1608_v60 }
 0x58b   : > { %v6576_v1 = vpop.permute.xlu0 %6575  ;;  %12049 = vst [vmem:[#allocation24_spill] sm:$0xff] %v8789_v24  ;;  %vm12002_vm15 = vcmp.lt.s32.totalorder %v8789_v24, 16 }
 0x58c   : > { %v6578_v5 = vunpack.i.h.bf16 %v6576_v1  ;;  %v6577_v59 = vunpack.i.l.bf16 %v6576_v1  ;;  %6660 = vrot.lane.b32.xlu0 %v8557_v13, %s7532_s23  ;;  %6655 = vrot.lane.b32.xlu1 %v8560_v16, %s7532_s23  ;;  %v2197_v1 = vunpack.c.h.b16 %v1607_v10  ;;  %v1621_v10 = vpack.c.bf16 %v8612_v33, %v8615_v17 }
 0x58d   : > { %6665 = vrot.lane.b32.xlu2 %v8560_v16, %s7531_s29  ;;  %v2250_v33 = vunpack.c.l.b16 %v1620_v9 }
 0x58e   : > { %v8652_v51 = vsel %vm1526_vm9, %v6578_v5, 0.0  ;;  %v8657_v8 = vsel %vm1526_vm9, %v6577_v59, %v6578_v5  ;;  %v8660_v12 = vsel %vm1526_vm9, 0.0, %v6577_v59  ;;  %v8688_v59 = vpack.c.b16 %v2198_v39, %v2196_v31 }
 0x58f   : > { %v1624_v29 = vpack.c.bf16 %v8652_v51, %v8652_v51  ;;  %v1599_v14 = vsel %vm1577_vm10, %v8660_v12, 0.0  ;;  %v1600_v25 = vsel %vm1578_vm11, %v8657_v8, 0.0  ;;  %v8690_v60 = vpack.c.b16 %v2199_v41, %v2197_v1 }
 0x590   : > { %v1609_v20 = vpack.c.bf16 %v1600_v25, %v1599_v14  ;;  %v2252_v34 = vunpack.c.h.b16 %v1621_v10  ;;  %v2251_v25 = vunpack.c.l.b16 %v1621_v10 }
 0x591   : > { %v2256_v58 = vunpack.c.l.b16 %v1624_v29  ;;  %12046 = vst [vmem:[#allocation21_spill] sm:$0xff] %v8690_v60  ;;  %v1619_v29 = vpack.c.bf16 %v8567_v21, %v8570_v46  ;;  %v8746_v46 = vpack.i.bf16 %v8657_v8, %v8660_v12 }
 0x592   : > { %v2200_v5 = vunpack.c.l.b16 %v1609_v20  ;;  %v2201_v50 = vunpack.c.h.b16 %v1609_v20 }
 0x593   : > { %v8686_v30 = vpack.c.b16 %v2259_v4, %v2256_v58  ;;  %v2253_v4 = vunpack.c.l.b16 %v1622_v37  ;;  %v2249_v17 = vunpack.c.h.b16 %v1619_v29  ;;  %v2248_v31 = vunpack.c.l.b16 %v1619_v29 }
 0x594   : > { %2278 = vrot.lane.b32.xlu0 %v8662_v6, %s11992_s26  ;;  %6670 = vrot.lane.b32.xlu1 %v8557_v13, %s7531_s29  ;;  %v8692_v45 = vpack.c.b16 %v2202_v43, %v2200_v5  ;;  %v8694_v15 = vpack.c.b16 %v2203_v18, %v2201_v50  ;;  %v8766_v50 = vpack.i.bf16 %v8578_v52, %v8652_v51 }
 0x595   : > { %2280 = vrot.lane.b32.xlu2 %v8664_v57, %s11992_s26  ;;  %v8730_v58 = vpack.c.b16 %v2253_v4, %v2250_v33  ;;  %v8732_v20 = vpack.c.b16 %v2252_v34, %v2249_v17  ;;  %v8734_v39 = vpack.c.b16 %v2251_v25, %v2248_v31  ;;  %v8782_v37 = vpack.c.bf16 %v8657_v8, %v8660_v12 }
 0x596   : > { %12047 = vst [vmem:[#allocation22_spill] sm:$0xff] %v8694_v15  ;;  %v8794_v8 = vadd.s32 1, %v529_v42 }
 0x598   : > { %12050 = vst [vmem:[#allocation25_spill] sm:$0xff] %v8794_v8  ;;  %vm12001_vm1 = vcmp.lt.s32.totalorder %v8794_v8, 16 }
 0x59c   : > { %2282 = vrot.lane.b32.xlu0 %v8696_v62, %s11992_s26  ;;  %2522 = vrot.lane.b32.xlu1 %v8664_v57, %s11978_s20 }
 0x59d   : > { %2520 = vrot.lane.b32.xlu2 %v8662_v6, %s11978_s20 }
 0x5a4   : > { %6685 = vrot.lane.b32.xlu0 %v8582_v56, %s7531_s29  ;;  %6675 = vrot.lane.b32.xlu1 %v8582_v56, %s11994_s22 }
 0x5a5   : > { %6695 = vrot.lane.b32.xlu2 %v8630_v28, %s11994_s22 }
 0x5ac   : > { %6690 = vrot.lane.b32.xlu0 %v8626_v44, %s11994_s22  ;;  %6680 = vrot.lane.b32.xlu1 %v8582_v56, %s7532_s23 }
 0x5ad   : > { %6705 = vrot.lane.b32.xlu2 %v8630_v28, %s7532_s23 }
 0x5b4   : > { %6700 = vrot.lane.b32.xlu0 %v8626_v44, %s7532_s23  ;;  %6715 = vrot.lane.b32.xlu1 %v8630_v28, %s7531_s29 }
 0x5b5   : > { %6710 = vrot.lane.b32.xlu2 %v8626_v44, %s7531_s29 }
 0x5b7   : > { %v6586_v14 = vpop.permute.xlu2 %6585 }
 0x5b8   : > { %v6588_v1 = vunpack.i.h.bf16 %v6586_v14  ;;  %v6587_v5 = vunpack.i.l.bf16 %v6586_v14 }
 0x5ba   : > { %v1809_v52 = vsel %vm12000_vm12, %v6587_v5, %v6588_v1 }
 0x5bb   : > { %v1841_v19 = vsel %vm1577_vm10, %v1809_v52, 0.0  ;;  %v2258_v52 = vunpack.c.h.b16 %v8774_v27 }
 0x5bc   : > { %2288 = vrot.lane.b32.xlu0 %v8730_v58, %s11992_s26  ;;  %2286 = vrot.lane.b32.xlu1 %v8732_v20, %s11992_s26 }
 0x5bd   : > { %2284 = vrot.lane.b32.xlu2 %v8734_v39, %s11992_s26 }
 0x5bf   : > { %v8742_v21 = vpop.permute.xlu2 %6590 }
 0x5c0   : > { %v6593_v53 = vunpack.i.h.bf16 %v8742_v21  ;;  %v6592_v33 = vunpack.i.l.bf16 %v8742_v21 }
 0x5c4   : > { %6725 = vrot.lane.b32.xlu0 %v8746_v46, %s7532_s23  ;;  %2528 = vrot.lane.b32.xlu1 %v8732_v20, %s11978_s20 }
 0x5c5   : > { %2526 = vrot.lane.b32.xlu2 %v8734_v39, %s11978_s20 }
 0x5c7   : > { %v8754_v26 = vpop.permute.xlu2 %6620 }
 0x5c8   : > { %v6622_v17 = vunpack.i.l.bf16 %v8754_v26 }
 0x5cc   : > { %6735 = vrot.lane.b32.xlu0 %v8746_v46, %s11974_s18  ;;  %6720 = vrot.lane.b32.xlu1 %v8746_v46, %s11994_s22 }
 0x5cd   : > { %6730 = vrot.lane.b32.xlu2 %v8746_v46, %s7531_s29 }
 0x5ce   : > { %v6601_v41 = vpop.permute.xlu1 %6600  ;;  %v6596_v54 = vpop.permute.xlu0 %6595 }
 0x5cf   : > { %v8762_v43 = vpop.permute.xlu2 %2514  ;;  %v6602_v18 = vunpack.i.l.bf16 %v6601_v41  ;;  %v6598_v10 = vunpack.i.h.bf16 %v6596_v54  ;;  %v6597_v35 = vunpack.i.l.bf16 %v6596_v54  ;;  %v6603_v9 = vunpack.i.h.bf16 %v6601_v41 }
 0x5d0   : > { %12048 = vst [vmem:[#allocation23_spill] sm:$0xff] %v8762_v43 }
 0x5d1   : > { %v1810_v51 = vsel %vm12000_vm12, %v6588_v1, %v6602_v18  ;;  %v1914_v41 = vsel %vm11999_vm13, %v6597_v35, %v6598_v10  ;;  %v1915_v1 = vsel %vm11999_vm13, %v6598_v10, %v6622_v17  ;;  %v2255_v35 = vunpack.c.h.b16 %v8782_v37 }
 0x5d2   : > { %v1842_v22 = vsel %vm1578_vm11, %v1810_v51, 0.0  ;;  %v1946_v10 = vsel %vm12001_vm1, %v1914_v41, 0.0 }
 0x5d3   : > { %v8813_v21 = vpack.c.bf16 %v1842_v22, %v1841_v19 }
 0x5d4   : > { %6740 = vrot.lane.b32.xlu0 %v8766_v50, %s11994_s22  ;;  %6755 = vrot.lane.b32.xlu1 %v8770_v63, %s7532_s23 }
 0x5d5   : > { %6745 = vrot.lane.b32.xlu2 %v8770_v63, %s11994_s22 }
 0x5d6   : > { %v6611_v29 = vpop.permute.xlu1 %6610  ;;  %v6606_v4 = vpop.permute.xlu0 %6605 }
 0x5d7   : > { %v6612_v12 = vunpack.i.l.bf16 %v6611_v29  ;;  %v6608_v34 = vunpack.i.h.bf16 %v6606_v4  ;;  %v6607_v14 = vunpack.i.l.bf16 %v6606_v4  ;;  %v8796_v25 = vpop.permute.xlu2 %6635  ;;  %v1704_v4 = vsel %vm12003_vm14, %v6592_v33, %v6593_v53 }
 0x5d9   : > { %v1811_v42 = vsel %vm12000_vm12, %v6603_v9, %v6607_v14  ;;  %v1812_v31 = vsel %vm12000_vm12, %v6607_v14, %v6608_v34  ;;  %v1705_v51 = vsel %vm12003_vm14, %v6593_v53, %v6612_v12  ;;  %v1947_v9 = vsel %vm12002_vm15, %v1915_v1, 0.0 }
 0x5da   : > { %v1843_v54 = vsel %vm1577_vm10, %v1811_v42, 0.0  ;;  %v1844_v18 = vsel %vm1578_vm11, %v1812_v31, 0.0  ;;  %v6623_v34 = vunpack.i.h.bf16 %v8754_v26  ;;  %v6613_v14 = vunpack.i.h.bf16 %v6611_v29 }
 0x5db   : > { %v8816_v5 = vpack.c.bf16 %v1844_v18, %v1843_v54  ;;  %v1737_v19 = vsel %vm12002_vm15, %v1705_v51, 0.0  ;;  %v2362_v42 = vunpack.c.h.b16 %v8813_v21  ;;  %v8838_v1 = vpack.c.b16 %v2258_v52, %v2255_v35 }
 0x5dc   : > { %6765 = vrot.lane.b32.xlu0 %v8770_v63, %s7531_s29  ;;  %6760 = vrot.lane.b32.xlu1 %v8766_v50, %s7531_s29  ;;  %v8840_v53 = vpack.c.bf16 %v1947_v9, %v1946_v10  ;;  %v1736_v26 = vsel %vm12001_vm1, %v1704_v4, 0.0 }
 0x5dd   : > { %6750 = vrot.lane.b32.xlu2 %v8766_v50, %s7532_s23  ;;  %v2364_v12 = vunpack.c.h.b16 %v8816_v5  ;;  %v8856_v10 = vpack.c.bf16 %v1737_v19, %v1736_v26  ;;  %v2257_v26 = vunpack.c.l.b16 %v8774_v27 }
 0x5de   : > { %v6626_v22 = vpop.permute.xlu1 %6625  ;;  %v6616_v17 = vpop.permute.xlu0 %6615 }
 0x5df   : > { %v6628_v31 = vunpack.i.h.bf16 %v6626_v22  ;;  %v6627_v54 = vunpack.i.l.bf16 %v6626_v22  ;;  %v6618_v41 = vunpack.i.h.bf16 %v6616_v17  ;;  %v6617_v18 = vunpack.i.l.bf16 %v6616_v17  ;;  %v6651_v40 = vpop.permute.xlu2 %6650 }
 0x5e0   : > { %v8844_v29 = vpack.c.b16 %v2364_v12, %v2362_v42  ;;  %v2254_v42 = vunpack.c.l.b16 %v8782_v37  ;;  %v6652_v27 = vunpack.i.l.bf16 %v6651_v40 }
 0x5e1   : > { %v1916_v33 = vsel %vm11999_vm13, %v6623_v34, %v6627_v54  ;;  %v1917_v51 = vsel %vm11999_vm13, %v6627_v54, %v6628_v31  ;;  %v1706_v49 = vsel %vm12003_vm14, %v6613_v14, %v6617_v18  ;;  %v1707_v22 = vsel %vm12003_vm14, %v6617_v18, %v6618_v41 }
 0x5e2   : > { %12051 = vst [vmem:[#allocation26_spill] sm:$0xff] %v8844_v29  ;;  %v1948_v17 = vsel %vm12001_vm1, %v1916_v33, 0.0  ;;  %v1949_v35 = vsel %vm12002_vm15, %v1917_v51, 0.0  ;;  %v1738_v52 = vsel %vm12001_vm1, %v1706_v49, 0.0  ;;  %v1739_v4 = vsel %vm12002_vm15, %v1707_v22, 0.0 }
 0x5e3   : > { %v8858_v9 = vpack.c.bf16 %v1949_v35, %v1948_v17  ;;  %v8866_v12 = vpack.c.bf16 %v1739_v4, %v1738_v52  ;;  %v2443_v49 = vunpack.c.h.b16 %v8840_v53  ;;  %v2322_v31 = vunpack.c.h.b16 %v8856_v10 }
 0x5e4   : > { %2292 = vrot.lane.b32.xlu0 %v8838_v1, %s11992_s26  ;;  %6775 = vrot.lane.b32.xlu1 %v8770_v63, %s11974_s18  ;;  %v8886_v51 = vpack.c.b16 %v2257_v26, %v2254_v42  ;;  %v6653_v35 = vunpack.i.h.bf16 %v6651_v40  ;;  %v6638_v40 = vunpack.i.h.bf16 %v8796_v25 }
 0x5e5   : > { %6770 = vrot.lane.b32.xlu2 %v8766_v50, %s11974_s18  ;;  %v2445_v34 = vunpack.c.h.b16 %v8858_v9  ;;  %v2324_v54 = vunpack.c.h.b16 %v8866_v12 }
 0x5e6   : > { %v8872_v14 = vpop.permute.xlu0 %2274  ;;  %v8874_v19 = vpop.permute.xlu1 %2272 }
 0x5e7   : > { %v8879_v41 = vpop.permute.xlu2 %6665  ;;  %v8881_v18 = vpack.c.b16 %v2445_v34, %v2443_v49  ;;  %v8884_v33 = vpack.c.b16 %v2324_v54, %v2322_v31  ;;  %v1816_v49 = vsel %vm12000_vm12, %v6652_v27, %v6653_v35 }
 0x5e9   : > { %12052 = vst [vmem:[#allocation27_spill] sm:$0xff] %v8881_v18 }
 0x5ea   : > { %12053 = vst [vmem:[#allocation28_spill] sm:$0xff] %v8884_v33  ;;  %v6637_v33 = vunpack.i.l.bf16 %v8796_v25 }
 0x5ec   : > { %6780 = vrot.lane.b32.xlu0 %v8582_v56, %s11974_s18  ;;  %2290 = vrot.lane.b32.xlu1 %v8886_v51, %s11992_s26 }
 0x5ed   : > { %6785 = vrot.lane.b32.xlu2 %v8626_v44, %s11974_s18 }
 0x5ee   : > { %v6641_v37 = vpop.permute.xlu0 %6640  ;;  %v8894_v22 = vpop.permute.xlu1 %2516 }
 0x5ef   : > { %12054 = vst [vmem:[#allocation29_spill] sm:$0xff] %v8894_v22  ;;  %v8896_v17 = vpop.permute.xlu2 %2280 }
 0x5f4   : > { %2276 = vrot.lane.b32.xlu0 %v8514_v23, %s11992_s26  ;;  %6790 = vrot.lane.b32.xlu1 %v8630_v28, %s11974_s18 }
 0x5f5   : > { %6795 = vrot.lane.b32.xlu2 %v8506_v61, %s11974_s18 }
 0x5f6   : > { %v6646_v52 = vpop.permute.xlu0 %6645  ;;  %v6631_v4 = vpop.permute.xlu1 %6630 }
 0x5f7   : > { %v6648_v34 = vunpack.i.h.bf16 %v6646_v52  ;;  %v6647_v42 = vunpack.i.l.bf16 %v6646_v52  ;;  %v8905_v31 = vpop.permute.xlu2 %2520  ;;  %v6633_v54 = vunpack.i.h.bf16 %v6631_v4  ;;  %v6632_v26 = vunpack.i.l.bf16 %v6631_v4 }
 0x5f8   : > { %12055 = vst [vmem:[#allocation30_spill] sm:$0xff] %v8905_v31  ;;  %v1848_v4 = vsel %vm1578_vm11, %v1816_v49, 0.0 }
 0x5f9   : > { %v1813_v29 = vsel %vm12000_vm12, %v6632_v26, %v6633_v54  ;;  %v1814_v18 = vsel %vm12000_vm12, %v6633_v54, %v6647_v42  ;;  %v1815_v38 = vsel %vm12000_vm12, %v6648_v34, %v6652_v27  ;;  %v6642_v27 = vunpack.i.l.bf16 %v6641_v37 }
 0x5fa   : > { %v1845_v48 = vsel %vm1577_vm10, %v1813_v29, 0.0  ;;  %v1846_v35 = vsel %vm1578_vm11, %v1814_v18, 0.0  ;;  %v1847_v52 = vsel %vm1577_vm10, %v1815_v38, 0.0  ;;  %v6643_v18 = vunpack.i.h.bf16 %v6641_v37 }
 0x5fb   : > { %v8920_v60 = vpack.c.bf16 %v1846_v35, %v1845_v48  ;;  %v8922_v25 = vpack.c.bf16 %v1848_v4, %v1847_v52  ;;  %v1708_v34 = vsel %vm12003_vm14, %v6637_v33, %v6638_v40 }
 0x5fc   : > { %6805 = vrot.lane.b32.xlu0 %v8557_v13, %s11974_s18  ;;  %6800 = vrot.lane.b32.xlu1 %v8560_v16, %s11974_s18  ;;  %v1740_v43 = vsel %vm12001_vm1, %v1708_v34, 0.0 }
 0x5fd   : > { %6810 = vrot.lane.b32.xlu2 %v8746_v46, %s11976_s15  ;;  %v2366_v29 = vunpack.c.h.b16 %v8920_v60  ;;  %v2368_v38 = vunpack.c.h.b16 %v8922_v25  ;;  %v6667_v46 = vunpack.i.l.bf16 %v8879_v41 }
 0x5fe   : > { %v6661_v48 = vpop.permute.xlu0 %6660  ;;  %v6656_v49 = vpop.permute.xlu1 %6655 }
 0x5ff   : > { %v6663_v42 = vunpack.i.h.bf16 %v6661_v48  ;;  %v6662_v54 = vunpack.i.l.bf16 %v6661_v48  ;;  %v8933_v26 = vpop.permute.xlu2 %6695  ;;  %v6658_v35 = vunpack.i.h.bf16 %v6656_v49  ;;  %v6657_v52 = vunpack.i.l.bf16 %v6656_v49 }
 0x600   : > { %v8935_v4 = vpack.c.b16 %v2368_v38, %v2366_v29  ;;  %v1918_v38 = vsel %vm11999_vm13, %v6642_v27, %v6643_v18 }
 0x601   : > { %v1709_v15 = vsel %vm12003_vm14, %v6638_v40, %v6657_v52  ;;  %v1710_v31 = vsel %vm12003_vm14, %v6658_v35, %v6662_v54  ;;  %v1711_v37 = vsel %vm12003_vm14, %v6662_v54, %v6663_v42  ;;  %v1919_v40 = vsel %vm11999_vm13, %v6643_v18, %v6667_v46 }
 0x602   : > { %12056 = vst [vmem:[#allocation31_spill] sm:$0xff] %v8935_v4  ;;  %v1741_v33 = vsel %vm12002_vm15, %v1709_v15, 0.0  ;;  %v1742_v48 = vsel %vm12001_vm1, %v1710_v31, 0.0  ;;  %v1743_v29 = vsel %vm12002_vm15, %v1711_v37, 0.0  ;;  %v1951_v34 = vsel %vm12002_vm15, %v1919_v40, 0.0 }
 0x603   : > { %v8951_v49 = vpack.c.bf16 %v1741_v33, %v1740_v43  ;;  %v8953_v35 = vpack.c.bf16 %v1743_v29, %v1742_v48  ;;  %v1950_v43 = vsel %vm12001_vm1, %v1918_v38, 0.0 }
 0x604   : > { %6820 = vrot.lane.b32.xlu0 %v8770_v63, %s11976_s15  ;;  %6815 = vrot.lane.b32.xlu1 %v8766_v50, %s11976_s15  ;;  %v6668_v63 = vunpack.i.h.bf16 %v8879_v41  ;;  %v8976_v33 = vpack.c.bf16 %v1951_v34, %v1950_v43 }
 0x605   : > { %6830 = vrot.lane.b32.xlu2 %v8494_v32, %s11974_s18  ;;  %v2326_v15 = vunpack.c.h.b16 %v8951_v49  ;;  %v2328_v31 = vunpack.c.h.b16 %v8953_v35 }
 0x606   : > { %v8963_v27 = vpop.permute.xlu0 %2278  ;;  %v6671_v18 = vpop.permute.xlu1 %6670  ;;  %v2447_v41 = vunpack.c.h.b16 %v8976_v33 }
 0x607   : > { %v8970_v42 = vpop.permute.xlu2 %6705  ;;  %v6673_v50 = vunpack.i.h.bf16 %v6671_v18  ;;  %v6672_v54 = vunpack.i.l.bf16 %v6671_v18  ;;  %v8972_v52 = vpack.c.b16 %v2328_v31, %v2326_v15 }
 0x609   : > { %12057 = vst [vmem:[#allocation32_spill] sm:$0xff] %v8972_v52  ;;  %v1920_v46 = vsel %vm11999_vm13, %v6668_v63, %v6672_v54  ;;  %v1921_v37 = vsel %vm11999_vm13, %v6672_v54, %v6673_v50  ;;  %v6698_v50 = vunpack.i.h.bf16 %v8933_v26  ;;  %v6697_v54 = vunpack.i.l.bf16 %v8933_v26 }
 0x60a   : > { %v1952_v48 = vsel %vm12001_vm1, %v1920_v46, 0.0  ;;  %v1953_v29 = vsel %vm12002_vm15, %v1921_v37, 0.0 }
 0x60b   : > { %v8982_v38 = vpack.c.bf16 %v1953_v29, %v1952_v48 }
 0x60c   : > { %6825 = vrot.lane.b32.xlu0 %v8496_v2, %s11974_s18  ;;  %6835 = vrot.lane.b32.xlu1 %v8475_v36, %s11974_s18  ;;  %s11826_s18 = scalar_lea.vmem [#allocation7], %s12344_s27 }
 0x60d   : > { %6845 = vrot.lane.b32.xlu2 %v8626_v44, %s11976_s15  ;;  %v2449_v40 = vunpack.c.h.b16 %v8982_v38 }
 0x60e   : > { %v8992_v15 = vpop.permute.xlu0 %2282  ;;  %v8994_v31 = vpop.permute.xlu1 %2522 }
 0x60f   : > { %12058 = vst [vmem:[#allocation33_spill] sm:$0xff] %v8992_v15  ;;  %v6711_v18 = vpop.permute.xlu2 %6710  ;;  %v8996_v43 = vpack.c.b16 %v2449_v40, %v2447_v41 }
 0x610   : > { %12059 = vst [vmem:[#allocation34_spill] sm:$0xff] %v8994_v31  ;;  %v6712_v40 = vunpack.i.l.bf16 %v6711_v18 }
 0x611   : > { %12060 = vst [vmem:[#allocation35_spill] sm:$0xff] %v8996_v43 }
 0x614   : > { %6840 = vrot.lane.b32.xlu0 %v8582_v56, %s11976_s15  ;;  %6850 = vrot.lane.b32.xlu1 %v8630_v28, %s11976_s15  ;;  %v1820_v56 = vsel %vm12000_vm12, %v6697_v54, %v6698_v50 }
 0x615   : > { %2532 = vrot.lane.b32.xlu2 %v8886_v51, %s11978_s20  ;;  %v1852_v4 = vsel %vm1578_vm11, %v1820_v56, 0.0 }
 0x616   : > { %v6686_v44 = vpop.permute.xlu0 %6685  ;;  %v6676_v34 = vpop.permute.xlu1 %6675 }
 0x617   : > { %v9004_v63 = vpop.permute.xlu2 %2284  ;;  %v6678_v46 = vunpack.i.h.bf16 %v6676_v34  ;;  %v6677_v37 = vunpack.i.l.bf16 %v6676_v34  ;;  %v6688_v48 = vunpack.i.h.bf16 %v6686_v44  ;;  %v6687_v29 = vunpack.i.l.bf16 %v6686_v44 }
 0x619   : > { %v1817_v26 = vsel %vm12000_vm12, %v6677_v37, %v6678_v46  ;;  %v1922_v43 = vsel %vm11999_vm13, %v6687_v29, %v6688_v48  ;;  %v1923_v31 = vsel %vm11999_vm13, %v6688_v48, %v6712_v40 }
 0x61a   : > { %v1849_v50 = vsel %vm1577_vm10, %v1817_v26, 0.0 }
 0x61c   : > { %2294 = vrot.lane.b32.xlu0 %v8686_v30, %s11992_s26  ;;  %2534 = vrot.lane.b32.xlu1 %v8838_v1, %s11978_s20  ;;  %s12260_s26 = sld [smem:[#allocation45_spill]] }
 0x61d   : > { %2407 = vrot.lane.b32.xlu2 %v8732_v20, %s11972_s19 }
 0x61e   : > { %v6691_v28 = vpop.permute.xlu0 %6690  ;;  %v6681_v41 = vpop.permute.xlu1 %6680 }
 0x61f   : > { %v6693_v34 = vunpack.i.h.bf16 %v6691_v28  ;;  %v6692_v52 = vunpack.i.l.bf16 %v6691_v28  ;;  %v9016_v44 = vpop.permute.xlu2 %2526  ;;  %v6683_v37 = vunpack.i.h.bf16 %v6681_v41  ;;  %v6682_v22 = vunpack.i.l.bf16 %v6681_v41 }
 0x620   : > { %12061 = vst [vmem:[#allocation36_spill] sm:$0xff] %v9016_v44 }
 0x621   : > { %v1818_v15 = vsel %vm12000_vm12, %v6678_v46, %v6692_v52  ;;  %v1819_v20 = vsel %vm12000_vm12, %v6693_v34, %v6697_v54  ;;  %v6708_v52 = vunpack.i.h.bf16 %v8970_v42  ;;  %v6707_v54 = vunpack.i.l.bf16 %v8970_v42 }
 0x622   : > { %v1850_v28 = vsel %vm1578_vm11, %v1818_v15, 0.0  ;;  %v1851_v44 = vsel %vm1577_vm10, %v1819_v20, 0.0  ;;  %v1954_v15 = vsel %vm12001_vm1, %v1922_v43, 0.0  ;;  %v6713_v42 = vunpack.i.h.bf16 %v6711_v18 }
 0x623   : > { %v9030_v56 = vpack.c.bf16 %v1850_v28, %v1849_v50  ;;  %v9032_v29 = vpack.c.bf16 %v1852_v4, %v1851_v44  ;;  %v1955_v4 = vsel %vm12002_vm15, %v1923_v31, 0.0  ;;  %v1715_v43 = vsel %vm12003_vm14, %v6707_v54, %v6708_v52 }
 0x624   : > { %2405 = vrot.lane.b32.xlu0 %v8734_v39, %s11972_s19  ;;  %6855 = vrot.lane.b32.xlu1 %v8506_v61, %s11976_s15  ;;  %v1712_v39 = vsel %vm12003_vm14, %v6682_v22, %v6683_v37  ;;  %v9051_v20 = vpack.c.bf16 %v1955_v4, %v1954_v15 }
 0x625   : > { %6865 = vrot.lane.b32.xlu2 %v8557_v13, %s11976_s15  ;;  %v2370_v46 = vunpack.c.h.b16 %v9030_v56  ;;  %v2372_v48 = vunpack.c.h.b16 %v9032_v29  ;;  %v1744_v15 = vsel %vm12001_vm1, %v1712_v39, 0.0 }
 0x626   : > { %v6701_v41 = vpop.permute.xlu0 %6700  ;;  %v6716_v26 = vpop.permute.xlu1 %6715 }
 0x627   : > { %v6703_v40 = vunpack.i.h.bf16 %v6701_v41  ;;  %v6702_v61 = vunpack.i.l.bf16 %v6701_v41  ;;  %v9049_v34 = vpop.permute.xlu2 %6730  ;;  %v6718_v13 = vunpack.i.h.bf16 %v6716_v26  ;;  %v6717_v44 = vunpack.i.l.bf16 %v6716_v26 }
 0x628   : > { %v9054_v31 = vpack.c.b16 %v2372_v48, %v2370_v46 }
 0x629   : > { %v1924_v50 = vsel %vm11999_vm13, %v6713_v42, %v6717_v44  ;;  %v1925_v18 = vsel %vm11999_vm13, %v6717_v44, %v6718_v13  ;;  %v1713_v28 = vsel %vm12003_vm14, %v6683_v37, %v6702_v61  ;;  %v1714_v22 = vsel %vm12003_vm14, %v6703_v40, %v6707_v54 }
 0x62a   : > { %12062 = vst [vmem:[#allocation37_spill] sm:$0xff] %v9054_v31  ;;  %v1956_v41 = vsel %vm12001_vm1, %v1924_v50, 0.0  ;;  %v1957_v26 = vsel %vm12002_vm15, %v1925_v18, 0.0  ;;  %v1745_v52 = vsel %vm12002_vm15, %v1713_v28, 0.0  ;;  %v1746_v46 = vsel %vm12001_vm1, %v1714_v22, 0.0 }
 0x62b   : > { %v9068_v4 = vpack.c.bf16 %v1957_v26, %v1956_v41  ;;  %v1747_v37 = vsel %vm12002_vm15, %v1715_v43, 0.0  ;;  %v9074_v54 = vpack.c.bf16 %v1745_v52, %v1744_v15  ;;  %v2451_v42 = vunpack.c.h.b16 %v9051_v20 }
 0x62c   : > { %6860 = vrot.lane.b32.xlu0 %v8560_v16, %s11976_s15  ;;  %2399 = vrot.lane.b32.xlu1 %v8662_v6, %s11972_s19  ;;  %v9080_v48 = vpack.c.bf16 %v1747_v37, %v1746_v46  ;;  %v6732_v37 = vunpack.i.l.bf16 %v9049_v34 }
 0x62d   : > { %2411 = vrot.lane.b32.xlu2 %v8886_v51, %s11972_s19  ;;  %v2453_v39 = vunpack.c.h.b16 %v9068_v4  ;;  %v2330_v40 = vunpack.c.h.b16 %v9074_v54 }
 0x62e   : > { %v9087_v61 = vpop.permute.xlu0 %2288  ;;  %v9089_v13 = vpop.permute.xlu1 %2286  ;;  %v2332_v16 = vunpack.c.h.b16 %v9080_v48 }
 0x62f   : > { %v6746_v44 = vpop.permute.xlu2 %6745  ;;  %v9092_v43 = vpack.c.b16 %v2453_v39, %v2451_v42 }
 0x630   : > { %v9094_v6 = vpack.c.b16 %v2332_v16, %v2330_v40  ;;  %v6748_v22 = vunpack.i.h.bf16 %v6746_v44 }
 0x631   : > { %12063 = vst [vmem:[#allocation38_spill] sm:$0xff] %v9092_v43 }
 0x632   : > { %12064 = vst [vmem:[#allocation39_spill] sm:$0xff] %v9094_v6 }
 0x634   : > { %2401 = vrot.lane.b32.xlu0 %v8664_v57, %s11972_s19  ;;  %2413 = vrot.lane.b32.xlu1 %v8838_v1, %s11972_s19 }
 0x635   : > { %6870 = vrot.lane.b32.xlu2 %v8496_v2, %s11976_s15  ;;  %v6747_v2 = vunpack.i.l.bf16 %v6746_v44 }
 0x636   : > { %v6726_v51 = vpop.permute.xlu0 %6725  ;;  %v9102_v50 = vpop.permute.xlu1 %2528 }
 0x637   : > { %v6751_v18 = vpop.permute.xlu2 %6750  ;;  %v6728_v15 = vunpack.i.h.bf16 %v6726_v51  ;;  %v6727_v52 = vunpack.i.l.bf16 %v6726_v51 }
 0x638   : > { %v6752_v46 = vunpack.i.l.bf16 %v6751_v18  ;;  %v6753_v42 = vunpack.i.h.bf16 %v6751_v18 }
 0x63a   : > { %v1717_v31 = vsel %vm12003_vm14, %v6728_v15, %v6752_v46 }
 0x63b   : > { %v1749_v46 = vsel %vm12002_vm15, %v1717_v31, 0.0  ;;  %v2369_v31 = vunpack.c.l.b16 %v9030_v56 }
 0x63c   : > { %6880 = vrot.lane.b32.xlu0 %v8475_v36, %s11976_s15  ;;  %6875 = vrot.lane.b32.xlu1 %v8494_v32, %s11976_s15  ;;  %v1824_v32 = vsel %vm12000_vm12, %v6747_v2, %v6748_v22  ;;  %v1716_v22 = vsel %vm12003_vm14, %v6727_v52, %v6728_v15 }
 0x63d   : > { %2393 = vrot.lane.b32.xlu2 %v8540_v3, %s11972_s19  ;;  %v6733_v3 = vunpack.i.h.bf16 %v9049_v34 }
 0x63e   : > { %v9110_v57 = vpop.permute.xlu0 %6735  ;;  %v6721_v28 = vpop.permute.xlu1 %6720 }
 0x63f   : > { %v9112_v1 = vpop.permute.xlu2 %6770  ;;  %v6723_v41 = vunpack.i.h.bf16 %v6721_v28  ;;  %v6722_v26 = vunpack.i.l.bf16 %v6721_v28 }
 0x641   : > { %v1821_v36 = vsel %vm12000_vm12, %v6722_v26, %v6723_v41  ;;  %v1856_v26 = vsel %vm1578_vm11, %v1824_v32, 0.0 }
 0x642   : > { %v1853_v6 = vsel %vm1577_vm10, %v1821_v36, 0.0 }
 0x644   : > { %2536 = vrot.lane.b32.xlu0 %v8686_v30, %s11978_s20  ;;  %2395 = vrot.lane.b32.xlu1 %v8538_v11, %s11972_s19 }
 0x645   : > { %2530 = vrot.lane.b32.xlu2 %v8730_v58, %s11978_s20 }
 0x646   : > { %v6741_v39 = vpop.permute.xlu0 %6740  ;;  %v6756_v40 = vpop.permute.xlu1 %6755 }
 0x647   : > { %v6743_v16 = vunpack.i.h.bf16 %v6741_v39  ;;  %v6742_v44 = vunpack.i.l.bf16 %v6741_v39  ;;  %v9124_v51 = vpop.permute.xlu2 %6785  ;;  %v6758_v28 = vunpack.i.h.bf16 %v6756_v40  ;;  %v6757_v11 = vunpack.i.l.bf16 %v6756_v40 }
 0x649   : > { %v1822_v34 = vsel %vm12000_vm12, %v6723_v41, %v6742_v44  ;;  %v1823_v18 = vsel %vm12000_vm12, %v6743_v16, %v6747_v2  ;;  %v1718_v39 = vsel %vm12003_vm14, %v6753_v42, %v6757_v11  ;;  %v1719_v43 = vsel %vm12003_vm14, %v6757_v11, %v6758_v28 }
 0x64a   : > { %v1854_v40 = vsel %vm1578_vm11, %v1822_v34, 0.0  ;;  %v1855_v36 = vsel %vm1577_vm10, %v1823_v18, 0.0  ;;  %v1750_v32 = vsel %vm12001_vm1, %v1718_v39, 0.0  ;;  %v1751_v15 = vsel %vm12002_vm15, %v1719_v43, 0.0 }
 0x64b   : > { %v1863_v52 = vpack.c.bf16 %v1854_v40, %v1853_v6  ;;  %v1864_v41 = vpack.c.bf16 %v1856_v26, %v1855_v36  ;;  %v1748_v2 = vsel %vm12001_vm1, %v1716_v22, 0.0  ;;  %v1926_v42 = vsel %vm11999_vm13, %v6732_v37, %v6733_v3 }
 0x64c   : > { %2524 = vrot.lane.b32.xlu0 %v8696_v62, %s11978_s20  ;;  %2415 = vrot.lane.b32.xlu1 %v8686_v30, %s11972_s19  ;;  %v9153_v16 = vpack.c.bf16 %v1751_v15, %v1750_v32  ;;  %v9158_v22 = vpack.c.bf16 %v1749_v46, %v1748_v2  ;;  %v2371_v40 = vunpack.c.l.b16 %v9032_v29 }
 0x64d   : > { %2409 = vrot.lane.b32.xlu2 %v8730_v58, %s11972_s19  ;;  %v2373_v43 = vunpack.c.l.b16 %v1863_v52  ;;  %v2374_v6 = vunpack.c.h.b16 %v1863_v52  ;;  %v2375_v44 = vunpack.c.l.b16 %v1864_v41  ;;  %v2376_v28 = vunpack.c.h.b16 %v1864_v41 }
 0x64e   : > { %v6766_v11 = vpop.permute.xlu0 %6765  ;;  %v6761_v26 = vpop.permute.xlu1 %6760  ;;  %v1958_v58 = vsel %vm12001_vm1, %v1926_v42, 0.0  ;;  %v2336_v36 = vunpack.c.h.b16 %v9153_v16  ;;  %v2334_v42 = vunpack.c.h.b16 %v9158_v22 }
 0x64f   : > { %v6768_v34 = vunpack.i.h.bf16 %v6766_v11  ;;  %v6767_v18 = vunpack.i.l.bf16 %v6766_v11  ;;  %v6763_v30 = vunpack.i.h.bf16 %v6761_v26  ;;  %v6762_v39 = vunpack.i.l.bf16 %v6761_v26  ;;  %v9164_v32 = vpop.permute.xlu2 %6795 }
 0x650   : > { %v2383_v37 = vpack.c.b16 %v2375_v44, %v2373_v43  ;;  %v9169_v41 = vpack.c.b16 %v2376_v28, %v2374_v6  ;;  %v2381_v6 = vpack.c.b16 %v2371_v40, %v2369_v31  ;;  %v2365_v44 = vunpack.c.l.b16 %v8920_v60 }
 0x651   : > { %v1927_v15 = vsel %vm11999_vm13, %v6733_v3, %v6762_v39  ;;  %v1928_v56 = vsel %vm11999_vm13, %v6763_v30, %v6767_v18  ;;  %v1929_v52 = vsel %vm11999_vm13, %v6767_v18, %v6768_v34  ;;  %v2367_v28 = vunpack.c.l.b16 %v8922_v25 }
 0x652   : > { %2776 = vmatpush.bf16.msrb.mxu2 %v2383_v37  ;;  %v1959_v2 = vsel %vm12002_vm15, %v1927_v15, 0.0  ;;  %v1960_v29 = vsel %vm12001_vm1, %v1928_v56, 0.0  ;;  %v1961_v46 = vsel %vm12002_vm15, %v1929_v52, 0.0  ;;  %v9184_v11 = vpack.c.b16 %v2336_v36, %v2334_v42 }
 0x653   : > { %v1968_v43 = vpack.c.bf16 %v1959_v2, %v1958_v58  ;;  %v1969_v3 = vpack.c.bf16 %v1961_v46, %v1960_v29  ;;  %v2452_v31 = vunpack.c.l.b16 %v9068_v4  ;;  %v2379_v25 = vpack.c.b16 %v2367_v28, %v2365_v44  ;;  %v1477_v58 = vld [vmem:[%s11951_s7 + $0x38] sm:$0xff]  ;;  %v1475_v4 = vld [vmem:[%s11951_s7 + $0x28] sm:$0xff] }
 0x654   : > { %2403 = vrot.lane.b32.xlu0 %v8696_v62, %s11972_s19  ;;  %2518 = vrot.lane.b32.xlu1 %v8514_v23, %s11978_s20  ;;  %v2363_v40 = vunpack.c.l.b16 %v8816_v5  ;;  %v2450_v36 = vunpack.c.l.b16 %v9051_v20  ;;  %v2361_v15 = vunpack.c.l.b16 %v8813_v21  ;;  %v2448_v52 = vunpack.c.l.b16 %v8982_v38 }
 0x655   : > { %2397 = vrot.lane.b32.xlu2 %v8514_v23, %s11972_s19  ;;  %v2454_v26 = vunpack.c.l.b16 %v1968_v43  ;;  %v2455_v34 = vunpack.c.h.b16 %v1968_v43  ;;  %v2456_v18 = vunpack.c.l.b16 %v1969_v3  ;;  %v2457_v30 = vunpack.c.h.b16 %v1969_v3  ;;  %v1476_v23 = vld [vmem:[%s11951_s7 + $0x30] sm:$0xff]  ;;  %s12163_s19 = smov 127  }
 0x656   : > { %2777 = vmatpush.bf16.msrb.mxu2 %v2381_v6  ;;  %v9188_v39 = vpop.permute.xlu0 %2292  ;;  %v9190_v62 = vpop.permute.xlu1 %6775  ;;  %v2462_v5 = vpack.c.b16 %v2452_v31, %v2450_v36  ;;  %v2377_v2 = vpack.c.b16 %v2363_v40, %v2361_v15  ;;  %v2335_v29 = vunpack.c.l.b16 %v9153_v16  ;;  %v2446_v20 = vunpack.c.l.b16 %v8976_v33  ;;  %v1473_v33 = vld [vmem:[%s11951_s7 + $0x18] sm:$0xff] }
 0x657   : > { %v2464_v37 = vpack.c.b16 %v2456_v18, %v2454_v26  ;;  %v9193_v60 = vpack.c.b16 %v2457_v30, %v2455_v34  ;;  %v9207_v56 = vpop.permute.xlu2 %6810  ;;  %v2333_v21 = vunpack.c.l.b16 %v9158_v22  ;;  %v2444_v3 = vunpack.c.l.b16 %v8858_v9  ;;  %v1474_v22 = vld [vmem:[%s11951_s7 + $0x20] sm:$0xff]  ;;  %v1472_v9 = vld [vmem:[%s11951_s7 + $0x10] sm:$0xff] }
 0x658   : > { %v2460_v38 = vpack.c.b16 %v2448_v52, %v2446_v20  ;;  %v2329_v16 = vunpack.c.l.b16 %v9074_v54  ;;  %v2331_v44 = vunpack.c.l.b16 %v9080_v48  ;;  %v2442_v28 = vunpack.c.l.b16 %v8840_v53 }
 0x659   : > { %2805 = vmatpush.bf16.msrb.mxu1 %v2464_v37  ;;  %v2343_v6 = vpack.c.b16 %v2335_v29, %v2333_v21  ;;  %v2301_v54 = vsel %vm11998_vm3, %v9004_v63, %v9089_v13  ;;  %v2325_v34 = vunpack.c.l.b16 %v8951_v49  ;;  %v2327_v18 = vunpack.c.l.b16 %v8953_v35  ;;  %v1470_v49 = vld [vmem:[%s11951_s7] sm:$0xff]  ;;  %v1471_v35 = vld [vmem:[%s11951_s7 + $0x8] sm:$0xff] }
 0x65a   : > { %2778 = vmatpush.bf16.msrb.mxu2 %v2379_v25  ;;  %v2458_v26 = vpack.c.b16 %v2444_v3, %v2442_v28  ;;  %v2341_v48 = vpack.c.b16 %v2331_v44, %v2329_v16  ;;  %v2299_v31 = vsel %vm11998_vm3, %v8963_v27, %v8896_v17  ;;  %v2323_v25 = vunpack.c.l.b16 %v8866_v12  ;;  %v6144_v12 = vld [vmem:[%s11950_s6 + $0x14] sm:$0xf0]  ;;  %v6418_v16 = vld [vmem:[%s11950_s6 + $0x2c] sm:$0xf]  ;;  %v6164_v28 = vld [vmem:[%s11950_s6 + $0x3c] sm:$0xf0] }
 0x65b   : > { %v2339_v63 = vpack.c.b16 %v2327_v18, %v2325_v34  ;;  %v2321_v40 = vunpack.c.l.b16 %v8856_v10  ;;  %v2297_v27 = vsel %vm11998_vm3, %v8874_v19, %v8872_v14  ;;  %v6812_v52 = vunpack.i.l.bf16 %v9207_v56 }
 0x65c   : > { %2627 = vperm.xlu0 %6542, %v1476_v23   ;;  %2632 = vperm.xlu1 %6541, %v1477_v58   ;;  %v6413_v23 = vld [vmem:[%s11950_s6 + $0x4] sm:$0xf] }
 0x65d   : > { %2622 = vperm.xlu2 %6543, %v1475_v4   ;;  %2806 = vmatpush.bf16.msrb.mxu1 %v2462_v5  ;;  %v2337_v58 = vpack.c.b16 %v2323_v25, %v2321_v40  ;;  %v9261_v36 = vor.u32 %v6413_v23, %v6144_v12  ;;  %v6813_v5 = vunpack.i.h.bf16 %v9207_v56  ;;  %v6415_v56 = vld [vmem:[%s11950_s6 + $0x10] sm:$0xf0]  ;;  %v6772_v40 = vunpack.i.l.bf16 %v9112_v1 }
 0x65e   : > { %2779 = vmatpush.bf16.msrb.mxu2 %v2377_v2  ;;  %v9212_v46 = vpop.permute.xlu0 %6780  ;;  %v2291_v42 = vpop.permute.xlu1 %2290  ;;  %v6773_v12 = vunpack.i.h.bf16 %v9112_v1 }
 0x65f   : > { %v2303_v43 = vsel %vm11998_vm3, %v2291_v42, %v9188_v39  ;;  %v9235_v30 = vpop.permute.xlu2 %6830  ;;  %v2136_v19 = vsel %vm11991_vm4, %v6812_v52, %v6813_v5 }
 0x660   : > { %2747 = vmatpush.bf16.msrb.mxu0 %v2303_v43  ;;  %v2168_v44 = vsel %vm12001_vm1, %v2136_v19, 0.0 }
 0x661   : > { %2807 = vmatpush.bf16.msrb.mxu1 %v2460_v38 }
 0x662   : > { %2780 = vmatpush.bf16.msrb.mxu2 %v2343_v6 }
 0x664   : > { %2612 = vperm.xlu0 %6542, %v1473_v33   ;;  %2617 = vperm.xlu1 %6541, %v1474_v22  }
 0x665   : > { %2607 = vperm.xlu2 %6543, %v1472_v9   ;;  %2748 = vmatpush.bf16.msrb.mxu0 %v2301_v54 }
 0x666   : > { %2781 = vmatpush.bf16.msrb.mxu2 %v2341_v48  ;;  %2808 = vmatpush.bf16.msrb.mxu1 %v2458_v26  ;;  %v9237_v53 = vpop.permute.xlu0 %2276  ;;  %v9239_v37 = vpop.permute.xlu1 %6790  ;;  %v9308_v48 = vor.u32 %v6418_v16, %v6164_v28 }
 0x667   : > { %v9267_v15 = vpop.permute.xlu2 %6845  ;;  %v6793_v28 = vunpack.i.h.bf16 %v9239_v37 }
 0x669   : > { %2749 = vmatpush.bf16.msrb.mxu0 %v2299_v31 }
 0x66a   : > { %2782 = vmatpush.bf16.msrb.mxu2 %v2339_v63 }
 0x66c   : > { %2597 = vperm.xlu0 %6542, %v1470_v49   ;;  %2602 = vperm.xlu1 %6541, %v1471_v35   ;;  %v6738_v49 = vunpack.i.h.bf16 %v9110_v57  ;;  %v6737_v35 = vunpack.i.l.bf16 %v9110_v57 }
 0x66d   : > { %2750 = vmatpush.bf16.msrb.mxu0 %v2297_v27  ;;  %v6848_v27 = vunpack.i.h.bf16 %v9267_v15 }
 0x66e   : > { %2783 = vmatpush.bf16.msrb.mxu2 %v2337_v58  ;;  %v9263_v10 = vpop.permute.xlu0 %6805  ;;  %v9265_v4 = vpop.permute.xlu1 %6800  ;;  %v2031_v23 = vsel %vm11997_vm5, %v6737_v35, %v6738_v49  ;;  %v6847_v58 = vunpack.i.l.bf16 %v9267_v15  ;;  %v6783_v35 = vunpack.i.h.bf16 %v9212_v46 }
 0x66f   : > { %v9275_v38 = vpop.permute.xlu2 %2532 }
 0x671   : > { %2751 = vmatpush.bf16.msrb.mxu0 %v8692_v45  ;;  %2784 = vmatmul.bf16.vlgmr.msrb.gmra.mxu2 %v9261_v36 }
 0x675   : > { %2752 = vmatpush.bf16.msrb.mxu0 %v8688_v59  ;;  %v6142_v59 = vld [vmem:[%s11950_s6] sm:$0xf] }
 0x676   : > { %v6821_v2 = vpop.permute.xlu0 %6820  ;;  %v6816_v29 = vpop.permute.xlu1 %6815  ;;  %v9305_v54 = vor.u32 %v6415_v56, %v6142_v59  ;;  %v6420_v59 = vld [vmem:[%s11950_s6 + $0x38] sm:$0xf0]  ;;  %v6184_v56 = vld [vmem:[%s11950_s6 + $0x64] sm:$0xf0] }
 0x677   : > { %v6823_v20 = vunpack.i.h.bf16 %v6821_v2  ;;  %v6822_v42 = vunpack.i.l.bf16 %v6821_v2  ;;  %v6818_v21 = vunpack.i.h.bf16 %v6816_v29  ;;  %v6817_v43 = vunpack.i.l.bf16 %v6816_v29 }
 0x679   : > { %v2139_v45 = vsel %vm11991_vm4, %v6822_v42, %v6823_v20  ;;  %v2138_v3 = vsel %vm11991_vm4, %v6818_v21, %v6822_v42  ;;  %v2137_v6 = vsel %vm11991_vm4, %v6813_v5, %v6817_v43  ;;  %2753 = vmatpush.bf16.msrb.mxu0 %v8641_v47  ;;  %v2032_v20 = vsel %vm11997_vm5, %v6738_v49, %v6772_v40 }
 0x67a   : > { %v2171_v33 = vsel %vm12002_vm15, %v2139_v45, 0.0  ;;  %v2170_v47 = vsel %vm12001_vm1, %v2138_v3, 0.0  ;;  %v2169_v22 = vsel %vm12002_vm15, %v2137_v6, 0.0  ;;  %v6778_v42 = vunpack.i.h.bf16 %v9190_v62  ;;  %v6162_v6 = vld [vmem:[%s11950_s6 + $0x28] sm:$0xf] }
 0x67b   : > { %v9301_v9 = vpack.c.bf16 %v2171_v33, %v2170_v47  ;;  %v9303_v26 = vpack.c.bf16 %v2169_v22, %v2168_v44  ;;  %v6777_v21 = vunpack.i.l.bf16 %v9190_v62  ;;  %v6792_v43 = vunpack.i.l.bf16 %v9239_v37  ;;  %v6423_v62 = vld [vmem:[%s11950_s6 + $0x54] sm:$0xf] }
 0x67c   : > { %v6788_v22 = vunpack.i.h.bf16 %v9124_v51  ;;  %v9364_v40 = vor.u32 %v6420_v59, %v6162_v6  ;;  %v6807_v6 = vunpack.i.l.bf16 %v9263_v10  ;;  %v6803_v59 = vunpack.i.h.bf16 %v9265_v4 }
 0x67d   : > { %2754 = vmatpush.bf16.msrb.mxu0 %v8528_v0  ;;  %v2575_v34 = vunpack.c.l.b16 %v9303_v26  ;;  %v2577_v18 = vunpack.c.l.b16 %v9301_v9  ;;  %v9320_v0 = vpop.permute.xlu2 %2407  ;;  %v2034_v49 = vsel %vm11997_vm5, %v6777_v21, %v6778_v42  ;;  %v2030_v42 = vsel %vm11997_vm5, %v6792_v43, %v6793_v28 }
 0x67e   : > { %v9312_v31 = vpop.permute.xlu0 %6825  ;;  %v9314_v63 = vpop.permute.xlu1 %6835 }
 0x67f   : > { %v2585_v25 = vpack.c.b16 %v2577_v18, %v2575_v34 }
 0x680   : > { %2755 = vmatmul.bf16.vlgmr.msrb.gmra.mxu0 %v9305_v54 }
 0x681   : > { %2789 = vmatmul.bf16.gmra.mxu2 %v9308_v48  ;;  %2867 = vmatpush.bf16.msra.mxu0 %v2585_v25  ;;  %v2033_v25 = vsel %vm11997_vm5, %v6773_v12, %v6777_v21  ;;  %v2029_v12 = vsel %vm11997_vm5, %v6788_v22, %v6792_v43 }
 0x686   : > { %v6841_v5 = vpop.permute.xlu0 %6840  ;;  %v6851_v52 = vpop.permute.xlu1 %6850 }
 0x687   : > { %v6843_v19 = vunpack.i.h.bf16 %v6841_v5  ;;  %v6842_v2 = vunpack.i.l.bf16 %v6841_v5  ;;  %v6853_v57 = vunpack.i.h.bf16 %v6851_v52  ;;  %v6852_v29 = vunpack.i.l.bf16 %v6851_v52 }
 0x688   : > { %v9369_v5 = vor.u32 %v6423_v62, %v6184_v56  ;;  %v2062_v62 = vsel %vm1578_vm11, %v2030_v42, 0.0  ;;  %v12065_v56 = vld [vmem:[#allocation36_spill] sm:$0xff]  ;;  %v6837_v42 = vunpack.i.l.bf16 %v9314_v63 }
 0x689   : > { %v2132_v1 = vsel %vm11991_vm4, %v6842_v2, %v6843_v19  ;;  %v2133_v45 = vsel %vm11991_vm4, %v6843_v19, %v6847_v58  ;;  %v2134_v15 = vsel %vm11991_vm4, %v6848_v27, %v6852_v29  ;;  %v2135_v3 = vsel %vm11991_vm4, %v6852_v29, %v6853_v57  ;;  %v9367_v58 = vpop.permute.xlu2 %6865 }
 0x68a   : > { %v2164_v16 = vsel %vm12001_vm1, %v2132_v1, 0.0  ;;  %v2165_v44 = vsel %vm12002_vm15, %v2133_v45, 0.0  ;;  %v2166_v33 = vsel %vm12001_vm1, %v2134_v15, 0.0  ;;  %v2167_v47 = vsel %vm12002_vm15, %v2135_v3, 0.0 }
 0x68b   : > { %v9357_v34 = vpack.c.bf16 %v2165_v44, %v2164_v16  ;;  %v9359_v18 = vpack.c.bf16 %v2167_v47, %v2166_v33  ;;  %v6782_v27 = vunpack.i.l.bf16 %v9212_v46  ;;  %v6787_v19 = vunpack.i.l.bf16 %v9124_v51  ;;  %v12066_v44 = vld [vmem:[#allocation29_spill] sm:$0xff]  ;;  %v12067_v33 = vld [vmem:[#allocation23_spill] sm:$0xff] }
 0x68c   : > { %v2063_v29 = vsel %vm1577_vm10, %v2031_v23, 0.0  ;;  %v2064_v46 = vsel %vm1578_vm11, %v2032_v20, 0.0  ;;  %v6798_v45 = vunpack.i.h.bf16 %v9164_v32  ;;  %v6797_v15 = vunpack.i.l.bf16 %v9164_v32 }
 0x68d   : > { %v2571_v37 = vunpack.c.l.b16 %v9357_v34  ;;  %v2573_v52 = vunpack.c.l.b16 %v9359_v18  ;;  %v2065_v23 = vsel %vm1577_vm10, %v2033_v25, 0.0  ;;  %v2066_v20 = vsel %vm1578_vm11, %v2034_v49, 0.0  ;;  %v12069_v25 = vld [vmem:[#allocation30_spill] sm:$0xff] }
 0x68e   : > { %v2295_v2 = vpop.permute.xlu0 %2294  ;;  %v9375_v57 = vpop.permute.xlu1 %2534  ;;  %v2028_v43 = vsel %vm11997_vm5, %v6783_v35, %v6787_v19  ;;  %v2061_v32 = vsel %vm1577_vm10, %v2029_v12, 0.0  ;;  %v6808_v3 = vunpack.i.h.bf16 %v9263_v10  ;;  %v2543_v16 = vsel %vm11990_vm6, %v12065_v56, %v9102_v50  ;;  %v6204_v56 = vld [vmem:[%s11950_s6 + $0x8c] sm:$0xf0] }
 0x68f   : > { %v2304_v21 = vsel %vm11998_vm3, %v9188_v39, %v2295_v2  ;;  %v2545_v51 = vsel %vm11990_vm6, %v9275_v38, %v9375_v57  ;;  %v2583_v1 = vpack.c.b16 %v2573_v52, %v2571_v37  ;;  %v2027_v39 = vsel %vm11997_vm5, %v6782_v27, %v6783_v35 }
 0x690   : > { %2760 = vmatmul.bf16.gmra.mxu0 %v9364_v40  ;;  %2834 = vmatpush.bf16.msra.mxu3 %v2545_v51  ;;  %v6802_v38 = vunpack.i.l.bf16 %v9265_v4  ;;  %v2539_v47 = vsel %vm11990_vm6, %v12067_v33, %v12066_v44  ;;  %v9411_v22 = vpack.c.bf16 %v2064_v46, %v2063_v29  ;;  %v2023_v28 = vsel %vm11997_vm5, %v6797_v15, %v6798_v45  ;;  %v12068_v4 = vld [vmem:[#allocation34_spill] sm:$0xff]  ;;  %v12070_v51 = vld [vmem:[#allocation33_spill] sm:$0xff] }
 0x691   : > { %2794 = vmatmul.bf16.gmra.mxu2 %v9369_v5  ;;  %2868 = vmatpush.bf16.msra.mxu0 %v2583_v1  ;;  %v2302_v10 = vsel %vm11998_vm3, %v9089_v13, %v9087_v61  ;;  %v2541_v49 = vsel %vm11990_vm6, %v12069_v25, %v12068_v4  ;;  %v9420_v35 = vpack.c.bf16 %v2066_v20, %v2065_v23  ;;  %v2059_v37 = vsel %vm1577_vm10, %v2027_v39, 0.0 }
 0x692   : > { %2892 = vmatpush.bf16.msra.mxu2 %v2304_v21  ;;  %v2024_v27 = vsel %vm11997_vm5, %v6798_v45, %v6802_v38  ;;  %v2060_v52 = vsel %vm1578_vm11, %v2028_v43, 0.0  ;;  %v9427_v19 = vpack.c.bf16 %v2062_v62, %v2061_v32  ;;  %v2026_v12 = vsel %vm11997_vm5, %v6807_v6, %v6808_v3  ;;  %v9436_v21 = vpop.permute.xlu2 %2411  ;;  %v6425_v38 = vld [vmem:[%s11950_s6 + $0x60] sm:$0xf0]  ;;  %v6428_v62 = vld [vmem:[%s11950_s6 + $0x7c] sm:$0xf] }
 0x693   : > { %v2025_v61 = vsel %vm11997_vm5, %v6803_v59, %v6807_v6  ;;  %v6828_v13 = vunpack.i.h.bf16 %v9312_v31  ;;  %v6827_v2 = vunpack.i.l.bf16 %v9312_v31  ;;  %v2300_v1 = vsel %vm11998_vm3, %v8896_v17, %v12070_v51  ;;  %v6182_v17 = vld [vmem:[%s11950_s6 + $0x50] sm:$0xf] }
 0x694   : > { %2835 = vmatpush.bf16.msra.mxu3 %v2543_v16  ;;  %v2494_v45 = vunpack.c.l.b16 %v9411_v22  ;;  %v2055_v15 = vsel %vm1577_vm10, %v2023_v28, 0.0  ;;  %v6833_v23 = vunpack.i.h.bf16 %v9235_v30  ;;  %v6838_v31 = vunpack.i.h.bf16 %v9314_v63 }
 0x695   : > { %v2496_v20 = vunpack.c.l.b16 %v9420_v35  ;;  %v2056_v39 = vsel %vm1578_vm11, %v2024_v27, 0.0  ;;  %v6832_v43 = vunpack.i.l.bf16 %v9235_v30  ;;  %v9456_v32 = vpack.c.bf16 %v2060_v52, %v2059_v37 }
 0x696   : > { %2893 = vmatpush.bf16.msra.mxu2 %v2302_v10  ;;  %v9433_v29 = vpop.permute.xlu0 %2405  ;;  %v6856_v46 = vpop.permute.xlu1 %6855  ;;  %v2057_v63 = vsel %vm1577_vm10, %v2025_v61, 0.0  ;;  %v2058_v3 = vsel %vm1578_vm11, %v2026_v12, 0.0  ;;  %v2019_v6 = vsel %vm11997_vm5, %v6827_v2, %v6828_v13  ;;  %v6868_v30 = vunpack.i.h.bf16 %v9367_v58 }
 0x697   : > { %v6867_v59 = vunpack.i.l.bf16 %v9367_v58  ;;  %v2492_v16 = vunpack.c.l.b16 %v9427_v19  ;;  %v2020_v33 = vsel %vm11997_vm5, %v6828_v13, %v6832_v43  ;;  %v2021_v28 = vsel %vm11997_vm5, %v6833_v23, %v6837_v42 }
 0x698   : > { %2836 = vmatpush.bf16.msra.mxu3 %v2541_v49  ;;  %v6858_v10 = vunpack.i.h.bf16 %v6856_v46  ;;  %v6857_v25 = vunpack.i.l.bf16 %v6856_v46  ;;  %v2022_v49 = vsel %vm11997_vm5, %v6837_v42, %v6838_v31  ;;  %v9475_v58 = vor.u32 %v6425_v38, %v6182_v17 }
 0x699   : > { %v9477_v27 = vpack.c.bf16 %v2056_v39, %v2055_v15  ;;  %v9479_v37 = vpack.c.bf16 %v2058_v3, %v2057_v63  ;;  %v2298_v52 = vsel %vm11998_vm3, %v8872_v14, %v9237_v53  ;;  %v9484_v12 = vor.u32 %v6428_v62, %v6204_v56  ;;  %v12071_v3 = vld [vmem:[#allocation22_spill] sm:$0xff] }
 0x69a   : > { %2894 = vmatpush.bf16.msra.mxu2 %v2300_v1  ;;  %v2504_v61 = vpack.c.b16 %v2496_v20, %v2494_v45  ;;  %v2490_v13 = vunpack.c.l.b16 %v9456_v32  ;;  %v2131_v2 = vsel %vm11991_vm4, %v6867_v59, %v6868_v30  ;;  %v2051_v42 = vsel %vm1577_vm10, %v2019_v6, 0.0  ;;  %v9502_v39 = vpop.permute.xlu2 %6870 }
 0x69b   : > { %v2052_v51 = vsel %vm1578_vm11, %v2020_v33, 0.0  ;;  %v2053_v14 = vsel %vm1577_vm10, %v2021_v28, 0.0  ;;  %v2128_v53 = vsel %vm11991_vm4, %v6857_v25, %v6858_v10  ;;  %v2054_v15 = vsel %vm1578_vm11, %v2022_v49, 0.0 }
 0x69c   : > { %2837 = vmatpush.bf16.msra.mxu3 %v2539_v47  ;;  %v2502_v23 = vpack.c.b16 %v2492_v16, %v2490_v13  ;;  %v2486_v31 = vunpack.c.l.b16 %v9477_v27  ;;  %v2488_v20 = vunpack.c.l.b16 %v9479_v37  ;;  %v2163_v38 = vsel %vm12002_vm15, %v2131_v2, 0.0 }
 0x69d   : > { %v9509_v63 = vpack.c.bf16 %v2052_v51, %v2051_v42  ;;  %v2160_v6 = vsel %vm12001_vm1, %v2128_v53, 0.0  ;;  %v9518_v56 = vpack.c.bf16 %v2054_v15, %v2053_v14  ;;  %v6414_v42 = vld [vmem:[%s11950_s6 + $0xc] sm:$0xf]  ;;  %v6152_v51 = vld [vmem:[%s11950_s6 + $0x1c] sm:$0xf0]  ;;  %v2576_v14 = vunpack.c.h.b16 %v9303_v26 }
 0x69e   : > { %2895 = vmatpush.bf16.msra.mxu2 %v2298_v52  ;;  %v6861_v46 = vpop.permute.xlu0 %6860  ;;  %v9488_v47 = vpop.permute.xlu1 %2399  ;;  %v2500_v52 = vpack.c.b16 %v2488_v20, %v2486_v31  ;;  %v2578_v53 = vunpack.c.h.b16 %v9301_v9  ;;  %v6872_v15 = vunpack.i.l.bf16 %v9502_v39  ;;  %v2422_v9 = vsel %vm11989_vm7, %v9433_v29, %v9320_v0 }
 0x69f   : > { %v6863_v1 = vunpack.i.h.bf16 %v6861_v46  ;;  %v6862_v45 = vunpack.i.l.bf16 %v6861_v46  ;;  %v2484_v13 = vunpack.c.l.b16 %v9518_v56  ;;  %v9556_v26 = vor.u32 %v6414_v42, %v6152_v51 }
 0x6a0   : > { %2765 = vmatmul.bf16.gmra.mxu0 %v9475_v58  ;;  %2838 = vmatpush.bf16.msra.mxu3 %v2504_v61  ;;  %v2482_v61 = vunpack.c.l.b16 %v9509_v63 }
 0x6a1   : > { %v2129_v43 = vsel %vm11991_vm4, %v6858_v10, %v6862_v45  ;;  %v2130_v17 = vsel %vm11991_vm4, %v6863_v1, %v6867_v59  ;;  %2799 = vmatmul.bf16.gmra.mxu2 %v9484_v12  ;;  %v12072_v10 = vld [vmem:[#allocation21_spill] sm:$0xff]  ;;  %v6873_v45 = vunpack.i.h.bf16 %v9502_v39  ;;  %v2586_v39 = vpack.c.b16 %v2578_v53, %v2576_v14 }
 0x6a2   : > { %2896 = vmatpush.bf16.msra.mxu2 %v12071_v3  ;;  %v2161_v30 = vsel %vm12002_vm15, %v2129_v43, 0.0  ;;  %v2162_v62 = vsel %vm12001_vm1, %v2130_v17, 0.0  ;;  %v6430_v1 = vld [vmem:[%s11950_s6 + $0x88] sm:$0xf0]  ;;  %v2498_v31 = vpack.c.b16 %v2484_v13, %v2482_v61  ;;  %v2394_v20 = vpop.permute.xlu2 %2393  ;;  %v2572_v17 = vunpack.c.h.b16 %v9357_v34 }
 0x6a3   : > { %v9520_v59 = vpack.c.bf16 %v2161_v30, %v2160_v6  ;;  %v9522_v16 = vpack.c.bf16 %v2163_v38, %v2162_v62  ;;  %v2574_v38 = vunpack.c.h.b16 %v9359_v18  ;;  %v2124_v3 = vsel %vm11991_vm4, %v6872_v15, %v6873_v45  ;;  %v12074_v6 = vld [vmem:[#allocation19_spill] sm:$0xff] }
 0x6a4   : > { %2839 = vmatpush.bf16.msra.mxu3 %v2502_v23  ;;  %v12073_v23 = vld [vmem:[#allocation20_spill] sm:$0xff] }
 0x6a5   : > { %v2567_v33 = vunpack.c.l.b16 %v9520_v59  ;;  %v2569_v28 = vunpack.c.l.b16 %v9522_v16  ;;  %v2568_v18 = vunpack.c.h.b16 %v9520_v59 }
 0x6a6   : > { %2897 = vmatpush.bf16.msra.mxu2 %v12072_v10  ;;  %v9527_v25 = vpop.permute.xlu0 %2401  ;;  %v9529_v49 = vpop.permute.xlu1 %2413 }
 0x6a7   : > { %v2424_v2 = vsel %vm11989_vm7, %v9436_v21, %v9529_v49  ;;  %v2581_v46 = vpack.c.b16 %v2569_v28, %v2567_v33  ;;  %v6202_v21 = vld [vmem:[%s11950_s6 + $0x78] sm:$0xf]  ;;  %v2420_v29 = vsel %vm11989_vm7, %v9488_v47, %v9527_v25 }
 0x6a8   : > { %2809 = vmatpush.bf16.msrb.mxu1 %v2424_v2  ;;  %2840 = vmatpush.bf16.msra.mxu3 %v2500_v52  ;;  %v9558_v43 = vor.u32 %v6430_v1, %v6202_v21  ;;  %v2570_v52 = vunpack.c.h.b16 %v9522_v16  ;;  %v12075_v2 = vld [vmem:[#allocation38_spill] sm:$0xff]  ;;  %v6416_v21 = vld [vmem:[%s11950_s6 + $0x18] sm:$0xf0] }
 0x6a9   : > { %2869 = vmatpush.bf16.msra.mxu0 %v2581_v46  ;;  %v2156_v46 = vsel %vm12001_vm1, %v2124_v3, 0.0 }
 0x6aa   : > { %2898 = vmatpush.bf16.msra.mxu2 %v12073_v23  ;;  %v2582_v53 = vpack.c.b16 %v2570_v52, %v2568_v18  ;;  %v2531_v1 = vpop.permute.xlu2 %2530 }
 0x6ac   : > { %2810 = vmatpush.bf16.msrb.mxu1 %v2422_v9  ;;  %2841 = vmatpush.bf16.msra.mxu3 %v2498_v31 }
 0x6ae   : > { %2899 = vmatpush.bf16.msra.mxu2 %v12074_v6  ;;  %v6881_v30 = vpop.permute.xlu0 %6880  ;;  %v6876_v62 = vpop.permute.xlu1 %6875 }
 0x6af   : > { %v6883_v33 = vunpack.i.h.bf16 %v6881_v30  ;;  %v6882_v28 = vunpack.i.l.bf16 %v6881_v30  ;;  %v6878_v10 = vunpack.i.h.bf16 %v6876_v62  ;;  %v6877_v34 = vunpack.i.l.bf16 %v6876_v62  ;;  %2842 = vmatmul.bf16.vlgmr.msra.gmra.mxu3 %v9556_v26  ;;  %v6419_v62 = vld [vmem:[%s11950_s6 + $0x34] sm:$0xf] }
 0x6b0   : > { %2950 = vmatpush.bf16.msrb.mxu3 %v9193_v60  ;;  %2770 = vmatmul.bf16.gmra.mxu0 %v9558_v43  ;;  %v2584_v60 = vpack.c.b16 %v2574_v38, %v2572_v17 }
 0x6b1   : > { %2811 = vmatpush.bf16.msrb.mxu1 %v2420_v29  ;;  %v2127_v61 = vsel %vm11991_vm4, %v6882_v28, %v6883_v33  ;;  %v2126_v13 = vsel %vm11991_vm4, %v6878_v10, %v6882_v28  ;;  %v2125_v47 = vsel %vm11991_vm4, %v6873_v45, %v6877_v34  ;;  %2900 = vmatmul.bf16.vlgmr.msra.gmra.mxu2 %v9305_v54  ;;  %v6150_v54 = vld [vmem:[%s11950_s6 + $0x8] sm:$0xf]  ;;  %v12076_v45 = vld [vmem:[#allocation35_spill] sm:$0xff]  ;;  %v6417_v28 = vld [vmem:[%s11950_s6 + $0x20] sm:$0xf0] }
 0x6b2   : > { %3012 = vmatpush.bf16.msrb.mxu2 %v2586_v39  ;;  %v2157_v42 = vsel %vm12002_vm15, %v2125_v47, 0.0  ;;  %v2158_v59 = vsel %vm12001_vm1, %v2126_v13, 0.0  ;;  %v2159_v16 = vsel %vm12002_vm15, %v2127_v61, 0.0  ;;  %v9593_v30 = vor.u32 %v6416_v21, %v6150_v54  ;;  %v6172_v29 = vld [vmem:[%s11950_s6 + $0x44] sm:$0xf0]  ;;  %v12077_v10 = vld [vmem:[#allocation27_spill] sm:$0xff]  ;;  %v2410_v13 = vpop.permute.xlu2 %2409 }
 0x6b3   : > { %v2172_v51 = vpack.c.bf16 %v2157_v42, %v2156_v46  ;;  %v2173_v14 = vpack.c.bf16 %v2159_v16, %v2158_v59  ;;  %v9612_v34 = vor.u32 %v6419_v62, %v6172_v29  ;;  %v12079_v47 = vld [vmem:[#allocation31_spill] sm:$0xff]  ;;  %v6421_v46 = vld [vmem:[%s11950_s6 + $0x40] sm:$0xf0]  ;;  %v12080_v42 = vld [vmem:[#allocation26_spill] sm:$0xff]  ;;  %v2497_v16 = vunpack.c.h.b16 %v9420_v35 }
 0x6b4   : > { %2951 = vmatpush.bf16.msrb.mxu3 %v12075_v2  ;;  %v2423_v2 = vsel %vm11989_vm7, %v9320_v0, %v2410_v13  ;;  %v6192_v54 = vld [vmem:[%s11950_s6 + $0x6c] sm:$0xf0]  ;;  %v6178_v35 = vld [vmem:[%s11950_s6 + $0x38] sm:$0xf]  ;;  %v6429_v62 = vld [vmem:[%s11950_s6 + $0x84] sm:$0xf] }
 0x6b5   : > { %v2563_v15 = vunpack.c.l.b16 %v2172_v51  ;;  %v2565_v23 = vunpack.c.l.b16 %v2173_v14  ;;  %v2564_v31 = vunpack.c.h.b16 %v2172_v51  ;;  %v2566_v9 = vunpack.c.h.b16 %v2173_v14  ;;  %v6427_v29 = vld [vmem:[%s11950_s6 + $0x70] sm:$0xf0] }
 0x6b6   : > { %3013 = vmatpush.bf16.msrb.mxu2 %v2584_v60  ;;  %v2537_v17 = vpop.permute.xlu0 %2536  ;;  %v2396_v38 = vpop.permute.xlu1 %2395  ;;  %v12078_v60 = vld [vmem:[#allocation37_spill] sm:$0xff]  ;;  %v2495_v14 = vunpack.c.h.b16 %v9411_v22 }
 0x6b7   : > { %v2418_v39 = vsel %vm11989_vm7, %v2394_v20, %v2396_v38  ;;  %v2579_v3 = vpack.c.b16 %v2565_v23, %v2563_v15  ;;  %v2580_v6 = vpack.c.b16 %v2566_v9, %v2564_v31  ;;  %v2546_v33 = vsel %vm11990_vm6, %v9375_v57, %v2537_v17  ;;  %v6158_v20 = vld [vmem:[%s11950_s6 + $0x10] sm:$0xf]  ;;  %v12081_v15 = vld [vmem:[#allocation39_spill] sm:$0xff] }
 0x6b8   : > { %2952 = vmatpush.bf16.msrb.mxu3 %v12076_v45  ;;  %2812 = vmatpush.bf16.msrb.mxu1 %v2418_v39  ;;  %v9614_v57 = vor.u32 %v6417_v28, %v6158_v20  ;;  %v2505_v22 = vpack.c.b16 %v2497_v16, %v2495_v14  ;;  %v2493_v45 = vunpack.c.h.b16 %v9427_v19  ;;  %v2491_v23 = vunpack.c.h.b16 %v9456_v32  ;;  %v12082_v19 = vld [vmem:[#allocation32_spill] sm:$0xff]  ;;  %v6190_v32 = vld [vmem:[%s11950_s6 + $0x58] sm:$0xf] }
 0x6b9   : > { %2870 = vmatpush.bf16.msra.mxu0 %v2579_v3  ;;  %v2487_v9 = vunpack.c.h.b16 %v9477_v27  ;;  %v2489_v17 = vunpack.c.h.b16 %v9479_v37  ;;  %v2483_v39 = vunpack.c.h.b16 %v9509_v63  ;;  %v2485_v3 = vunpack.c.h.b16 %v9518_v56  ;;  %v6426_v27 = vld [vmem:[%s11950_s6 + $0x68] sm:$0xf0]  ;;  %v12083_v37 = vld [vmem:[#allocation28_spill] sm:$0xff]  ;;  %v6212_v63 = vld [vmem:[%s11950_s6 + $0x94] sm:$0xf0] }
 0x6ba   : > { %3014 = vmatpush.bf16.msrb.mxu2 %v2582_v53  ;;  %v6424_v53 = vld [vmem:[%s11950_s6 + $0x5c] sm:$0xf]  ;;  %v2503_v31 = vpack.c.b16 %v2493_v45, %v2491_v23  ;;  %v6198_v56 = vld [vmem:[%s11950_s6 + $0x60] sm:$0xf] }
 0x6bb   : > { %2813 = vmatmul.bf16.vlgmr.msrb.gmra.mxu1 %v9593_v30  ;;  %v6199_v20 = vor.u32 %v6427_v29, %v6198_v56  ;;  %v6210_v28 = vld [vmem:[%s11950_s6 + $0x80] sm:$0xf] }
 0x6bc   : > { %2921 = vmatpush.bf16.msra.mxu1 %v9169_v41  ;;  %2953 = vmatpush.bf16.msrb.mxu3 %v12077_v10  ;;  %v2544_v41 = vsel %vm11990_vm6, %v9102_v50, %v2531_v1  ;;  %v9657_v1 = vor.u32 %v6424_v53, %v6192_v54  ;;  %v6431_v10 = vld [vmem:[%s11950_s6 + $0x90] sm:$0xf0] }
 0x6bd   : > { %2979 = vmatpush.bf16.msrb.mxu0 %v2546_v33  ;;  %v6215_v33 = vor.u32 %v6429_v62, %v6212_v63 }
 0x6be   : > { %3015 = vmatpush.bf16.msrb.mxu2 %v2580_v6  ;;  %v2525_v18 = vpop.permute.xlu0 %2524  ;;  %v2416_v52 = vpop.permute.xlu1 %2415  ;;  %v6191_v6 = vor.u32 %v6426_v27, %v6190_v32 }
 0x6bf   : > { %2847 = vmatmul.bf16.gmra.mxu3 %v9612_v34  ;;  %v2425_v61 = vsel %vm11989_vm7, %v9529_v49, %v2416_v52  ;;  %v2542_v50 = vsel %vm11990_vm6, %v12068_v4, %v2525_v18  ;;  %v6170_v49 = vld [vmem:[%s11950_s6 + $0x30] sm:$0xf]  ;;  %v6432_v18 = vld [vmem:[%s11950_s6 + $0x98] sm:$0xf0] }
 0x6c0   : > { %2922 = vmatpush.bf16.msra.mxu1 %v12078_v60  ;;  %6220 = vmatmul.msk.bf16.vlgmr.msra.gmra.mxu0 %vm11996_vm0, %v9614_v57  ;;  %v6171_v51 = vor.u32 %v6421_v46, %v6170_v49  ;;  %v6211_v60 = vor.u32 %v6431_v10, %v6210_v28 }
 0x6c1   : > { %2980 = vmatpush.bf16.msrb.mxu0 %v2544_v41  ;;  %2954 = vmatpush.bf16.msrb.mxu3 %v2425_v61  ;;  %v6218_v41 = vld [vmem:[%s11950_s6 + $0x88] sm:$0xf] }
 0x6c2   : > { %2905 = vmatmul.bf16.gmra.mxu2 %v9364_v40  ;;  %v6219_v52 = vor.u32 %v6432_v18, %v6218_v41 }
 0x6c4   : > { %2923 = vmatpush.bf16.msra.mxu1 %v12079_v47 }
 0x6c5   : > { %2981 = vmatpush.bf16.msrb.mxu0 %v2542_v50  ;;  %2955 = vmatpush.bf16.msrb.mxu3 %v2423_v2 }
 0x6c6   : > { %v2404_v40 = vpop.permute.xlu0 %2403  ;;  %v2519_v59 = vpop.permute.xlu1 %2518 }
 0x6c7   : > { %v2421_v4 = vsel %vm11989_vm7, %v9527_v25, %v2404_v40  ;;  %v2540_v0 = vsel %vm11990_vm6, %v12066_v44, %v2519_v59  ;;  %v6422_v44 = vld [vmem:[%s11950_s6 + $0x48] sm:$0xf0]  ;;  %v2398_v25 = vpop.permute.xlu2 %2397 }
 0x6c8   : > { %2924 = vmatpush.bf16.msra.mxu1 %v12080_v42  ;;  %v2419_v21 = vsel %vm11989_vm7, %v2396_v38, %v2398_v25  ;;  %v2501_v38 = vpack.c.b16 %v2489_v17, %v2487_v9 }
 0x6c9   : > { %2956 = vmatpush.bf16.msrb.mxu3 %v2421_v4  ;;  %2982 = vmatpush.bf16.msrb.mxu0 %v2540_v0 }
 0x6cb   : > { %2818 = vmatmul.bf16.gmra.mxu1 %v6171_v51 }
 0x6cc   : > { %2925 = vmatpush.bf16.msra.mxu1 %v9184_v11  ;;  %v6179_v11 = vor.u32 %v6422_v44, %v6178_v35 }
 0x6cd   : > { %2957 = vmatpush.bf16.msrb.mxu3 %v2419_v21  ;;  %2983 = vmatpush.bf16.msrb.mxu0 %v2505_v22 }
 0x6cf   : > { %2852 = vmatmul.bf16.gmra.mxu3 %v9657_v1 }
 0x6d0   : > { %2926 = vmatpush.bf16.msra.mxu1 %v12081_v15  ;;  %6221 = vmatmul.msk.bf16.gmra.mxu0 %vm11996_vm0, %v6179_v11 }
 0x6d1   : > { %2984 = vmatpush.bf16.msrb.mxu0 %v2503_v31 }
 0x6d2   : > { %2910 = vmatmul.bf16.gmra.mxu2 %v9475_v58  ;;  %v2499_v58 = vpack.c.b16 %v2485_v3, %v2483_v39 }
 0x6d4   : > { %2927 = vmatpush.bf16.msra.mxu1 %v12082_v19  ;;  %v9785_v19 = vpop.permute.xlu0 %2627 }
 0x6d5   : > { %2985 = vmatpush.bf16.msrb.mxu0 %v2501_v38 }
 0x6d8   : > { %2928 = vmatpush.bf16.msra.mxu1 %v12083_v37 }
 0x6d9   : > { %2986 = vmatpush.bf16.msrb.mxu0 %v2499_v58 }
 0x6db   : > { %2823 = vmatmul.bf16.gmra.mxu1 %v6191_v6 }
 0x6dc   : > { %v9797_v37 = vpop.permute.xlu0 %2612 }
 0x6df   : > { %2857 = vmatmul.bf16.gmra.mxu3 %v6215_v33 }
 0x6e0   : > { %6222 = vmatmul.msk.bf16.gmra.mxu0 %vm11996_vm0, %v6199_v20 }
 0x6e2   : > { %2915 = vmatmul.bf16.gmra.mxu2 %v9558_v43 }
 0x6eb   : > { %2828 = vmatmul.bf16.gmra.mxu1 %v6211_v60 }
 0x6ef   : > { %2958 = vmatmul.bf16.vlgmr.msrb.gmra.mxu3 %v9593_v30 }
 0x6f0   : > { %6223 = vmatmul.msk.bf16.gmra.mxu0 %vm11996_vm0, %v6219_v52 }
 0x6f2   : > { %6224 = vmatmul.msk.bf16.vlgmr.msrb.gmra.mxu2 %vm11996_vm0, %v9614_v57 }
 0x6f4   : > { %v9707_v43 = vpop.f32.mrf.mxu2 }
 0x6fb   : > { %2929 = vmatmul.bf16.vlgmr.msra.gmra.mxu1 %v9261_v36 }
 0x6fc   : > { %v9710_v61 = vpop.f32.mrf.mxu2 }
 0x6fd   : > { %12084 = vst [vmem:[#allocation36_spill] sm:$0xff] %v9710_v61  ;;  %v9712_v13 = vpop.f32.mrf.mxu0 }
 0x6ff   : > { %2963 = vmatmul.bf16.gmra.mxu3 %v6171_v51 }
 0x700   : > { %2987 = vmatmul.bf16.vlgmr.msrb.gmra.mxu0 %v9556_v26 }
 0x702   : > { %6225 = vmatmul.msk.bf16.gmra.mxu2 %vm11996_vm0, %v6179_v11 }
 0x704   : > { %v9716_v47 = vpop.f32.mrf.mxu2 }
 0x705   : > { %v9718_v30 = vpop.f32.mrf.mxu0 }
 0x706   : > { %12085 = vst [vmem:[#allocation29_spill] sm:$0xff] %v9718_v30 }
 0x70b   : > { %2934 = vmatmul.bf16.gmra.mxu1 %v9308_v48 }
 0x70c   : > { %v9721_v57 = vpop.f32.mrf.mxu2 }
 0x70d   : > { %v9723_v50 = vpop.f32.mrf.mxu0 }
 0x70f   : > { %2968 = vmatmul.bf16.gmra.mxu3 %v6191_v6 }
 0x710   : > { %2992 = vmatmul.bf16.gmra.mxu0 %v9612_v34 }
 0x712   : > { %6226 = vmatmul.msk.bf16.gmra.mxu2 %vm11996_vm0, %v6199_v20 }
 0x714   : > { %v9727_v36 = vpop.f32.mrf.mxu2 }
 0x715   : > { %v9729_v26 = vpop.f32.mrf.mxu0 }
 0x71b   : > { %2939 = vmatmul.bf16.gmra.mxu1 %v9369_v5 }
 0x71c   : > { %v9732_v2 = vpop.f32.mrf.mxu2 }
 0x71d   : > { %v9734_v49 = vpop.f32.mrf.mxu0 }
 0x71f   : > { %2973 = vmatmul.bf16.gmra.mxu3 %v6211_v60 }
 0x720   : > { %2997 = vmatmul.bf16.gmra.mxu0 %v9657_v1 }
 0x722   : > { %6227 = vmatmul.msk.bf16.gmra.mxu2 %vm11996_vm0, %v6219_v52 }
 0x724   : > { %v9738_v48 = vpop.f32.mrf.mxu2 }
 0x725   : > { %v9740_v34 = vpop.f32.mrf.mxu0 }
 0x72b   : > { %2944 = vmatmul.bf16.gmra.mxu1 %v9484_v12 }
 0x72c   : > { %v9743_v46 = vpop.f32.mrf.mxu2 }
 0x72d   : > { %v9745_v42 = vpop.f32.mrf.mxu0 }
 0x730   : > { %3002 = vmatmul.bf16.gmra.mxu0 %v6215_v33  ;;  %v9807_v33 = vpop.permute.xlu0 %2597 }
 0x732   : > { %v9747_v5 = vpop.f32.mrf.mxu3 }
 0x733   : > { %12086 = vst [vmem:[#allocation23_spill] sm:$0xff] %v9747_v5 }
 0x734   : > { %v2901_v40 = vpop.f32.mrf.mxu2 }
 0x735   : > { %v9749_v59 = vpop.f32.mrf.mxu0  ;;  %v2902_v20 = vadd.f32 %v2901_v40, %v9807_v33 }
 0x738   : > { %v9751_v16 = vpop.f32.mrf.mxu1 }
 0x739   : > { %12087 = vst [vmem:[#allocation34_spill] sm:$0xff] %v9751_v16 }
 0x73a   : > { %v9753_v4 = vpop.f32.mrf.mxu3 }
 0x73b   : > { %12088 = vst [vmem:[#allocation30_spill] sm:$0xff] %v9753_v4 }
 0x73c   : > { %v9755_v0 = vpop.f32.mrf.mxu2 }
 0x73d   : > { %12089 = vst [vmem:[#allocation33_spill] sm:$0xff] %v9755_v0  ;;  %v9757_v51 = vpop.f32.mrf.mxu0 }
 0x73e   : > { %12090 = vst [vmem:[#allocation22_spill] sm:$0xff] %v9757_v51 }
 0x740   : > { %v9759_v14 = vpop.f32.mrf.mxu1 }
 0x741   : > { %12091 = vst [vmem:[#allocation21_spill] sm:$0xff] %v9759_v14 }
 0x742   : > { %v9761_v12 = vpop.f32.mrf.mxu3 }
 0x745   : > { %v2906_v53 = vpop.f32.mrf.mxu2  ;;  %v9763_v54 = vpop.f32.mrf.mxu0 }
 0x746   : > { %12092 = vst [vmem:[#allocation20_spill] sm:$0xff] %v9763_v54 }
 0x748   : > { %v9765_v35 = vpop.f32.mrf.mxu1 }
 0x74a   : > { %v9767_v44 = vpop.f32.mrf.mxu3 }
 0x74d   : > { %v9769_v25 = vpop.f32.mrf.mxu2  ;;  %v9771_v22 = vpop.f32.mrf.mxu0 }
 0x750   : > { %v9773_v21 = vpop.f32.mrf.mxu1 }
 0x752   : > { %v9775_v1 = vpop.f32.mrf.mxu3 }
 0x753   : > { %12093 = vst [vmem:[#allocation19_spill] sm:$0xff] %v9775_v1 }
 0x755   : > { %v9777_v45 = vpop.f32.mrf.mxu2  ;;  %v9779_v11 = vpop.f32.mrf.mxu0 }
 0x756   : > { %12094 = vst [vmem:[#allocation38_spill] sm:$0xff] %v9779_v11 }
 0x758   : > { %v9781_v15 = vpop.f32.mrf.mxu1 }
 0x759   : > { %12095 = vst [vmem:[#allocation35_spill] sm:$0xff] %v9781_v15 }
 0x75a   : > { %v2855_v23 = vpop.f32.mrf.mxu3 }
 0x75d   : > { %v2913_v31 = vpop.f32.mrf.mxu2  ;;  %v9783_v9 = vpop.f32.mrf.mxu0 }
 0x75e   : > { %12096 = vst [vmem:[#allocation27_spill] sm:$0xff] %v9783_v9 }
 0x760   : > { %v2826_v17 = vpop.f32.mrf.mxu1 }
 0x762   : > { %v9787_v38 = vpop.f32.mrf.mxu3 }
 0x765   : > { %v9789_v39 = vpop.f32.mrf.mxu2  ;;  %v9791_v3 = vpop.f32.mrf.mxu0 }
 0x768   : > { %v9793_v32 = vpop.f32.mrf.mxu1 }
 0x76a   : > { %v9795_v27 = vpop.f32.mrf.mxu3 }
 0x76d   : > { %v9799_v58 = vpop.f32.mrf.mxu2  ;;  %v9801_v6 = vpop.f32.mrf.mxu0 }
 0x770   : > { %v9803_v62 = vpop.f32.mrf.mxu1 }
 0x772   : > { %v2959_v63 = vpop.f32.mrf.mxu3 }
 0x775   : > { %v3017_v56 = vpop.f32.mrf.mxu2  ;;  %v9805_v29 = vpop.f32.mrf.mxu0 }
 0x776   : > { %12097 = vst [vmem:[#allocation37_spill] sm:$0xff] %v9805_v29 }
 0x778   : > { %v2930_v28 = vpop.f32.mrf.mxu1 }
 0x779   : > { %v2931_v10 = vadd.f32 %v2930_v28, %v2902_v20 }
 0x77a   : > { %v9810_v60 = vpop.f32.mrf.mxu3 }
 0x77b   : > { %12098 = vst [vmem:[#allocation31_spill] sm:$0xff] %v9810_v60  ;;  %v2960_v41 = vadd.f32 %v2959_v63, %v2931_v10  ;;  %v2623_v10 = vpop.permute.xlu2 %2622 }
 0x77d   : > { %v9812_v18 = vpop.f32.mrf.mxu2  ;;  %v2988_v52 = vpop.f32.mrf.mxu0 }
 0x77e   : > { %12099 = vst [vmem:[#allocation26_spill] sm:$0xff] %v9812_v18  ;;  %v2989_v8 = vadd.f32 %v2988_v52, %v2960_v41 }
 0x780   : > { %v9814_v24 = vadd.f32 %v3017_v56, %v2989_v8  ;;  %v9816_v55 = vpop.f32.mrf.mxu1  ;;  %v9833_v8 = vld [vmem:[%s11945_s1] sm:$0x3] }
 0x781   : > { %12101 = vst [vmem:[#allocation32_spill] sm:$0xff] %v9816_v55  ;;  %v6228_v56 = vmul.f32 -1.442695, %v9833_v8  ;;  %v2914_v55 = vadd.f32 %v2913_v31, %v2623_v10 }
 0x782   : > { %12100 = vst [vmem:[#allocation39_spill] sm:$0xff] %v9814_v24  ;;  %v2964_v7 = vpop.f32.mrf.mxu3  ;;  %v2769_v24 = vadd.f32 %v9740_v34, %v2623_v10  ;;  %v2633_v34 = vpop.permute.xlu1 %2632 }
 0x783   : > { %7298 = vpow2.f32 %v6228_v56  ;;  %v2608_v14 = vpop.permute.xlu2 %2607 }
 0x784   : > { %v2798_v51 = vadd.f32 %v9732_v2, %v2769_v24  ;;  %v2907_v1 = vadd.f32 %v2906_v53, %v2608_v14  ;;  %v2762_v0 = vadd.f32 %v9723_v50, %v2608_v14 }
 0x785   : > { %v9818_v54 = vpop.f32.mrf.mxu0  ;;  %v9820_v4 = vpop.f32.mrf.mxu2 }
 0x786   : > { %12102 = vst [vmem:[#allocation28_spill] sm:$0xff] %v9818_v54  ;;  %v2827_v30 = vadd.f32 %v2826_v17, %v2798_v51  ;;  %v2791_v53 = vadd.f32 %v9716_v47, %v2762_v0  ;;  %v2774_v51 = vadd.f32 %v9749_v59, %v2633_v34  ;;  %v2757_v17 = vadd.f32 %v9712_v13, %v9807_v33 }
 0x788   : > { %v2935_v9 = vpop.f32.mrf.mxu1  ;;  %v2856_v16 = vadd.f32 %v2855_v23, %v2827_v30  ;;  %v2909_v30 = vadd.f32 %v9769_v25, %v9797_v37 }
 0x789   : > { %v7299_v61 = vpop.eup %7298  ;;  %v2936_v15 = vadd.f32 %v2935_v9, %v2907_v1  ;;  %v2820_v1 = vadd.f32 %v9765_v35, %v2791_v53 }
 0x78a   : > { %v9822_v40 = vpop.f32.mrf.mxu3  ;;  %v3041_v29 = vadd.f32 1.0, %v7299_v61  ;;  %v2764_v61 = vadd.f32 %v9729_v26, %v9797_v37  ;;  %v9858_v47 = vadd.f32 %v9791_v3, %v2856_v16  ;;  %v2618_v9 = vpop.permute.xlu1 %2617 }
 0x78b   : > { %v2849_v16 = vadd.f32 %v9761_v12, %v2820_v1 }
 0x78c   : > { %7300 = vrcp.f32 %v3041_v29  ;;  %vm3047_vm8 = vweird.f32 %v3041_v29  ;;  %v3053_v35 = vand.u32 2147483648, %v3041_v29  ;;  %v3051_v23 = vand.u32 2147483647, %v3041_v29 }
 0x78d   : > { %v2993_v20 = vpop.f32.mrf.mxu0  ;;  %v9824_v28 = vpop.f32.mrf.mxu2  ;;  %v2793_v3 = vadd.f32 %v9721_v57, %v2764_v61  ;;  %v9881_v57 = vadd.f32 %v9771_v22, %v2849_v16  ;;  %v2767_v22 = vadd.f32 %v9734_v49, %v2618_v9 }
 0x78e   : > { %vm3052_vm4 = vcmp.eq.f32.partialorder %v3051_v23, 8.507059e+37  ;;  %v12115_v23 = vld [vmem:[#allocation32_spill] sm:$0xff] }
 0x790   : > { %v2937_v63 = vpop.f32.mrf.mxu1 }
 0x792   : > { %v9826_v18 = vpop.f32.mrf.mxu3  ;;  %v7301_v14 = vpop.eup %7300 }
 0x793   : > { %12103 = vst [vmem:[#allocation40_spill] sm:$0xff] %v9826_v18  ;;  %v3043_v0 = vmul.f32 %v7301_v14, %v3041_v29  ;;  %vm3048_vm7 = vweird.f32 %v7301_v14 }
 0x794   : > { %vm9875_vm6 = vmor %vm3047_vm8, %vm3048_vm7  ;;  %vm3274_vm7 = vcmask 15360  }
 0x795   : > { %v9828_v41 = vpop.f32.mrf.mxu0  ;;  %v9839_v54 = vpop.f32.mrf.mxu2 }
 0x796   : > { %12104 = vst [vmem:[#allocation41_spill] sm:$0xff] %v9839_v54  ;;  %v2772_v54 = vadd.f32 %v9745_v42, %v9785_v19 }
 0x798   : > { %v9836_v52 = vpop.f32.mrf.mxu1  ;;  %v2801_v50 = vadd.f32 %v9738_v48, %v2772_v54  ;;  %v2938_v54 = vadd.f32 %v2937_v63, %v2909_v30  ;;  %v2919_v63 = vadd.f32 %v9799_v58, %v2633_v34 }
 0x79a   : > { %v2971_v5 = vpop.f32.mrf.mxu3  ;;  %v2830_v42 = vadd.f32 %v9793_v32, %v2801_v50  ;;  %v2803_v32 = vadd.f32 %v9743_v46, %v2774_v51  ;;  %v2967_v13 = vadd.f32 %v9822_v40, %v2938_v54  ;;  %v2822_v46 = vadd.f32 %v9773_v21, %v2793_v3  ;;  %v12108_v30 = vld [vmem:[#allocation40_spill] sm:$0xff] }
 0x79c   : > { %v2832_v10 = vadd.f32 %v9803_v62, %v2803_v32  ;;  %v2996_v58 = vadd.f32 %v9828_v41, %v2967_v13  ;;  %v2851_v51 = vadd.f32 %v9767_v44, %v2822_v46  ;;  %v2603_v41 = vpop.permute.xlu1 %2602  ;;  %v12118_v32 = vld [vmem:[#allocation19_spill] sm:$0xff]  ;;  %v12122_v46 = vld [vmem:[#allocation22_spill] sm:$0xff] }
 0x79d   : > { %v9842_v60 = vpop.f32.mrf.mxu0  ;;  %v3029_v24 = vpop.f32.mrf.mxu2 }
 0x79e   : > { %12105 = vst [vmem:[#allocation42_spill] sm:$0xff] %v9842_v60  ;;  %v2965_v60 = vadd.f32 %v2964_v7, %v2936_v15  ;;  %v2917_v7 = vadd.f32 %v9789_v39, %v9785_v19  ;;  %v3044_v15 = vsub.f32 1.0, %v3043_v0  ;;  %v2859_v19 = vadd.f32 %v9787_v38, %v2830_v42  ;;  %v12109_v42 = vld [vmem:[#allocation34_spill] sm:$0xff] }
 0x79f   : > { %v2861_v49 = vadd.f32 %v9795_v27, %v2832_v10  ;;  %v9907_v1 = vadd.f32 %v9824_v28, %v2996_v58  ;;  %v12114_v28 = vld [vmem:[#allocation29_spill] sm:$0xff] }
 0x7a0   : > { %v2942_v11 = vpop.f32.mrf.mxu1  ;;  %v2994_v26 = vadd.f32 %v2993_v20, %v2965_v60  ;;  %v3045_v39 = vmul.f32 %v7301_v14, %v3044_v15  ;;  %v3054_v20 = vor.u32 1.1754944e-38, %v3053_v35  ;;  %v9887_v29 = vadd.f32 %v9801_v6, %v2859_v19  ;;  %v6433_v15 = vld [vmem:[%s11952_s8] sm:$0xff] }
 0x7a1   : > { %v2943_v56 = vadd.f32 %v2942_v11, %v2914_v55 }
 0x7a2   : > { %v9872_v37 = vadd.f32 %v9820_v4, %v2994_v26  ;;  %v3046_v33 = vadd.f32 %v7301_v14, %v3045_v39  ;;  %v2912_v4 = vadd.f32 %v9777_v45, %v2618_v9  ;;  %v12110_v26 = vld [vmem:[#allocation33_spill] sm:$0xff]  ;;  %v12117_v39 = vld [vmem:[#allocation23_spill] sm:$0xff] }
 0x7a3   : > { %v2972_v2 = vadd.f32 %v2971_v5, %v2943_v56  ;;  %v2974_v5 = vpop.f32.mrf.mxu3  ;;  %v2904_v27 = vadd.f32 %v12110_v26, %v2603_v41 }
 0x7a4   : > { %v3418_v21 = vadd.f32 %v9872_v37, %v9881_v57  ;;  %v2941_v6 = vadd.f32 %v9836_v52, %v2912_v4  ;;  %v2796_v52 = vadd.f32 %v9727_v36, %v2767_v22  ;;  %v12125_v22 = vld [vmem:[#allocation28_spill] sm:$0xff] }
 0x7a5   : > { %v3000_v18 = vpop.f32.mrf.mxu0  ;;  %v3032_v60 = vpop.f32.mrf.mxu2  ;;  %v2933_v16 = vadd.f32 %v12115_v23, %v2904_v27 }
 0x7a6   : > { %v3001_v55 = vadd.f32 %v3000_v18, %v2972_v2 }
 0x7a8   : > { %v9861_v59 = vadd.f32 %v3029_v24, %v3001_v55  ;;  %v2945_v48 = vpop.f32.mrf.mxu1  ;;  %v3050_v24 = vsel %vm9875_vm6, %v7301_v14, %v3046_v33  ;;  %v2786_v55 = vadd.f32 %v9707_v43, %v2757_v17  ;;  %v12112_v43 = vld [vmem:[#allocation35_spill] sm:$0xff] }
 0x7a9   : > { %v2946_v11 = vadd.f32 %v2945_v48, %v2917_v7  ;;  %v3055_v45 = vsel %vm3052_vm4, %v3054_v20, %v3050_v24  ;;  %v2970_v7 = vadd.f32 %v12108_v30, %v2941_v6  ;;  %v12111_v48 = vld [vmem:[#allocation38_spill] sm:$0xff]  ;;  %v2825_v54 = vadd.f32 %v12112_v43, %v2796_v52  ;;  %v12120_v20 = vld [vmem:[#allocation31_spill] sm:$0xff] }
 0x7aa   : > { %v3427_v25 = vadd.f32 %v9861_v59, %v9858_v47  ;;  %v3057_v53 = vmul.f32 %v3055_v45, %v9833_v8  ;;  %v2815_v44 = vadd.f32 %v12109_v42, %v2786_v55  ;;  %v9913_v0 = vadd.f32 %v12111_v48, %v2851_v51  ;;  %v12126_v45 = vld [vmem:[#allocation39_spill] sm:$0xff]  ;;  %v12127_v6 = vld [vmem:[#allocation30_spill] sm:$0xff]  ;;  %v3075_v55 = vld [vmem:[%s11953_s9] sm:$0xff] }
 0x7ab   : > { %v2975_v31 = vadd.f32 %v2974_v5, %v2946_v11  ;;  %v2976_v34 = vpop.f32.mrf.mxu3  ;;  %v12113_v11 = vld [vmem:[#allocation37_spill] sm:$0xff]  ;;  %v2962_v13 = vadd.f32 %v12120_v20, %v2933_v16  ;;  %v12130_v52 = vlaneseq  ;;  %vm3323_vm4 = vcmask 1041408   ;;  %v9988_v48 = vld [vmem:[%s11947_s3 + $0x18] sm:$0xff] }
 0x7ac   : > { %3428 = vadd.xlane.f32.xlu0 %v3427_v25  ;;  %v3074_v50 = vpack.c.bf16 %v3057_v53, %v3057_v53  ;;  %v9917_v35 = vadd.f32 %v12113_v11, %v2861_v49  ;;  %v2759_v25 = vadd.f32 %v12114_v28, %v2603_v41  ;;  %v3421_v19 = vadd.f32 %v9907_v1, %v9913_v0  ;;  %v9974_v41 = vld [vmem:[%s11947_s3 + $0x8] sm:$0xff] }
 0x7ad   : > { %v3003_v18 = vpop.f32.mrf.mxu0  ;;  %v3034_v5 = vpop.f32.mrf.mxu2  ;;  %v2844_v3 = vadd.f32 %v12117_v39, %v2815_v44  ;;  %v3269_v30 = vshrl.u32 %v12130_v52, 7  ;;  %v9982_v44 = vld [vmem:[%s11947_s3 + $0x10] sm:$0xff] }
 0x7ae   : > { %v3004_v38 = vadd.f32 %v3003_v18, %v2975_v31  ;;  %3226 = vmatpush.bf16.xpose.msrb.mxu1 %v3074_v50  ;;  %v12116_v31 = vld [vmem:[#allocation42_spill] sm:$0xff]  ;;  %v12119_v18 = vld [vmem:[#allocation36_spill] sm:$0xff]  ;;  %v3076_v50 = vld [vmem:[%s11953_s9 + $0x8] sm:$0xff] }
 0x7af   : > { %v2999_v9 = vadd.f32 %v12116_v31, %v2970_v7  ;;  %v2788_v12 = vadd.f32 %v12119_v18, %v2759_v25  ;;  %v9939_v4 = vadd.f32 %v12122_v46, %v2844_v3  ;;  %v3270_v7 = vstv %s7637_s17  ;;  %v12131_v18 = vld [vmem:[#allocation16_spill] sm:$0xff] }
 0x7b0   : > { %v9890_v56 = vadd.f32 %v3032_v60, %v3004_v38  ;;  %v2947_v40 = vpop.f32.mrf.mxu1  ;;  %v2854_v60 = vadd.f32 %v12118_v32, %v2825_v54  ;;  %v12121_v38 = vld [vmem:[#allocation41_spill] sm:$0xff]  ;;  %vm3271_vm6 = vcmp.eq.s32.totalorder %v3269_v30, %v3270_v7  ;;  %v6435_v30 = vld [vmem:[%s11952_s8 + $0x10] sm:$0xff]  ;;  %v6436_v7 = vld [vmem:[%s11952_s8 + $0x18] sm:$0xff] }
 0x7b1   : > { %v2948_v2 = vadd.f32 %v2947_v40, %v2919_v63  ;;  %v9936_v33 = vadd.f32 %v12121_v38, %v2999_v9  ;;  %v12123_v63 = vld [vmem:[#allocation21_spill] sm:$0xff]  ;;  %v12124_v40 = vld [vmem:[#allocation27_spill] sm:$0xff]  ;;  %v3412_v58 = vadd.f32 %v12126_v45, %v9939_v4 }
 0x7b2   : > { %v3430_v62 = vadd.f32 %v9890_v56, %v9887_v29  ;;  %v2817_v10 = vadd.f32 %v12123_v63, %v2788_v12  ;;  %v9943_v24 = vadd.f32 %v12124_v40, %v2854_v60 }
 0x7b3   : > { %v2977_v61 = vadd.f32 %v2976_v34, %v2948_v2  ;;  %v2991_v2 = vadd.f32 %v12125_v22, %v2962_v13 }
 0x7b4   : > { %3431 = vadd.xlane.f32.xlu1 %v3430_v62  ;;  %3419 = vadd.xlane.f32.xlu0 %v3418_v21  ;;  %v3424_v21 = vadd.f32 %v9936_v33, %v9943_v24  ;;  %v2846_v34 = vadd.f32 %v12127_v6, %v2817_v10  ;;  %v12128_v62 = vld [vmem:[#allocation26_spill] sm:$0xff] }
 0x7b5   : > { %v3005_v14 = vpop.f32.mrf.mxu0  ;;  %3227 = vmatmul.bf16.vlgmr.msrb.gmra.mxu1 %v6433_v15  ;;  %v9952_v53 = vadd.f32 %v12128_v62, %v2991_v2 }
 0x7b6   : > { %v3006_v8 = vadd.f32 %v3005_v14, %v2977_v61  ;;  %v12129_v61 = vld [vmem:[#allocation20_spill] sm:$0xff] }
 0x7b7   : > { %v9955_v51 = vadd.f32 %v12129_v61, %v2846_v34  ;;  %v9968_v14 = vld [vmem:[%s11947_s3] sm:$0xff] }
 0x7b8   : > { %v9919_v36 = vadd.f32 %v3034_v5, %v3006_v8  ;;  %v7538_v8 = vmov 0.0  }
 0x7b9   : > { %v3415_v49 = vadd.f32 %v9952_v53, %v9955_v51  ;;  %v6261_v42 = vsel %vm3271_vm6, 1.0, %v7538_v8 }
 0x7ba   : > { %v3433_v17 = vadd.f32 %v9919_v36, %v9917_v35  ;;  %6262 = vmatpush.msk.msra.mxu3 %vm3323_vm4, %v6261_v42 }
 0x7bc   : > { %3434 = vadd.xlane.f32.xlu2 %v3433_v17  ;;  %3422 = vadd.xlane.f32.xlu1 %v3421_v19 }
 0x7c4   : > { %3425 = vadd.xlane.f32.xlu2 %v3424_v21  ;;  %3413 = vadd.xlane.f32.xlu1 %v3412_v58 }
 0x7cc   : > { %3416 = vadd.xlane.f32.xlu2 %v3415_v49 }
 0x7dd   : > { %3098 = vperm.xlu1 %6541, %v3076_v50   ;;  %3481 = vxpose.xlu0.b32.start [1/4] (short) (narrow) %v9968_v14, 64  ;;  %v6434_v50 = vld [vmem:[%s11952_s8 + $0x8] sm:$0xff] }
 0x7de   : > { %3232 = vmatmul.bf16.gmra.mxu1 %v6434_v50 }
 0x7e4   : > { %3093 = vperm.xlu2 %6543, %v3075_v55  }
 0x7e5   : > { %3482 = vxpose.xlu0.b32.cont [2/4] (short) (narrow) %v9974_v41, 64 }
 0x7ed   : > { %3483 = vxpose.xlu0.b32.cont [3/4] (short) (narrow) %v9982_v44, 64 }
 0x7ee   : > { %3237 = vmatmul.bf16.gmra.mxu1 %v6435_v30 }
 0x7f5   : > { %3484 = vxpose.xlu0.b32.end [4/4] (short) (narrow) %v9988_v48, 64 }
 0x7fe   : > { %3242 = vmatmul.bf16.gmra.mxu1 %v6436_v7  ;;  %v3408_v7 = vld [vmem:[%s11955_s11 + $0x20] sm:$0xff] }
 0x81f   : > { %v3429_v5 = vpop.xlane.xlu0 %3428 }
 0x827   : > { %v3432_v26 = vpop.xlane.xlu1 %3431  ;;  %v3420_v11 = vpop.xlane.xlu0 %3419 }
 0x82f   : > { %v3435_v27 = vpop.xlane.xlu2 %3434  ;;  %v3423_v43 = vpop.xlane.xlu1 %3422 }
 0x830   : > { %3456 = vmatpush.msra.mxu0 %v3435_v27 }
 0x832   : > { %3457 = vmatpush.msra.mxu0 %v3432_v26  ;;  %v3228_v15 = vpop.f32.mrf.mxu1 }
 0x834   : > { %3458 = vmatpush.msra.mxu0 %v3429_v5 }
 0x837   : > { %v3426_v54 = vpop.xlane.xlu2 %3425  ;;  %v3414_v25 = vpop.xlane.xlu1 %3413 }
 0x838   : > { %3459 = vmatpush.msra.mxu0 %v3426_v54  ;;  %v6437_v54 = vld [vmem:[%s11952_s8 + $0x20] sm:$0xff] }
 0x839   : > { %3247 = vmatmul.bf16.gmra.mxu1 %v6437_v54 }
 0x83a   : > { %3460 = vmatpush.msra.mxu0 %v3423_v43  ;;  %v3230_v31 = vpop.f32.mrf.mxu1 }
 0x83c   : > { %3461 = vmatpush.msra.mxu0 %v3420_v11 }
 0x83f   : > { %v3417_v28 = vpop.xlane.xlu2 %3416 }
 0x840   : > { %3462 = vmatpush.msra.mxu0 %v3417_v28 }
 0x842   : > { %3463 = vmatpush.msra.mxu0 %v3414_v25 }
 0x843   : > { %6279 = vmatmul.msk.f32.vlgmr.msra.gmra.mxu0 %vm11996_vm0, %v9968_v14 }
 0x847   : > { %v3094_v23 = vpop.permute.xlu2 %3093 }
 0x848   : > { %v3229_v16 = vadd.f32 %v3228_v15, %v3094_v23 }
 0x84a   : > { %6263 = vmatmul.msk.f32.vlgmr.msra.gmra.mxu3 %vm3274_vm7, %v3229_v16 }
 0x84b   : > { %6280 = vmatmul.msk.f32.gmra.mxu0 %vm11996_vm0, %v9974_v41 }
 0x84f   : > { %v3099_v9 = vpop.permute.xlu1 %3098 }
 0x850   : > { %v3231_v17 = vadd.f32 %v3230_v31, %v3099_v9 }
 0x852   : > { %6264 = vmatmul.msk.f32.gmra.mxu3 %vm3274_vm7, %v3231_v17 }
 0x853   : > { %6281 = vmatmul.msk.f32.gmra.mxu0 %vm11996_vm0, %v9982_v44 }
 0x85b   : > { %6282 = vmatmul.msk.f32.gmra.mxu0 %vm11996_vm0, %v9988_v48 }
 0x881   : > { %v10001_v32 = vpop.trf.xlu0 }
 0x889   : > { %v10005_v13 = vpop.trf.xlu0 }
 0x891   : > { %v10011_v63 = vpop.trf.xlu0 }
 0x899   : > { %v10015_v10 = vpop.trf.xlu0 }
 0x8a1   : > { %v10019_v40 = vpop.trf.xlu0 }
 0x8a9   : > { %v10025_v22 = vpop.trf.xlu0 }
 0x8b1   : > { %v10029_v2 = vpop.trf.xlu0 }
 0x8b9   : > { %v10033_v21 = vpop.trf.xlu0 }
 0x8c0   : > { %v3465_v19 = vpop.f32.mrf.mxu0 }
 0x8c1   : > { %v3477_v46 = vmul.f32 %v3465_v19, %v12131_v18 }
 0x8c8   : > { %v3468_v39 = vpop.f32.mrf.mxu0 }
 0x8c9   : > { %v3478_v38 = vmul.f32 %v3468_v39, %v12131_v18  ;;  %v3402_v39 = vld [vmem:[%s11954_s10 + $0x30] sm:$0xff] }
 0x8d0   : > { %v3471_v3 = vpop.f32.mrf.mxu0 }
 0x8d1   : > { %v3479_v20 = vmul.f32 %v3471_v3, %v12131_v18 }
 0x8d8   : > { %v3474_v60 = vpop.f32.mrf.mxu0 }
 0x8d9   : > { %v3480_v12 = vmul.f32 %v3474_v60, %v12131_v18 }
 0x8db   : > { %3549 = vmatpush.msra.mxu2 %v3480_v12 }
 0x8dd   : > { %3550 = vmatpush.msra.mxu2 %v3479_v20 }
 0x8df   : > { %3551 = vmatpush.msra.mxu2 %v3478_v38 }
 0x8e1   : > { %3552 = vmatpush.msra.mxu2 %v3477_v46 }
 0x8e2   : > { %6283 = vmatmul.msk.f32.vlgmr.msra.gmra.mxu2 %vm678_vm2, %v10001_v32 }
 0x8ea   : > { %6284 = vmatmul.msk.f32.gmra.mxu2 %vm678_vm2, %v10005_v13 }
 0x8f2   : > { %6285 = vmatmul.msk.f32.gmra.mxu2 %vm678_vm2, %v10011_v63 }
 0x8fa   : > { %6286 = vmatmul.msk.f32.gmra.mxu2 %vm678_vm2, %v10015_v10 }
 0x902   : > { %6287 = vmatmul.msk.f32.gmra.mxu2 %vm678_vm2, %v10019_v40 }
 0x90a   : > { %6288 = vmatmul.msk.f32.gmra.mxu2 %vm678_vm2, %v10025_v22 }
 0x912   : > { %6289 = vmatmul.msk.f32.gmra.mxu2 %vm678_vm2, %v10029_v2 }
 0x91a   : > { %6290 = vmatmul.msk.f32.gmra.mxu2 %vm678_vm2, %v10033_v21 }
 0x965   : > { %v3554_v58 = vpop.f32.mrf.mxu2 }
 0x96d   : > { %v3557_v6 = vpop.f32.mrf.mxu2 }
 0x975   : > { %v3560_v34 = vpop.f32.mrf.mxu2 }
 0x97d   : > { %v3563_v62 = vpop.f32.mrf.mxu2 }
 0x985   : > { %v3566_v61 = vpop.f32.mrf.mxu2 }
 0x986   : > { %3600 = vperm.xlu1 %6541, %v3566_v61  }
 0x98d   : > { %v3569_v49 = vpop.f32.mrf.mxu2 }
 0x98e   : > { %3605 = vperm.xlu2 %6543, %v3569_v49  }
 0x995   : > { %v3572_v55 = vpop.f32.mrf.mxu2 }
 0x996   : > { %3610 = vperm.xlu1 %6541, %v3572_v55  }
 0x99d   : > { %v3575_v52 = vpop.f32.mrf.mxu2 }
 0x99e   : > { %3590 = vperm.xlu1 %6541, %v3560_v34   ;;  %3615 = vperm.xlu2 %6543, %v3575_v52  }
 0x9a6   : > { %3580 = vperm.xlu1 %6541, %v3554_v58   ;;  %3595 = vperm.xlu2 %6543, %v3563_v62  }
 0x9ae   : > { %3585 = vperm.xlu2 %6543, %v3557_v6  }
 0x9e8   : > { %v3606_v8 = vpop.permute.xlu2 %3605 }
 0x9e9   : > { %v10047_v42 = vsub.f32 %v9858_v47, %v3606_v8  ;;  %v10050_v26 = vsub.f32 %v9861_v59, %v3606_v8 }
 0x9eb   : > { %v3644_v27 = vmul.f32 %v10047_v42, %v10047_v42  ;;  %v3645_v5 = vmul.f32 %v10050_v26, %v10050_v26 }
 0x9ed   : > { %v3665_v43 = vadd.f32 %v3645_v5, %v3644_v27 }
 0x9ef   : > { %3666 = vadd.xlane.f32.xlu0 %v3665_v43 }
 0x9f8   : > { %v3601_v11 = vpop.permute.xlu1 %3600  ;;  %v3616_v28 = vpop.permute.xlu2 %3615 }
 0x9f9   : > { %v10060_v47 = vsub.f32 %v9943_v24, %v3601_v11  ;;  %v10063_v59 = vsub.f32 %v9936_v33, %v3601_v11  ;;  %v10070_v23 = vsub.f32 %v9917_v35, %v3616_v28  ;;  %v10073_v16 = vsub.f32 %v9919_v36, %v3616_v28  ;;  %v3399_v33 = vld [vmem:[%s11954_s10 + $0x18] sm:$0xff]  ;;  %v6438_v35 = vld [vmem:[%s11952_s8 + $0x28] sm:$0xff] }
 0x9fa   : > { %3252 = vmatmul.bf16.gmra.mxu1 %v6438_v35  ;;  %v3411_v28 = vld [vmem:[%s11955_s11 + $0x38] sm:$0xff]  ;;  %v3083_v35 = vld [vmem:[%s11953_s9 + $0x40] sm:$0xff] }
 0x9fb   : > { %v3642_v25 = vmul.f32 %v10060_v47, %v10060_v47  ;;  %v3643_v15 = vmul.f32 %v10063_v59, %v10063_v59  ;;  %v3648_v24 = vmul.f32 %v10070_v23, %v10070_v23  ;;  %v3649_v9 = vmul.f32 %v10073_v16, %v10073_v16 }
 0x9fd   : > { %v3662_v31 = vadd.f32 %v3643_v15, %v3642_v25  ;;  %v3671_v17 = vadd.f32 %v3649_v9, %v3648_v24  ;;  %v3077_v25 = vld [vmem:[%s11953_s9 + $0x10] sm:$0xff]  ;;  %v3080_v15 = vld [vmem:[%s11953_s9 + $0x28] sm:$0xff] }
 0x9fe   : > { %v3081_v24 = vld [vmem:[%s11953_s9 + $0x30] sm:$0xff]  ;;  %v3084_v9 = vld [vmem:[%s11953_s9 + $0x48] sm:$0xff] }
 0x9ff   : > { %3663 = vadd.xlane.f32.xlu2 %v3662_v31  ;;  %v3079_v31 = vld [vmem:[%s11953_s9 + $0x20] sm:$0xff] }
 0xa00   : > { %v3596_v36 = vpop.permute.xlu2 %3595 }
 0xa01   : > { %v10099_v38 = vsub.f32 %v9913_v0, %v3596_v36  ;;  %v10102_v46 = vsub.f32 %v9907_v1, %v3596_v36  ;;  %v6439_v1 = vld [vmem:[%s11952_s8 + $0x30] sm:$0xff] }
 0xa02   : > { %v3085_v36 = vld [vmem:[%s11953_s9 + $0x50] sm:$0xff] }
 0xa03   : > { %3865 = vperm.xlu0 %6542, %v3399_v33   ;;  %v3640_v6 = vmul.f32 %v10099_v38, %v10099_v38  ;;  %v3641_v34 = vmul.f32 %v10102_v46, %v10102_v46  ;;  %v3082_v33 = vld [vmem:[%s11953_s9 + $0x38] sm:$0xff] }
 0xa07   : > { %3672 = vadd.xlane.f32.xlu2 %v3671_v17  ;;  %v3086_v17 = vld [vmem:[%s11953_s9 + $0x58] sm:$0xff] }
 0xa08   : > { %v3611_v19 = vpop.permute.xlu1 %3610  ;;  %v3586_v61 = vpop.permute.xlu2 %3585 }
 0xa09   : > { %v10089_v3 = vsub.f32 %v9887_v29, %v3611_v19  ;;  %v10092_v60 = vsub.f32 %v9890_v56, %v3611_v19  ;;  %v3405_v56 = vld [vmem:[%s11955_s11 + $0x8] sm:$0xff]  ;;  %v10125_v55 = vsub.f32 %v9955_v51, %v3586_v61 }
 0xa0a   : > { %3257 = vmatmul.bf16.gmra.mxu1 %v6439_v1  ;;  %v3088_v19 = vld [vmem:[%s11953_s9 + $0x68] sm:$0xff] }
 0xa0b   : > { %v3646_v12 = vmul.f32 %v10089_v3, %v10089_v3  ;;  %v3647_v20 = vmul.f32 %v10092_v60, %v10092_v60  ;;  %3880 = vperm.xlu0 %6542, %v3402_v39   ;;  %v3636_v8 = vmul.f32 %v10125_v55, %v10125_v55  ;;  %v3087_v39 = vld [vmem:[%s11953_s9 + $0x60] sm:$0xff] }
 0xa0d   : > { %v3668_v58 = vadd.f32 %v3647_v20, %v3646_v12  ;;  %v3090_v12 = vld [vmem:[%s11953_s9 + $0x78] sm:$0xff]  ;;  %v3089_v20 = vld [vmem:[%s11953_s9 + $0x70] sm:$0xff] }
 0xa0f   : > { %3669 = vadd.xlane.f32.xlu1 %v3668_v58  ;;  %v3396_v58 = vld [vmem:[%s11954_s10] sm:$0xff] }
 0xa10   : > { %v3591_v29 = vpop.permute.xlu1 %3590 }
 0xa11   : > { %v10112_v62 = vsub.f32 %v9881_v57, %v3591_v29  ;;  %v10115_v0 = vsub.f32 %v9872_v37, %v3591_v29  ;;  %v10128_v57 = vsub.f32 %v9952_v53, %v3586_v61  ;;  %v3659_v37 = vadd.f32 %v3641_v34, %v3640_v6  ;;  %v3397_v29 = vld [vmem:[%s11954_s10 + $0x8] sm:$0xff]  ;;  %v3398_v6 = vld [vmem:[%s11954_s10 + $0x10] sm:$0xff]  ;;  %v3400_v34 = vld [vmem:[%s11954_s10 + $0x20] sm:$0xff] }
 0xa12   : > { %v3401_v61 = vld [vmem:[%s11954_s10 + $0x28] sm:$0xff] }
 0xa13   : > { %v3638_v49 = vmul.f32 %v10112_v62, %v10112_v62  ;;  %v3639_v50 = vmul.f32 %v10115_v0, %v10115_v0  ;;  %3911 = vperm.xlu0 %6542, %v3405_v56   ;;  %v3637_v51 = vmul.f32 %v10128_v57, %v10128_v57 }
 0xa15   : > { %v3656_v52 = vadd.f32 %v3639_v50, %v3638_v49  ;;  %v3653_v54 = vadd.f32 %v3637_v51, %v3636_v8  ;;  %v3403_v49 = vld [vmem:[%s11954_s10 + $0x38] sm:$0xff] }
 0xa16   : > { %v3407_v51 = vld [vmem:[%s11955_s11 + $0x18] sm:$0xff] }
 0xa17   : > { %3660 = vadd.xlane.f32.xlu1 %v3659_v37  ;;  %3657 = vadd.xlane.f32.xlu2 %v3656_v52  ;;  %v3404_v52 = vld [vmem:[%s11955_s11] sm:$0xff] }
 0xa18   : > { %v3581_v30 = vpop.permute.xlu1 %3580 }
 0xa19   : > { %v10138_v27 = vsub.f32 %v9939_v4, %v3581_v30  ;;  %v10141_v53 = vsub.f32 %v12126_v45, %v3581_v30  ;;  %v6440_v4 = vld [vmem:[%s11952_s8 + $0x38] sm:$0xff]  ;;  %v3406_v30 = vld [vmem:[%s11955_s11 + $0x10] sm:$0xff] }
 0xa1a   : > { %3262 = vmatmul.bf16.gmra.mxu1 %v6440_v4  ;;  %v3078_v45 = vld [vmem:[%s11953_s9 + $0x18] sm:$0xff]  ;;  %v3410_v4 = vld [vmem:[%s11955_s11 + $0x30] sm:$0xff] }
 0xa1b   : > { %v3634_v5 = vmul.f32 %v10138_v27, %v10138_v27  ;;  %v3635_v43 = vmul.f32 %v10141_v53, %v10141_v53  ;;  %3926 = vperm.xlu0 %6542, %v3408_v7  }
 0xa1d   : > { %v3650_v11 = vadd.f32 %v3635_v43, %v3634_v5  ;;  %v3409_v5 = vld [vmem:[%s11955_s11 + $0x28] sm:$0xff]  ;;  %v3233_v43 = vpop.f32.mrf.mxu1 }
 0xa1f   : > { %3654 = vadd.xlane.f32.xlu1 %v3653_v54  ;;  %3651 = vadd.xlane.f32.xlu2 %v3650_v11  ;;  %v3344_v54 = vpop.f32.mrf.mxu3 }
 0xa23   : > { %3941 = vperm.xlu0 %6542, %v3411_v28  }
 0xa37   : > { %3108 = vperm.xlu2 %6543, %v3078_v45   ;;  %v3960_v45 = vadd.f32 1.0, %v3344_v54 }
 0xa38   : > { %3103 = vperm.xlu1 %6541, %v3077_v25   ;;  %v3235_v25 = vpop.f32.mrf.mxu1 }
 0xa3f   : > { %3118 = vperm.xlu2 %6543, %v3080_v15   ;;  %v3347_v15 = vpop.f32.mrf.mxu3 }
 0xa40   : > { %3113 = vperm.xlu1 %6541, %v3079_v31   ;;  %v3961_v31 = vadd.f32 1.0, %v3347_v15 }
 0xa47   : > { %3128 = vperm.xlu2 %6543, %v3082_v33   ;;  %v3238_v33 = vpop.f32.mrf.mxu1 }
 0xa48   : > { %3123 = vperm.xlu1 %6541, %v3081_v24  }
 0xa4f   : > { %3138 = vperm.xlu2 %6543, %v3084_v9  }
 0xa50   : > { %3133 = vperm.xlu1 %6541, %v3083_v35   ;;  %v3240_v35 = vpop.f32.mrf.mxu1 }
 0xa57   : > { %3148 = vperm.xlu2 %6543, %v3086_v17  }
 0xa58   : > { %3143 = vperm.xlu1 %6541, %v3085_v36   ;;  %v3243_v36 = vpop.f32.mrf.mxu1 }
 0xa5f   : > { %3158 = vperm.xlu2 %6543, %v3088_v19  }
 0xa60   : > { %3153 = vperm.xlu1 %6541, %v3087_v39   ;;  %v3245_v39 = vpop.f32.mrf.mxu1 }
 0xa62   : > { %v3667_v37 = vpop.xlane.xlu0 %3666 }
 0xa67   : > { %3168 = vperm.xlu2 %6543, %v3090_v12  }
 0xa68   : > { %3163 = vperm.xlu1 %6541, %v3089_v20  }
 0xa6f   : > { %3850 = vperm.xlu2 %6543, %v3396_v58   ;;  %v3248_v58 = vpop.f32.mrf.mxu1 }
 0xa70   : > { %3855 = vperm.xlu1 %6541, %v3397_v29  }
 0xa72   : > { %v3664_v56 = vpop.xlane.xlu2 %3663 }
 0xa77   : > { %3860 = vperm.xlu2 %6543, %v3398_v6   ;;  %v3250_v6 = vpop.f32.mrf.mxu1 }
 0xa78   : > { %3870 = vperm.xlu1 %6541, %v3400_v34  }
 0xa7a   : > { %v3673_v1 = vpop.xlane.xlu2 %3672 }
 0xa7b   : > { %3682 = vmatpush.msrb.mxu0 %v3673_v1 }
 0xa7f   : > { %3875 = vperm.xlu2 %6543, %v3401_v61   ;;  %v3253_v61 = vpop.f32.mrf.mxu1 }
 0xa80   : > { %3885 = vperm.xlu1 %6541, %v3403_v49  }
 0xa82   : > { %v3670_v50 = vpop.xlane.xlu1 %3669 }
 0xa83   : > { %3683 = vmatpush.msrb.mxu0 %v3670_v50 }
 0xa85   : > { %3684 = vmatpush.msrb.mxu0 %v3667_v37 }
 0xa87   : > { %3906 = vperm.xlu2 %6543, %v3404_v52   ;;  %3685 = vmatpush.msrb.mxu0 %v3664_v56  ;;  %v3255_v37 = vpop.f32.mrf.mxu1 }
 0xa88   : > { %3916 = vperm.xlu1 %6541, %v3406_v30  }
 0xa8a   : > { %v3658_v7 = vpop.xlane.xlu2 %3657  ;;  %v3661_v8 = vpop.xlane.xlu1 %3660 }
 0xa8b   : > { %3686 = vmatpush.msrb.mxu0 %v3661_v8 }
 0xa8d   : > { %3687 = vmatpush.msrb.mxu0 %v3658_v7 }
 0xa8f   : > { %3921 = vperm.xlu2 %6543, %v3407_v51   ;;  %v3258_v8 = vpop.f32.mrf.mxu1 }
 0xa90   : > { %3931 = vperm.xlu1 %6541, %v3409_v5  }
 0xa92   : > { %v3655_v11 = vpop.xlane.xlu1 %3654  ;;  %v3652_v28 = vpop.xlane.xlu2 %3651 }
 0xa93   : > { %3688 = vmatpush.msrb.mxu0 %v3655_v11 }
 0xa95   : > { %3689 = vmatpush.msrb.mxu0 %v3652_v28 }
 0xa96   : > { %6291 = vmatmul.msk.f32.vlgmr.msrb.gmra.mxu0 %vm11996_vm0, %v9968_v14 }
 0xa97   : > { %3936 = vperm.xlu2 %6543, %v3410_v4   ;;  %v3260_v54 = vpop.f32.mrf.mxu1 }
 0xa98   : > { %3970 = vperm.xlu1 %6541, %v3960_v45  }
 0xa9a   : > { %v3109_v14 = vpop.permute.xlu2 %3108 }
 0xa9b   : > { %v3236_v17 = vadd.f32 %v3235_v25, %v3109_v14 }
 0xa9e   : > { %6292 = vmatmul.msk.f32.gmra.mxu0 %vm11996_vm0, %v9974_v41 }
 0xa9f   : > { %3975 = vperm.xlu2 %6543, %v3961_v31   ;;  %v3263_v4 = vpop.f32.mrf.mxu1 }
 0xaa2   : > { %v3119_v12 = vpop.permute.xlu2 %3118 }
 0xaa6   : > { %6293 = vmatmul.msk.f32.gmra.mxu0 %vm11996_vm0, %v9982_v44  ;;  %v3241_v44 = vadd.f32 %v3240_v35, %v3119_v12 }
 0xaa7   : > { %v3265_v15 = vpop.f32.mrf.mxu1 }
 0xaaa   : > { %v3104_v24 = vpop.permute.xlu1 %3103 }
 0xaab   : > { %v3234_v9 = vadd.f32 %v3233_v43, %v3104_v24 }
 0xaad   : > { %6265 = vmatmul.msk.f32.gmra.mxu3 %vm3274_vm7, %v3234_v9 }
 0xaae   : > { %6294 = vmatmul.msk.f32.gmra.mxu0 %vm11996_vm0, %v9988_v48  ;;  %v3129_v48 = vpop.permute.xlu2 %3128 }
 0xaaf   : > { %v3246_v56 = vadd.f32 %v3245_v39, %v3129_v48 }
 0xab2   : > { %v3114_v19 = vpop.permute.xlu1 %3113 }
 0xab3   : > { %v3239_v41 = vadd.f32 %v3238_v33, %v3114_v19 }
 0xab5   : > { %6266 = vmatmul.msk.f32.gmra.mxu3 %vm3274_vm7, %v3236_v17 }
 0xab6   : > { %v3139_v49 = vpop.permute.xlu2 %3138 }
 0xab7   : > { %v3251_v50 = vadd.f32 %v3250_v6, %v3139_v49 }
 0xaba   : > { %v3124_v20 = vpop.permute.xlu1 %3123 }
 0xabb   : > { %v3244_v29 = vadd.f32 %v3243_v36, %v3124_v20 }
 0xabd   : > { %6267 = vmatmul.msk.f32.gmra.mxu3 %vm3274_vm7, %v3239_v41 }
 0xabe   : > { %v3149_v7 = vpop.permute.xlu2 %3148 }
 0xabf   : > { %v3256_v51 = vadd.f32 %v3255_v37, %v3149_v7 }
 0xac2   : > { %v3134_v34 = vpop.permute.xlu1 %3133 }
 0xac3   : > { %v3249_v1 = vadd.f32 %v3248_v58, %v3134_v34 }
 0xac5   : > { %6268 = vmatmul.msk.f32.gmra.mxu3 %vm3274_vm7, %v3241_v44 }
 0xac6   : > { %v3159_v11 = vpop.permute.xlu2 %3158 }
 0xac7   : > { %v3261_v28 = vadd.f32 %v3260_v54, %v3159_v11 }
 0xaca   : > { %v3144_v52 = vpop.permute.xlu1 %3143 }
 0xacb   : > { %v3254_v30 = vadd.f32 %v3253_v61, %v3144_v52 }
 0xacd   : > { %6269 = vmatmul.msk.f32.gmra.mxu3 %vm3274_vm7, %v3244_v29 }
 0xace   : > { %v3169_v31 = vpop.permute.xlu2 %3168 }
 0xacf   : > { %v3266_v33 = vadd.f32 %v3265_v15, %v3169_v31 }
 0xad2   : > { %v3154_v5 = vpop.permute.xlu1 %3153 }
 0xad3   : > { %v3259_v43 = vadd.f32 %v3258_v8, %v3154_v5 }
 0xad5   : > { %6270 = vmatmul.msk.f32.gmra.mxu3 %vm3274_vm7, %v3246_v56 }
 0xada   : > { %v3164_v45 = vpop.permute.xlu1 %3163 }
 0xadb   : > { %v3264_v25 = vadd.f32 %v3263_v4, %v3164_v45 }
 0xadd   : > { %6271 = vmatmul.msk.f32.gmra.mxu3 %vm3274_vm7, %v3249_v1 }
 0xae5   : > { %6272 = vmatmul.msk.f32.gmra.mxu3 %vm3274_vm7, %v3251_v50 }
 0xaed   : > { %6273 = vmatmul.msk.f32.gmra.mxu3 %vm3274_vm7, %v3254_v30 }
 0xaf5   : > { %6274 = vmatmul.msk.f32.gmra.mxu3 %vm3274_vm7, %v3256_v51 }
 0xafd   : > { %6275 = vmatmul.msk.f32.gmra.mxu3 %vm3274_vm7, %v3259_v43 }
 0xb05   : > { %6276 = vmatmul.msk.f32.gmra.mxu3 %vm3274_vm7, %v3261_v28 }
 0xb0d   : > { %6277 = vmatmul.msk.f32.gmra.mxu3 %vm3274_vm7, %v3264_v25 }
 0xb13   : > { %v3691_v24 = vpop.f32.mrf.mxu0 }
 0xb14   : > { %v3703_v14 = vmul.f32 %v3691_v24, %v12131_v18 }
 0xb15   : > { %6278 = vmatmul.msk.f32.gmra.mxu3 %vm3274_vm7, %v3266_v33 }
 0xb16   : > { %v3707_v41 = vadd.f32 1e-05, %v3703_v14 }
 0xb18   : > { %vm3717_vm15 = vweird.f32 %v3707_v41 }
 0xb1b   : > { %v3694_v9 = vpop.f32.mrf.mxu0 }
 0xb1c   : > { %v3704_v35 = vmul.f32 %v3694_v9, %v12131_v18 }
 0xb1e   : > { %v3708_v17 = vadd.f32 1e-05, %v3704_v35 }
 0xb20   : > { %7302 = vrsqrt.f32 %v3708_v17  ;;  %vm3727_vm13 = vweird.f32 %v3708_v17 }
 0xb23   : > { %v3697_v36 = vpop.f32.mrf.mxu0 }
 0xb24   : > { %v3705_v19 = vmul.f32 %v3697_v36, %v12131_v18 }
 0xb26   : > { %v3709_v39 = vadd.f32 1e-05, %v3705_v19  ;;  %v7303_v20 = vpop.eup %7302 }
 0xb27   : > { %v3722_v34 = vmul.f32 %v7303_v20, %v3708_v17  ;;  %vm3728_vm0 = vweird.f32 %v7303_v20 }
 0xb28   : > { %7304 = vrsqrt.f32 %v3709_v39  ;;  %vm3737_vm5 = vweird.f32 %v3709_v39  ;;  %vm3729_vm1 = vmor %vm3727_vm13, %vm3728_vm0 }
 0xb29   : > { %7306 = vrsqrt.f32 %v3707_v41  ;;  %v3723_v50 = vmul.f32 %v7303_v20, %v3722_v34 }
 0xb2b   : > { %v3700_v12 = vpop.f32.mrf.mxu0  ;;  %v3724_v5 = vmul.f32 0.5, %v3723_v50 }
 0xb2c   : > { %v3706_v44 = vmul.f32 %v3700_v12, %v12131_v18 }
 0xb2d   : > { %v3725_v4 = vsub.f32 1.5, %v3724_v5  ;;  %v3866_v5 = vpop.permute.xlu0 %3865 }
 0xb2e   : > { %v7305_v58 = vpop.eup %7304  ;;  %v3710_v29 = vadd.f32 1e-05, %v3706_v44 }
 0xb2f   : > { %v7307_v48 = vpop.eup %7306  ;;  %v3732_v56 = vmul.f32 %v7305_v58, %v3709_v39  ;;  %vm3738_vm6 = vweird.f32 %v7305_v58  ;;  %v3726_v9 = vmul.f32 %v7303_v20, %v3725_v4 }
 0xb30   : > { %7308 = vrsqrt.f32 %v3710_v29  ;;  %v3350_v6 = vpop.f32.mrf.mxu3  ;;  %v3712_v61 = vmul.f32 %v7307_v48, %v3707_v41  ;;  %vm3747_vm4 = vweird.f32 %v3710_v29  ;;  %vm3739_vm3 = vmor %vm3737_vm5, %vm3738_vm6  ;;  %vm3718_vm12 = vweird.f32 %v7307_v48 }
 0xb31   : > { %v3962_v1 = vadd.f32 1.0, %v3350_v6  ;;  %v3733_v49 = vmul.f32 %v7305_v58, %v3732_v56  ;;  %v3730_v36 = vsel %vm3729_vm1, %v7303_v20, %v3726_v9  ;;  %vm3719_vm14 = vmor %vm3717_vm15, %vm3718_vm12  ;;  %v10270_v56 = vpop.permute.xlu2 %3850 }
 0xb32   : > { %v3713_v52 = vmul.f32 %v7307_v48, %v3712_v61 }
 0xb33   : > { %3980 = vperm.xlu0 %6542, %v3962_v1   ;;  %v3734_v30 = vmul.f32 0.5, %v3733_v49  ;;  %v3856_v1 = vpop.permute.xlu1 %3855 }
 0xb34   : > { %v3714_v43 = vmul.f32 0.5, %v3713_v52 }
 0xb35   : > { %v3735_v11 = vsub.f32 1.5, %v3734_v30 }
 0xb36   : > { %v7309_v37 = vpop.eup %7308  ;;  %v3715_v45 = vsub.f32 1.5, %v3714_v43 }
 0xb37   : > { %v3742_v7 = vmul.f32 %v7309_v37, %v3710_v29  ;;  %vm3748_vm8 = vweird.f32 %v7309_v37  ;;  %v3736_v15 = vmul.f32 %v7305_v58, %v3735_v11 }
 0xb38   : > { %v3353_v8 = vpop.f32.mrf.mxu3  ;;  %vm3749_vm7 = vmor %vm3747_vm4, %vm3748_vm8  ;;  %v3716_v14 = vmul.f32 %v7307_v48, %v3715_v45 }
 0xb39   : > { %v3743_v51 = vmul.f32 %v7309_v37, %v3742_v7  ;;  %v3963_v18 = vadd.f32 1.0, %v3353_v8  ;;  %v3740_v35 = vsel %vm3739_vm3, %v7305_v58, %v3736_v15  ;;  %v10272_v34 = vpop.permute.xlu2 %3860 }
 0xb3a   : > { %v3720_v19 = vsel %vm3719_vm14, %v7307_v48, %v3716_v14 }
 0xb3b   : > { %v3744_v54 = vmul.f32 0.5, %v3743_v51  ;;  %3985 = vperm.xlu1 %6541, %v3963_v18   ;;  %v10276_v49 = vpop.permute.xlu1 %3870 }
 0xb3d   : > { %v3745_v28 = vsub.f32 1.5, %v3744_v54 }
 0xb3f   : > { %v3746_v25 = vmul.f32 %v7309_v37, %v3745_v28  ;;  %v10288_v28 = vpop.permute.xlu0 %3880 }
 0xb40   : > { %v3356_v31 = vpop.f32.mrf.mxu3 }
 0xb41   : > { %v3964_v33 = vadd.f32 1.0, %v3356_v31  ;;  %v3750_v24 = vsel %vm3749_vm7, %v7309_v37, %v3746_v25  ;;  %v10274_v61 = vpop.permute.xlu2 %3875 }
 0xb42   : > { %3763 = vmatpush.msra.mxu0 %v3750_v24 }
 0xb43   : > { %3990 = vperm.xlu2 %6543, %v3964_v33   ;;  %v10280_v52 = vpop.permute.xlu1 %3885 }
 0xb44   : > { %3764 = vmatpush.msra.mxu0 %v3740_v35 }
 0xb46   : > { %3765 = vmatpush.msra.mxu0 %v3730_v36 }
 0xb47   : > { %v3912_v25 = vpop.permute.xlu0 %3911 }
 0xb48   : > { %v3359_v12 = vpop.f32.mrf.mxu3  ;;  %3766 = vmatpush.msra.mxu0 %v3720_v19 }
 0xb49   : > { %v3965_v44 = vadd.f32 1.0, %v3359_v12  ;;  %6295 = vmatmul.msk.f32.vlgmr.msra.gmra.mxu0 %vm678_vm2, %v10001_v32  ;;  %v10278_v50 = vpop.permute.xlu2 %3906 }
 0xb4b   : > { %3995 = vperm.xlu0 %6542, %v3965_v44   ;;  %v10282_v8 = vpop.permute.xlu1 %3916 }
 0xb4f   : > { %v10294_v33 = vpop.permute.xlu0 %3926 }
 0xb50   : > { %v3362_v39 = vpop.f32.mrf.mxu3 }
 0xb51   : > { %v3966_v29 = vadd.f32 1.0, %v3362_v39  ;;  %6296 = vmatmul.msk.f32.gmra.mxu0 %vm678_vm2, %v10005_v13  ;;  %v3922_v30 = vpop.permute.xlu2 %3921 }
 0xb53   : > { %4000 = vperm.xlu1 %6541, %v3966_v29   ;;  %v10286_v54 = vpop.permute.xlu1 %3931 }
 0xb57   : > { %v10300_v35 = vpop.permute.xlu0 %3941 }
 0xb58   : > { %v3365_v17 = vpop.f32.mrf.mxu3 }
 0xb59   : > { %v3967_v58 = vadd.f32 1.0, %v3365_v17  ;;  %6297 = vmatmul.msk.f32.gmra.mxu0 %vm678_vm2, %v10011_v63  ;;  %v10284_v18 = vpop.permute.xlu2 %3936 }
 0xb5b   : > { %4005 = vperm.xlu2 %6543, %v3967_v58   ;;  %v3971_v4 = vpop.permute.xlu1 %3970 }
 0xb60   : > { %v3368_v41 = vpop.f32.mrf.mxu3 }
 0xb61   : > { %6298 = vmatmul.msk.f32.gmra.mxu0 %vm678_vm2, %v10015_v10  ;;  %4026 = vperm.xlu0 %6542, %v3368_v41   ;;  %v3976_v11 = vpop.permute.xlu2 %3975 }
 0xb68   : > { %v3371_v20 = vpop.f32.mrf.mxu3 }
 0xb69   : > { %6299 = vmatmul.msk.f32.gmra.mxu0 %vm678_vm2, %v10019_v40  ;;  %4031 = vperm.xlu1 %6541, %v3371_v20  }
 0xb70   : > { %v3374_v32 = vpop.f32.mrf.mxu3 }
 0xb71   : > { %6300 = vmatmul.msk.f32.gmra.mxu0 %vm678_vm2, %v10025_v22  ;;  %4036 = vperm.xlu2 %6543, %v3374_v32  }
 0xb78   : > { %v3377_v13 = vpop.f32.mrf.mxu3 }
 0xb79   : > { %6301 = vmatmul.msk.f32.gmra.mxu0 %vm678_vm2, %v10029_v2  ;;  %4041 = vperm.xlu0 %6542, %v3377_v13  }
 0xb80   : > { %v3380_v63 = vpop.f32.mrf.mxu3 }
 0xb81   : > { %6302 = vmatmul.msk.f32.gmra.mxu0 %vm678_vm2, %v10033_v21  ;;  %4046 = vperm.xlu1 %6541, %v3380_v63  }
 0xb88   : > { %v3383_v10 = vpop.f32.mrf.mxu3 }
 0xb89   : > { %4051 = vperm.xlu2 %6543, %v3383_v10  }
 0xb90   : > { %v3386_v48 = vpop.f32.mrf.mxu3 }
 0xb91   : > { %4056 = vperm.xlu0 %6542, %v3386_v48  }
 0xb98   : > { %v3389_v40 = vpop.f32.mrf.mxu3 }
 0xb99   : > { %4061 = vperm.xlu1 %6541, %v3389_v40  }
 0xb9d   : > { %v10290_v45 = vpop.permute.xlu2 %3990 }
 0xba5   : > { %v10304_v19 = vpop.permute.xlu0 %3980 }
 0xbad   : > { %v3986_v15 = vpop.permute.xlu1 %3985 }
 0xbb5   : > { %v10292_v31 = vpop.permute.xlu2 %4005 }
 0xbbd   : > { %v10310_v32 = vpop.permute.xlu0 %3995 }
 0xbc5   : > { %v10296_v24 = vpop.permute.xlu1 %4000 }
 0xbc6   : > { %v3768_v22 = vpop.f32.mrf.mxu0 }
 0xbc7   : > { %3794 = vperm.xlu1 %6541, %v3768_v22  }
 0xbcb   : > { %v10298_v9 = vpop.permute.xlu2 %4036 }
 0xbce   : > { %v3771_v6 = vpop.f32.mrf.mxu0 }
 0xbcf   : > { %3799 = vperm.xlu2 %6543, %v3771_v6  }
 0xbd6   : > { %v3774_v2 = vpop.f32.mrf.mxu0 }
 0xbd7   : > { %3804 = vperm.xlu1 %6541, %v3774_v2  }
 0xbdb   : > { %v4032_v14 = vpop.permute.xlu1 %4031 }
 0xbde   : > { %v3777_v21 = vpop.f32.mrf.mxu0 }
 0xbdf   : > { %3809 = vperm.xlu2 %6543, %v3777_v21  }
 0xbe3   : > { %v10302_v36 = vpop.permute.xlu2 %4051 }
 0xbe6   : > { %v3780_v37 = vpop.f32.mrf.mxu0 }
 0xbe7   : > { %3814 = vperm.xlu0 %6542, %v3780_v37  }
 0xbee   : > { %v3783_v7 = vpop.f32.mrf.mxu0 }
 0xbef   : > { %3819 = vperm.xlu1 %6541, %v3783_v7  }
 0xbf3   : > { %v10306_v12 = vpop.permute.xlu1 %4046 }
 0xbf6   : > { %v3786_v51 = vpop.f32.mrf.mxu0 }
 0xbf7   : > { %3824 = vperm.xlu2 %6543, %v3786_v51  }
 0xbfe   : > { %v3789_v43 = vpop.f32.mrf.mxu0 }
 0xbff   : > { %3829 = vperm.xlu1 %6541, %v3789_v43  }
 0xc0b   : > { %v10312_v10 = vpop.permute.xlu1 %4061 }
 0xc29   : > { %v3800_v44 = vpop.permute.xlu2 %3799 }
 0xc2a   : > { %v3834_v39 = vmul.f32 %v3800_v44, %v10125_v55  ;;  %v3835_v29 = vmul.f32 %v3800_v44, %v10128_v57  ;;  %v4027_v57 = vpop.permute.xlu0 %4026 }
 0xc2c   : > { %v3890_v17 = vmul.f32 %v3856_v1, %v3834_v39  ;;  %v3891_v58 = vmul.f32 %v3856_v1, %v3835_v29 }
 0xc2e   : > { %v3946_v41 = vadd.f32 %v3912_v25, %v3890_v17  ;;  %v3947_v20 = vadd.f32 %v3912_v25, %v3891_v58 }
 0xc30   : > { %v4010_v13 = vmul.f32 %v3976_v11, %v3946_v41  ;;  %v4011_v63 = vmul.f32 %v3976_v11, %v3947_v20 }
 0xc32   : > { %v10314_v48 = vadd.f32 %v4032_v14, %v4010_v13  ;;  %v10316_v40 = vadd.f32 %v4032_v14, %v4011_v63  ;;  %v4042_v20 = vpop.permute.xlu0 %4041 }
 0xc34   : > { %v6305_v22 = vmul.f32 -1.442695, %v10314_v48  ;;  %v6306_v55 = vmul.f32 -1.442695, %v10316_v40 }
 0xc36   : > { %7310 = vpow2.f32 %v6305_v22 }
 0xc37   : > { %7312 = vpow2.f32 %v6306_v55 }
 0xc39   : > { %v3810_v6 = vpop.permute.xlu2 %3809  ;;  %v3795_v2 = vpop.permute.xlu1 %3794 }
 0xc3a   : > { %v3838_v1 = vmul.f32 %v3810_v6, %v10099_v38  ;;  %v3839_v21 = vmul.f32 %v3810_v6, %v10102_v46  ;;  %v3832_v37 = vmul.f32 %v3795_v2, %v10138_v27  ;;  %v3833_v7 = vmul.f32 %v3795_v2, %v10141_v53 }
 0xc3c   : > { %v7311_v51 = vpop.eup %7310  ;;  %v3894_v43 = vmul.f32 %v3866_v5, %v3838_v1  ;;  %v3895_v11 = vmul.f32 %v3866_v5, %v3839_v21  ;;  %v3888_v25 = vmul.f32 %v10270_v56, %v3832_v37  ;;  %v3889_v14 = vmul.f32 %v10270_v56, %v3833_v7 }
 0xc3d   : > { %v7313_v44 = vpop.eup %7312  ;;  %v4130_v39 = vadd.f32 1.0, %v7311_v51 }
 0xc3e   : > { %v4131_v29 = vadd.f32 1.0, %v7313_v44  ;;  %v3950_v17 = vadd.f32 %v3922_v30, %v3894_v43  ;;  %v3951_v58 = vadd.f32 %v3922_v30, %v3895_v11  ;;  %v3944_v38 = vadd.f32 %v10278_v50, %v3888_v25 }
 0xc3f   : > { %7314 = vrcp.f32 %v4130_v39  ;;  %v3945_v46 = vadd.f32 %v10278_v50, %v3889_v14  ;;  %v4183_v1 = vand.u32 2147483647, %v4130_v39  ;;  %v4185_v7 = vand.u32 2147483648, %v4130_v39 }
 0xc40   : > { %7316 = vrcp.f32 %v4131_v29  ;;  %v4014_v27 = vmul.f32 %v3986_v15, %v3950_v17  ;;  %v4015_v53 = vmul.f32 %v3986_v15, %v3951_v58  ;;  %v4008_v41 = vmul.f32 %v3971_v4, %v3944_v38 }
 0xc41   : > { %v4009_v5 = vmul.f32 %v3971_v4, %v3945_v46  ;;  %v4198_v43 = vand.u32 2147483647, %v4131_v29  ;;  %v4200_v11 = vand.u32 2147483648, %v4131_v29  ;;  %vm4179_vm2 = vweird.f32 %v4130_v39 }
 0xc42   : > { %v10328_v13 = vadd.f32 %v4042_v20, %v4014_v27  ;;  %v10330_v63 = vadd.f32 %v4042_v20, %v4015_v53  ;;  %v10332_v56 = vadd.f32 %v4027_v57, %v4008_v41  ;;  %vm10342_vm12 = vcmp.eq.f32.partialorder %v4183_v1, 8.507059e+37 }
 0xc43   : > { %v10334_v22 = vadd.f32 %v4027_v57, %v4009_v5  ;;  %vm4194_vm14 = vweird.f32 %v4131_v29  ;;  %vm10350_vm1 = vcmp.eq.f32.partialorder %v4198_v43, 8.507059e+37 }
 0xc44   : > { %v6309_v30 = vmul.f32 -1.442695, %v10328_v13  ;;  %v6310_v55 = vmul.f32 -1.442695, %v10330_v63  ;;  %v6303_v50 = vmul.f32 -1.442695, %v10332_v56 }
 0xc45   : > { %v7315_v6 = vpop.eup %7314  ;;  %v6304_v15 = vmul.f32 -1.442695, %v10334_v22 }
 0xc46   : > { %v7317_v2 = vpop.eup %7316  ;;  %7318 = vpow2.f32 %v6309_v30  ;;  %v4175_v4 = vmul.f32 %v7315_v6, %v4130_v39  ;;  %vm4180_vm0 = vweird.f32 %v7315_v6 }
 0xc47   : > { %7320 = vpow2.f32 %v6310_v55  ;;  %v4190_v21 = vmul.f32 %v7317_v2, %v4131_v29  ;;  %vm4195_vm13 = vweird.f32 %v7317_v2  ;;  %vm4181_vm15 = vmor %vm4179_vm2, %vm4180_vm0 }
 0xc48   : > { %7322 = vpow2.f32 %v6303_v50  ;;  %v4176_v37 = vsub.f32 1.0, %v4175_v4  ;;  %vm4196_vm3 = vmor %vm4194_vm14, %vm4195_vm13 }
 0xc49   : > { %7324 = vpow2.f32 %v6304_v15  ;;  %v3805_v57 = vpop.permute.xlu1 %3804  ;;  %v4191_v51 = vsub.f32 1.0, %v4190_v21 }
 0xc4a   : > { %v3836_v25 = vmul.f32 %v3805_v57, %v10112_v62  ;;  %v3837_v14 = vmul.f32 %v3805_v57, %v10115_v0  ;;  %v4177_v44 = vmul.f32 %v7315_v6, %v4176_v37  ;;  %v4186_v0 = vor.u32 1.1754944e-38, %v4185_v7 }
 0xc4b   : > { %v4192_v58 = vmul.f32 %v7317_v2, %v4191_v51 }
 0xc4c   : > { %v7319_v38 = vpop.eup %7318  ;;  %v3892_v46 = vmul.f32 %v10272_v34, %v3836_v25  ;;  %v3893_v27 = vmul.f32 %v10272_v34, %v3837_v14  ;;  %v4178_v53 = vadd.f32 %v7315_v6, %v4177_v44  ;;  %v4201_v34 = vor.u32 1.1754944e-38, %v4200_v11 }
 0xc4d   : > { %v7321_v41 = vpop.eup %7320  ;;  %v10348_v62 = vadd.f32 1.0, %v7319_v38  ;;  %v4193_v20 = vadd.f32 %v7317_v2, %v4192_v58 }
 0xc4e   : > { %v7323_v5 = vpop.eup %7322  ;;  %v3948_v30 = vadd.f32 %v10282_v8, %v3892_v46  ;;  %v3949_v55 = vadd.f32 %v10282_v8, %v3893_v27  ;;  %v4182_v50 = vsel %vm4181_vm15, %v7315_v6, %v4178_v53  ;;  %v10362_v21 = vadd.f32 1.0, %v7321_v41  ;;  %v4057_v6 = vpop.permute.xlu0 %4056 }
 0xc4f   : > { %v7325_v29 = vpop.eup %7324  ;;  %7326 = vrcp.f32 %v10348_v62  ;;  %v10358_v15 = vadd.f32 1.0, %v7323_v5  ;;  %v4187_v4 = vsel %vm10342_vm12, %v4186_v0, %v4182_v50  ;;  %v4197_v1 = vsel %vm4196_vm3, %v7317_v2, %v4193_v20 }
 0xc50   : > { %v10364_v37 = vadd.f32 1.0, %v7325_v29  ;;  %v4012_v7 = vmul.f32 %v10304_v19, %v3948_v30  ;;  %v4013_v8 = vmul.f32 %v10304_v19, %v3949_v55  ;;  %v4202_v51 = vsel %vm10350_vm1, %v4201_v34, %v4197_v1 }
 0xc51   : > { %7328 = vrcp.f32 %v10358_v15  ;;  %v3825_v57 = vpop.permute.xlu2 %3824  ;;  %v4386_v43 = vmul.f32 %v4187_v4, %v10314_v48  ;;  %v4387_v14 = vmul.f32 %v4202_v51, %v10316_v40  ;;  %v4155_v44 = vand.u32 2147483648, %v10358_v15 }
 0xc52   : > { %7330 = vrcp.f32 %v10364_v37  ;;  %v10374_v2 = vadd.f32 %v10298_v9, %v4012_v7  ;;  %v10377_v11 = vadd.f32 %v10298_v9, %v4013_v8  ;;  %v3844_v25 = vmul.f32 %v3825_v57, %v10089_v3 }
 0xc53   : > { %v3845_v19 = vmul.f32 %v3825_v57, %v10092_v60  ;;  %7332 = vrcp.f32 %v10362_v21  ;;  %v6889_v46 = vpack.i.bf16 %v4387_v14, %v4386_v43  ;;  %vm4149_vm5 = vweird.f32 %v10358_v15 }
 0xc54   : > { %v6307_v48 = vmul.f32 -1.442695, %v10374_v2  ;;  %v6308_v17 = vmul.f32 -1.442695, %v10377_v11  ;;  %v3900_v58 = vmul.f32 %v10288_v28, %v3844_v25  ;;  %v4153_v3 = vand.u32 2147483647, %v10358_v15 }
 0xc55   : > { %v10387_v38 = vpop.eup %7326  ;;  %v3901_v9 = vmul.f32 %v10288_v28, %v3845_v19  ;;  %vm4164_vm8 = vweird.f32 %v10364_v37  ;;  %v4168_v40 = vand.u32 2147483647, %v10364_v37  ;;  %v4170_v27 = vand.u32 2147483648, %v10364_v37  ;;  %6890 = vrot.lane.b32.xlu0 %v6889_v46, %s7529_s21 }
 0xc56   : > { %7334 = vpow2.f32 %v6307_v48  ;;  %v3956_v60 = vadd.f32 %v10284_v18, %v3900_v58  ;;  %v4156_v28 = vor.u32 1.1754944e-38, %v4155_v44  ;;  %v4235_v0 = vmul.f32 %v10387_v38, %v10348_v62 }
 0xc57   : > { %v10396_v53 = vpop.eup %7328  ;;  %7336 = vpow2.f32 %v6308_v17  ;;  %v3957_v41 = vadd.f32 %v10284_v18, %v3901_v9  ;;  %vm4239_vm6 = vweird.f32 %v10348_v62  ;;  %v4171_v50 = vor.u32 1.1754944e-38, %v4170_v27 }
 0xc58   : > { %v7331_v20 = vpop.eup %7330  ;;  %v4020_v39 = vmul.f32 %v10296_v24, %v3956_v60  ;;  %v4145_v5 = vmul.f32 %v10396_v53, %v10358_v15  ;;  %vm4150_vm4 = vweird.f32 %v10396_v53  ;;  %vm10415_vm0 = vcmp.eq.f32.partialorder %v4153_v3, 8.507059e+37 }
 0xc59   : > { %v4021_v30 = vmul.f32 %v10296_v24, %v3957_v41  ;;  %v3815_v55 = vpop.permute.xlu0 %3814  ;;  %v4160_v18 = vmul.f32 %v7331_v20, %v10364_v37  ;;  %vm4165_vm7 = vweird.f32 %v7331_v20  ;;  %v10409_v34 = vpop.eup %7332  ;;  %vm10419_vm2 = vcmp.eq.f32.partialorder %v4168_v40, 8.507059e+37  ;;  %vm10442_vm13 = vmor %vm4149_vm5, %vm4150_vm4 }
 0xc5a   : > { %v10411_v29 = vadd.f32 %v4057_v6, %v4020_v39  ;;  %v3840_v4 = vmul.f32 %v3815_v55, %v10060_v47  ;;  %v3841_v1 = vmul.f32 %v3815_v55, %v10063_v59  ;;  %v4146_v7 = vsub.f32 1.0, %v4145_v5  ;;  %vm10451_vm14 = vmor %vm4164_vm8, %vm4165_vm7 }
 0xc5b   : > { %v10423_v57 = vadd.f32 %v4057_v6, %v4021_v30  ;;  %v4161_v51 = vsub.f32 1.0, %v4160_v18  ;;  %v4236_v43 = vsub.f32 1.0, %v4235_v0  ;;  %vm4240_vm12 = vweird.f32 %v10387_v38 }
 0xc5c   : > { %v7335_v25 = vpop.eup %7334  ;;  %v6315_v47 = vmul.f32 -1.442695, %v10411_v29  ;;  %v3896_v59 = vmul.f32 %v10276_v49, %v3840_v4  ;;  %v3897_v19 = vmul.f32 %v10276_v49, %v3841_v1  ;;  %v4147_v14 = vmul.f32 %v10396_v53, %v4146_v7  ;;  %vm10463_vm15 = vmor %vm4239_vm6, %vm4240_vm12 }
 0xc5d   : > { %v7337_v44 = vpop.eup %7336  ;;  %v10430_v48 = vadd.f32 1.0, %v7335_v25  ;;  %v6316_v17 = vmul.f32 -1.442695, %v10423_v57  ;;  %v4162_v6 = vmul.f32 %v7331_v20, %v4161_v51  ;;  %v4237_v58 = vmul.f32 %v10387_v38, %v4236_v43 }
 0xc5e   : > { %v10434_v9 = vadd.f32 1.0, %v7337_v44  ;;  %7338 = vpow2.f32 %v6315_v47  ;;  %v3952_v46 = vadd.f32 %v10294_v33, %v3896_v59  ;;  %v3953_v3 = vadd.f32 %v10294_v33, %v3897_v19 }
 0xc5f   : > { %7340 = vrcp.f32 %v10430_v48  ;;  %v4148_v60 = vadd.f32 %v10396_v53, %v4147_v14  ;;  %v4163_v40 = vadd.f32 %v7331_v20, %v4162_v6  ;;  %v4238_v33 = vadd.f32 %v10387_v38, %v4237_v58 }
 0xc60   : > { %7342 = vrcp.f32 %v10434_v9  ;;  %v4016_v15 = vmul.f32 %v10290_v45, %v3952_v46  ;;  %v4017_v41 = vmul.f32 %v10290_v45, %v3953_v3  ;;  %v4243_v37 = vand.u32 2147483647, %v10348_v62 }
 0xc61   : > { %7344 = vpow2.f32 %v6316_v17  ;;  %v3820_v39 = vpop.permute.xlu1 %3819  ;;  %v4152_v5 = vsel %vm10442_vm13, %v10396_v53, %v4148_v60  ;;  %v4167_v30 = vsel %vm10451_vm14, %v7331_v20, %v4163_v40  ;;  %v4242_v45 = vsel %vm10463_vm15, %v10387_v38, %v4238_v33 }
 0xc62   : > { %v10477_v55 = vadd.f32 %v10306_v12, %v4016_v15  ;;  %v10480_v18 = vadd.f32 %v10306_v12, %v4017_v41  ;;  %v3842_v4 = vmul.f32 %v3820_v39, %v10047_v42  ;;  %v3843_v1 = vmul.f32 %v3820_v39, %v10050_v26 }
 0xc63   : > { %v4157_v53 = vsel %vm10415_vm0, %v4156_v28, %v4152_v5  ;;  %v4172_v20 = vsel %vm10419_vm2, %v4171_v50, %v4167_v30  ;;  %vm10488_vm1 = vcmp.eq.f32.partialorder %v4243_v37, 8.507059e+37  ;;  %v4245_v38 = vand.u32 2147483648, %v10348_v62 }
 0xc64   : > { %v7339_v51 = vpop.eup %7338  ;;  %v6311_v12 = vmul.f32 -1.442695, %v10477_v55  ;;  %v6312_v43 = vmul.f32 -1.442695, %v10480_v18  ;;  %v3898_v42 = vmul.f32 %v10274_v61, %v3842_v4  ;;  %v3899_v26 = vmul.f32 %v10274_v61, %v3843_v1 }
 0xc65   : > { %v10497_v8 = vpop.eup %7340  ;;  %v10499_v28 = vadd.f32 1.0, %v7339_v51  ;;  %v4384_v50 = vmul.f32 %v4157_v53, %v10332_v56  ;;  %v4385_v24 = vmul.f32 %v4172_v20, %v10334_v22  ;;  %v4246_v25 = vor.u32 1.1754944e-38, %v4245_v38 }
 0xc66   : > { %v10503_v47 = vpop.eup %7342  ;;  %7346 = vpow2.f32 %v6311_v12  ;;  %v3954_v62 = vadd.f32 %v10286_v54, %v3898_v42  ;;  %v3955_v59 = vadd.f32 %v10286_v54, %v3899_v26  ;;  %v4250_v19 = vmul.f32 %v10409_v34, %v10362_v21 }
 0xc67   : > { %v7345_v61 = vpop.eup %7344  ;;  %7348 = vrcp.f32 %v10499_v28  ;;  %v6884_v14 = vpack.i.bf16 %v4385_v24, %v4384_v50  ;;  %v4247_v56 = vsel %vm10488_vm1, %v4246_v25, %v4242_v45  ;;  %vm4254_vm3 = vweird.f32 %v10362_v21 }
 0xc68   : > { %v10512_v44 = vadd.f32 1.0, %v7345_v61  ;;  %7350 = vpow2.f32 %v6312_v43  ;;  %v4018_v22 = vmul.f32 %v10310_v32, %v3954_v62  ;;  %v4019_v17 = vmul.f32 %v10310_v32, %v3955_v59 }
 0xc69   : > { %6885 = vrot.lane.b32.xlu2 %v6884_v14, %s7529_s21  ;;  %v4251_v54 = vsub.f32 1.0, %v4250_v19  ;;  %v4258_v6 = vand.u32 2147483647, %v10362_v21  ;;  %v4260_v58 = vand.u32 2147483648, %v10362_v21  ;;  %vm4255_vm5 = vweird.f32 %v10409_v34 }
 0xc6a   : > { %7352 = vrcp.f32 %v10512_v44  ;;  %v10522_v46 = vadd.f32 %v10302_v36, %v4018_v22  ;;  %v10525_v3 = vadd.f32 %v10302_v36, %v4019_v17  ;;  %v4390_v60 = vmul.f32 %v4247_v56, %v10328_v13  ;;  %vm4256_vm6 = vmor %vm4254_vm3, %vm4255_vm5 }
 0xc6b   : > { %v4252_v32 = vmul.f32 %v10409_v34, %v4251_v54  ;;  %vm10529_vm8 = vcmp.eq.f32.partialorder %v4258_v6, 8.507059e+37  ;;  %v4205_v40 = vmul.f32 %v10497_v8, %v10430_v48  ;;  %v4261_v36 = vor.u32 1.1754944e-38, %v4260_v58 }
 0xc6c   : > { %v7347_v27 = vpop.eup %7346  ;;  %v6313_v33 = vmul.f32 -1.442695, %v10522_v46  ;;  %v6314_v15 = vmul.f32 -1.442695, %v10525_v3  ;;  %vm4209_vm4 = vweird.f32 %v10430_v48  ;;  %v4213_v13 = vand.u32 2147483647, %v10430_v48 }
 0xc6d   : > { %v10539_v41 = vpop.eup %7348  ;;  %v10541_v0 = vadd.f32 1.0, %v7347_v27  ;;  %v4253_v37 = vadd.f32 %v10409_v34, %v4252_v32  ;;  %v4206_v39 = vsub.f32 1.0, %v4205_v40  ;;  %vm4210_vm7 = vweird.f32 %v10497_v8 }
 0xc6e   : > { %v7351_v5 = vpop.eup %7350  ;;  %7354 = vpow2.f32 %v6313_v33  ;;  %v4215_v30 = vand.u32 2147483648, %v10430_v48  ;;  %v4220_v45 = vmul.f32 %v10503_v47, %v10434_v9  ;;  %vm4224_vm0 = vweird.f32 %v10434_v9  ;;  %vm4211_vm12 = vmor %vm4209_vm4, %vm4210_vm7 }
 0xc6f   : > { %7356 = vrcp.f32 %v10541_v0  ;;  %v4257_v4 = vsel %vm4256_vm6, %v10409_v34, %v4253_v37  ;;  %v4207_v1 = vmul.f32 %v10497_v8, %v4206_v39  ;;  %v10559_v20 = vadd.f32 1.0, %v7351_v5 }
 0xc70   : > { %v10557_v53 = vpop.eup %7352  ;;  %7358 = vpow2.f32 %v6314_v15  ;;  %v4262_v21 = vsel %vm10529_vm8, %v4261_v36, %v4257_v4  ;;  %vm10563_vm2 = vcmp.eq.f32.partialorder %v4213_v13, 8.507059e+37  ;;  %v4216_v12 = vor.u32 1.1754944e-38, %v4215_v30 }
 0xc71   : > { %v4391_v38 = vmul.f32 %v4262_v21, %v10330_v63  ;;  %v3830_v51 = vpop.permute.xlu1 %3829  ;;  %v4208_v34 = vadd.f32 %v10497_v8, %v4207_v1  ;;  %v4221_v43 = vsub.f32 1.0, %v4220_v45  ;;  %vm4225_vm13 = vweird.f32 %v10503_v47 }
 0xc72   : > { %v3846_v42 = vmul.f32 %v3830_v51, %v10070_v23  ;;  %v3847_v26 = vmul.f32 %v3830_v51, %v10073_v16  ;;  %v4228_v50 = vand.u32 2147483647, %v10434_v9  ;;  %v4230_v62 = vand.u32 2147483648, %v10434_v9  ;;  %vm4226_vm15 = vmor %vm4224_vm0, %vm4225_vm13 }
 0xc73   : > { %v6899_v24 = vpack.i.bf16 %v4391_v38, %v4390_v60  ;;  %v4212_v63 = vsel %vm4211_vm12, %v10497_v8, %v4208_v34  ;;  %v4222_v25 = vmul.f32 %v10503_v47, %v4221_v43  ;;  %7360 = vrcp.f32 %v10559_v20 }
 0xc74   : > { %v7355_v59 = vpop.eup %7354  ;;  %v3902_v23 = vmul.f32 %v10280_v52, %v3846_v42  ;;  %v3903_v16 = vmul.f32 %v10280_v52, %v3847_v26  ;;  %v4217_v48 = vsel %vm10563_vm2, %v4216_v12, %v4212_v63  ;;  %vm4229_vm14 = vcmp.eq.f32.partialorder %v4228_v50, 8.507059e+37 }
 0xc75   : > { %v10585_v19 = vpop.eup %7356  ;;  %v10587_v61 = vadd.f32 1.0, %v7355_v59  ;;  %6900 = vrot.lane.b32.xlu2 %v6899_v24, %s7529_s21  ;;  %v4223_v8 = vadd.f32 %v10503_v47, %v4222_v25  ;;  %v4231_v14 = vor.u32 1.1754944e-38, %v4230_v62  ;;  %v4388_v52 = vmul.f32 %v4217_v48, %v10374_v2 }
 0xc76   : > { %v7359_v56 = vpop.eup %7358  ;;  %v3958_v22 = vadd.f32 %v10300_v35, %v3902_v23  ;;  %v3959_v17 = vadd.f32 %v10300_v35, %v3903_v16  ;;  %v4325_v54 = vmul.f32 %v10539_v41, %v10499_v28  ;;  %vm4329_vm1 = vweird.f32 %v10499_v28 }
 0xc77   : > { %v10600_v6 = vadd.f32 1.0, %v7359_v56  ;;  %7362 = vrcp.f32 %v10587_v61  ;;  %v4227_v58 = vsel %vm4226_vm15, %v10503_v47, %v4223_v8  ;;  %vm4330_vm3 = vweird.f32 %v10539_v41 }
 0xc78   : > { %v4022_v35 = vmul.f32 %v10292_v31, %v3958_v22  ;;  %v4023_v32 = vmul.f32 %v10292_v31, %v3959_v17  ;;  %v4232_v49 = vsel %vm4229_vm14, %v4231_v14, %v4227_v58  ;;  %v4326_v9 = vsub.f32 1.0, %v4325_v54  ;;  %vm4331_vm8 = vmor %vm4329_vm1, %vm4330_vm3 }
 0xc79   : > { %v4389_v60 = vmul.f32 %v4232_v49, %v10377_v11  ;;  %v4333_v2 = vand.u32 2147483647, %v10499_v28  ;;  %v4335_v40 = vand.u32 2147483648, %v10499_v28  ;;  %v10611_v27 = vpop.eup %7360  ;;  %v4340_v15 = vmul.f32 %v10557_v53, %v10512_v44 }
 0xc7a   : > { %v10614_v47 = vadd.f32 %v10312_v10, %v4022_v35  ;;  %v10617_v33 = vadd.f32 %v10312_v10, %v4023_v32  ;;  %v4327_v31 = vmul.f32 %v10539_v41, %v4326_v9  ;;  %7364 = vrcp.f32 %v10600_v6 }
 0xc7b   : > { %v6894_v11 = vpack.i.bf16 %v4389_v60, %v4388_v52  ;;  %vm10623_vm5 = vcmp.eq.f32.partialorder %v4333_v2, 8.507059e+37  ;;  %v4336_v37 = vor.u32 1.1754944e-38, %v4335_v40  ;;  %v4341_v5 = vsub.f32 1.0, %v4340_v15 }
 0xc7c   : > { %v6317_v39 = vmul.f32 -1.442695, %v10614_v47  ;;  %v6318_v13 = vmul.f32 -1.442695, %v10617_v33  ;;  %v4328_v10 = vadd.f32 %v10539_v41, %v4327_v31  ;;  %vm4344_vm4 = vweird.f32 %v10512_v44 }
 0xc7d   : > { %v10630_v30 = vpop.eup %7362  ;;  %6895 = vrot.lane.b32.xlu1 %v6894_v11, %s7529_s21  ;;  %v4348_v45 = vand.u32 2147483647, %v10512_v44  ;;  %v4350_v4 = vand.u32 2147483648, %v10512_v44  ;;  %v4265_v1 = vmul.f32 %v10585_v19, %v10541_v0  ;;  %v4342_v7 = vmul.f32 %v10557_v53, %v4341_v5 }
 0xc7e   : > { %7366 = vpow2.f32 %v6317_v39  ;;  %v4332_v21 = vsel %vm4331_vm8, %v10539_v41, %v4328_v10  ;;  %vm4345_vm6 = vweird.f32 %v10557_v53  ;;  %vm4269_vm0 = vweird.f32 %v10541_v0 }
 0xc7f   : > { %7368 = vpow2.f32 %v6318_v13  ;;  %v4337_v28 = vsel %vm10623_vm5, %v4336_v37, %v4332_v21  ;;  %vm10647_vm7 = vcmp.eq.f32.partialorder %v4348_v45, 8.507059e+37  ;;  %v4343_v51 = vadd.f32 %v10557_v53, %v4342_v7  ;;  %vm4346_vm2 = vmor %vm4344_vm4, %vm4345_vm6 }
 0xc80   : > { %v4351_v34 = vor.u32 1.1754944e-38, %v4350_v4  ;;  %v4396_v12 = vmul.f32 %v4337_v28, %v10411_v29  ;;  %v4266_v41 = vsub.f32 1.0, %v4265_v1  ;;  %v10654_v43 = vpop.eup %7364  ;;  %vm4270_vm12 = vweird.f32 %v10585_v19 }
 0xc81   : > { %v4273_v42 = vand.u32 2147483647, %v10541_v0  ;;  %v4275_v26 = vand.u32 2147483648, %v10541_v0  ;;  %v4280_v50 = vmul.f32 %v10611_v27, %v10559_v20  ;;  %v4347_v24 = vsel %vm4346_vm2, %v10557_v53, %v4343_v51  ;;  %vm4271_vm1 = vmor %vm4269_vm0, %vm4270_vm12 }
 0xc82   : > { %v4267_v63 = vmul.f32 %v10585_v19, %v4266_v41  ;;  %vm4284_vm13 = vweird.f32 %v10559_v20  ;;  %v4288_v29 = vand.u32 2147483647, %v10559_v20  ;;  %v4352_v44 = vsel %vm10647_vm7, %v4351_v34, %v4347_v24 }
 0xc83   : > { %vm10669_vm14 = vcmp.eq.f32.partialorder %v4273_v42, 8.507059e+37  ;;  %v4281_v62 = vsub.f32 1.0, %v4280_v50  ;;  %vm4285_vm15 = vweird.f32 %v10611_v27  ;;  %v4397_v23 = vmul.f32 %v4352_v44, %v10423_v57 }
 0xc84   : > { %v7367_v59 = vpop.eup %7366  ;;  %v4268_v53 = vadd.f32 %v10585_v19, %v4267_v63  ;;  %v4276_v16 = vor.u32 1.1754944e-38, %v4275_v26  ;;  %v4290_v48 = vand.u32 2147483648, %v10559_v20  ;;  %vm10684_vm3 = vcmp.eq.f32.partialorder %v4288_v29, 8.507059e+37  ;;  %vm4286_vm5 = vmor %vm4284_vm13, %vm4285_vm15 }
 0xc85   : > { %v7369_v8 = vpop.eup %7368  ;;  %v10677_v14 = vadd.f32 1.0, %v7367_v59  ;;  %v4282_v56 = vmul.f32 %v10611_v27, %v4281_v62  ;;  %v4295_v57 = vmul.f32 %v10630_v30, %v10587_v61  ;;  %v6914_v52 = vpack.i.bf16 %v4397_v23, %v4396_v12 }
 0xc86   : > { %v10690_v17 = vadd.f32 1.0, %v7369_v8  ;;  %v4272_v54 = vsel %vm4271_vm1, %v10585_v19, %v4268_v53  ;;  %v4291_v58 = vor.u32 1.1754944e-38, %v4290_v48  ;;  %vm4300_vm8 = vweird.f32 %v10630_v30 }
 0xc87   : > { %7370 = vrcp.f32 %v10677_v14  ;;  %v4277_v0 = vsel %vm10669_vm14, %v4276_v16, %v4272_v54  ;;  %v4283_v35 = vadd.f32 %v10611_v27, %v4282_v56  ;;  %v4296_v32 = vsub.f32 1.0, %v4295_v57  ;;  %6915 = vrot.lane.b32.xlu2 %v6914_v52, %s7529_s21 }
 0xc88   : > { %7372 = vrcp.f32 %v10690_v17  ;;  %v4392_v19 = vmul.f32 %v4277_v0, %v10477_v55  ;;  %v4303_v49 = vand.u32 2147483647, %v10587_v61  ;;  %v4305_v2 = vand.u32 2147483648, %v10587_v61 }
 0xc89   : > { %v4287_v9 = vsel %vm4286_vm5, %v10611_v27, %v4283_v35  ;;  %v4297_v60 = vmul.f32 %v10630_v30, %v4296_v32  ;;  %v4310_v40 = vmul.f32 %v10654_v43, %v10600_v6  ;;  %vm4299_vm4 = vweird.f32 %v10587_v61 }
 0xc8a   : > { %v4292_v31 = vsel %vm10684_vm3, %v4291_v58, %v4287_v9  ;;  %vm4301_vm6 = vmor %vm4299_vm4, %vm4300_vm8  ;;  %vm4304_vm7 = vcmp.eq.f32.partialorder %v4303_v49, 8.507059e+37  ;;  %v4306_v27 = vor.u32 1.1754944e-38, %v4305_v2  ;;  %vm4315_vm0 = vweird.f32 %v10654_v43 }
 0xc8b   : > { %v4393_v20 = vmul.f32 %v4292_v31, %v10480_v18  ;;  %v4298_v55 = vadd.f32 %v10630_v30, %v4297_v60  ;;  %v4311_v15 = vsub.f32 1.0, %v4310_v40  ;;  %v4320_v11 = vand.u32 2147483648, %v10600_v6 }
 0xc8c   : > { %v4318_v18 = vand.u32 2147483647, %v10600_v6  ;;  %vm4314_vm2 = vweird.f32 %v10600_v6  ;;  %v4363_v21 = vand.u32 2147483647, %v10677_v14  ;;  %v4365_v38 = vand.u32 2147483648, %v10677_v14 }
 0xc8d   : > { %v7371_v36 = vpop.eup %7370  ;;  %v6904_v37 = vpack.i.bf16 %v4393_v20, %v4392_v19  ;;  %v4302_v39 = vsel %vm4301_vm6, %v10630_v30, %v4298_v55  ;;  %v4312_v13 = vmul.f32 %v10654_v43, %v4311_v15  ;;  %vm4316_vm12 = vmor %vm4314_vm2, %vm4315_vm0  ;;  %v4321_v4 = vor.u32 1.1754944e-38, %v4320_v11 }
 0xc8e   : > { %v7373_v10 = vpop.eup %7372  ;;  %v4307_v5 = vsel %vm4304_vm7, %v4306_v27, %v4302_v39  ;;  %v4355_v61 = vmul.f32 %v7371_v36, %v10677_v14  ;;  %vm4319_vm13 = vcmp.eq.f32.partialorder %v4318_v18, 8.507059e+37  ;;  %vm4360_vm14 = vweird.f32 %v7371_v36 }
 0xc8f   : > { %6905 = vrot.lane.b32.xlu0 %v6904_v37, %s7529_s21  ;;  %v4313_v45 = vadd.f32 %v10654_v43, %v4312_v13  ;;  %v4370_v30 = vmul.f32 %v7373_v10, %v10690_v17  ;;  %v4394_v28 = vmul.f32 %v4307_v5, %v10522_v46  ;;  %vm4359_vm15 = vweird.f32 %v10677_v14 }
 0xc90   : > { %v4356_v1 = vsub.f32 1.0, %v4355_v61  ;;  %v4380_v41 = vand.u32 2147483648, %v10690_v17  ;;  %vm4375_vm1 = vweird.f32 %v7373_v10  ;;  %vm4361_vm3 = vmor %vm4359_vm15, %vm4360_vm14  ;;  %v4366_v46 = vor.u32 1.1754944e-38, %v4365_v38 }
 0xc91   : > { %v4317_v7 = vsel %vm4316_vm12, %v10654_v43, %v4313_v45  ;;  %v4371_v12 = vsub.f32 1.0, %v4370_v30  ;;  %v4378_v43 = vand.u32 2147483647, %v10690_v17  ;;  %vm4364_vm5 = vcmp.eq.f32.partialorder %v4363_v21, 8.507059e+37 }
 0xc92   : > { %v4322_v51 = vsel %vm4319_vm13, %v4321_v4, %v4317_v7  ;;  %v4357_v34 = vmul.f32 %v7371_v36, %v4356_v1  ;;  %vm4374_vm8 = vweird.f32 %v10690_v17  ;;  %v4381_v29 = vor.u32 1.1754944e-38, %v4380_v41 }
 0xc93   : > { %v4395_v6 = vmul.f32 %v4322_v51, %v10525_v3  ;;  %v4372_v26 = vmul.f32 %v7373_v10, %v4371_v12  ;;  %vm4376_vm4 = vmor %vm4374_vm8, %vm4375_vm1  ;;  %vm4379_vm6 = vcmp.eq.f32.partialorder %v4378_v43, 8.507059e+37  ;;  %vm12178_vm14 = vcmask 916480  }
 0xc94   : > { %v4358_v42 = vadd.f32 %v7371_v36, %v4357_v34  ;;  %vm12179_vm15 = vmmov %vm12178_vm14 }
 0xc95   : > { %v6909_v50 = vpack.i.bf16 %v4395_v6, %v4394_v28  ;;  %v4373_v63 = vadd.f32 %v7373_v10, %v4372_v26 }
 0xc96   : > { %v4362_v24 = vsel %vm4361_vm3, %v7371_v36, %v4358_v42 }
 0xc97   : > { %6910 = vrot.lane.b32.xlu1 %v6909_v50, %s7529_s21  ;;  %v4367_v3 = vsel %vm4364_vm5, %v4366_v46, %v4362_v24  ;;  %v4377_v44 = vsel %vm4376_vm4, %v7373_v10, %v4373_v63  ;;  %vm12183_vm5 = vmmov %vm12178_vm14 }
 0xc98   : > { %v4398_v25 = vmul.f32 %v4367_v3, %v10614_v47  ;;  %v4382_v62 = vsel %vm4379_vm6, %v4381_v29, %v4377_v44  ;;  %vm12184_vm8 = vmmov %vm12183_vm5 }
 0xc99   : > { %v4399_v59 = vmul.f32 %v4382_v62, %v10617_v33 }
 0xc9b   : > { %v6919_v23 = vpack.i.bf16 %v4399_v59, %v4398_v25 }
 0xc9d   : > { %6920 = vrot.lane.b32.xlu0 %v6919_v23, %s7529_s21  ;;  %s12162_s21 = smov 112  }
 0xcc3   : > { %v6886_v53 = vpop.permute.xlu2 %6885 }
 0xcc4   : > { %v6888_v16 = vunpack.i.h.bf16 %v6886_v53  ;;  %v6887_v48 = vunpack.i.l.bf16 %v6886_v53 }
 0xcc6   : > { %v4480_v8 = vsel %vm1526_vm9, %v6887_v48, %v6888_v16  ;;  %v4512_v14 = vsel %vm1526_vm9, 0.0, %v6887_v48  ;;  %v10744_v22 = vsel %vm1526_vm9, %v6888_v16, 0.0 }
 0xcc7   : > { %v10741_v56 = vpack.i.bf16 %v4480_v8, %v4512_v14  ;;  %v4528_v47 = vsel %vm1577_vm10, %v4512_v14, 0.0  ;;  %v6891_v33 = vpop.permute.xlu0 %6890  ;;  %v4529_v52 = vsel %vm1578_vm11, %v4480_v8, 0.0  ;;  %v4553_v35 = vpack.c.bf16 %v10744_v22, %v10744_v22 }
 0xcc8   : > { %v6893_v54 = vunpack.i.h.bf16 %v6891_v33  ;;  %v6892_v58 = vunpack.i.l.bf16 %v6891_v33  ;;  %v4544_v0 = vpack.c.bf16 %v4529_v52, %v4528_v47  ;;  %v4552_v11 = vpack.c.bf16 %v4480_v8, %v4512_v14 }
 0xcc9   : > { %6925 = vrot.lane.b32.xlu1 %v10741_v56, %s7532_s23  ;;  %6935 = vrot.lane.b32.xlu0 %v10741_v56, %s7531_s29  ;;  %v5162_v20 = vunpack.c.l.b16 %v4553_v35 }
 0xcca   : > { %v4521_v32 = vsel %vm1526_vm9, %v6893_v54, 0.0  ;;  %v4481_v19 = vsel %vm1526_vm9, %v6892_v58, %v6893_v54  ;;  %v10759_v49 = vsel %vm1526_vm9, 0.0, %v6892_v58  ;;  %v5160_v45 = vunpack.c.l.b16 %v4552_v11 }
 0xccb   : > { %v10763_v9 = vpack.i.bf16 %v10759_v49, %v10744_v22  ;;  %v10765_v60 = vpack.i.bf16 %v4521_v32, %v4481_v19  ;;  %v4555_v2 = vpack.c.bf16 %v4521_v32, %v4521_v32  ;;  %v4554_v31 = vpack.c.bf16 %v4481_v19, %v10759_v49 }
 0xccc   : > { %v4530_v10 = vsel %vm1577_vm10, %v10759_v49, 0.0  ;;  %v4531_v5 = vsel %vm1578_vm11, %v4481_v19, 0.0  ;;  %v5112_v28 = vunpack.c.l.b16 %v4544_v0  ;;  %v5113_v51 = vunpack.c.h.b16 %v4544_v0 }
 0xccd   : > { %6940 = vrot.lane.b32.xlu2 %v10763_v9, %s7532_s23  ;;  %v5165_v27 = vunpack.c.l.b16 %v4555_v2  ;;  %v5163_v18 = vunpack.c.l.b16 %v4554_v31  ;;  %v4545_v30 = vpack.c.bf16 %v4531_v5, %v4530_v10  ;;  %v5164_v41 = vunpack.c.h.b16 %v4554_v31 }
 0xcce   : > { %v5161_v50 = vunpack.c.h.b16 %v4552_v11 }
 0xccf   : > { %v6901_v40 = vpop.permute.xlu2 %6900  ;;  %v10779_v13 = vpack.c.b16 %v5165_v27, %v5162_v20  ;;  %v10795_v7 = vpack.c.b16 %v5163_v18, %v5160_v45  ;;  %v5114_v38 = vunpack.c.l.b16 %v4545_v30  ;;  %v5115_v34 = vunpack.c.h.b16 %v4545_v30 }
 0xcd0   : > { %v6903_v55 = vunpack.i.h.bf16 %v6901_v40  ;;  %v6902_v15 = vunpack.i.l.bf16 %v6901_v40  ;;  %v10821_v63 = vpack.c.b16 %v5164_v41, %v5161_v50 }
 0xcd1   : > { %6930 = vrot.lane.b32.xlu1 %v10741_v56, %s12162_s21  ;;  %6945 = vrot.lane.b32.xlu0 %v10765_v60, %s7532_s23  ;;  %v10801_v12 = vpack.c.b16 %v5114_v38, %v5112_v28  ;;  %v10803_v6 = vpack.c.b16 %v5115_v34, %v5113_v51 }
 0xcd2   : > { %v10775_v36 = vsel %vm1526_vm9, %v6903_v55, 0.0  ;;  %v4483_v37 = vsel %vm1526_vm9, %v6902_v15, %v6903_v55  ;;  %v4515_v39 = vsel %vm1526_vm9, 0.0, %v6902_v15 }
 0xcd3   : > { %v10787_v61 = vpack.i.bf16 %v10775_v36, %v4483_v37  ;;  %v4534_v4 = vsel %vm1577_vm10, %v4515_v39, 0.0  ;;  %v4535_v1 = vsel %vm1578_vm11, %v4483_v37, 0.0  ;;  %12164 = vst [vmem:[#allocation40_spill] sm:$0xff] %v10803_v6  ;;  %v6999_v62 = vpack.i.bf16 %v4483_v37, %v4515_v39 }
 0xcd4   : > { %v4547_v21 = vpack.c.bf16 %v4535_v1, %v4534_v4  ;;  %v4558_v53 = vpack.c.bf16 %v4483_v37, %v4515_v39  ;;  %v4559_v14 = vpack.c.bf16 %v10775_v36, %v10775_v36  ;;  %v7004_v4 = vpack.i.bf16 %v10759_v49, %v10775_v36 }
 0xcd5   : > { %6950 = vrot.lane.b32.xlu2 %v10763_v9, %s12162_s21 }
 0xcd6   : > { %v5170_v54 = vunpack.c.h.b16 %v4558_v53  ;;  %v5171_v2 = vunpack.c.l.b16 %v4559_v14  ;;  %v5118_v27 = vunpack.c.l.b16 %v4547_v21  ;;  %v5119_v37 = vunpack.c.h.b16 %v4547_v21 }
 0xcd7   : > { %v5169_v34 = vunpack.c.l.b16 %v4558_v53 }
 0xcd9   : > { %5196 = vrot.lane.b32.xlu1 %v10795_v7, %s12163_s19  ;;  %6955 = vrot.lane.b32.xlu0 %v10765_v60, %s12162_s21 }
 0xcdd   : > { %6960 = vrot.lane.b32.xlu2 %v10765_v60, %s7531_s29 }
 0xce1   : > { %6985 = vrot.lane.b32.xlu0 %v10787_v61, %s7532_s23  ;;  %v10809_v42 = vpop.permute.xlu2 %6915 }
 0xce2   : > { %v6918_v26 = vunpack.i.h.bf16 %v10809_v42  ;;  %v6917_v43 = vunpack.i.l.bf16 %v10809_v42 }
 0xce4   : > { %v10816_v46 = vsel %vm1526_vm9, %v6917_v43, %v6918_v26  ;;  %v10819_v24 = vsel %vm1526_vm9, 0.0, %v6917_v43  ;;  %v10918_v14 = vsel %vm1526_vm9, %v6918_v26, 0.0 }
 0xce5   : > { %5198 = vrot.lane.b32.xlu2 %v10821_v63, %s12163_s19  ;;  %v4540_v3 = vsel %vm1577_vm10, %v10819_v24, 0.0  ;;  %v4541_v29 = vsel %vm1578_vm11, %v10816_v46, 0.0 }
 0xce6   : > { %v10833_v44 = vpack.c.bf16 %v4541_v29, %v4540_v3 }
 0xce9   : > { %6995 = vrot.lane.b32.xlu0 %v10787_v61, %s12162_s21 }
 0xcef   : > { %v6896_v25 = vpop.permute.xlu1 %6895 }
 0xcf0   : > { %v6898_v59 = vunpack.i.h.bf16 %v6896_v25  ;;  %v6897_v23 = vunpack.i.l.bf16 %v6896_v25 }
 0xcf1   : > { %7000 = vrot.lane.b32.xlu0 %v6999_v62, %s7531_s29 }
 0xcf2   : > { %v4522_v16 = vsel %vm1526_vm9, %v6898_v59, 0.0  ;;  %v4482_v48 = vsel %vm1526_vm9, %v6897_v23, %v6898_v59  ;;  %v10839_v8 = vsel %vm1526_vm9, 0.0, %v6897_v23 }
 0xcf3   : > { %v6974_v47 = vpack.i.bf16 %v4522_v16, %v4482_v48  ;;  %v10844_v33 = vpack.i.bf16 %v4482_v48, %v10839_v8  ;;  %v4556_v52 = vpack.c.bf16 %v4482_v48, %v10839_v8  ;;  %v4557_v58 = vpack.c.bf16 %v4522_v16, %v4522_v16 }
 0xcf4   : > { %v10850_v0 = vpack.i.bf16 %v4515_v39, %v4522_v16  ;;  %v4532_v35 = vsel %vm1577_vm10, %v10839_v8, 0.0  ;;  %v4533_v40 = vsel %vm1578_vm11, %v4482_v48, 0.0 }
 0xcf5   : > { %6975 = vrot.lane.b32.xlu2 %v6974_v47, %s7531_s29  ;;  %6965 = vrot.lane.b32.xlu1 %v10844_v33, %s7532_s23  ;;  %v5167_v32 = vunpack.c.h.b16 %v4556_v52  ;;  %v5168_v19 = vunpack.c.l.b16 %v4557_v58  ;;  %v4546_v31 = vpack.c.bf16 %v4533_v40, %v4532_v35  ;;  %v5166_v38 = vunpack.c.l.b16 %v4556_v52 }
 0xcf7   : > { %v10857_v20 = vpack.c.b16 %v5170_v54, %v5167_v32  ;;  %v10859_v55 = vpack.c.b16 %v5171_v2, %v5168_v19  ;;  %v5116_v15 = vunpack.c.l.b16 %v4546_v31  ;;  %v5117_v11 = vunpack.c.h.b16 %v4546_v31 }
 0xcf8   : > { %v10888_v50 = vpack.c.b16 %v5169_v34, %v5166_v38  ;;  %v4565_v2 = vpack.c.bf16 %v10918_v14, %v10918_v14  ;;  %v5125_v34 = vunpack.c.h.b16 %v10833_v44 }
 0xcf9   : > { %5204 = vrot.lane.b32.xlu0 %v10857_v20, %s12163_s19  ;;  %v10863_v39 = vpack.c.b16 %v5118_v27, %v5116_v15  ;;  %v10865_v18 = vpack.c.b16 %v5119_v37, %v5117_v11 }
 0xcfb   : > { %12165 = vst [vmem:[#allocation34_spill] sm:$0xff] %v10865_v18 }
 0xcfd   : > { %6980 = vrot.lane.b32.xlu2 %v10850_v0, %s7532_s23  ;;  %6970 = vrot.lane.b32.xlu1 %v10844_v33, %s12162_s21 }
 0xd01   : > { %v6906_v10 = vpop.permute.xlu0 %6905 }
 0xd02   : > { %v6908_v5 = vunpack.i.h.bf16 %v6906_v10  ;;  %v6907_v45 = vunpack.i.l.bf16 %v6906_v10 }
 0xd04   : > { %v4484_v1 = vsel %vm1526_vm9, %v6907_v45, %v6908_v5  ;;  %v10875_v21 = vsel %vm1526_vm9, 0.0, %v6907_v45  ;;  %v4524_v59 = vsel %vm1526_vm9, %v6908_v5, 0.0  ;;  %v5180_v45 = vunpack.c.l.b16 %v4565_v2 }
 0xd05   : > { %6990 = vrot.lane.b32.xlu2 %v10850_v0, %s12162_s21  ;;  %7005 = vrot.lane.b32.xlu1 %v7004_v4, %s7531_s29  ;;  %v4536_v30 = vsel %vm1577_vm10, %v10875_v21, 0.0  ;;  %v10884_v28 = vpack.i.bf16 %v4484_v1, %v10875_v21  ;;  %v4537_v49 = vsel %vm1578_vm11, %v4484_v1, 0.0  ;;  %v7019_v58 = vpack.i.bf16 %v4524_v59, %v4484_v1 }
 0xd06   : > { %v4548_v36 = vpack.c.bf16 %v4537_v49, %v4536_v30  ;;  %v4560_v31 = vpack.c.bf16 %v4484_v1, %v10875_v21 }
 0xd08   : > { %v5120_v15 = vunpack.c.l.b16 %v4548_v36  ;;  %v5121_v27 = vunpack.c.h.b16 %v4548_v36  ;;  %v5124_v36 = vunpack.c.l.b16 %v10833_v44 }
 0xd09   : > { %v6911_v51 = vpop.permute.xlu1 %6910 }
 0xd0a   : > { %v6913_v41 = vunpack.i.h.bf16 %v6911_v51  ;;  %v6912_v43 = vunpack.i.l.bf16 %v6911_v51 }
 0xd0c   : > { %v10891_v3 = vsel %vm1526_vm9, %v6913_v41, 0.0  ;;  %v10894_v29 = vsel %vm1526_vm9, %v6912_v43, %v6913_v41  ;;  %v4517_v25 = vsel %vm1526_vm9, 0.0, %v6912_v43 }
 0xd0d   : > { %7010 = vrot.lane.b32.xlu1 %v10884_v28, %s7532_s23  ;;  %v10901_v62 = vpack.i.bf16 %v10891_v3, %v10894_v29  ;;  %5202 = vrot.lane.b32.xlu2 %v10888_v50, %s12163_s19  ;;  %v4538_v23 = vsel %vm1577_vm10, %v4517_v25, 0.0  ;;  %v10910_v53 = vpack.i.bf16 %v4517_v25, %v4524_v59  ;;  %v4539_v48 = vsel %vm1578_vm11, %v10894_v29, 0.0 }
 0xd0e   : > { %v4549_v54 = vpack.c.bf16 %v4539_v48, %v4538_v23  ;;  %v7039_v42 = vpack.i.bf16 %v10894_v29, %v4517_v25  ;;  %v4562_v26 = vpack.c.bf16 %v10894_v29, %v4517_v25  ;;  %v7044_v43 = vpack.i.bf16 %v10839_v8, %v10891_v3 }
 0xd0f   : > { %7030 = vrot.lane.b32.xlu0 %v10901_v62, %s7532_s23  ;;  %v6921_v16 = vpop.permute.xlu0 %6920  ;;  %v5172_v25 = vunpack.c.l.b16 %v4560_v31 }
 0xd10   : > { %v6923_v47 = vunpack.i.h.bf16 %v6921_v16  ;;  %v6922_v52 = vunpack.i.l.bf16 %v6921_v16  ;;  %v5122_v10 = vunpack.c.l.b16 %v4549_v54  ;;  %v5123_v5 = vunpack.c.h.b16 %v4549_v54 }
 0xd11   : > { %v5175_v30 = vunpack.c.l.b16 %v4562_v26  ;;  %v5176_v44 = vunpack.c.h.b16 %v4562_v26  ;;  %v4563_v54 = vpack.c.bf16 %v10891_v3, %v10891_v3 }
 0xd12   : > { %v10921_v35 = vsel %vm1526_vm9, 0.0, %v6922_v52  ;;  %v10924_v32 = vsel %vm1526_vm9, %v6923_v47, 0.0  ;;  %v10927_v19 = vsel %vm1526_vm9, %v6922_v52, %v6923_v47  ;;  %v10946_v49 = vpack.c.b16 %v5122_v10, %v5120_v15 }
 0xd13   : > { %v4542_v40 = vsel %vm1577_vm10, %v10921_v35, 0.0  ;;  %v4567_v11 = vpack.c.bf16 %v10924_v32, %v10924_v32  ;;  %v4543_v37 = vsel %vm1578_vm11, %v10927_v19, 0.0  ;;  %v10948_v1 = vpack.c.b16 %v5123_v5, %v5121_v27 }
 0xd14   : > { %v4551_v4 = vpack.c.bf16 %v4543_v37, %v4542_v40  ;;  %v10961_v47 = vpack.c.b16 %v5175_v30, %v5172_v25  ;;  %v5173_v52 = vunpack.c.h.b16 %v4560_v31  ;;  %v5177_v2 = vunpack.c.l.b16 %v4563_v54 }
 0xd15   : > { %7015 = vrot.lane.b32.xlu1 %v10884_v28, %s12162_s21  ;;  %7020 = vrot.lane.b32.xlu2 %v7019_v58, %s7531_s29  ;;  %v5183_v38 = vunpack.c.l.b16 %v4567_v11  ;;  %12166 = vst [vmem:[#allocation33_spill] sm:$0xff] %v10948_v1  ;;  %v4561_v58 = vpack.c.bf16 %v4524_v59, %v4524_v59  ;;  %v7054_v31 = vpack.i.bf16 %v10819_v24, %v10894_v29  ;;  %vm12170_vm9 = vcmask 1031168  }
 0xd16   : > { %v5126_v51 = vunpack.c.l.b16 %v4551_v4  ;;  %v5127_v41 = vunpack.c.h.b16 %v4551_v4  ;;  %v10967_v8 = vpack.c.b16 %v5176_v44, %v5173_v52  ;;  %v10990_v15 = vpack.i.bf16 %v10816_v46, %v10819_v24  ;;  %vm12173_vm0 = vmmov %vm12170_vm9 }
 0xd17   : > { %7040 = vrot.lane.b32.xlu0 %v7039_v42, %s7531_s29  ;;  %v10954_v23 = vpack.c.b16 %v5183_v38, %v5180_v45  ;;  %v5174_v42 = vunpack.c.l.b16 %v4561_v58  ;;  %v7069_v27 = vpack.i.bf16 %v10918_v14, %v10816_v46  ;;  %v7064_v11 = vpack.i.bf16 %v10819_v24, %v10744_v22  ;;  %v12171_v22 = vld [vmem:[#allocation24_spill] sm:$0xff]  ;;  %vm12176_vm12 = vmmov %vm12173_vm0 }
 0xd18   : > { %v10956_v16 = vpack.c.b16 %v5126_v51, %v5124_v36  ;;  %v10958_v48 = vpack.c.b16 %v5127_v41, %v5125_v34  ;;  %v11007_v4 = vpack.i.bf16 %v10924_v32, %v10927_v19  ;;  %vm12172_vm7 = vcmp.lt.s32.totalorder %v12171_v22, 16  ;;  %v12174_v34 = vld [vmem:[#allocation25_spill] sm:$0xff]  ;;  %vm12177_vm13 = vmmov %vm12173_vm0 }
 0xd19   : > { %v10977_v26 = vpack.c.b16 %v5177_v2, %v5174_v42  ;;  %vm12175_vm2 = vcmp.lt.s32.totalorder %v12174_v34, 16  ;;  %v7089_v52 = vpack.i.bf16 %v10927_v19, %v10921_v35  ;;  %v11024_v54 = vpack.i.bf16 %v10921_v35, %v10918_v14  ;;  %vm12181_vm3 = vmmov %vm12172_vm7 }
 0xd1a   : > { %12167 = vst [vmem:[#allocation38_spill] sm:$0xff] %v10958_v48  ;;  %vm12180_vm1 = vmmov %vm12175_vm2 }
 0xd1b   : > { %vm12186_vm4 = vmmov %vm12173_vm0 }
 0xd1c   : > { %vm12187_vm6 = vmmov %vm12181_vm3 }
 0xd1d   : > { %7045 = vrot.lane.b32.xlu1 %v7044_v43, %s7531_s29  ;;  %7025 = vrot.lane.b32.xlu2 %v10910_v53, %s7532_s23 }
 0xd1f   : > { %5208 = vrot.lane.b32.xlu0 %v10961_v47, %s12163_s19 }
 0xd25   : > { %5210 = vrot.lane.b32.xlu1 %v10967_v8, %s12163_s19  ;;  %7035 = vrot.lane.b32.xlu2 %v10910_v53, %s12162_s21 }
 0xd27   : > { %5448 = vrot.lane.b32.xlu0 %v10961_v47, %s12168_s24  ;;  %v6941_v40 = vpop.permute.xlu2 %6940 }
 0xd28   : > { %v6942_v5 = vunpack.i.l.bf16 %v6941_v40  ;;  %v6943_v25 = vunpack.i.h.bf16 %v6941_v40 }
 0xd2d   : > { %5450 = vrot.lane.b32.xlu1 %v10967_v8, %s12168_s24  ;;  %5212 = vrot.lane.b32.xlu2 %v10977_v26, %s12163_s19 }
 0xd2f   : > { %7055 = vrot.lane.b32.xlu0 %v7054_v31, %s12162_s21  ;;  %v10986_v59 = vpop.permute.xlu2 %6950 }
 0xd30   : > { %v6952_v44 = vunpack.i.l.bf16 %v10986_v59 }
 0xd35   : > { %7050 = vrot.lane.b32.xlu1 %v10990_v15, %s7532_s23  ;;  %7070 = vrot.lane.b32.xlu2 %v7069_v27, %s7531_s29 }
 0xd37   : > { %7060 = vrot.lane.b32.xlu0 %v7069_v27, %s12162_s21  ;;  %v10998_v29 = vpop.permute.xlu2 %6960 }
 0xd3b   : > { %v11002_v37 = vpop.permute.xlu0 %6935  ;;  %v6926_v10 = vpop.permute.xlu1 %6925 }
 0xd3c   : > { %v6928_v45 = vunpack.i.h.bf16 %v6926_v10  ;;  %v6927_v30 = vunpack.i.l.bf16 %v6926_v10 }
 0xd3d   : > { %7065 = vrot.lane.b32.xlu1 %v7064_v11, %s7531_s29  ;;  %7075 = vrot.lane.b32.xlu2 %v10990_v15, %s12169_s25 }
 0xd3e   : > { %v4633_v38 = vsel %vm12170_vm9, %v6928_v45, %v6942_v5  ;;  %v4632_v51 = vsel %vm12173_vm0, %v6927_v30, %v6928_v45  ;;  %vm12188_vm9 = vmmov %vm12173_vm0 }
 0xd3f   : > { %7085 = vrot.lane.b32.xlu0 %v11007_v4, %s7532_s23  ;;  %v4665_v36 = vsel %vm12172_vm7, %v4633_v38, 0.0  ;;  %v4664_v41 = vsel %vm12175_vm2, %v4632_v51, 0.0  ;;  %v11029_v40 = vpop.permute.xlu2 %5198  ;;  %vm12189_vm7 = vmmov %vm12180_vm1 }
 0xd40   : > { %v4680_v43 = vpack.c.bf16 %v4665_v36, %v4664_v41  ;;  %vm12190_vm0 = vmmov %vm12183_vm5 }
 0xd41   : > { %vm12192_vm2 = vmmov %vm12190_vm0 }
 0xd43   : > { %v6946_v58 = vpop.permute.xlu0 %6945  ;;  %v6931_v2 = vpop.permute.xlu1 %6930 }
 0xd44   : > { %v6948_v42 = vunpack.i.h.bf16 %v6946_v58  ;;  %v6947_v31 = vunpack.i.l.bf16 %v6946_v58  ;;  %v6933_v27 = vunpack.i.h.bf16 %v6931_v2  ;;  %v6932_v11 = vunpack.i.l.bf16 %v6931_v2 }
 0xd45   : > { %7090 = vrot.lane.b32.xlu1 %v7089_v52, %s12162_s21  ;;  %7080 = vrot.lane.b32.xlu2 %v11024_v54, %s7532_s23  ;;  %v5244_v58 = vunpack.c.l.b16 %v4680_v43  ;;  %s12197_s23 = smov 111  }
 0xd46   : > { %v4634_v10 = vsel %vm12176_vm12, %v6943_v25, %v6947_v31  ;;  %v4635_v5 = vsel %vm12177_vm13, %v6947_v31, %v6948_v42  ;;  %v4737_v14 = vsel %vm12178_vm14, %v6933_v27, %v6952_v44  ;;  %v4736_v45 = vsel %vm12179_vm15, %v6932_v11, %v6933_v27  ;;  %vm12193_vm12 = vmmov %vm12186_vm4 }
 0xd47   : > { %7100 = vrot.lane.b32.xlu0 %v7089_v52, %s7531_s29  ;;  %v4666_v30 = vsel %vm12180_vm1, %v4634_v10, 0.0  ;;  %v4667_v38 = vsel %vm12181_vm3, %v4635_v5, 0.0  ;;  %v4769_v36 = vsel %vm1578_vm11, %v4737_v14, 0.0  ;;  %v4768_v51 = vsel %vm1577_vm10, %v4736_v45, 0.0  ;;  %vm12194_vm13 = vmmov %vm12186_vm4 }
 0xd48   : > { %v4784_v41 = vpack.c.bf16 %v4769_v36, %v4768_v51  ;;  %v4681_v25 = vpack.c.bf16 %v4667_v38, %v4666_v30  ;;  %v7104_v52 = vpack.i.bf16 %v10875_v21, %v10924_v32  ;;  %v7094_v42 = vpack.i.bf16 %v10891_v3, %v10924_v32  ;;  %vm12195_vm14 = vmmov %vm12181_vm3 }
 0xd49   : > { %v4566_v27 = vpack.c.bf16 %v10927_v19, %v10921_v35  ;;  %v5245_v11 = vunpack.c.h.b16 %v4680_v43  ;;  %v6953_v10 = vunpack.i.h.bf16 %v10986_v59  ;;  %v4564_v21 = vpack.c.bf16 %v10816_v46, %v10819_v24  ;;  %vm12196_vm15 = vmmov %vm12180_vm1 }
 0xd4a   : > { %v5246_v44 = vunpack.c.l.b16 %v4681_v25  ;;  %v5247_v2 = vunpack.c.h.b16 %v4681_v25  ;;  %v5284_v24 = vunpack.c.l.b16 %v4784_v41  ;;  %v5285_v51 = vunpack.c.h.b16 %v4784_v41  ;;  %vm12199_vm1 = vmmov %vm12190_vm0 }
 0xd4b   : > { %v6956_v31 = vpop.permute.xlu0 %6955  ;;  %v5182_v43 = vunpack.c.h.b16 %v4566_v27  ;;  %v5179_v46 = vunpack.c.h.b16 %v4564_v21  ;;  %vm12200_vm3 = vmmov %vm12190_vm0 }
 0xd4c   : > { %v6958_v5 = vunpack.i.h.bf16 %v6956_v31  ;;  %v6957_v14 = vunpack.i.l.bf16 %v6956_v31  ;;  %v11051_v45 = vpack.c.b16 %v5246_v44, %v5244_v58  ;;  %v11057_v30 = vpack.c.b16 %v5247_v2, %v5245_v11 }
 0xd4d   : > { %7105 = vrot.lane.b32.xlu1 %v7104_v52, %s7531_s29  ;;  %7095 = vrot.lane.b32.xlu2 %v7094_v42, %s12162_s21  ;;  %v11069_v58 = vpack.c.b16 %v5182_v43, %v5179_v46  ;;  %s12191_s29 = smov 96   ;;  %s6461_s21 = sshll.u32 %s7637_s17, 7 }
 0xd4e   : > { %12182 = vst [vmem:[#allocation35_spill] sm:$0xff] %v11057_v30  ;;  %v4738_v3 = vsel %vm12183_vm5, %v6953_v10, %v6957_v14  ;;  %v4739_v35 = vsel %vm12184_vm8, %v6957_v14, %v6958_v5  ;;  %v5181_v10 = vunpack.c.l.b16 %v4566_v27  ;;  %vm12201_vm5 = vcmask 900096   ;;  %s5991_s17 = scalar_lea.sflag [#allocation4], %s7711_s13 }
 0xd4f   : > { %7110 = vrot.lane.b32.xlu0 %v11024_v54, %s12169_s25  ;;  %v4770_v32 = vsel %vm1577_vm10, %v4738_v3, 0.0  ;;  %v4771_v19 = vsel %vm1578_vm11, %v4739_v35, 0.0  ;;  %v11067_v59 = vpop.permute.xlu2 %6975  ;;  %v5178_v3 = vunpack.c.l.b16 %v4564_v21  ;;  %v11094_v21 = vpop.permute.xlu1 %5196  ;;  %vm12202_vm8 = vmmov %vm12201_vm5  ;;  %v6938_v30 = vunpack.i.h.bf16 %v11002_v37 }
 0xd50   : > { %v4785_v38 = vpack.c.bf16 %v4771_v19, %v4770_v32 }
 0xd51   : > { %v11087_v19 = vpack.c.b16 %v5181_v10, %v5178_v3 }
 0xd52   : > { %v5286_v36 = vunpack.c.l.b16 %v4785_v38  ;;  %v5287_v25 = vunpack.c.h.b16 %v4785_v38 }
 0xd53   : > { %v6986_v44 = vpop.permute.xlu0 %6985 }
 0xd54   : > { %v6988_v2 = vunpack.i.h.bf16 %v6986_v44  ;;  %v6987_v52 = vunpack.i.l.bf16 %v6986_v44  ;;  %v11071_v42 = vpack.c.b16 %v5286_v36, %v5284_v24  ;;  %v11073_v31 = vpack.c.b16 %v5287_v25, %v5285_v51 }
 0xd55   : > { %7115 = vrot.lane.b32.xlu1 %v11007_v4, %s12169_s25  ;;  %5216 = vrot.lane.b32.xlu2 %v11069_v58, %s12163_s19 }
 0xd56   : > { %12185 = vst [vmem:[#allocation37_spill] sm:$0xff] %v11073_v31  ;;  %v4639_v11 = vsel %vm12186_vm4, %v6987_v52, %v6988_v2  ;;  %vm12204_vm4 = vmmov %vm12201_vm5 }
 0xd57   : > { %5444 = vrot.lane.b32.xlu0 %v10857_v20, %s12168_s24  ;;  %v6981_v41 = vpop.permute.xlu2 %6980  ;;  %v4671_v14 = vsel %vm12187_vm6, %v4639_v11, 0.0  ;;  %vm12205_vm6 = vmmov %vm12204_vm4 }
 0xd58   : > { %v6983_v5 = vunpack.i.h.bf16 %v6981_v41  ;;  %v6982_v10 = vunpack.i.l.bf16 %v6981_v41 }
 0xd5a   : > { %v4638_v35 = vsel %vm12188_vm9, %v6983_v5, %v6987_v52  ;;  %vm12206_vm9 = vmmov %vm12195_vm14 }
 0xd5b   : > { %v4670_v32 = vsel %vm12189_vm7, %v4638_v35, 0.0  ;;  %v6996_v43 = vpop.permute.xlu0 %6995 }
 0xd5c   : > { %v6998_v38 = vunpack.i.h.bf16 %v6996_v43  ;;  %v6997_v46 = vunpack.i.l.bf16 %v6996_v43  ;;  %v4683_v24 = vpack.c.bf16 %v4671_v14, %v4670_v32 }
 0xd5d   : > { %5214 = vrot.lane.b32.xlu1 %v11087_v19, %s12163_s19  ;;  %5442 = vrot.lane.b32.xlu2 %v10888_v50, %s12168_s24 }
 0xd5e   : > { %v4743_v27 = vsel %vm12190_vm0, %v6997_v46, %v6998_v38  ;;  %vm12207_vm0 = vmmov %vm12189_vm7 }
 0xd5f   : > { %7130 = vrot.lane.b32.xlu0 %v11007_v4, %s12191_s29  ;;  %v6991_v36 = vpop.permute.xlu2 %6990  ;;  %v4775_v25 = vsel %vm1578_vm11, %v4743_v27, 0.0 }
 0xd60   : > { %v6993_v51 = vunpack.i.h.bf16 %v6991_v36 }
 0xd62   : > { %v4742_v44 = vsel %vm12192_vm2, %v6993_v51, %v6997_v46  ;;  %v5250_v51 = vunpack.c.l.b16 %v4683_v24  ;;  %vm12208_vm2 = vmmov %vm12206_vm9 }
 0xd63   : > { %v4774_v2 = vsel %vm1577_vm10, %v4742_v44, 0.0  ;;  %v7001_v41 = vpop.permute.xlu0 %7000  ;;  %v6992_v44 = vunpack.i.l.bf16 %v6991_v36 }
 0xd64   : > { %v4787_v52 = vpack.c.bf16 %v4775_v25, %v4774_v2  ;;  %v5251_v25 = vunpack.c.h.b16 %v4683_v24  ;;  %v6962_v24 = vunpack.i.l.bf16 %v10998_v29  ;;  %v7003_v36 = vunpack.i.h.bf16 %v7001_v41 }
 0xd65   : > { %7120 = vrot.lane.b32.xlu1 %v10990_v15, %s12191_s29  ;;  %7125 = vrot.lane.b32.xlu2 %v11024_v54, %s12191_s29 }
 0xd67   : > { %7145 = vrot.lane.b32.xlu0 %v10901_v62, %s12169_s25  ;;  %v6966_v4 = vpop.permute.xlu1 %6965  ;;  %v11109_v11 = vpop.permute.xlu2 %5202 }
 0xd68   : > { %v6968_v5 = vunpack.i.h.bf16 %v6966_v4  ;;  %v6967_v14 = vunpack.i.l.bf16 %v6966_v4 }
 0xd6a   : > { %v4637_v3 = vsel %vm12193_vm12, %v6968_v5, %v6982_v10  ;;  %v4636_v35 = vsel %vm12194_vm13, %v6967_v14, %v6968_v5  ;;  %vm12209_vm13 = vmmov %vm12193_vm12 }
 0xd6b   : > { %v4669_v32 = vsel %vm12195_vm14, %v4637_v3, 0.0  ;;  %v4668_v15 = vsel %vm12196_vm15, %v4636_v35, 0.0  ;;  %v6963_v35 = vunpack.i.h.bf16 %v10998_v29  ;;  %vm12210_vm14 = vmmov %vm12207_vm0 }
 0xd6c   : > { %v4682_v54 = vpack.c.bf16 %v4669_v32, %v4668_v15  ;;  %v7002_v15 = vunpack.i.l.bf16 %v7001_v41  ;;  %vm12211_vm15 = vmmov %vm12208_vm2 }
 0xd6d   : > { %7135 = vrot.lane.b32.xlu1 %v10884_v28, %s12169_s25  ;;  %7140 = vrot.lane.b32.xlu2 %v10910_v53, %s12169_s25  ;;  %v4843_v29 = vsel %vm12201_vm5, %v6962_v24, %v6963_v35  ;;  %vm12214_vm5 = vmmov %vm12207_vm0 }
 0xd6e   : > { %v5248_v43 = vunpack.c.l.b16 %v4682_v54  ;;  %v5249_v38 = vunpack.c.h.b16 %v4682_v54  ;;  %v4846_v41 = vsel %vm12202_vm8, %v7002_v15, %v7003_v36  ;;  %vm12215_vm8 = vmmov %vm12208_vm2 }
 0xd6f   : > { %5330 = vrot.lane.b32.xlu0 %v10967_v8, %s12197_s23  ;;  %v6971_v46 = vpop.permute.xlu1 %6970  ;;  %v11123_v27 = vpop.permute.xlu2 %7020 }
 0xd70   : > { %v6973_v2 = vunpack.i.h.bf16 %v6971_v46  ;;  %v6972_v4 = vunpack.i.l.bf16 %v6971_v46  ;;  %v11125_v10 = vpack.c.b16 %v5250_v51, %v5248_v43  ;;  %v11127_v5 = vpack.c.b16 %v5251_v25, %v5249_v38 }
 0xd71   : > { %v5290_v25 = vunpack.c.l.b16 %v4787_v52 }
 0xd72   : > { %12198 = vst [vmem:[#allocation29_spill] sm:$0xff] %v11127_v5  ;;  %v4741_v14 = vsel %vm12199_vm1, %v6973_v2, %v6992_v44  ;;  %v4740_v3 = vsel %vm12200_vm3, %v6972_v4, %v6973_v2  ;;  %v5291_v44 = vunpack.c.h.b16 %v4787_v52  ;;  %v4878_v52 = vsel %vm12189_vm7, %v4846_v41, 0.0  ;;  %vm12212_vm1 = vmmov %vm12193_vm12 }
 0xd73   : > { %v4773_v8 = vsel %vm1578_vm11, %v4741_v14, 0.0  ;;  %v4772_v32 = vsel %vm1577_vm10, %v4740_v3, 0.0  ;;  %v11145_v14 = vpop.permute.xlu0 %5204  ;;  %vm12213_vm3 = vmmov %vm12212_vm1 }
 0xd74   : > { %v4786_v54 = vpack.c.bf16 %v4773_v8, %v4772_v32  ;;  %v4875_v32 = vsel %vm12206_vm9, %v4843_v29, 0.0  ;;  %vm12218_vm9 = vmmov %vm12208_vm2 }
 0xd75   : > { %5206 = vrot.lane.b32.xlu1 %v10859_v55, %s12163_s19  ;;  %5328 = vrot.lane.b32.xlu2 %v10961_v47, %s12197_s23  ;;  %vm12219_vm7 = vmmov %vm12207_vm0 }
 0xd76   : > { %v5288_v43 = vunpack.c.l.b16 %v4786_v54  ;;  %v5289_v38 = vunpack.c.h.b16 %v4786_v54 }
 0xd77   : > { %7150 = vrot.lane.b32.xlu0 %v10884_v28, %s12191_s29  ;;  %v7006_v46 = vpop.permute.xlu1 %7005  ;;  %v7026_v51 = vpop.permute.xlu2 %7025 }
 0xd78   : > { %v7008_v2 = vunpack.i.h.bf16 %v7006_v46  ;;  %v7007_v4 = vunpack.i.l.bf16 %v7006_v46  ;;  %v11147_v3 = vpack.c.b16 %v5290_v25, %v5288_v43  ;;  %v11149_v47 = vpack.c.b16 %v5291_v44, %v5289_v38 }
 0xd79   : > { %v7027_v38 = vunpack.i.l.bf16 %v7026_v51  ;;  %v7028_v44 = vunpack.i.h.bf16 %v7026_v51 }
 0xd7a   : > { %12203 = vst [vmem:[#allocation32_spill] sm:$0xff] %v11149_v47  ;;  %v4842_v8 = vsel %vm12204_vm4, %v7008_v2, %v6962_v24  ;;  %v4847_v28 = vsel %vm12205_vm6, %v7003_v36, %v7007_v4  ;;  %vm12217_vm6 = vmmov %vm12204_vm4 }
 0xd7b   : > { %v4874_v35 = vsel %vm12207_vm0, %v4842_v8, 0.0  ;;  %v4879_v15 = vsel %vm12208_vm2, %v4847_v28, 0.0  ;;  %vm12221_vm0 = vcmask 1039360   ;;  %vm12224_vm2 = vcmask 916480  }
 0xd7c   : > { %v11161_v54 = vpack.c.bf16 %v4879_v15, %v4878_v52  ;;  %v11163_v43 = vpack.c.bf16 %v4875_v32, %v4874_v35 }
 0xd7d   : > { %5436 = vrot.lane.b32.xlu1 %v10795_v7, %s12168_s24  ;;  %5438 = vrot.lane.b32.xlu2 %v10821_v63, %s12168_s24 }
 0xd7f   : > { %7165 = vrot.lane.b32.xlu0 %v10844_v33, %s12169_s25  ;;  %v7011_v24 = vpop.permute.xlu1 %7010  ;;  %v11171_v36 = vpop.permute.xlu2 %7035 }
 0xd80   : > { %v7013_v46 = vunpack.i.h.bf16 %v7011_v24  ;;  %v7012_v25 = vunpack.i.l.bf16 %v7011_v24 }
 0xd81   : > { %v7031_v29 = vpop.permute.xlu0 %7030 }
 0xd82   : > { %v4640_v41 = vsel %vm12193_vm12, %v7012_v25, %v7013_v46  ;;  %v4641_v2 = vsel %vm12209_vm13, %v7013_v46, %v7027_v38  ;;  %v7033_v4 = vunpack.i.h.bf16 %v7031_v29  ;;  %v7032_v8 = vunpack.i.l.bf16 %v7031_v29  ;;  %vm12225_vm12 = vmmov %vm12224_vm2 }
 0xd83   : > { %v4672_v28 = vsel %vm12210_vm14, %v4640_v41, 0.0  ;;  %v4673_v32 = vsel %vm12211_vm15, %v4641_v2, 0.0  ;;  %vm12226_vm13 = vmmov %vm12224_vm2 }
 0xd84   : > { %v4642_v52 = vsel %vm12212_vm1, %v7028_v44, %v7032_v8  ;;  %v4643_v35 = vsel %vm12213_vm3, %v7032_v8, %v7033_v4  ;;  %v4684_v15 = vpack.c.bf16 %v4673_v32, %v4672_v28  ;;  %vm12227_vm14 = vmmov %vm12224_vm2 }
 0xd85   : > { %v4674_v51 = vsel %vm12214_vm5, %v4642_v52, 0.0  ;;  %v4675_v24 = vsel %vm12215_vm8, %v4643_v35, 0.0  ;;  %7155 = vrot.lane.b32.xlu1 %v10910_v53, %s12191_s29  ;;  %7160 = vrot.lane.b32.xlu2 %v10901_v62, %s12191_s29  ;;  %v6978_v53 = vunpack.i.h.bf16 %v11067_v59  ;;  %v6977_v62 = vunpack.i.l.bf16 %v11067_v59  ;;  %vm12228_vm15 = vmmov %vm12204_vm4 }
 0xd86   : > { %v4685_v38 = vpack.c.bf16 %v4675_v24, %v4674_v51  ;;  %v5252_v44 = vunpack.c.l.b16 %v4684_v15  ;;  %v5253_v29 = vunpack.c.h.b16 %v4684_v15  ;;  %vm12229_vm3 = vmmov %vm12212_vm1 }
 0xd87   : > { %5200 = vrot.lane.b32.xlu0 %v10779_v13, %s12163_s19  ;;  %v7016_v46 = vpop.permute.xlu1 %7015  ;;  %v5213_v25 = vpop.permute.xlu2 %5212  ;;  %v4845_v35 = vsel %vm12204_vm4, %v6977_v62, %v6978_v53  ;;  %vm12230_vm8 = vmmov %vm12214_vm5 }
 0xd88   : > { %v5254_v41 = vunpack.c.l.b16 %v4685_v38  ;;  %v5255_v2 = vunpack.c.h.b16 %v4685_v38  ;;  %v4877_v24 = vsel %vm12218_vm9, %v4845_v35, 0.0  ;;  %vm12231_vm4 = vmmov %vm12218_vm9 }
 0xd89   : > { %v11191_v4 = vpop.permute.xlu0 %7040  ;;  %vm12233_vm9 = vmmov %vm12217_vm6 }
 0xd8a   : > { %v11193_v8 = vpack.c.b16 %v5254_v41, %v5252_v44  ;;  %v11195_v28 = vpack.c.b16 %v5255_v2, %v5253_v29  ;;  %v5370_v29 = vunpack.c.l.b16 %v11161_v54 }
 0xd8c   : > { %12216 = vst [vmem:[#allocation42_spill] sm:$0xff] %v11195_v28 }
 0xd8d   : > { %7170 = vrot.lane.b32.xlu1 %v10850_v0, %s12169_s25  ;;  %7175 = vrot.lane.b32.xlu2 %v10787_v61, %s12169_s25 }
 0xd8f   : > { %7180 = vrot.lane.b32.xlu0 %v10844_v33, %s12191_s29  ;;  %v11205_v32 = vpop.permute.xlu1 %7045  ;;  %v11207_v52 = vpop.permute.xlu2 %7070 }
 0xd90   : > { %v7048_v15 = vunpack.i.h.bf16 %v11205_v32 }
 0xd91   : > { %v11211_v51 = vpop.permute.xlu0 %5208 }
 0xd92   : > { %v4844_v59 = vsel %vm12217_vm6, %v7048_v15, %v6977_v62  ;;  %v5371_v62 = vunpack.c.h.b16 %v11161_v54 }
 0xd93   : > { %v4876_v38 = vsel %vm12219_vm7, %v4844_v59, 0.0  ;;  %vm12234_vm7 = vmmov %vm12231_vm4 }
 0xd94   : > { %v4890_v44 = vpack.c.bf16 %v4877_v24, %v4876_v38  ;;  %v7018_v24 = vunpack.i.h.bf16 %v7016_v46  ;;  %v7017_v38 = vunpack.i.l.bf16 %v7016_v46 }
 0xd95   : > { %5322 = vrot.lane.b32.xlu1 %v10888_v50, %s12197_s23  ;;  %5324 = vrot.lane.b32.xlu2 %v10857_v20, %s12197_s23 }
 0xd96   : > { %v5368_v33 = vunpack.c.l.b16 %v4890_v44  ;;  %v5369_v41 = vunpack.c.h.b16 %v4890_v44 }
 0xd97   : > { %5454 = vrot.lane.b32.xlu0 %v11087_v19, %s12168_s24  ;;  %v11225_v2 = vpop.permute.xlu1 %5210  ;;  %v11227_v53 = vpop.permute.xlu2 %7075 }
 0xd98   : > { %v11230_v35 = vpack.c.b16 %v5370_v29, %v5368_v33  ;;  %v11236_v20 = vsel %vm12221_vm0, %v11225_v2, %v5213_v25  ;;  %v11238_v50 = vpack.c.b16 %v5371_v62, %v5369_v41  ;;  %v7037_v25 = vunpack.i.l.bf16 %v11171_v36  ;;  %vm12235_vm0 = vmmov %vm12224_vm2 }
 0xd99   : > { %v11232_v15 = vpop.permute.xlu0 %5448  ;;  %v4744_v33 = vsel %vm12224_vm2, %v7017_v38, %v7018_v24  ;;  %vm12236_vm2 = vmmov %vm12212_vm1 }
 0xd9a   : > { %12220 = vst [vmem:[#allocation23_spill] sm:$0xff] %v11232_v15  ;;  %v4745_v29 = vsel %vm12225_vm12, %v7018_v24, %v7037_v25  ;;  %v4776_v38 = vsel %vm1577_vm10, %v4744_v33, 0.0  ;;  %vm12237_vm12 = vmmov %vm12212_vm1 }
 0xd9b   : > { %12222 = vst [vmem:[#allocation19_spill] sm:$0xff] %v11238_v50  ;;  %v4777_v24 = vsel %vm1578_vm11, %v4745_v29, 0.0 }
 0xd9c   : > { %v11269_v31 = vpack.c.bf16 %v4777_v24, %v4776_v38 }
 0xd9d   : > { %7185 = vrot.lane.b32.xlu1 %v10850_v0, %s12191_s29  ;;  %5218 = vrot.lane.b32.xlu2 %v10954_v23, %s12163_s19  ;;  %v7038_v0 = vunpack.i.h.bf16 %v11171_v36 }
 0xd9f   : > { %7195 = vrot.lane.b32.xlu0 %v10741_v56, %s12169_s25  ;;  %v11246_v54 = vpop.permute.xlu1 %5450  ;;  %v7081_v59 = vpop.permute.xlu2 %7080 }
 0xda0   : > { %12223 = vst [vmem:[#allocation36_spill] sm:$0xff] %v11246_v54  ;;  %v7082_v15 = vunpack.i.l.bf16 %v7081_v59 }
 0xda1   : > { %v7056_v44 = vpop.permute.xlu0 %7055 }
 0xda2   : > { %v7057_v41 = vunpack.i.l.bf16 %v7056_v44 }
 0xda4   : > { %v4746_v36 = vsel %vm12226_vm13, %v7038_v0, %v7057_v41  ;;  %vm12238_vm13 = vmmov %vm12235_vm0 }
 0xda5   : > { %5456 = vrot.lane.b32.xlu1 %v11069_v58, %s12168_s24  ;;  %7190 = vrot.lane.b32.xlu2 %v10787_v61, %s12191_s29  ;;  %v6937_v61 = vunpack.i.l.bf16 %v11002_v37  ;;  %v4778_v33 = vsel %vm1577_vm10, %v4746_v36, 0.0 }
 0xda7   : > { %5334 = vrot.lane.b32.xlu0 %v11087_v19, %s12197_s23  ;;  %v7051_v46 = vpop.permute.xlu1 %7050  ;;  %v11258_v62 = vpop.permute.xlu2 %7095  ;;  %v4840_v47 = vsel %vm12228_vm15, %v6937_v61, %v6938_v30  ;;  %vm12240_vm15 = vmmov %vm12231_vm4 }
 0xda8   : > { %v7098_v25 = vunpack.i.h.bf16 %v11258_v62  ;;  %v7053_v50 = vunpack.i.h.bf16 %v7051_v46  ;;  %v7052_v19 = vunpack.i.l.bf16 %v7051_v46  ;;  %v4872_v36 = vsel %vm12214_vm5, %v4840_v47, 0.0 }
 0xda9   : > { %v7061_v5 = vpop.permute.xlu0 %7060  ;;  %v7058_v46 = vunpack.i.h.bf16 %v7056_v44  ;;  %v12232_v47 = vunpack.i.l.bf16 %v11123_v27 }
 0xdaa   : > { %v4747_v28 = vsel %vm12227_vm14, %v7057_v41, %v7098_v25  ;;  %v7023_v41 = vunpack.i.h.bf16 %v11123_v27  ;;  %v4644_v0 = vsel %vm12212_vm1, %v7052_v19, %v7053_v50  ;;  %v4645_v38 = vsel %vm12229_vm3, %v7053_v50, %v7082_v15  ;;  %vm12239_vm14 = vmmov %vm12214_vm5 }
 0xdab   : > { %v4779_v29 = vsel %vm1578_vm11, %v4747_v28, 0.0  ;;  %v5293_v25 = vunpack.c.h.b16 %v11269_v31  ;;  %v7062_v19 = vunpack.i.l.bf16 %v7061_v5  ;;  %v4676_v15 = vsel %vm12230_vm8, %v4644_v0, 0.0  ;;  %vm12241_vm1 = vmmov %vm12235_vm0 }
 0xdac   : > { %v11280_v37 = vpack.c.bf16 %v4779_v29, %v4778_v33  ;;  %v7083_v33 = vunpack.i.h.bf16 %v7081_v59  ;;  %v4677_v6 = vsel %vm12231_vm4, %v4645_v38, 0.0  ;;  %v4849_v59 = vsel %vm12233_vm9, %v12232_v47, %v7023_v41  ;;  %vm12242_vm3 = vmmov %vm12235_vm0 }
 0xdad   : > { %7200 = vrot.lane.b32.xlu1 %v10763_v9, %s12169_s25  ;;  %7205 = vrot.lane.b32.xlu2 %v10765_v60, %s12169_s25  ;;  %v5366_v0 = vunpack.c.l.b16 %v11163_v43  ;;  %vm12243_vm5 = vmmov %vm12217_vm6  ;;  %s12345_s25 = sld [smem:[#allocation46_spill]] }
 0xdae   : > { %v5295_v61 = vunpack.c.h.b16 %v11280_v37  ;;  %vm12244_vm8 = vmmov %vm12231_vm4 }
 0xdaf   : > { %5316 = vrot.lane.b32.xlu0 %v10795_v7, %s12197_s23  ;;  %v11288_v28 = vpop.permute.xlu1 %7065  ;;  %v11290_v24 = vpop.permute.xlu2 %5216  ;;  %v7063_v7 = vunpack.i.h.bf16 %v7061_v5  ;;  %v5367_v5 = vunpack.c.h.b16 %v11163_v43  ;;  %v7043_v43 = vunpack.i.h.bf16 %v11191_v4  ;;  %vm12245_vm4 = vmmov %vm12243_vm5 }
 0xdb0   : > { %v7067_v29 = vunpack.i.l.bf16 %v11288_v28  ;;  %v11299_v54 = vpack.c.b16 %v5295_v61, %v5293_v25  ;;  %v4748_v25 = vsel %vm12235_vm0, %v7058_v46, %v7062_v19  ;;  %vm12247_vm9 = vmmov %vm12245_vm4 }
 0xdb1   : > { %v7086_v50 = vpop.permute.xlu0 %7085  ;;  %vm12249_vm0 = vmmov %vm12245_vm4 }
 0xdb2   : > { %v4841_v18 = vsel %vm12217_vm6, %v6938_v30, %v7067_v29  ;;  %v7088_v1 = vunpack.i.h.bf16 %v7086_v50  ;;  %v7087_v48 = vunpack.i.l.bf16 %v7086_v50  ;;  %v4749_v29 = vsel %vm12238_vm13, %v7062_v19, %v7063_v7  ;;  %vm12246_vm6 = vmmov %vm12245_vm4 }
 0xdb3   : > { %v4873_v44 = vsel %vm12234_vm7, %v4841_v18, 0.0  ;;  %v11323_v18 = vpack.c.bf16 %v4677_v6, %v4676_v15  ;;  %v7097_v19 = vunpack.i.l.bf16 %v11258_v62  ;;  %vm12248_vm7 = vmmov %vm12239_vm14 }
 0xdb4   : > { %v4646_v61 = vsel %vm12236_vm2, %v7083_v33, %v7087_v48  ;;  %v4647_v38 = vsel %vm12237_vm12, %v7087_v48, %v7088_v1  ;;  %v4888_v30 = vpack.c.bf16 %v4873_v44, %v4872_v36  ;;  %v7042_v1 = vunpack.i.l.bf16 %v11191_v4  ;;  %vm12250_vm2 = vmmov %vm12244_vm8 }
 0xdb5   : > { %v4678_v50 = vsel %vm12239_vm14, %v4646_v61, 0.0  ;;  %v4679_v41 = vsel %vm12240_vm15, %v4647_v38, 0.0  ;;  %5336 = vrot.lane.b32.xlu1 %v11069_v58, %s12197_s23  ;;  %7210 = vrot.lane.b32.xlu2 %v10741_v56, %s12191_s29  ;;  %v7047_v36 = vunpack.i.l.bf16 %v11205_v32  ;;  %v4780_v33 = vsel %vm1577_vm10, %v4748_v25, 0.0  ;;  %vm12251_vm12 = vmmov %vm12250_vm2 }
 0xdb6   : > { %v11327_v48 = vpack.c.bf16 %v4679_v41, %v4678_v50  ;;  %v5364_v46 = vunpack.c.l.b16 %v4888_v30  ;;  %v5365_v58 = vunpack.c.h.b16 %v4888_v30  ;;  %v4781_v4 = vsel %vm1578_vm11, %v4749_v29, 0.0  ;;  %vm12253_vm13 = vmmov %vm12249_vm0 }
 0xdb7   : > { %7215 = vrot.lane.b32.xlu0 %v10763_v9, %s12191_s29  ;;  %v7091_v56 = vpop.permute.xlu1 %7090  ;;  %v11335_v6 = vpop.permute.xlu2 %5442  ;;  %v7068_v32 = vunpack.i.h.bf16 %v11288_v28  ;;  %v5257_v25 = vunpack.c.h.b16 %v11323_v18  ;;  %v7073_v9 = vunpack.i.h.bf16 %v11207_v52  ;;  %v7072_v38 = vunpack.i.l.bf16 %v11207_v52  ;;  %vm12254_vm14 = vmmov %vm12249_vm0 }
 0xdb8   : > { %v7093_v15 = vunpack.i.h.bf16 %v7091_v56  ;;  %v7092_v7 = vunpack.i.l.bf16 %v7091_v56  ;;  %v11339_v47 = vpack.c.b16 %v5366_v0, %v5364_v46  ;;  %v5259_v62 = vunpack.c.h.b16 %v11327_v48  ;;  %vm12255_vm15 = vmmov %vm12248_vm7 }
 0xdb9   : > { %v7101_v44 = vpop.permute.xlu0 %7100  ;;  %v11344_v61 = vpack.c.b16 %v5367_v5, %v5365_v58  ;;  %v4790_v50 = vpack.c.bf16 %v4781_v4, %v4780_v33  ;;  %v4852_v58 = vsel %vm12243_vm5, %v7068_v32, %v7072_v38  ;;  %v4881_v52 = vsel %vm12244_vm8, %v4849_v59, 0.0 }
 0xdba   : > { %v4750_v30 = vsel %vm12241_vm1, %v7092_v7, %v7093_v15  ;;  %v4751_v29 = vsel %vm12242_vm3, %v7093_v15, %v7097_v19  ;;  %v11354_v41 = vpack.c.b16 %v5259_v62, %v5257_v25  ;;  %v7103_v5 = vunpack.i.h.bf16 %v7101_v44  ;;  %vm12256_vm1 = vmmov %vm12248_vm7 }
 0xdbb   : > { %v4782_v0 = vsel %vm1577_vm10, %v4750_v30, 0.0  ;;  %v4783_v28 = vsel %vm1578_vm11, %v4751_v29, 0.0  ;;  %v7102_v56 = vunpack.i.l.bf16 %v7101_v44  ;;  %v4850_v33 = vsel %vm12245_vm4, %v7042_v1, %v7043_v43  ;;  %vm12257_vm3 = vmmov %vm12250_vm2 }
 0xdbc   : > { %v4791_v46 = vpack.c.bf16 %v4783_v28, %v4782_v0  ;;  %v4851_v15 = vsel %vm12246_vm6, %v7043_v43, %v7047_v36  ;;  %v4853_v7 = vsel %vm12247_vm9, %v7072_v38, %v7073_v9  ;;  %v5297_v25 = vunpack.c.h.b16 %v4790_v50  ;;  %vm12258_vm5 = vmmov %vm12256_vm1 }
 0xdbd   : > { %5318 = vrot.lane.b32.xlu1 %v10821_v63, %s12197_s23  ;;  %5458 = vrot.lane.b32.xlu2 %v10954_v23, %s12168_s24  ;;  %v5296_v63 = vunpack.c.l.b16 %v4790_v50  ;;  %v4884_v62 = vsel %vm12248_vm7, %v4852_v58, 0.0  ;;  %v4854_v59 = vsel %vm12249_vm0, %v7102_v56, %v7103_v5  ;;  %v5292_v36 = vunpack.c.l.b16 %v11269_v31 }
 0xdbe   : > { %v5298_v19 = vunpack.c.l.b16 %v4791_v46  ;;  %v5299_v4 = vunpack.c.h.b16 %v4791_v46  ;;  %v5294_v9 = vunpack.c.l.b16 %v11280_v37  ;;  %v4883_v0 = vsel %vm12250_vm2, %v4851_v15, 0.0 }
 0xdbf   : > { %5452 = vrot.lane.b32.xlu0 %v10977_v26, %s12168_s24  ;;  %v7106_v32 = vpop.permute.xlu1 %7105  ;;  %v11368_v44 = vpop.permute.xlu2 %7125  ;;  %v4885_v50 = vsel %vm12251_vm12, %v4853_v7, 0.0  ;;  %v12252_v28 = vunpack.i.l.bf16 %v11123_v27  ;;  %v4886_v31 = vsel %vm12255_vm15, %v4854_v59, 0.0  ;;  %vm12259_vm8 = vcmask 1039360  }
 0xdc0   : > { %v7108_v1 = vunpack.i.h.bf16 %v7106_v32  ;;  %v7107_v30 = vunpack.i.l.bf16 %v7106_v32  ;;  %v5306_v43 = vpack.c.b16 %v5298_v19, %v5296_v63  ;;  %v11377_v38 = vpack.c.b16 %v5299_v4, %v5297_v25  ;;  %vm12263_vm9 = vmmov %vm12259_vm8 }
 0xdc1   : > { %v11373_v29 = vpop.permute.xlu0 %7110  ;;  %v4894_v58 = vpack.c.bf16 %v4885_v50, %v4884_v62  ;;  %v4882_v4 = vsel %vm12258_vm5, %v4850_v33, 0.0  ;;  %vm12261_vm4 = vcmask 785408   ;;  %vm12264_vm7 = vmmov %vm12259_vm8 }
 0xdc2   : > { %v4848_v46 = vsel %vm12253_vm13, %v7108_v1, %v12252_v28  ;;  %v4855_v56 = vsel %vm12254_vm14, %v7103_v5, %v7107_v30  ;;  %5697 = vmatpush.bf16.msra.mxu1 %v5306_v43  ;;  %v5304_v5 = vpack.c.b16 %v5294_v9, %v5292_v36  ;;  %v4893_v7 = vpack.c.bf16 %v4883_v0, %v4882_v4  ;;  %vm12262_vm6 = vmmov %vm12261_vm4 }
 0xdc3   : > { %v4880_v37 = vsel %vm12256_vm1, %v4848_v46, 0.0  ;;  %v4887_v19 = vsel %vm12257_vm3, %v4855_v56, 0.0  ;;  %v5376_v33 = vunpack.c.l.b16 %v4894_v58  ;;  %v5377_v59 = vunpack.c.h.b16 %v4894_v58  ;;  %vm12265_vm0 = vmmov %vm12261_vm4 }
 0xdc4   : > { %v4895_v15 = vpack.c.bf16 %v4887_v19, %v4886_v31  ;;  %v4892_v27 = vpack.c.bf16 %v4881_v52, %v4880_v37  ;;  %v5375_v30 = vunpack.c.h.b16 %v4893_v7  ;;  %v5258_v0 = vunpack.c.l.b16 %v11327_v48  ;;  %v4426_v19 = vld [vmem:[%s12260_s26 + $0x10] sm:$0xff]  ;;  %vm12266_vm2 = vmmov %vm12265_vm0 }
 0xdc5   : > { %7220 = vrot.lane.b32.xlu1 %v10765_v60, %s12191_s29  ;;  %5440 = vrot.lane.b32.xlu2 %v10779_v13, %s12168_s24  ;;  %v5256_v46 = vunpack.c.l.b16 %v11323_v18  ;;  %v7128_v48 = vunpack.i.h.bf16 %v11368_v44  ;;  %vm12267_vm12 = vmmov %vm12264_vm7  ;;  %vm12268_vm13 = vcmask 769024   ;;  %s6002_s29 = scalar_lea.hbm %s12345_s25, %s6461_s21  ;;  %s7470_s21 = scalar_lea.hbm %s12345_s25, 256 }
 0xdc6   : > { %v5378_v32 = vunpack.c.l.b16 %v4895_v15  ;;  %v5379_v63 = vunpack.c.h.b16 %v4895_v15  ;;  %5698 = vmatpush.bf16.msra.mxu1 %v5304_v5  ;;  %v5373_v52 = vunpack.c.h.b16 %v4892_v27  ;;  %v5372_v43 = vunpack.c.l.b16 %v4892_v27  ;;  %vm12269_vm14 = vmmov %vm12268_vm13  ;;  %s6005_s28 = sshll.u32 %s6002_s29, 4  ;;  %s6006_s28 = int_to_ptr.hbm [resolvable:$true] %s6005_s28 }
 0xdc7   : > { %5338 = vrot.lane.b32.xlu0 %v10954_v23, %s12197_s23  ;;  %v11401_v25 = vpop.permute.xlu1 %7115  ;;  %v11403_v62 = vpop.permute.xlu2 %7140  ;;  %v5374_v23 = vunpack.c.l.b16 %v4893_v7  ;;  %v5224_v27 = vsel %vm12263_vm9, %v11211_v51, %v11225_v2  ;;  %vm12270_vm15 = vmmov %vm12268_vm13  ;;  %s7464_s22 = sshra.s32 %s6006_s28, 4  ;;  %s7465_s22 = int_to_ptr.hbm [resolvable:$true] %s7464_s22 }
 0xdc8   : > { %v5386_v60 = vpack.c.b16 %v5378_v32, %v5376_v33  ;;  %v11407_v36 = vpack.c.b16 %v5379_v63, %v5377_v59  ;;  %v11410_v9 = vpack.c.b16 %v5375_v30, %v5373_v52  ;;  %v7127_v32 = vunpack.i.l.bf16 %v11368_v44  ;;  %v6441_v30 = vld [vmem:[#allocation5 + $0x4] sm:$0xf]  ;;  %vm12271_vm5 = vmmov %vm12268_vm13  ;;  %s7466_s20 = scalar_lea.hbm %s7465_s22, 128  ;;  %p7471_p11 = scmp.lt.s32.totalorder %s7465_s22, %s12345_s25 }
 0xdc9   : > { %v11405_v1 = vpop.permute.xlu0 %5444  ;;  %v5384_v50 = vpack.c.b16 %v5374_v23, %v5372_v43  ;;  %v5222_v52 = vsel %vm12264_vm7, %v11109_v11, %v11145_v14  ;;  %v7118_v44 = vunpack.i.h.bf16 %v11401_v25  ;;  %v7117_v59 = vunpack.i.l.bf16 %v11401_v25  ;;  %v6323_v43 = vld [vmem:[#allocation5 + $0x14] sm:$0xf0]  ;;  %p7467_p1 = scmp.ne.s32.totalorder %s7465_s22, %s7466_s20  ;;  %p7472_p9 = scmp.lt.s32.totalorder %s7470_s21, %s7466_s20 }
 0xdca   : > { %5699 = vmatpush.bf16.msra.mxu1 %v11147_v3  ;;  %5726 = vmatpush.bf16.msrb.mxu3 %v5386_v60  ;;  %v7112_v23 = vunpack.i.l.bf16 %v11373_v29  ;;  %v7113_v25 = vunpack.i.h.bf16 %v11373_v29 }
 0xdcb   : > { %p7468_p4 = pnand %p7467_p1, %p7683_p7  ;;  %p7473_p2 = por %p7472_p9, %p7471_p11 }
 0xdcd   : > { %5446 = vrot.lane.b32.xlu1 %v10859_v55, %s12168_s24  ;;  %5326 = vrot.lane.b32.xlu2 %v10859_v55, %s12197_s23  ;;  %v5266_v55 = vpack.c.b16 %v5258_v0, %v5256_v46  ;;  %v4429_v0 = vld [vmem:[%s12260_s26 + $0x28] sm:$0xff]  ;;  %v5220_v46 = vsel %vm12267_vm12, %v11094_v21, %v11029_v40  ;;  %vm12279_vm12 = vmmov %vm12257_vm3  ;;  %p7469_p8 = pneg %p7468_p4 }
 0xdce   : > { %5700 = vmatpush.bf16.msra.mxu1 %v11071_v42  ;;  %5727 = vmatpush.bf16.msrb.mxu3 %v5384_v50 }
 0xdcf   : > { %5320 = vrot.lane.b32.xlu0 %v10779_v13, %s12197_s23  ;;  %v5215_v28 = vpop.permute.xlu1 %5214  ;;  %v11420_v3 = vpop.permute.xlu2 %5328  ;;  %v4425_v13 = vld [vmem:[%s12260_s26 + $0x8] sm:$0xff]  ;;  %p7474_p10 = pnand %p7473_p2, %p7469_p8 }
 0xdd0   : > { %v5226_v56 = vsel %vm12259_vm8, %v5215_v28, %v11290_v24  ;;  %v7078_v28 = vunpack.i.h.bf16 %v11227_v53  ;;  %vm12272_vm8 = vmmov %vm12271_vm5 }
 0xdd1   : > { %v7131_v58 = vpop.permute.xlu0 %7130  ;;  %5668 = vmatpush.bf16.msrb.mxu2 %v5226_v56  ;;  %v11477_v56 = vor.u32 %v6441_v30, %v6323_v43 }
 0xdd2   : > { %v7133_v31 = vunpack.i.h.bf16 %v7131_v58  ;;  %v7132_v37 = vunpack.i.l.bf16 %v7131_v58  ;;  %5701 = vmatpush.bf16.msra.mxu1 %v5266_v55  ;;  %5728 = vmatpush.bf16.msrb.mxu3 %v11230_v35  ;;  %v5061_v21 = vsel %vm12270_vm15, %v7078_v28, %v7112_v23  ;;  %vm12282_vm15 = vcmask 1039360  }
 0xdd4   : > { %v4958_v42 = vsel %vm12261_vm4, %v7128_v48, %v7132_v37  ;;  %v4959_v18 = vsel %vm12262_vm6, %v7132_v37, %v7133_v31  ;;  %v5062_v48 = vsel %vm12268_vm13, %v7113_v25, %v7117_v59  ;;  %v5063_v31 = vsel %vm12269_vm14, %v7117_v59, %v7118_v44  ;;  %vm12273_vm4 = vmmov %vm12271_vm5 }
 0xdd5   : > { %v4990_v4 = vsel %vm1577_vm10, %v4958_v42, 0.0  ;;  %v4991_v15 = vsel %vm1578_vm11, %v4959_v18, 0.0  ;;  %5332 = vrot.lane.b32.xlu1 %v10977_v26, %s12197_s23  ;;  %5523 = vperm.xlu2 %6543, %v4425_v13   ;;  %vm12274_vm6 = vmmov %vm12257_vm3  ;;  %s6003_s23 = sshll.u32 %s11826_s18, 4  ;;  %s6004_s23 = int_to_ptr.vmem [resolvable:$true] %s6003_s23 }
 0xdd6   : > { %5669 = vmatpush.bf16.msrb.mxu2 %v5224_v27  ;;  %v4999_v35 = vpack.c.bf16 %v4991_v15, %v4990_v4  ;;  %5702 = vmatpush.bf16.msra.mxu1 %v11193_v8  ;;  %v4424_v8 = vld [vmem:[%s12260_s26] sm:$0xff]  ;;  %vm12275_vm9 = vmmov %vm12273_vm4 }
 0xdd7   : > { %5528 = vperm.xlu0 %6542, %v4426_v19   ;;  %v7121_v5 = vpop.permute.xlu1 %7120  ;;  %v11445_v7 = vpop.permute.xlu2 %5438  ;;  %5729 = vmatpush.bf16.msrb.mxu3 %v11339_v47  ;;  %v4428_v47 = vld [vmem:[%s12260_s26 + $0x20] sm:$0xff]  ;;  %vm12276_vm7 = vmmov %vm12273_vm4 }
 0xdd8   : > { %v7123_v63 = vunpack.i.h.bf16 %v7121_v5  ;;  %v7122_v33 = vunpack.i.l.bf16 %v7121_v5  ;;  %v5418_v13 = vunpack.c.l.b16 %v4999_v35  ;;  %v5419_v42 = vunpack.c.h.b16 %v4999_v35  ;;  %vm12281_vm14 = vmmov %vm12257_vm3 }
 0xdd9   : > { %v7146_v26 = vpop.permute.xlu0 %7145  ;;  %v5095_v35 = vsel %vm12257_vm3, %v5063_v31, 0.0  ;;  %vm12284_vm3 = vmmov %vm12273_vm4 }
 0xdda   : > { %v4956_v51 = vsel %vm12265_vm0, %v7122_v33, %v7123_v63  ;;  %v4957_v2 = vsel %vm12266_vm2, %v7123_v63, %v7127_v32  ;;  %5670 = vmatpush.bf16.msrb.mxu2 %v5222_v52  ;;  %5703 = vmatpush.bf16.msra.mxu1 %v11125_v10  ;;  %v7077_v10 = vunpack.i.l.bf16 %v11227_v53  ;;  %v7142_v53 = vunpack.i.l.bf16 %v11403_v62  ;;  %v4427_v63 = vld [vmem:[%s12260_s26 + $0x18] sm:$0xff]  ;;  %vm12277_vm0 = vmmov %vm12256_vm1 }
 0xddb   : > { %v4988_v11 = vsel %vm1577_vm10, %v4956_v51, 0.0  ;;  %v4989_v60 = vsel %vm1578_vm11, %v4957_v2, 0.0  ;;  %v7148_v4 = vunpack.i.h.bf16 %v7146_v26  ;;  %v7147_v15 = vunpack.i.l.bf16 %v7146_v26  ;;  %v4431_v33 = vld [vmem:[%s12260_s26 + $0x38] sm:$0xff]  ;;  %vm12278_vm2 = vmmov %vm12277_vm0 }
 0xddc   : > { %v4998_v50 = vpack.c.bf16 %v4989_v60, %v4988_v11  ;;  %v5060_v26 = vsel %vm12271_vm5, %v7077_v10, %v7078_v28  ;;  %v7143_v52 = vunpack.i.h.bf16 %v11403_v62  ;;  %vm12280_vm13 = vmmov %vm12277_vm0  ;;  %v6443_v10 = vld [vmem:[#allocation5 + $0x10] sm:$0xf0] }
 0xddd   : > { %5518 = vperm.xlu1 %6541, %v4424_v8   ;;  %5538 = vperm.xlu2 %6543, %v4428_v47   ;;  %v5059_v44 = vsel %vm12276_vm7, %v7147_v15, %v7148_v4  ;;  %v5092_v59 = vsel %vm12277_vm0, %v5060_v26, 0.0  ;;  %v6451_v26 = vld [vmem:[#allocation5 + $0x54] sm:$0xf]  ;;  %vm12285_vm5 = vmmov %vm12284_vm3 }
 0xdde   : > { %5671 = vmatpush.bf16.msrb.mxu2 %v5220_v46  ;;  %v5416_v58 = vunpack.c.l.b16 %v4998_v50  ;;  %v5417_v55 = vunpack.c.h.b16 %v4998_v50  ;;  %5704 = vmatpush.bf16.msra.mxu1 %v11051_v45  ;;  %v5094_v45 = vsel %vm12256_vm1, %v5062_v48, 0.0  ;;  %v5058_v47 = vsel %vm12275_vm9, %v7143_v52, %v7147_v15  ;;  %v6321_v46 = vld [vmem:[#allocation5] sm:$0xf]  ;;  %v6363_v52 = vld [vmem:[#allocation5 + $0x64] sm:$0xf0]  ;;  %vm12283_vm1 = vmmov %vm12282_vm15 }
 0xddf   : > { %5543 = vperm.xlu0 %6542, %v4429_v0   ;;  %v7136_v29 = vpop.permute.xlu1 %7135  ;;  %v11482_v37 = vpop.permute.xlu2 %7160  ;;  %v11510_v8 = vpack.c.bf16 %v5095_v35, %v5094_v45  ;;  %v5090_v23 = vsel %vm12280_vm13, %v5058_v47, 0.0  ;;  %v5091_v0 = vsel %vm12281_vm14, %v5059_v44, 0.0  ;;  %v6343_v48 = vld [vmem:[#allocation5 + $0x3c] sm:$0xf0]  ;;  %vm12288_vm9 = vmmov %vm12277_vm0  ;;  %vm12297_vm14 = vcmask 777216  }
 0xde0   : > { %v7138_v18 = vunpack.i.h.bf16 %v7136_v29  ;;  %v7137_v19 = vunpack.i.l.bf16 %v7136_v29  ;;  %v11488_v5 = vpack.c.b16 %v5418_v13, %v5416_v58  ;;  %v11490_v32 = vpack.c.b16 %v5419_v42, %v5417_v55  ;;  %v6446_v55 = vld [vmem:[#allocation5 + $0x2c] sm:$0xf]  ;;  %vm12289_vm7 = vmmov %vm12274_vm6 }
 0xde1   : > { %v11486_v27 = vpop.permute.xlu0 %5330  ;;  %5705 = vmatmul.bf16.vlgmr.msra.gmra.mxu1 %v11477_v56  ;;  %v5498_v28 = vunpack.c.l.b16 %v11510_v8  ;;  %v11537_v31 = vpack.c.bf16 %v5091_v0, %v5090_v23  ;;  %v11539_v13 = vor.u32 %v6443_v10, %v6321_v46 }
 0xde2   : > { %5672 = vmatpush.bf16.msrb.mxu2 %v10956_v16  ;;  %v5056_v51 = vsel %vm12272_vm8, %v7137_v19, %v7138_v18  ;;  %v5057_v2 = vsel %vm12273_vm4, %v7138_v18, %v7142_v53  ;;  %v5093_v16 = vsel %vm12274_vm6, %v5061_v21, 0.0  ;;  %vm12286_vm8 = vmmov %vm12284_vm3 }
 0xde3   : > { %v5088_v62 = vsel %vm12278_vm2, %v5056_v51, 0.0  ;;  %v5089_v11 = vsel %vm12279_vm12, %v5057_v2, 0.0  ;;  %v11521_v60 = vpack.c.bf16 %v5093_v16, %v5092_v59  ;;  %v5494_v18 = vunpack.c.l.b16 %v11537_v31  ;;  %vm12287_vm4 = vmmov %vm12284_vm3 }
 0xde4   : > { %v11530_v25 = vpack.c.bf16 %v5089_v11, %v5088_v62  ;;  %v11559_v59 = vor.u32 %v6451_v26, %v6363_v52  ;;  %vm12290_vm2 = vmmov %vm12283_vm1  ;;  %v6456_v26 = vld [vmem:[#allocation5 + $0x7c] sm:$0xf]  ;;  %v6383_v52 = vld [vmem:[#allocation5 + $0x8c] sm:$0xf0]  ;;  %vm12295_vm12 = vcmask 785408  }
 0xde5   : > { %5533 = vperm.xlu1 %6541, %v4427_v63   ;;  %5553 = vperm.xlu2 %6543, %v4431_v33   ;;  %v5496_v58 = vunpack.c.l.b16 %v11521_v60  ;;  %v6341_v63 = vld [vmem:[#allocation5 + $0x28] sm:$0xf]  ;;  %v6448_v33 = vld [vmem:[#allocation5 + $0x38] sm:$0xf0]  ;;  %vm12296_vm13 = vmmov %vm12295_vm12 }
 0xde6   : > { %5673 = vmatpush.bf16.msrb.mxu2 %v10946_v49  ;;  %v4430_v49 = vld [vmem:[%s12260_s26 + $0x30] sm:$0xff]  ;;  %v5492_v42 = vunpack.c.l.b16 %v11530_v25  ;;  %v11557_v44 = vor.u32 %v6448_v33, %v6341_v63  ;;  %v6453_v33 = vld [vmem:[#allocation5 + $0x60] sm:$0xf0] }
 0xde7   : > { %v5207_v30 = vpop.permute.xlu1 %5206  ;;  %v7176_v43 = vpop.permute.xlu2 %7175  ;;  %v5506_v29 = vpack.c.b16 %v5498_v28, %v5496_v58  ;;  %v6361_v63 = vld [vmem:[#allocation5 + $0x50] sm:$0xf] }
 0xde8   : > { %v5504_v4 = vpack.c.b16 %v5494_v18, %v5492_v42  ;;  %v7178_v51 = vunpack.i.h.bf16 %v7176_v43  ;;  %v7177_v2 = vunpack.i.l.bf16 %v7176_v43 }
 0xde9   : > { %v11527_v50 = vpop.permute.xlu0 %7150 }
 0xdea   : > { %5674 = vmatpush.bf16.msrb.mxu2 %v10863_v39  ;;  %v11543_v39 = vor.u32 %v6446_v55, %v6343_v48  ;;  %v5055_v11 = vsel %vm12284_vm3, %v7177_v2, %v7178_v51  ;;  %v12292_v51 = vld [vmem:[#allocation33_spill] sm:$0xff]  ;;  %vm12302_vm3 = vmmov %vm12295_vm12 }
 0xded   : > { %5548 = vperm.xlu1 %6541, %v4430_v49  }
 0xdee   : > { %5675 = vmatpush.bf16.msrb.mxu2 %v10801_v12 }
 0xdef   : > { %v11545_v21 = vpop.permute.xlu1 %5436  ;;  %v11547_v53 = vpop.permute.xlu2 %5324 }
 0xdf1   : > { %v7166_v19 = vpop.permute.xlu0 %7165  ;;  %5676 = vmatmul.bf16.vlgmr.msrb.gmra.mxu2 %v11539_v13  ;;  %5710 = vmatmul.bf16.gmra.mxu1 %v11543_v39 }
 0xdf2   : > { %5788 = vmatpush.bf16.msra.mxu2 %v5506_v29  ;;  %v7168_v16 = vunpack.i.h.bf16 %v7166_v19  ;;  %v7167_v47 = vunpack.i.l.bf16 %v7166_v19 }
 0xdf4   : > { %v5052_v23 = vsel %vm12285_vm5, %v7167_v47, %v7168_v16 }
 0xdf6   : > { %5789 = vmatpush.bf16.msra.mxu2 %v5504_v4 }
 0xdf7   : > { %v11552_v15 = vpop.permute.xlu1 %7155  ;;  %v5219_v45 = vpop.permute.xlu2 %5218 }
 0xdf8   : > { %v5227_v12 = vsel %vm12282_vm15, %v11290_v24, %v5219_v45  ;;  %v5223_v24 = vsel %vm12283_vm1, %v11145_v14, %v5207_v30  ;;  %v5087_v14 = vsel %vm12274_vm6, %v5055_v11, 0.0  ;;  %v5084_v30 = vsel %vm12288_vm9, %v5052_v23, 0.0  ;;  %vm12298_vm15 = vmmov %vm12295_vm12 }
 0xdf9   : > { %v5201_v35 = vpop.permute.xlu0 %5200  ;;  %5813 = vmatpush.bf16.msrb.mxu1 %v5227_v12  ;;  %v12291_v12 = vld [vmem:[#allocation38_spill] sm:$0xff]  ;;  %v7153_v11 = vunpack.i.h.bf16 %v11527_v50  ;;  %v7152_v23 = vunpack.i.l.bf16 %v11527_v50  ;;  %vm12301_vm1 = vmmov %vm12297_vm14 }
 0xdfa   : > { %v5221_v58 = vsel %vm12290_vm2, %v11029_v40, %v5201_v35  ;;  %v11587_v40 = vor.u32 %v6453_v33, %v6361_v63  ;;  %v11589_v35 = vor.u32 %v6456_v26, %v6383_v52  ;;  %v6381_v33 = vld [vmem:[#allocation5 + $0x78] sm:$0xf]  ;;  %v6458_v26 = vld [vmem:[#allocation5 + $0x88] sm:$0xf0]  ;;  %vm12303_vm5 = vmmov %vm12301_vm1 }
 0xdfb   : > { %v4952_v50 = vsel %vm12295_vm12, %v7152_v23, %v7153_v11  ;;  %vm12305_vm6 = vmmov %vm12287_vm4 }
 0xdfc   : > { %vm12306_vm9 = vmmov %vm12302_vm3 }
 0xdfd   : > { %5814 = vmatpush.bf16.msrb.mxu1 %v11236_v20  ;;  %vm12310_vm12 = vmmov %vm12287_vm4 }
 0xdff   : > { %v7171_v62 = vpop.permute.xlu1 %7170  ;;  %v11583_v4 = vpop.permute.xlu2 %7190 }
 0xe00   : > { %v7173_v0 = vunpack.i.h.bf16 %v7171_v62  ;;  %v7172_v28 = vunpack.i.l.bf16 %v7171_v62  ;;  %v12293_v62 = vld [vmem:[#allocation34_spill] sm:$0xff] }
 0xe01   : > { %v11565_v49 = vpop.permute.xlu0 %7180  ;;  %5681 = vmatmul.bf16.gmra.mxu2 %v11557_v44  ;;  %5815 = vmatpush.bf16.msrb.mxu1 %v5223_v24  ;;  %v5497_v24 = vunpack.c.h.b16 %v11521_v60  ;;  %v7163_v60 = vunpack.i.h.bf16 %v11482_v37 }
 0xe02   : > { %v5053_v20 = vsel %vm12286_vm8, %v7168_v16, %v7172_v28  ;;  %v5054_v43 = vsel %vm12287_vm4, %v7173_v0, %v7177_v2  ;;  %5715 = vmatmul.bf16.gmra.mxu1 %v11559_v59  ;;  %v5499_v16 = vunpack.c.h.b16 %v11510_v8  ;;  %v5493_v28 = vunpack.c.h.b16 %v11530_v25  ;;  %vm12304_vm8 = vmmov %vm12301_vm1 }
 0xe03   : > { %v5085_v46 = vsel %vm12289_vm7, %v5053_v20, 0.0  ;;  %v5086_v10 = vsel %vm12277_vm0, %v5054_v43, 0.0  ;;  %v7157_v8 = vunpack.i.l.bf16 %v11552_v15  ;;  %v12294_v43 = vld [vmem:[#allocation40_spill] sm:$0xff]  ;;  %vm12307_vm7 = vmmov %vm12302_vm3 }
 0xe04   : > { %v5098_v55 = vpack.c.bf16 %v5085_v46, %v5084_v30  ;;  %v5099_v48 = vpack.c.bf16 %v5087_v14, %v5086_v10  ;;  %v5507_v20 = vpack.c.b16 %v5499_v16, %v5497_v24  ;;  %v5495_v14 = vunpack.c.h.b16 %v11537_v31  ;;  %vm12308_vm0 = vmmov %vm12302_vm3 }
 0xe05   : > { %5816 = vmatpush.bf16.msrb.mxu1 %v5221_v58  ;;  %v7158_v30 = vunpack.i.h.bf16 %v11552_v15  ;;  %v7162_v46 = vunpack.i.l.bf16 %v11482_v37  ;;  %v4953_v25 = vsel %vm12296_vm13, %v7153_v11, %v7157_v8  ;;  %v12300_v37 = vld [vmem:[#allocation23_spill] sm:$0xff]  ;;  %vm12309_vm2 = vmmov %vm12308_vm0 }
 0xe06   : > { %v5488_v29 = vunpack.c.l.b16 %v5098_v55  ;;  %v5490_v42 = vunpack.c.l.b16 %v5099_v48  ;;  %v5505_v58 = vpack.c.b16 %v5495_v14, %v5493_v28  ;;  %v7193_v14 = vunpack.i.h.bf16 %v11583_v4  ;;  %vm12311_vm13 = vmmov %vm12287_vm4 }
 0xe07   : > { %v11581_v18 = vpop.permute.xlu1 %5322  ;;  %v11602_v0 = vpop.permute.xlu2 %7205  ;;  %v4954_v15 = vsel %vm12298_vm15, %v7158_v30, %v7162_v46  ;;  %v4955_v52 = vsel %vm12302_vm3, %v7162_v46, %v7163_v60  ;;  %v5460_v46 = vsel %vm12304_vm8, %v11545_v21, %v11445_v7  ;;  %vm12313_vm15 = vcmp.lt.s32.totalorder %v12174_v34, 16 }
 0xe08   : > { %v5502_v19 = vpack.c.b16 %v5490_v42, %v5488_v29  ;;  %v5489_v42 = vunpack.c.h.b16 %v5098_v55  ;;  %v4985_v55 = vsel %vm1578_vm11, %v4953_v25, 0.0  ;;  %v4986_v11 = vsel %vm1577_vm10, %v4954_v15, 0.0  ;;  %vm12315_vm3 = vmmov %vm12313_vm15 }
 0xe09   : > { %v5455_v45 = vpop.permute.xlu0 %5454  ;;  %5817 = vmatpush.bf16.msrb.mxu1 %v12291_v12  ;;  %v12299_v12 = vld [vmem:[#allocation36_spill] sm:$0xff]  ;;  %v4987_v30 = vsel %vm1578_vm11, %v4955_v52, 0.0 }
 0xe0a   : > { %5790 = vmatpush.bf16.msra.mxu2 %v5502_v19  ;;  %v5491_v19 = vunpack.c.h.b16 %v5099_v48  ;;  %v5464_v63 = vsel %vm12301_vm1, %v12300_v37, %v12299_v12  ;;  %v7208_v48 = vunpack.i.h.bf16 %v11602_v0 }
 0xe0c   : > { %v5503_v24 = vpack.c.b16 %v5491_v19, %v5489_v42 }
 0xe0d   : > { %5818 = vmatpush.bf16.msrb.mxu1 %v12292_v51  ;;  %v4984_v51 = vsel %vm1577_vm10, %v4952_v50, 0.0 }
 0xe0e   : > { %v11652_v50 = vpack.c.bf16 %v4985_v55, %v4984_v51 }
 0xe0f   : > { %v11591_v2 = vpop.permute.xlu1 %7185  ;;  %v11636_v8 = vpop.permute.xlu2 %7210 }
 0xe10   : > { %v7188_v23 = vunpack.i.h.bf16 %v11591_v2  ;;  %v7187_v28 = vunpack.i.l.bf16 %v11591_v2  ;;  %v5462_v2 = vsel %vm12303_vm5, %v11335_v6, %v11405_v1  ;;  %v11661_v6 = vpack.c.bf16 %v4987_v30, %v4986_v11 }
 0xe11   : > { %v11594_v47 = vpop.permute.xlu0 %7195  ;;  %5686 = vmatmul.bf16.gmra.mxu2 %v11587_v40  ;;  %5819 = vmatpush.bf16.msrb.mxu1 %v12293_v62  ;;  %vm12316_vm5 = vcmask 908288  }
 0xe12   : > { %5720 = vmatmul.bf16.gmra.mxu1 %v11589_v35  ;;  %v7198_v16 = vunpack.i.h.bf16 %v11594_v47  ;;  %v7197_v62 = vunpack.i.l.bf16 %v11594_v47  ;;  %v7192_v47 = vunpack.i.l.bf16 %v11583_v4 }
 0xe14   : > { %v4950_v42 = vsel %vm12307_vm7, %v7188_v23, %v7192_v47  ;;  %v4951_v15 = vsel %vm12309_vm2, %v7192_v47, %v7193_v14  ;;  %vm12320_vm7 = vcmask 523264  }
 0xe15   : > { %5820 = vmatpush.bf16.msrb.mxu1 %v12294_v43  ;;  %v7183_v43 = vunpack.i.h.bf16 %v11565_v49 }
 0xe17   : > { %v11612_v10 = vpop.permute.xlu1 %5456  ;;  %v5459_v23 = vpop.permute.xlu2 %5458 }
 0xe18   : > { %v5466_v29 = vsel %vm12297_vm14, %v5455_v45, %v11612_v10  ;;  %v7207_v45 = vunpack.i.l.bf16 %v11602_v0  ;;  %v7182_v0 = vunpack.i.l.bf16 %v11565_v49  ;;  %vm12312_vm14 = vcmp.lt.s32.totalorder %v12171_v22, 16 }
 0xe19   : > { %5933 = vmatpush.bf16.msra.mxu1 %v5507_v20  ;;  %v11617_v31 = vpop.permute.xlu0 %5334  ;;  %5755 = vmatpush.bf16.msrb.mxu0 %v5466_v29  ;;  %v11638_v20 = vor.u32 %v6458_v26, %v6381_v33  ;;  %v4949_v29 = vsel %vm12306_vm9, %v7183_v43, %v7187_v28  ;;  %vm12314_vm1 = vmmov %vm12312_vm14 }
 0xe1a   : > { %v5051_v49 = vsel %vm12287_vm4, %v7207_v45, %v7208_v48  ;;  %v4948_v21 = vsel %vm12308_vm0, %v7182_v0, %v7183_v43  ;;  %v4981_v55 = vsel %vm1578_vm11, %v4949_v29, 0.0  ;;  %v4982_v48 = vsel %vm1577_vm10, %v4950_v42, 0.0  ;;  %v6337_v29 = vld [vmem:[#allocation5 + $0x10] sm:$0xf]  ;;  %v6445_v42 = vld [vmem:[#allocation5 + $0x20] sm:$0xf0]  ;;  %vm12317_vm4 = vmmov %vm12316_vm5 }
 0xe1b   : > { %v5083_v33 = vsel %vm12312_vm14, %v5051_v49, 0.0  ;;  %v5412_v43 = vunpack.c.l.b16 %v11652_v50  ;;  %v5414_v0 = vunpack.c.l.b16 %v11661_v6  ;;  %v5467_v49 = vsel %vm12304_vm8, %v11612_v10, %v5459_v23  ;;  %vm12319_vm9 = vmmov %vm12304_vm8  ;;  %v6357_v23 = vld [vmem:[#allocation5 + $0x38] sm:$0xf] }
 0xe1c   : > { %vm12321_vm2 = vmmov %vm12317_vm4 }
 0xe1d   : > { %5934 = vmatpush.bf16.msra.mxu1 %v5505_v58  ;;  %5756 = vmatpush.bf16.msrb.mxu0 %v5464_v63  ;;  %v5048_v58 = vsel %vm12305_vm6, %v7197_v62, %v7198_v16  ;;  %v4983_v62 = vsel %vm1578_vm11, %v4951_v15, 0.0  ;;  %vm12318_vm6 = vmmov %vm12317_vm4 }
 0xe1e   : > { %v5080_v26 = vsel %vm12313_vm15, %v5048_v58, 0.0  ;;  %v11690_v47 = vpack.c.bf16 %v4983_v62, %v4982_v48  ;;  %v5424_v58 = vpack.c.b16 %v5414_v0, %v5412_v43  ;;  %vm12324_vm14 = vmmov %vm12308_vm0  ;;  %v6450_v43 = vld [vmem:[#allocation5 + $0x48] sm:$0xf0]  ;;  %v12325_v0 = vld [vmem:[#allocation32_spill] sm:$0xff] }
 0xe1f   : > { %v7201_v60 = vpop.permute.xlu1 %7200  ;;  %vm12326_vm15 = vmmov %vm12304_vm8  ;;  %v5441_v57 = vpop.permute.xlu2 %5440 }
 0xe20   : > { %v7203_v4 = vunpack.i.h.bf16 %v7201_v60  ;;  %v7202_v25 = vunpack.i.l.bf16 %v7201_v60 }
 0xe21   : > { %5935 = vmatpush.bf16.msra.mxu1 %v5503_v24  ;;  %v11658_v19 = vpop.permute.xlu0 %5316  ;;  %5691 = vmatmul.bf16.gmra.mxu2 %v11638_v20 }
 0xe22   : > { %5757 = vmatpush.bf16.msrb.mxu0 %v5462_v2  ;;  %v5049_v37 = vsel %vm12310_vm12, %v7198_v16, %v7202_v25  ;;  %v5050_v63 = vsel %vm12311_vm13, %v7203_v4, %v7207_v45  ;;  %5821 = vmatmul.bf16.vlgmr.msrb.gmra.mxu1 %v11539_v13  ;;  %v4980_v16 = vsel %vm1577_vm10, %v4948_v21, 0.0  ;;  %v5410_v25 = vunpack.c.l.b16 %v11690_v47  ;;  %vm12322_vm12 = vmmov %vm12308_vm0 }
 0xe23   : > { %v5081_v52 = vsel %vm12314_vm1, %v5049_v37, 0.0  ;;  %v5082_v51 = vsel %vm12315_vm3, %v5050_v63, 0.0  ;;  %v11688_v14 = vpack.c.bf16 %v4981_v55, %v4980_v16  ;;  %v5342_v37 = vsel %vm12318_vm6, %v11581_v18, %v11547_v53  ;;  %vm12323_vm13 = vmmov %vm12308_vm0 }
 0xe24   : > { %v5096_v45 = vpack.c.bf16 %v5081_v52, %v5080_v26  ;;  %v5097_v13 = vpack.c.bf16 %v5083_v33, %v5082_v51  ;;  %v6329_v33 = vld [vmem:[#allocation5 + $0x8] sm:$0xf]  ;;  %v6444_v26 = vld [vmem:[#allocation5 + $0x18] sm:$0xf0]  ;;  %v7213_v52 = vunpack.i.h.bf16 %v11636_v8  ;;  %vm12333_vm1 = vmmov %vm12321_vm2 }
 0xe25   : > { %v5408_v4 = vunpack.c.l.b16 %v11688_v14  ;;  %v11721_v48 = vor.u32 %v6444_v26, %v6329_v33  ;;  %v6447_v33 = vld [vmem:[#allocation5 + $0x34] sm:$0xf]  ;;  %vm12335_vm3 = vmmov %vm12320_vm7 }
 0xe26   : > { %5758 = vmatpush.bf16.msrb.mxu0 %v5460_v46  ;;  %v5484_v22 = vunpack.c.l.b16 %v5096_v45  ;;  %v5486_v24 = vunpack.c.l.b16 %v5097_v13  ;;  %v5485_v11 = vunpack.c.h.b16 %v5096_v45  ;;  %v5487_v34 = vunpack.c.h.b16 %v5097_v13  ;;  %vm12339_vm6 = vmmov %vm12335_vm3 }
 0xe27   : > { %v11684_v28 = vpop.permute.xlu1 %5336  ;;  %v5422_v10 = vpack.c.b16 %v5410_v25, %v5408_v4  ;;  %v11740_v4 = vor.u32 %v6450_v43, %v6357_v23  ;;  %v6349_v25 = vld [vmem:[#allocation5 + $0x30] sm:$0xf]  ;;  %v6459_v23 = vld [vmem:[#allocation5 + $0x90] sm:$0xf0] }
 0xe28   : > { %v5346_v30 = vsel %vm12316_vm5, %v11617_v31, %v11684_v28  ;;  %v5500_v60 = vpack.c.b16 %v5486_v24, %v5484_v22  ;;  %v5501_v2 = vpack.c.b16 %v5487_v34, %v5485_v11  ;;  %v5344_v31 = vsel %vm12317_vm4, %v11420_v3, %v11486_v27  ;;  %vm12336_vm5 = vmmov %vm12333_vm1 }
 0xe29   : > { %v7216_v46 = vpop.permute.xlu0 %7215  ;;  %5730 = vmatpush.bf16.msrb.mxu3 %v5346_v30  ;;  %v7212_v3 = vunpack.i.l.bf16 %v11636_v8  ;;  %vm12338_vm4 = vmmov %vm12333_vm1 }
 0xe2a   : > { %5759 = vmatpush.bf16.msrb.mxu0 %v11488_v5  ;;  %5791 = vmatpush.bf16.msra.mxu2 %v5500_v60  ;;  %v11703_v5 = vor.u32 %v6445_v42, %v6337_v29  ;;  %v7217_v15 = vunpack.i.l.bf16 %v7216_v46  ;;  %v7218_v45 = vunpack.i.h.bf16 %v7216_v46  ;;  %v6331_v46 = vld [vmem:[#allocation5 + $0x1c] sm:$0xf0]  ;;  %v6449_v29 = vld [vmem:[#allocation5 + $0x40] sm:$0xf0]  ;;  %v12327_v42 = vld [vmem:[#allocation37_spill] sm:$0xff] }
 0xe2b   : > { %5936 = vmatpush.bf16.msra.mxu1 %v5501_v2  ;;  %v4944_v8 = vsel %vm12322_vm12, %v7212_v3, %v7213_v52  ;;  %v6442_v2 = vld [vmem:[#allocation5 + $0xc] sm:$0xf] }
 0xe2c   : > { %v4945_v18 = vsel %vm12308_vm0, %v7213_v52, %v7217_v15  ;;  %v4976_v62 = vsel %vm1577_vm10, %v4944_v8, 0.0  ;;  %v11742_v17 = vor.u32 %v6442_v2, %v6331_v46  ;;  %vm12342_vm0 = vmmov %vm12335_vm3 }
 0xe2d   : > { %5731 = vmatpush.bf16.msrb.mxu3 %v5344_v31 }
 0xe2e   : > { %5900 = vmatpush.bf16.msrb.mxu2 %v5467_v49  ;;  %5760 = vmatpush.bf16.msrb.mxu0 %v5424_v58 }
 0xe2f   : > { %v11705_v21 = vpop.permute.xlu1 %5318 }
 0xe30   : > { %v5340_v55 = vsel %vm12321_vm2, %v11658_v19, %v11705_v21  ;;  %vm12343_vm2 = vmmov %vm12342_vm0 }
 0xe31   : > { %v5453_v63 = vpop.permute.xlu0 %5452  ;;  %5732 = vmatpush.bf16.msrb.mxu3 %v5342_v37  ;;  %6399 = vmatmul.msk.bf16.vlgmr.msra.gmra.mxu2 %vm12320_vm7, %v11703_v5  ;;  %v5409_v37 = vunpack.c.h.b16 %v11688_v14  ;;  %v6454_v14 = vld [vmem:[#allocation5 + $0x68] sm:$0xf0] }
 0xe32   : > { %5761 = vmatpush.bf16.msrb.mxu0 %v5422_v10  ;;  %5826 = vmatmul.bf16.gmra.mxu1 %v11557_v44  ;;  %v5465_v51 = vsel %vm12319_vm9, %v12299_v12, %v5453_v63  ;;  %v4977_v44 = vsel %vm1578_vm11, %v4945_v18, 0.0  ;;  %v5415_v10 = vunpack.c.h.b16 %v11661_v6  ;;  %v5411_v63 = vunpack.c.h.b16 %v11690_v47  ;;  %v12332_v6 = vld [vmem:[#allocation29_spill] sm:$0xff]  ;;  %vm12340_vm9 = vmmov %vm12335_vm3 }
 0xe33   : > { %5901 = vmatpush.bf16.msrb.mxu2 %v5465_v51  ;;  %v4992_v24 = vpack.c.bf16 %v4977_v44, %v4976_v62  ;;  %v12334_v44 = vld [vmem:[#allocation35_spill] sm:$0xff] }
 0xe34   : > { %v6460_v62 = vld [vmem:[#allocation5 + $0x98] sm:$0xf0] }
 0xe35   : > { %5733 = vmatpush.bf16.msrb.mxu3 %v5340_v55  ;;  %v5404_v30 = vunpack.c.l.b16 %v4992_v24  ;;  %v5405_v18 = vunpack.c.h.b16 %v4992_v24  ;;  %v6369_v55 = vld [vmem:[#allocation5 + $0x58] sm:$0xf]  ;;  %v6371_v24 = vld [vmem:[#allocation5 + $0x6c] sm:$0xf0] }
 0xe37   : > { %v7221_v12 = vpop.permute.xlu1 %7220 }
 0xe38   : > { %v7223_v13 = vunpack.i.h.bf16 %v7221_v12  ;;  %v7222_v16 = vunpack.i.l.bf16 %v7221_v12  ;;  %5734 = vmatmul.bf16.vlgmr.msrb.gmra.mxu3 %v11721_v48 }
 0xe39   : > { %5842 = vmatpush.bf16.msra.mxu3 %v11377_v38  ;;  %v5339_v26 = vpop.permute.xlu0 %5338 }
 0xe3a   : > { %v4946_v19 = vsel %vm12323_vm13, %v7218_v45, %v7222_v16  ;;  %v4947_v22 = vsel %vm12324_vm14, %v7222_v16, %v7223_v13  ;;  %v5347_v47 = vsel %vm12333_vm1, %v11684_v28, %v5339_v26  ;;  %v6370_v45 = vor.u32 %v6454_v14, %v6369_v55  ;;  %v5327_v13 = vpop.permute.xlu2 %5326  ;;  %v6397_v16 = vld [vmem:[#allocation5 + $0x88] sm:$0xf]  ;;  %v7374_v26 = vld [vmem:[%s7717_s14] sm:$0xff] }
 0xe3b   : > { %v4978_v38 = vsel %vm1577_vm10, %v4946_v19, 0.0  ;;  %v4979_v11 = vsel %vm1578_vm11, %v4947_v22, 0.0  ;;  %vm12328_vm10 = vmmov %vm12304_vm8  ;;  %v6452_v22 = vld [vmem:[#allocation5 + $0x5c] sm:$0xf] }
 0xe3c   : > { %v4993_v34 = vpack.c.bf16 %v4979_v11, %v4978_v38  ;;  %v5461_v31 = vsel %vm12328_vm10, %v11445_v7, %v5441_v57  ;;  %vm12329_vm11 = vmmov %vm12320_vm7  ;;  %v12331_v7 = vld [vmem:[#allocation19_spill] sm:$0xff]  ;;  %v6398_v11 = vor.u32 %v6460_v62, %v6397_v16 }
 0xe3d   : > { %5843 = vmatpush.bf16.msra.mxu3 %v11299_v54  ;;  %vm12337_vm8 = vmmov %vm12333_vm1 }
 0xe3e   : > { %v5406_v60 = vunpack.c.l.b16 %v4993_v34  ;;  %v5407_v52 = vunpack.c.h.b16 %v4993_v34  ;;  %v6374_v34 = vor.u32 %v6452_v22, %v6371_v24  ;;  %vm12341_vm7 = vmmov %vm12335_vm3 }
 0xe3f   : > { %v5447_v49 = vpop.permute.xlu1 %5446 }
 0xe40   : > { %v5463_v54 = vsel %vm12326_vm15, %v11405_v1, %v5447_v49  ;;  %v5420_v58 = vpack.c.b16 %v5406_v60, %v5404_v30  ;;  %v11749_v1 = vor.u32 %v6449_v29, %v6349_v25  ;;  %v5421_v12 = vpack.c.b16 %v5407_v52, %v5405_v18  ;;  %v6391_v30 = vld [vmem:[#allocation5 + $0x94] sm:$0xf0] }
 0xe41   : > { %5844 = vmatpush.bf16.msra.mxu3 %v12325_v0  ;;  %5902 = vmatpush.bf16.msrb.mxu2 %v5463_v54  ;;  %v5321_v28 = vpop.permute.xlu0 %5320  ;;  %v6457_v0 = vld [vmem:[#allocation5 + $0x84] sm:$0xf] }
 0xe42   : > { %5831 = vmatmul.bf16.gmra.mxu1 %v11587_v40  ;;  %5762 = vmatpush.bf16.msrb.mxu0 %v5420_v58  ;;  %v5413_v40 = vunpack.c.h.b16 %v11652_v50  ;;  %v6351_v50 = vld [vmem:[#allocation5 + $0x44] sm:$0xf0]  ;;  %v5341_v19 = vsel %vm12338_vm4, %v11705_v21, %v5321_v28  ;;  %v6394_v60 = vor.u32 %v6457_v0, %v6391_v30 }
 0xe43   : > { %6400 = vmatmul.msk.bf16.gmra.mxu2 %vm12329_vm11, %v11740_v4  ;;  %v6354_v51 = vor.u32 %v6447_v33, %v6351_v50 }
 0xe44   : > { %v5425_v15 = vpack.c.b16 %v5415_v10, %v5413_v40 }
 0xe45   : > { %5845 = vmatpush.bf16.msra.mxu3 %v12327_v42  ;;  %5763 = vmatmul.bf16.vlgmr.msrb.gmra.mxu0 %v11742_v17 }
 0xe46   : > { %5871 = vmatpush.bf16.msra.mxu0 %v11407_v36  ;;  %5903 = vmatpush.bf16.msrb.mxu2 %v5461_v31  ;;  %v12330_v36 = vld [vmem:[#allocation42_spill] sm:$0xff] }
 0xe47   : > { %v5333_v8 = vpop.permute.xlu1 %5332 }
 0xe48   : > { %5739 = vmatmul.bf16.gmra.mxu3 %v11749_v1 }
 0xe49   : > { %5846 = vmatpush.bf16.msra.mxu3 %v11354_v41  ;;  %v6377_v41 = vld [vmem:[#allocation5 + $0x60] sm:$0xf] }
 0xe4a   : > { %5872 = vmatpush.bf16.msra.mxu0 %v11410_v9  ;;  %5904 = vmatpush.bf16.msrb.mxu2 %v11490_v32  ;;  %v6455_v9 = vld [vmem:[#allocation5 + $0x70] sm:$0xf0]  ;;  %v5423_v32 = vpack.c.b16 %v5411_v63, %v5409_v37 }
 0xe4b   : > { %v6378_v3 = vor.u32 %v6455_v9, %v6377_v41 }
 0xe4d   : > { %5847 = vmatpush.bf16.msra.mxu3 %v12330_v36 }
 0xe4e   : > { %5873 = vmatpush.bf16.msra.mxu0 %v12331_v7  ;;  %5905 = vmatpush.bf16.msrb.mxu2 %v5425_v15  ;;  %v11818_v15 = vpop.permute.xlu2 %5523 }
 0xe51   : > { %5848 = vmatpush.bf16.msra.mxu3 %v12332_v6 }
 0xe52   : > { %5874 = vmatpush.bf16.msra.mxu0 %v11344_v61  ;;  %5906 = vmatpush.bf16.msrb.mxu2 %v5423_v32  ;;  %v5345_v61 = vsel %vm12336_vm5, %v11486_v27, %v5333_v8  ;;  %v6389_v27 = vld [vmem:[#allocation5 + $0x80] sm:$0xf] }
 0xe53   : > { %5836 = vmatmul.bf16.gmra.mxu1 %v11638_v20  ;;  %6401 = vmatmul.msk.bf16.gmra.mxu2 %vm12335_vm3, %v6378_v3  ;;  %v5343_v20 = vsel %vm12337_vm8, %v11547_v53, %v5327_v13  ;;  %v6390_v43 = vor.u32 %v6459_v23, %v6389_v27 }
 0xe55   : > { %5849 = vmatpush.bf16.msra.mxu3 %v12334_v44  ;;  %5768 = vmatmul.bf16.gmra.mxu0 %v6354_v51 }
 0xe56   : > { %5875 = vmatpush.bf16.msra.mxu0 %v5347_v47  ;;  %5907 = vmatpush.bf16.msrb.mxu2 %v5421_v12  ;;  %v7375_v12 = vld [vmem:[%s7717_s14 + $0x10] sm:$0xff] }
 0xe58   : > { %5744 = vmatmul.bf16.gmra.mxu3 %v6370_v45 }
 0xe5a   : > { %5876 = vmatpush.bf16.msra.mxu0 %v5345_v61 }
 0xe5e   : > { %5877 = vmatpush.bf16.msra.mxu0 %v5343_v20  ;;  %v5706_v38 = vpop.f32.mrf.mxu1 }
 0xe62   : > { %5878 = vmatpush.bf16.msra.mxu0 %v5341_v19 }
 0xe63   : > { %6403 = vmatmul.msk.bf16.vlgmr.msra.gmra.mxu1 %vm12339_vm6, %v11703_v5  ;;  %6402 = vmatmul.msk.bf16.gmra.mxu2 %vm12340_vm9, %v6398_v11 }
 0xe65   : > { %5773 = vmatmul.bf16.gmra.mxu0 %v6374_v34 }
 0xe66   : > { %v5708_v53 = vpop.f32.mrf.mxu1 }
 0xe68   : > { %5749 = vmatmul.bf16.gmra.mxu3 %v6390_v43 }
 0xe6e   : > { %v5711_v21 = vpop.f32.mrf.mxu1 }
 0xe73   : > { %6404 = vmatmul.msk.bf16.gmra.mxu1 %vm12341_vm7, %v11740_v4  ;;  %5908 = vmatmul.bf16.vlgmr.msrb.gmra.mxu2 %v11742_v17 }
 0xe74   : > { %v5677_v2 = vpop.f32.mrf.mxu2 }
 0xe75   : > { %5778 = vmatmul.bf16.gmra.mxu0 %v6394_v60 }
 0xe76   : > { %v11783_v46 = vpop.f32.mrf.mxu1 }
 0xe78   : > { %5850 = vmatmul.bf16.vlgmr.msra.gmra.mxu3 %v11477_v56 }
 0xe7c   : > { %v5679_v5 = vpop.f32.mrf.mxu2 }
 0xe7d   : > { %v5680_v63 = vadd.f32 %v5679_v5, %v11818_v15  ;;  %v7377_v5 = vld [vmem:[%s7717_s14 + $0x30] sm:$0xff] }
 0xe7f   : > { %v11786_v49 = vpop.f32.mrf.mxu1  ;;  %v5709_v50 = vadd.f32 %v5708_v53, %v5680_v63  ;;  %v7378_v63 = vld [vmem:[%s7717_s14 + $0x40] sm:$0xff] }
 0xe83   : > { %6405 = vmatmul.msk.bf16.gmra.mxu1 %vm12342_vm0, %v6378_v3  ;;  %5913 = vmatmul.bf16.gmra.mxu2 %v6354_v51  ;;  %v11829_v51 = vpop.permute.xlu0 %5528 }
 0xe84   : > { %v5682_v54 = vpop.f32.mrf.mxu2 }
 0xe85   : > { %5879 = vmatmul.bf16.vlgmr.msra.gmra.mxu0 %v11721_v48  ;;  %v5683_v55 = vadd.f32 %v5682_v54, %v11829_v51 }
 0xe87   : > { %v11791_v58 = vpop.f32.mrf.mxu1  ;;  %v5712_v44 = vadd.f32 %v5711_v21, %v5683_v55  ;;  %v7379_v55 = vld [vmem:[%s7717_s14 + $0x50] sm:$0xff] }
 0xe88   : > { %5855 = vmatmul.bf16.gmra.mxu3 %v11543_v39 }
 0xe8c   : > { %v5684_v4 = vpop.f32.mrf.mxu2 }
 0xe8f   : > { %v11797_v56 = vpop.f32.mrf.mxu1 }
 0xe93   : > { %6406 = vmatmul.msk.bf16.gmra.mxu1 %vm12343_vm2, %v6398_v11  ;;  %5918 = vmatmul.bf16.gmra.mxu2 %v6374_v34  ;;  %v7376_v11 = vld [vmem:[%s7717_s14 + $0x20] sm:$0xff] }
 0xe94   : > { %v11794_v57 = vpop.f32.mrf.mxu2 }
 0xe95   : > { %5884 = vmatmul.bf16.gmra.mxu0 %v11749_v1 }
 0xe97   : > { %v11802_v25 = vpop.f32.mrf.mxu1 }
 0xe98   : > { %5860 = vmatmul.bf16.gmra.mxu3 %v11559_v59  ;;  %v11813_v59 = vpop.permute.xlu1 %5518 }
 0xe99   : > { %v5678_v1 = vadd.f32 %v5677_v2, %v11813_v59 }
 0xe9b   : > { %v5707_v7 = vadd.f32 %v5706_v38, %v5678_v1  ;;  %v11851_v1 = vpop.permute.xlu0 %5543 }
 0xe9c   : > { %v11800_v17 = vpop.f32.mrf.mxu2 }
 0xe9f   : > { %v11807_v39 = vpop.f32.mrf.mxu1 }
 0xea0   : > { %v11833_v13 = vpop.permute.xlu1 %5533 }
 0xea1   : > { %v5685_v62 = vadd.f32 %v5684_v4, %v11833_v13 }
 0xea3   : > { %5923 = vmatmul.bf16.gmra.mxu2 %v6394_v60  ;;  %v5714_v38 = vadd.f32 %v11783_v46, %v5685_v62 }
 0xea4   : > { %v11804_v48 = vpop.f32.mrf.mxu2 }
 0xea5   : > { %5889 = vmatmul.bf16.gmra.mxu0 %v6370_v45 }
 0xea7   : > { %v11811_v42 = vpop.f32.mrf.mxu1 }
 0xea8   : > { %5865 = vmatmul.bf16.gmra.mxu3 %v11589_v35 }
 0xeac   : > { %v11809_v29 = vpop.f32.mrf.mxu2 }
 0xeaf   : > { %v11816_v36 = vpop.f32.mrf.mxu1 }
 0xeb4   : > { %v5793_v31 = vpop.f32.mrf.mxu2 }
 0xeb5   : > { %5894 = vmatmul.bf16.gmra.mxu0 %v6390_v43  ;;  %v11842_v43 = vpop.permute.xlu2 %5538 }
 0xeb6   : > { %v5688_v0 = vadd.f32 %v11794_v57, %v11842_v43  ;;  %v5690_v57 = vadd.f32 %v11800_v17, %v11851_v1 }
 0xeb7   : > { %v11822_v52 = vpop.f32.mrf.mxu1 }
 0xeb8   : > { %v5717_v46 = vadd.f32 %v11786_v49, %v5688_v0  ;;  %v5719_v49 = vadd.f32 %v11791_v58, %v5690_v57 }
 0xebb   : > { %v5735_v40 = vpop.f32.mrf.mxu3 }
 0xebc   : > { %v5795_v10 = vpop.f32.mrf.mxu2  ;;  %v5736_v35 = vadd.f32 %v5735_v40, %v5707_v7 }
 0xebf   : > { %v11836_v28 = vpop.f32.mrf.mxu1 }
 0xec2   : > { %v5764_v37 = vpop.f32.mrf.mxu0 }
 0xec3   : > { %v5765_v41 = vadd.f32 %v5764_v37, %v5736_v35  ;;  %v5737_v9 = vpop.f32.mrf.mxu3 }
 0xec4   : > { %v5738_v3 = vadd.f32 %v5737_v9, %v5709_v50  ;;  %v11860_v50 = vpop.permute.xlu1 %5548 }
 0xec5   : > { %v5794_v33 = vadd.f32 %v5793_v31, %v5765_v41  ;;  %v5693_v17 = vadd.f32 %v11804_v48, %v11860_v50 }
 0xec6   : > { %v5798_v32 = vpop.f32.mrf.mxu2 }
 0xec7   : > { %v5958_v6 = vadd.f32 %v7374_v26, %v5794_v33  ;;  %v11846_v60 = vpop.f32.mrf.mxu1 }
 0xec9   : > { %5974 = vst [vmem:[%s11826_s18] sm:$0xff] %v5958_v6 }
 0xeca   : > { %v5766_v18 = vpop.f32.mrf.mxu0 }
 0xecb   : > { %v5767_v14 = vadd.f32 %v5766_v18, %v5738_v3  ;;  %v5740_v47 = vpop.f32.mrf.mxu3  ;;  %v5722_v18 = vadd.f32 %v11797_v56, %v5693_v17 }
 0xecc   : > { %v5741_v20 = vadd.f32 %v5740_v47, %v5712_v44  ;;  %v11869_v44 = vpop.permute.xlu2 %5553 }
 0xecd   : > { %v5796_v8 = vadd.f32 %v5795_v10, %v5767_v14  ;;  %v5695_v48 = vadd.f32 %v11809_v29, %v11869_v44  ;;  %v5823_v29 = vadd.f32 %v11807_v39, %v11813_v59 }
 0xece   : > { %v5800_v61 = vpop.f32.mrf.mxu2 }
 0xecf   : > { %v5960_v45 = vadd.f32 %v7375_v12, %v5796_v8  ;;  %v5724_v56 = vadd.f32 %v11802_v25, %v5695_v48 }
 0xed0   : > { %v11855_v37 = vpop.f32.mrf.mxu1 }
 0xed1   : > { %5976 = vst [vmem:[%s11826_s18 + $0x10] sm:$0xff] %v5960_v45 }
 0xed2   : > { %v5769_v16 = vpop.f32.mrf.mxu0 }
 0xed3   : > { %v5770_v19 = vadd.f32 %v5769_v16, %v5741_v20  ;;  %v5742_v22 = vpop.f32.mrf.mxu3  ;;  %v7380_v16 = vld [vmem:[%s7717_s14 + $0x60] sm:$0xff] }
 0xed4   : > { %v5743_v23 = vadd.f32 %v5742_v22, %v5714_v38 }
 0xed5   : > { %v5799_v24 = vadd.f32 %v5798_v32, %v5770_v19 }
 0xed6   : > { %v5803_v27 = vpop.f32.mrf.mxu2 }
 0xed7   : > { %v5962_v34 = vadd.f32 %v7376_v11, %v5799_v24 }
 0xed8   : > { %v11866_v47 = vpop.f32.mrf.mxu1 }
 0xed9   : > { %5978 = vst [vmem:[%s11826_s18 + $0x20] sm:$0xff] %v5962_v34 }
 0xeda   : > { %v5771_v53 = vpop.f32.mrf.mxu0 }
 0xedb   : > { %v5772_v30 = vadd.f32 %v5771_v53, %v5743_v23  ;;  %v5745_v21 = vpop.f32.mrf.mxu3  ;;  %v7381_v23 = vld [vmem:[%s7717_s14 + $0x70] sm:$0xff] }
 0xedc   : > { %v5746_v31 = vadd.f32 %v5745_v21, %v5717_v46 }
 0xedd   : > { %v5801_v2 = vadd.f32 %v5800_v61, %v5772_v30 }
 0xede   : > { %v5805_v4 = vpop.f32.mrf.mxu2 }
 0xedf   : > { %v5964_v54 = vadd.f32 %v7377_v5, %v5801_v2 }
 0xee0   : > { %v5938_v22 = vpop.f32.mrf.mxu1 }
 0xee1   : > { %5980 = vst [vmem:[%s11826_s18 + $0x30] sm:$0xff] %v5964_v54  ;;  %v5825_v54 = vadd.f32 %v11811_v42, %v11818_v15  ;;  %v7383_v42 = vld [vmem:[%s7717_s14 + $0x18] sm:$0xff] }
 0xee2   : > { %v5774_v40 = vpop.f32.mrf.mxu0 }
 0xee3   : > { %v5775_v10 = vadd.f32 %v5774_v40, %v5746_v31  ;;  %v5747_v7 = vpop.f32.mrf.mxu3  ;;  %v7382_v40 = vld [vmem:[%s7717_s14 + $0x8] sm:$0xff] }
 0xee4   : > { %v5748_v33 = vadd.f32 %v5747_v7, %v5719_v49 }
 0xee5   : > { %v5804_v35 = vadd.f32 %v5803_v27, %v5775_v10 }
 0xee6   : > { %v5808_v9 = vpop.f32.mrf.mxu2 }
 0xee7   : > { %v5966_v41 = vadd.f32 %v7378_v63, %v5804_v35  ;;  %v5828_v63 = vadd.f32 %v11816_v36, %v11829_v51  ;;  %v7384_v36 = vld [vmem:[%s7717_s14 + $0x28] sm:$0xff] }
 0xee8   : > { %v5940_v21 = vpop.f32.mrf.mxu1 }
 0xee9   : > { %5982 = vst [vmem:[%s11826_s18 + $0x40] sm:$0xff] %v5966_v41 }
 0xeea   : > { %v5776_v26 = vpop.f32.mrf.mxu0 }
 0xeeb   : > { %v5777_v6 = vadd.f32 %v5776_v26, %v5748_v33  ;;  %v5750_v32 = vpop.f32.mrf.mxu3 }
 0xeec   : > { %v5751_v8 = vadd.f32 %v5750_v32, %v5722_v18  ;;  %v5830_v18 = vadd.f32 %v11822_v52, %v11833_v13  ;;  %v7385_v52 = vld [vmem:[%s7717_s14 + $0x38] sm:$0xff] }
 0xeed   : > { %v5806_v3 = vadd.f32 %v5805_v4, %v5777_v6 }
 0xeee   : > { %v5810_v14 = vpop.f32.mrf.mxu2 }
 0xeef   : > { %v5968_v58 = vadd.f32 %v7379_v55, %v5806_v3 }
 0xef0   : > { %v5943_v35 = vpop.f32.mrf.mxu1 }
 0xef1   : > { %5984 = vst [vmem:[%s11826_s18 + $0x50] sm:$0xff] %v5968_v58 }
 0xef2   : > { %v5779_v12 = vpop.f32.mrf.mxu0 }
 0xef3   : > { %v5780_v45 = vadd.f32 %v5779_v12, %v5751_v8  ;;  %v5752_v61 = vpop.f32.mrf.mxu3 }
 0xef4   : > { %v5753_v24 = vadd.f32 %v5752_v61, %v5724_v56  ;;  %v5833_v61 = vadd.f32 %v11836_v28, %v11842_v43  ;;  %v7386_v28 = vld [vmem:[%s7717_s14 + $0x48] sm:$0xff] }
 0xef5   : > { %v5809_v20 = vadd.f32 %v5808_v9, %v5780_v45 }
 0xef6   : > { %v5909_v19 = vpop.f32.mrf.mxu2 }
 0xef7   : > { %v5970_v62 = vadd.f32 %v7380_v16, %v5809_v20 }
 0xef8   : > { %v5945_v3 = vpop.f32.mrf.mxu1 }
 0xef9   : > { %5986 = vst [vmem:[%s11826_s18 + $0x60] sm:$0xff] %v5970_v62 }
 0xefa   : > { %v5781_v38 = vpop.f32.mrf.mxu0 }
 0xefb   : > { %v5782_v11 = vadd.f32 %v5781_v38, %v5753_v24  ;;  %v5851_v34 = vpop.f32.mrf.mxu3  ;;  %v5835_v38 = vadd.f32 %v11846_v60, %v11851_v1  ;;  %v7387_v60 = vld [vmem:[%s7717_s14 + $0x58] sm:$0xff] }
 0xefc   : > { %v5852_v25 = vadd.f32 %v5851_v34, %v5823_v29 }
 0xefd   : > { %v5811_v27 = vadd.f32 %v5810_v14, %v5782_v11 }
 0xefe   : > { %v5911_v0 = vpop.f32.mrf.mxu2 }
 0xeff   : > { %v5972_v53 = vadd.f32 %v7381_v23, %v5811_v27 }
 0xf00   : > { %v5948_v56 = vpop.f32.mrf.mxu1 }
 0xf01   : > { %5988 = vst [vmem:[%s11826_s18 + $0x70] sm:$0xff] %v5972_v53 }
 0xf02   : > { %v5880_v30 = vpop.f32.mrf.mxu0 }
 0xf03   : > { %v5881_v2 = vadd.f32 %v5880_v30, %v5852_v25  ;;  %v5853_v46 = vpop.f32.mrf.mxu3  ;;  %v5838_v30 = vadd.f32 %v11855_v37, %v11860_v50  ;;  %v7388_v50 = vld [vmem:[%s7717_s14 + $0x68] sm:$0xff] }
 0xf04   : > { %v5854_v31 = vadd.f32 %v5853_v46, %v5825_v54 }
 0xf05   : > { %v5910_v5 = vadd.f32 %v5909_v19, %v5881_v2 }
 0xf06   : > { %v5914_v57 = vpop.f32.mrf.mxu2 }
 0xf07   : > { %v5939_v4 = vadd.f32 %v5938_v22, %v5910_v5 }
 0xf08   : > { %v5950_v23 = vpop.f32.mrf.mxu1 }
 0xf09   : > { %v5959_v39 = vadd.f32 %v7382_v40, %v5939_v4 }
 0xf0a   : > { %v5882_v59 = vpop.f32.mrf.mxu0 }
 0xf0b   : > { %5975 = vst [vmem:[%s11826_s18 + $0x8] sm:$0xff] %v5959_v39  ;;  %v5883_v10 = vadd.f32 %v5882_v59, %v5854_v31  ;;  %v5856_v7 = vpop.f32.mrf.mxu3  ;;  %v5840_v39 = vadd.f32 %v11866_v47, %v11869_v44 }
 0xf0c   : > { %v5857_v9 = vadd.f32 %v5856_v7, %v5828_v63  ;;  %v7389_v63 = vld [vmem:[%s7717_s14 + $0x78] sm:$0xff] }
 0xf0d   : > { %v5912_v49 = vadd.f32 %v5911_v0, %v5883_v10 }
 0xf0e   : > { %v5916_v6 = vpop.f32.mrf.mxu2 }
 0xf0f   : > { %v5941_v41 = vadd.f32 %v5940_v21, %v5912_v49 }
 0xf10   : > { %v5953_v4 = vpop.f32.mrf.mxu1 }
 0xf11   : > { %v5961_v15 = vadd.f32 %v7383_v42, %v5941_v41 }
 0xf12   : > { %v5885_v33 = vpop.f32.mrf.mxu0 }
 0xf13   : > { %5977 = vst [vmem:[%s11826_s18 + $0x18] sm:$0xff] %v5961_v15  ;;  %v5886_v26 = vadd.f32 %v5885_v33, %v5857_v9  ;;  %v5858_v17 = vpop.f32.mrf.mxu3 }
 0xf14   : > { %v5859_v58 = vadd.f32 %v5858_v17, %v5830_v18 }
 0xf15   : > { %v5915_v32 = vadd.f32 %v5914_v57, %v5886_v26 }
 0xf16   : > { %v5919_v45 = vpop.f32.mrf.mxu2 }
 0xf17   : > { %v5944_v55 = vadd.f32 %v5943_v35, %v5915_v32 }
 0xf18   : > { %v5955_v47 = vpop.f32.mrf.mxu1 }
 0xf19   : > { %v5963_v51 = vadd.f32 %v7384_v36, %v5944_v55 }
 0xf1a   : > { %v5887_v14 = vpop.f32.mrf.mxu0 }
 0xf1b   : > { %5979 = vst [vmem:[%s11826_s18 + $0x28] sm:$0xff] %v5963_v51  ;;  %v5888_v8 = vadd.f32 %v5887_v14, %v5859_v58  ;;  %v5861_v12 = vpop.f32.mrf.mxu3 }
 0xf1c   : > { %v5862_v16 = vadd.f32 %v5861_v12, %v5833_v61 }
 0xf1d   : > { %v5917_v48 = vadd.f32 %v5916_v6, %v5888_v8 }
 0xf1e   : > { %v5921_v34 = vpop.f32.mrf.mxu2 }
 0xf1f   : > { %v5946_v20 = vadd.f32 %v5945_v3, %v5917_v48 }
 0xf21   : > { %v5965_v13 = vadd.f32 %v7385_v52, %v5946_v20 }
 0xf22   : > { %v5890_v62 = vpop.f32.mrf.mxu0 }
 0xf23   : > { %5981 = vst [vmem:[%s11826_s18 + $0x38] sm:$0xff] %v5965_v13  ;;  %v5891_v19 = vadd.f32 %v5890_v62, %v5862_v16  ;;  %v5863_v22 = vpop.f32.mrf.mxu3 }
 0xf24   : > { %v5864_v27 = vadd.f32 %v5863_v22, %v5835_v38 }
 0xf25   : > { %v5920_v24 = vadd.f32 %v5919_v45, %v5891_v19 }
 0xf26   : > { %v5924_v5 = vpop.f32.mrf.mxu2 }
 0xf27   : > { %v5949_v11 = vadd.f32 %v5948_v56, %v5920_v24 }
 0xf29   : > { %v5967_v43 = vadd.f32 %v7386_v28, %v5949_v11 }
 0xf2a   : > { %v5892_v29 = vpop.f32.mrf.mxu0 }
 0xf2b   : > { %5983 = vst [vmem:[%s11826_s18 + $0x48] sm:$0xff] %v5967_v43  ;;  %v5893_v53 = vadd.f32 %v5892_v29, %v5864_v27  ;;  %v5866_v0 = vpop.f32.mrf.mxu3 }
 0xf2c   : > { %v5867_v2 = vadd.f32 %v5866_v0, %v5838_v30 }
 0xf2d   : > { %v5922_v25 = vadd.f32 %v5921_v34, %v5893_v53 }
 0xf2e   : > { %v5926_v35 = vpop.f32.mrf.mxu2 }
 0xf2f   : > { %v5951_v21 = vadd.f32 %v5950_v23, %v5922_v25 }
 0xf31   : > { %v5969_v1 = vadd.f32 %v7387_v60, %v5951_v21 }
 0xf32   : > { %v5895_v46 = vpop.f32.mrf.mxu0 }
 0xf33   : > { %5985 = vst [vmem:[%s11826_s18 + $0x58] sm:$0xff] %v5969_v1  ;;  %v5896_v54 = vadd.f32 %v5895_v46, %v5867_v2  ;;  %v5868_v40 = vpop.f32.mrf.mxu3 }
 0xf34   : > { %v5869_v37 = vadd.f32 %v5868_v40, %v5840_v39 }
 0xf35   : > { %v5925_v31 = vadd.f32 %v5924_v5, %v5896_v54 }
 0xf37   : > { %v5954_v59 = vadd.f32 %v5953_v4, %v5925_v31 }
 0xf39   : > { %v5971_v57 = vadd.f32 %v7388_v50, %v5954_v59 }
 0xf3a   : > { %v5897_v10 = vpop.f32.mrf.mxu0 }
 0xf3b   : > { %5987 = vst [vmem:[%s11826_s18 + $0x68] sm:$0xff] %v5971_v57  ;;  %v5898_v7 = vadd.f32 %v5897_v10, %v5869_v37 }
 0xf3d   : > { %v5927_v49 = vadd.f32 %v5926_v35, %v5898_v7 }
 0xf3f   : > { %v5956_v44 = vadd.f32 %v5955_v47, %v5927_v49 }
 0xf41   : > { %v5973_v41 = vadd.f32 %v7389_v63, %v5956_v44 }
 0xf43   : > { %5989 = vst [vmem:[%s11826_s18 + $0x78] sm:$0xff] %v5973_v41 }
 0xf44   : > { %7477 = shalt.err (!%p7474_p10)
}
 0xf45   : > { %s7539_s13 = smov 256   ;;  %s7540_s14 = smov 16  }
 0xf46   : > { %6472 = dma.vmem_to_hbm [thread:$0]  (%p7683_p7), %s6004_s23, 2048, %s6006_s28, %s5991_s17, %s7539_s13, %s7539_s13, %s7540_s14  }
 0xf47 PF: > { %s12346_s18 = sld [smem:[#allocation11_spill]]  ;;  %p12348_p12 = scmp.ge.s32.totalorder %s7520_s16, 2 }
 0xf49   : > { %p6483_p13 = pnand %p12348_p12, %p7651_p6 }
 0xf4b   : > { %p6484_p0 = pneg %p6483_p13 }
 0xf4d   : > { %s6020_s0 = sand.u32 1, %s12346_s18  }
 0xf4e   : > { %s6021_s15 = scalar_lea.sflag [#allocation4], %s6020_s0 }
 0xf4f   : > { %7503 = dma.done.wait (%p6484_p0), %s6021_s15, 2048  }
 0xf50   : > { %7505 = vsyncadd (%p6484_p0), %s6021_s15, 4294965248  ;;  %s12349_s16 = sld [smem:[#allocation14_spill]]  ;;  %s12352_s29 = smov %s7512_s30 }
 0xf51   : > { %s12350_s22 = sld [smem:[#allocation12_spill]] }
 0xf52   : > { %s12351_s15 = sld [smem:[#allocation15_spill]] }
 0xf56   : > { %p28_p3 = scmp.ge.s32.totalorder %s12349_s16, 4  }
 0xf57   : > { %s12353_s30 = smov %s12350_s22 }
 0xf58   :  { %30 = sbr.rel (!%p28_p3) target bundleno = 11 (0xb), region = 125 }
 0xf5d   :  { %6027 = vsyncpa [#allocation3], 1 }
 0xf5e   :  { %6029 = vsyncpa [#allocation3 + $0x1], 1 }
 0xf5f   :  { %6030 = vsyncpa [#allocation6], 1 }
 0xf60   :  { %6031 = vsyncpa [#allocation4], 1 }
 0xf61   :  { %6033 = vsyncpa [#allocation4 + $0x1], 1 }

</bundles_post_ra>
